<compile_context>
chip_gen: v5e
topology: v5e:2x2
jax: 0.10.0
libtpu: 0.0.40
codegen_flags: <defaults>
</compile_context>

<pallas_src>
import math

import jax
import jax.numpy as jnp
from jax.experimental import pallas as pl
from jax.experimental.pallas import tpu as pltpu


def _round_up(x, m):
    return (x + m - 1) // m * m


def _choose_tiles(M, *, max_tm=512, min_tm=16, split_rows=256):
    """Balanced, sublane-aligned M tiles; >=2 tiles when there is enough work to
    shard across two TensorCores (v7x megacore); no nearly-empty trailing tile."""
    Mp = _round_up(max(M, 1), min_tm)
    if Mp <= max_tm:
        n_tiles = 2 if Mp >= split_rows else 1
    else:
        n_tiles = max(2, -(-Mp // max_tm))
    tm = _round_up(-(-Mp // n_tiles), min_tm)
    Mp = _round_up(Mp, tm)
    return tm, Mp


def _vmem_limit_bytes(entries):
    """entries: iterable of (shape, dtype, n_buffers). Returns an explicit VMEM budget."""
    total = 0
    for shape, dtype, nbuf in entries:
        total += math.prod(shape) * jnp.dtype(dtype).itemsize * nbuf
    limit = int(total * 1.25) + (4 << 20)          # headroom for internal scratch
    return max(32 << 20, min(limit, 96 << 20))


def _resident(shape):
    """Grid-invariant input: constant index_map + single-buffered (no wasted 2x VMEM)."""
    return pl.BlockSpec(shape, lambda i: (0, 0), pipeline_mode=pl.Buffered(1))


# ---------------------------------------------------------------------------
# Pallas kernels
# ---------------------------------------------------------------------------

def _encoder_fused_kernel(attx_ref, aw_ref, ab_ref, cw_ref, cb_ref,
                          fcx_ref, fcw_ref, fcb_ref,
                          emb_ref, patt_ref, fc_ref):
    """Per M-tile: att_embed (Linear+ReLU) -> ctx2att (Linear), both emitted in bf16.
    fc_embed (Linear+ReLU) is computed only on grid step 0 into its own output block."""
    emb = jnp.dot(attx_ref[...], aw_ref[...], preferred_element_type=jnp.float32)
    emb = jnp.maximum(emb + ab_ref[...], 0.0)
    emb_ref[...] = emb.astype(emb_ref.dtype)
    patt = jnp.dot(emb.astype(cw_ref.dtype), cw_ref[...],
                   preferred_element_type=jnp.float32) + cb_ref[...]
    patt_ref[...] = patt.astype(patt_ref.dtype)

    @pl.when(pl.program_id(0) == 0)
    def _():
        fc = jnp.dot(fcx_ref[...], fcw_ref[...], preferred_element_type=jnp.float32)
        fc_ref[...] = jnp.maximum(fc + fcb_ref[...], 0.0).astype(fc_ref.dtype)


def _logit_logsoftmax_kernel(x_ref, w_ref, b_ref, o_ref):
    """Fused logit projection + log_softmax over the (padded, lane-dense) vocab axis."""
    logits = jnp.dot(x_ref[...], w_ref[...], preferred_element_type=jnp.float32)
    logits = logits + b_ref[...]
    m = jnp.max(logits, axis=-1, keepdims=True)
    z = logits - m
    lse = jnp.log(jnp.sum(jnp.exp(z), axis=-1, keepdims=True))
    o_ref[...] = (z - lse).astype(o_ref.dtype)


# ---------------------------------------------------------------------------
# Kernel wrappers
# ---------------------------------------------------------------------------

def pallas_encoder_fused(att_x, att_w, att_b, ctx_w, ctx_b,
                         fc_x, fc_w, fc_b, *, max_tm=512, out_dtype=jnp.bfloat16):
    """att_x: [M, att_feat] bf16, fc_x: [B, fc_feat] bf16; weights bf16 [in, out].

    Returns (att_emb [M, rnn], p_att [M, att_hid], fc_emb [B, rnn]) in `out_dtype`,
    from a single pallas_call (att_emb never round-trips HBM before ctx2att)."""
    M, K = att_x.shape
    _, N = att_w.shape
    _, H = ctx_w.shape
    B, Kf = fc_x.shape

    tm, Mp = _choose_tiles(M, max_tm=max_tm)
    if Mp != M:
        att_x = jnp.pad(att_x, ((0, Mp - M), (0, 0)))
    Bp = _round_up(B, 8)
    if Bp != B:
        fc_x = jnp.pad(fc_x, ((0, Bp - B), (0, 0)))
    n_tiles = Mp // tm

    ab2 = att_b.reshape(1, N).astype(jnp.float32)
    cb2 = ctx_b.reshape(1, H).astype(jnp.float32)
    fb2 = fc_b.reshape(1, N).astype(jnp.float32)

    vmem_limit = _vmem_limit_bytes([
        ((tm, K), att_x.dtype, 2),
        ((K, N), att_w.dtype, 1), ((1, N), jnp.float32, 1),
        ((N, H), ctx_w.dtype, 1), ((1, H), jnp.float32, 1),
        ((Bp, Kf), fc_x.dtype, 1),
        ((Kf, N), fc_w.dtype, 1), ((1, N), jnp.float32, 1),
        ((tm, N), out_dtype, 2), ((tm, H), out_dtype, 2), ((Bp, N), out_dtype, 2),
    ])

    emb, patt, fc = pl.pallas_call(
        _encoder_fused_kernel,
        out_shape=(jax.ShapeDtypeStruct((Mp, N), out_dtype),
                   jax.ShapeDtypeStruct((Mp, H), out_dtype),
                   jax.ShapeDtypeStruct((n_tiles * Bp, N), out_dtype)),
        grid_spec=pltpu.PrefetchScalarGridSpec(
            num_scalar_prefetch=0,
            grid=(n_tiles,),
            in_specs=[
                pl.BlockSpec((tm, K), lambda i: (i, 0)),   # att_x tile (double-buffered)
                _resident((K, N)),                         # att_w (~2 MB bf16)
                _resident((1, N)),                         # att_b
                _resident((N, H)),                         # ctx_w (~0.5 MB bf16)
                _resident((1, H)),                         # ctx_b
                _resident((Bp, Kf)),                       # fc_feats (small)
                _resident((Kf, N)),                        # fc_w (~2 MB bf16)
                _resident((1, N)),                         # fc_b
            ],
            out_specs=(pl.BlockSpec((tm, N), lambda i: (i, 0)),
                       pl.BlockSpec((tm, H), lambda i: (i, 0)),
                       pl.BlockSpec((Bp, N), lambda i: (i, 0))),   # only block 0 is valid
        ),
        compiler_params=pltpu.CompilerParams(
            dimension_semantics=("parallel",),
            vmem_limit_bytes=vmem_limit),
    )(att_x, att_w, ab2, ctx_w, cb2, fc_x, fc_w, fb2)
    return emb[:M], patt[:M], fc[:B]


def pallas_logit_logsoftmax(x, w_pad, b_pad, n_valid, *, max_tm=512):
    """x: [M, rnn] bf16, w_pad: [rnn, Vpad] bf16, b_pad: [Vpad] f32 (-1e30 in padding).

    Returns log-probs [M, n_valid] f32. One call for ALL decode steps (M = B*(T-1))."""
    # TODO(synk): for a realistic vocab (>> few thousand) the vocab axis should be tiled
    #             with an online log-sum-exp (v7x has only 64 MiB VMEM) and the padded
    #             tensor returned unsliced; the single-block form is fine at demo sizes.
    M, K = x.shape
    _, Np = w_pad.shape
    tm, Mp = _choose_tiles(M, max_tm=max_tm)
    if Mp != M:
        x = jnp.pad(x, ((0, Mp - M), (0, 0)))
    b2 = b_pad.reshape(1, Np).astype(jnp.float32)

    vmem_limit = _vmem_limit_bytes([
        ((tm, K), x.dtype, 2),
        ((K, Np), w_pad.dtype, 1), ((1, Np), jnp.float32, 1),
        ((tm, Np), jnp.float32, 2),
    ])

    out = pl.pallas_call(
        _logit_logsoftmax_kernel,
        out_shape=jax.ShapeDtypeStruct((Mp, Np), jnp.float32),
        grid_spec=pltpu.PrefetchScalarGridSpec(
            num_scalar_prefetch=0,
            grid=(Mp // tm,),
            in_specs=[
                pl.BlockSpec((tm, K), lambda i: (i, 0)),   # core output tile
                _resident((K, Np)),                        # logit_w (single-buffered)
                _resident((1, Np)),                        # logit_b
            ],
            out_specs=pl.BlockSpec((tm, Np), lambda i: (i, 0)),
        ),
        compiler_params=pltpu.CompilerParams(
            dimension_semantics=("parallel",),
            vmem_limit_bytes=vmem_limit),
    )(x, w_pad, b2)
    return out[:M, :n_valid]


# ---------------------------------------------------------------------------
# Parameters (shapes as in AttModel.__init__); matmul weights stored bf16, [in, out].
# ---------------------------------------------------------------------------

class AttModelParams:
    def __init__(self, key, vocab_size, seq_length):
        self.vocab_size = vocab_size
        self.seq_length = seq_length
        self.input_encoding_size = 512
        self.rnn_size = 512
        self.fc_feat_size = 2048
        self.att_feat_size = 2048
        self.att_hid_size = 512

        V1 = vocab_size + 1
        Vp = _round_up(V1, 128)          # lane-dense padded vocab
        self.vocab_pad = Vp

        ks = jax.random.split(key, 9)
        s = 0.02
        f32, bf16 = jnp.float32, jnp.bfloat16

        # nn.Embedding(V+1, 512): stored bf16 (half the gather bytes).
        self.embed_w = (s * jax.random.normal(ks[0], (V1, self.input_encoding_size), f32)).astype(bf16)
        # nn.Linear(2048, 512) fc_embed
        self.fc_w = (s * jax.random.normal(ks[1], (self.fc_feat_size, self.rnn_size), f32)).astype(bf16)
        self.fc_b = s * jax.random.normal(ks[2], (self.rnn_size,), f32)
        # nn.Linear(2048, 512) att_embed
        self.att_w = (s * jax.random.normal(ks[3], (self.att_feat_size, self.rnn_size), f32)).astype(bf16)
        self.att_b = s * jax.random.normal(ks[4], (self.rnn_size,), f32)
        # nn.Linear(512, 512) ctx2att
        self.ctx_w = (s * jax.random.normal(ks[5], (self.rnn_size, self.att_hid_size), f32)).astype(bf16)
        self.ctx_b = s * jax.random.normal(ks[6], (self.att_hid_size,), f32)
        # nn.Linear(512, V+1) logit, padded to Vp columns (pad bias = -1e30 -> zero prob)
        lw = s * jax.random.normal(ks[7], (self.rnn_size, V1), f32)
        lb = s * jax.random.normal(ks[8], (V1,), f32)
        self.logit_w = jnp.pad(lw, ((0, 0), (0, Vp - V1))).astype(bf16)
        self.logit_b = jnp.concatenate([lb, jnp.full((Vp - V1,), -1e30, f32)])


# ---------------------------------------------------------------------------
# AttModel forward (Pallas-backed, eval mode: Dropout == identity)
# ---------------------------------------------------------------------------

def att_model_forward(params, fc_feats, att_feats, seq):
    """Returns (log-probs [B, T-1, V+1] f32, fc_emb [B, rnn] bf16,
                att_emb [B, L, rnn] bf16, p_att_feats [B, L, att_hid] bf16)."""
    B = fc_feats.shape[0]
    L = att_feats.shape[1]
    T = seq.shape[1]
    V1 = params.vocab_size + 1

    fc_bf = fc_feats.astype(jnp.bfloat16)
    att_bf = att_feats.reshape(B * L, params.att_feat_size).astype(jnp.bfloat16)

    # fc_embed + att_embed + ctx2att in one fused pallas_call.
    att_emb_flat, p_att_flat, fc_emb = pallas_encoder_fused(
        att_bf, params.att_w, params.att_b, params.ctx_w, params.ctx_b,
        fc_bf, params.fc_w, params.fc_b)
    att_emb = att_emb_flat.reshape(B, L, params.rnn_size)
    p_att_feats = p_att_flat.reshape(B, L, params.att_hid_size)

    # Decode loop, batched across all T-1 steps:
    #   xt = self.embed(seq[:, i])  ==  Embedding gather + ReLU (bf16, glue JAX).
    toks = seq[:, :T - 1]                                           # [B, T-1]
    xt = jnp.maximum(jnp.take(params.embed_w, toks, axis=0), 0)     # [B, T-1, 512] bf16
    # TODO(synk): output, state = self.core(xt, ...) — core is undefined in AttModel;
    #             xt is used as the stand-in core output.
    # TODO(synk): the gather itself could be fused into the logit kernel via scalar
    #             prefetch; kept in glue JAX for robustness.
    core_out = xt.reshape(B * (T - 1), params.rnn_size)

    # output = F.log_softmax(self.logit(output)) — one fused call for all steps.
    logprobs = pallas_logit_logsoftmax(core_out, params.logit_w, params.logit_b, V1)
    out = logprobs.reshape(B, T - 1, V1)
    return out, fc_emb, att_emb, p_att_feats


# ---------------------------------------------------------------------------
# Pure-JAX reference (same bf16-rounded weights/inputs, f32 math) for validation
# ---------------------------------------------------------------------------

def _ref_forward(params, fc_feats, att_feats, seq):
    f32 = jnp.float32
    B, L, _ = att_feats.shape
    T = seq.shape[1]
    V1 = params.vocab_size + 1
    x_fc = fc_feats.astype(jnp.bfloat16).astype(f32)
    x_att = att_feats.reshape(B * L, -1).astype(jnp.bfloat16).astype(f32)
    fc_emb = jnp.maximum(x_fc @ params.fc_w.astype(f32) + params.fc_b, 0.0)
    att_emb = jnp.maximum(x_att @ params.att_w.astype(f32) + params.att_b, 0.0)
    p_att = att_emb.astype(jnp.bfloat16).astype(f32) @ params.ctx_w.astype(f32) + params.ctx_b
    toks = seq[:, :T - 1]
    xt = jnp.maximum(jnp.take(params.embed_w, toks, axis=0).astype(f32), 0.0)
    core = xt.reshape(B * (T - 1), -1).astype(jnp.bfloat16).astype(f32)
    logits = core @ params.logit_w.astype(f32)[:, :V1] + params.logit_b[:V1]
    lp = jax.nn.log_softmax(logits, axis=-1)
    return (lp.reshape(B, T - 1, V1), fc_emb,
            att_emb.reshape(B, L, -1), p_att.reshape(B, L, -1))


# ---------------------------------------------------------------------------
# Demo / smoke test
# ---------------------------------------------------------------------------

if __name__ == "__main__":
    key = jax.random.PRNGKey(0)
    k_fc, k_att, k_seq, k_par = jax.random.split(key, 4)

    B = 2
    L = 8
    VOCAB = 50
    SEQ_LEN = 8

    params = AttModelParams(k_par, vocab_size=VOCAB, seq_length=SEQ_LEN)

    fc_feats = jax.random.normal(k_fc, (B, params.fc_feat_size), jnp.float32)        # [2, 2048]
    att_feats = jax.random.normal(k_att, (B, L, params.att_feat_size), jnp.float32)  # [2, 8, 2048]
    seq = jax.random.randint(k_seq, (B, SEQ_LEN), 1, VOCAB + 1, jnp.int32)            # [2, 8]

    out, fc_emb, att_emb, p_att = att_model_forward(params, fc_feats, att_feats, seq)
    jax.block_until_ready((out, fc_emb, att_emb, p_att))

    # shape checks
    assert out.shape == (B, SEQ_LEN - 1, VOCAB + 1)
    assert fc_emb.shape == (B, params.rnn_size)
    assert att_emb.shape == (B, L, params.rnn_size)
    assert p_att.shape == (B, L, params.att_hid_size)

    # log_softmax rows must sum to 1 in prob space (normalization is exact in f32)
    assert jnp.allclose(jnp.exp(out).sum(-1), 1.0, atol=1e-4)

    # numerical check against pure-JAX reference (bf16 weights, f32 accumulation,
    # bf16 encoder outputs)
    r_out, r_fc, r_att, r_patt = _ref_forward(params, fc_feats, att_feats, seq)
    f32 = jnp.float32
    assert jnp.allclose(out, r_out, atol=5e-2)
    assert jnp.allclose(fc_emb.astype(f32), r_fc, atol=5e-2)
    assert jnp.allclose(att_emb.astype(f32), r_att, atol=5e-2)
    assert jnp.allclose(p_att.astype(f32), r_patt, atol=5e-2)

    print("KERNEL_OK")
</pallas_src>

<mosaic_0001>
module attributes {stable_mosaic.version = 11 : i64} {
  func.func @_encoder_fused_kernel(%arg0: i32, %arg1: memref<16x2048xbf16, #tpu.memory_space<vmem>>, %arg2: memref<2048x512xbf16, #tpu.memory_space<vmem>>, %arg3: memref<1x512xf32, #tpu.memory_space<vmem>>, %arg4: memref<512x512xbf16, #tpu.memory_space<vmem>>, %arg5: memref<1x512xf32, #tpu.memory_space<vmem>>, %arg6: memref<8x2048xbf16, #tpu.memory_space<vmem>>, %arg7: memref<2048x512xbf16, #tpu.memory_space<vmem>>, %arg8: memref<1x512xf32, #tpu.memory_space<vmem>>, %arg9: memref<16x512xbf16, #tpu.memory_space<vmem>>, %arg10: memref<16x512xbf16, #tpu.memory_space<vmem>>, %arg11: memref<8x512xbf16, #tpu.memory_space<vmem>>) attributes {dimension_semantics = [#tpu.dimension_semantics<parallel>], iteration_bounds = array<i64: 1>, scalar_prefetch = 0 : i64, scratch_operands = 0 : i64, tpu.core_type = #tpu.core_type<tc>, window_params = [{transform_indices = @transform_0, window_bounds = array<i64: 16, 2048>}, {pipeline_mode = #tpu.pipeline_mode<synchronous>, transform_indices = @transform_1, window_bounds = array<i64: 2048, 512>}, {pipeline_mode = #tpu.pipeline_mode<synchronous>, transform_indices = @transform_2, window_bounds = array<i64: 1, 512>}, {pipeline_mode = #tpu.pipeline_mode<synchronous>, transform_indices = @transform_3, window_bounds = array<i64: 512, 512>}, {pipeline_mode = #tpu.pipeline_mode<synchronous>, transform_indices = @transform_4, window_bounds = array<i64: 1, 512>}, {pipeline_mode = #tpu.pipeline_mode<synchronous>, transform_indices = @transform_5, window_bounds = array<i64: 8, 2048>}, {pipeline_mode = #tpu.pipeline_mode<synchronous>, transform_indices = @transform_6, window_bounds = array<i64: 2048, 512>}, {pipeline_mode = #tpu.pipeline_mode<synchronous>, transform_indices = @transform_7, window_bounds = array<i64: 1, 512>}, {transform_indices = @transform_8, window_bounds = array<i64: 16, 512>}, {transform_indices = @transform_9, window_bounds = array<i64: 16, 512>}, {transform_indices = @transform_10, window_bounds = array<i64: 8, 512>}]} {
    %c0 = arith.constant 0 : index
    %c0_0 = arith.constant 0 : index
    %0 = vector.load %arg1[%c0, %c0_0] : memref<16x2048xbf16, #tpu.memory_space<vmem>>, vector<16x2048xbf16>
    %c0_1 = arith.constant 0 : index
    %c0_2 = arith.constant 0 : index
    %1 = vector.load %arg2[%c0_1, %c0_2] : memref<2048x512xbf16, #tpu.memory_space<vmem>>, vector<2048x512xbf16>
    %cst = arith.constant dense<0.000000e+00> : vector<16x512xf32>
    %2 = tpu.matmul %0, %1, %cst {dimension_numbers = #tpu.dot_dimension_numbers<[1], [0], [0], [1], [0, 0, 1, 1], [], []>} : vector<16x2048xbf16>, vector<2048x512xbf16>, vector<16x512xf32> -> vector<16x512xf32>
    %c0_3 = arith.constant 0 : index
    %c0_4 = arith.constant 0 : index
    %3 = vector.load %arg3[%c0_3, %c0_4] : memref<1x512xf32, #tpu.memory_space<vmem>>, vector<1x512xf32>
    %4 = vector.broadcast %3 : vector<1x512xf32> to vector<16x512xf32>
    %5 = arith.addf %2, %4 : vector<16x512xf32>
    %cst_5 = arith.constant 0.000000e+00 : f32
    %6 = vector.broadcast %cst_5 : f32 to vector<16x512xf32>
    %7 = arith.maximumf %5, %6 : vector<16x512xf32>
    %8 = arith.truncf %7 : vector<16x512xf32> to vector<16x512xbf16>
    %c0_6 = arith.constant 0 : index
    %c0_7 = arith.constant 0 : index
    %9 = vector.load %arg9[%c0_6, %c0_7] : memref<16x512xbf16, #tpu.memory_space<vmem>>, vector<16x512xbf16>
    tpu.vector_store %arg9[%c0_6, %c0_7], %8 {strides = array<i32>} : memref<16x512xbf16, #tpu.memory_space<vmem>>, vector<16x512xbf16>,
    %10 = arith.truncf %7 : vector<16x512xf32> to vector<16x512xbf16>
    %c0_8 = arith.constant 0 : index
    %c0_9 = arith.constant 0 : index
    %11 = vector.load %arg4[%c0_8, %c0_9] : memref<512x512xbf16, #tpu.memory_space<vmem>>, vector<512x512xbf16>
    %cst_10 = arith.constant dense<0.000000e+00> : vector<16x512xf32>
    %12 = tpu.matmul %10, %11, %cst_10 {dimension_numbers = #tpu.dot_dimension_numbers<[1], [0], [0], [1], [0, 0, 1, 1], [], []>} : vector<16x512xbf16>, vector<512x512xbf16>, vector<16x512xf32> -> vector<16x512xf32>
    %c0_11 = arith.constant 0 : index
    %c0_12 = arith.constant 0 : index
    %13 = vector.load %arg5[%c0_11, %c0_12] : memref<1x512xf32, #tpu.memory_space<vmem>>, vector<1x512xf32>
    %14 = vector.broadcast %13 : vector<1x512xf32> to vector<16x512xf32>
    %15 = arith.addf %12, %14 : vector<16x512xf32>
    %16 = arith.truncf %15 : vector<16x512xf32> to vector<16x512xbf16>
    %c0_13 = arith.constant 0 : index
    %c0_14 = arith.constant 0 : index
    %17 = vector.load %arg10[%c0_13, %c0_14] : memref<16x512xbf16, #tpu.memory_space<vmem>>, vector<16x512xbf16>
    tpu.vector_store %arg10[%c0_13, %c0_14], %16 {strides = array<i32>} : memref<16x512xbf16, #tpu.memory_space<vmem>>, vector<16x512xbf16>,
    %c0_i32 = arith.constant 0 : i32
    %18 = arith.cmpi eq, %arg0, %c0_i32 : i32
    %19 = arith.extui %18 : i1 to i32
    %c0_i32_15 = arith.constant 0 : i32
    %20 = arith.cmpi ne, %19, %c0_i32_15 : i32
    scf.if %20 {
      %c0_16 = arith.constant 0 : index
      %c0_17 = arith.constant 0 : index
      %21 = vector.load %arg6[%c0_16, %c0_17] : memref<8x2048xbf16, #tpu.memory_space<vmem>>, vector<8x2048xbf16>
      %c0_18 = arith.constant 0 : index
      %c0_19 = arith.constant 0 : index
      %22 = vector.load %arg7[%c0_18, %c0_19] : memref<2048x512xbf16, #tpu.memory_space<vmem>>, vector<2048x512xbf16>
      %cst_20 = arith.constant dense<0.000000e+00> : vector<8x512xf32>
      %23 = tpu.matmul %21, %22, %cst_20 {dimension_numbers = #tpu.dot_dimension_numbers<[1], [0], [0], [1], [0, 0, 1, 1], [], []>} : vector<8x2048xbf16>, vector<2048x512xbf16>, vector<8x512xf32> -> vector<8x512xf32>
      %c0_21 = arith.constant 0 : index
      %c0_22 = arith.constant 0 : index
      %24 = vector.load %arg8[%c0_21, %c0_22] : memref<1x512xf32, #tpu.memory_space<vmem>>, vector<1x512xf32>
      %25 = vector.broadcast %24 : vector<1x512xf32> to vector<8x512xf32>
      %26 = arith.addf %23, %25 : vector<8x512xf32>
      %cst_23 = arith.constant 0.000000e+00 : f32
      %27 = vector.broadcast %cst_23 : f32 to vector<8x512xf32>
      %28 = arith.maximumf %26, %27 : vector<8x512xf32>
      %29 = arith.truncf %28 : vector<8x512xf32> to vector<8x512xbf16>
      %c0_24 = arith.constant 0 : index
      %c0_25 = arith.constant 0 : index
      %30 = vector.load %arg11[%c0_24, %c0_25] : memref<8x512xbf16, #tpu.memory_space<vmem>>, vector<8x512xbf16>
      tpu.vector_store %arg11[%c0_24, %c0_25], %29 {strides = array<i32>} : memref<8x512xbf16, #tpu.memory_space<vmem>>, vector<8x512xbf16>,
    } else {
    }
    return
  }
  func.func @transform_0(%arg0: i32) -> (i32, i32) {
    %c0_i32 = arith.constant 0 : i32
    %c0_i32_0 = arith.constant 0 : i32
    return %arg0, %c0_i32 : i32, i32
  }
  func.func @transform_1(%arg0: i32) -> (i32, i32) {
    %c0_i32 = arith.constant 0 : i32
    %c0_i32_0 = arith.constant 0 : i32
    %c0_i32_1 = arith.constant 0 : i32
    return %c0_i32, %c0_i32_0 : i32, i32
  }
  func.func @transform_2(%arg0: i32) -> (i32, i32) {
    %c0_i32 = arith.constant 0 : i32
    %c0_i32_0 = arith.constant 0 : i32
    %c0_i32_1 = arith.constant 0 : i32
    return %c0_i32, %c0_i32_0 : i32, i32
  }
  func.func @transform_3(%arg0: i32) -> (i32, i32) {
    %c0_i32 = arith.constant 0 : i32
    %c0_i32_0 = arith.constant 0 : i32
    %c0_i32_1 = arith.constant 0 : i32
    return %c0_i32, %c0_i32_0 : i32, i32
  }
  func.func @transform_4(%arg0: i32) -> (i32, i32) {
    %c0_i32 = arith.constant 0 : i32
    %c0_i32_0 = arith.constant 0 : i32
    %c0_i32_1 = arith.constant 0 : i32
    return %c0_i32, %c0_i32_0 : i32, i32
  }
  func.func @transform_5(%arg0: i32) -> (i32, i32) {
    %c0_i32 = arith.constant 0 : i32
    %c0_i32_0 = arith.constant 0 : i32
    %c0_i32_1 = arith.constant 0 : i32
    return %c0_i32, %c0_i32_0 : i32, i32
  }
  func.func @transform_6(%arg0: i32) -> (i32, i32) {
    %c0_i32 = arith.constant 0 : i32
    %c0_i32_0 = arith.constant 0 : i32
    %c0_i32_1 = arith.constant 0 : i32
    return %c0_i32, %c0_i32_0 : i32, i32
  }
  func.func @transform_7(%arg0: i32) -> (i32, i32) {
    %c0_i32 = arith.constant 0 : i32
    %c0_i32_0 = arith.constant 0 : i32
    %c0_i32_1 = arith.constant 0 : i32
    return %c0_i32, %c0_i32_0 : i32, i32
  }
  func.func @transform_8(%arg0: i32) -> (i32, i32) {
    %c0_i32 = arith.constant 0 : i32
    %c0_i32_0 = arith.constant 0 : i32
    return %arg0, %c0_i32 : i32, i32
  }
  func.func @transform_9(%arg0: i32) -> (i32, i32) {
    %c0_i32 = arith.constant 0 : i32
    %c0_i32_0 = arith.constant 0 : i32
    return %arg0, %c0_i32 : i32, i32
  }
  func.func @transform_10(%arg0: i32) -> (i32, i32) {
    %c0_i32 = arith.constant 0 : i32
    %c0_i32_0 = arith.constant 0 : i32
    return %arg0, %c0_i32 : i32, i32
  }
}

</mosaic_0001>

<bundles_post_ra>
// kernel: tpu_custom_call.1
= control target key start
LH: loop header
LB: loop body
LE: loop exit
PB: predicated region body
PF: predicated region fallthrough
CT: control target
= control target key end

     0   :  { %16 = vsyncpa [#allocation3], 0  ;;  %s16187_s0 = inlined_call_operand.hbm [shape: bf16[16,2048], index: 0, kind: input, shape index: {}]   ;;  %s16188_s1 = inlined_call_operand.hbm [shape: bf16[2048,512], index: 1, kind: input, shape index: {}]   ;;  %s16189_s2 = inlined_call_operand.hbm [shape: f32[1,512], index: 2, kind: input, shape index: {}]   ;;  %s16190_s3 = inlined_call_operand.hbm [shape: bf16[512,512], index: 3, kind: input, shape index: {}]   ;;  %s16191_s4 = inlined_call_operand.hbm [shape: f32[1,512], index: 4, kind: input, shape index: {}]   ;;  %s16192_s5 = inlined_call_operand.hbm [shape: bf16[8,2048], index: 5, kind: input, shape index: {}]   ;;  %s16193_s6 = inlined_call_operand.hbm [shape: bf16[2048,512], index: 6, kind: input, shape index: {}]   ;;  %s16194_s7 = inlined_call_operand.hbm [shape: f32[1,512], index: 7, kind: input, shape index: {}]   ;;  %s16195_s8 = inlined_call_operand.hbm [shape: bf16[16,512], index: 8, kind: output, shape index: {0}]   ;;  %s16196_s9 = inlined_call_operand.hbm [shape: bf16[16,512], index: 9, kind: output, shape index: {1}]   ;;  %s16197_s10 = inlined_call_operand.hbm [shape: bf16[8,512], index: 10, kind: output, shape index: {2}]  }
   0x1   :  { %17 = vsyncpa [#allocation6], 0 }
   0x2   :  { %18 = vsyncpa [#allocation9], 0 }
   0x3   :  { %19 = vsyncpa [#allocation12], 0 }
   0x4   :  { %20 = vsyncpa [#allocation15], 0 }
   0x5   :  { %21 = vsyncpa [#allocation4], 0  ;;  %s40_s15 = sshll.u32 %s16188_s1, 4  ;;  %s41_s15 = int_to_ptr.hbm [resolvable:$true] %s40_s15 }
   0x6   :  { %22 = vsyncpa [#allocation18], 0  ;;  %s15454_s16 = smov [#allocation5]   ;;  %s64_s20 = sshll.u32 %s16190_s3, 4  ;;  %s65_s20 = int_to_ptr.hbm [resolvable:$true] %s64_s20 }
   0x7   :  { %s42_s17 = sshll.u32 %s15454_s16, 4  ;;  %s15455_s21 = smov 256   ;;  %s43_s17 = int_to_ptr.vmem [resolvable:$true] %s42_s17 }
   0x8   :  { %s15456_s22 = smov 16   ;;  %s15457_s23 = smov [#allocation8]  }
   0x9   :  { %48 = dma.hbm_to_vmem [thread:$0]  %s41_s15, 65536, %s43_s17, [#allocation6], %s15455_s21, %s15455_s21, %s15456_s22  }
   0xa   :  { %s66_s24 = sshll.u32 %s15457_s23, 4  ;;  %s89_s26 = sshll.u32 %s16192_s5, 4  ;;  %s67_s24 = int_to_ptr.vmem [resolvable:$true] %s66_s24  ;;  %s90_s26 = int_to_ptr.hbm [resolvable:$true] %s89_s26 }
   0xb   :  { %72 = dma.hbm_to_vmem [thread:$0]  %s65_s20, 16384, %s67_s24, [#allocation9], %s15455_s21, %s15455_s21, %s15456_s22  }
   0xc   :  { %s27_s28 = sshll.u32 %s16187_s0, 4  ;;  %s15458_s29 = smov [#allocation11]   ;;  %s28_s28 = int_to_ptr.hbm [resolvable:$true] %s27_s28 }
   0xd   :  { %s91_s30 = sshll.u32 %s15458_s29, 4  ;;  %s15459_s11 = smov [#allocation2]   ;;  %s92_s30 = int_to_ptr.vmem [resolvable:$true] %s91_s30 }
   0xe   :  { %94 = dma.hbm_to_vmem [thread:$0]  %s90_s26, 1024, %s92_s30, [#allocation12]  }
   0xf   :  { %s29_s12 = sshll.u32 %s15459_s11, 4  ;;  %s15460_s13 = smov 1024   ;;  %s30_s12 = int_to_ptr.vmem [resolvable:$true] %s29_s12 }
  0x10   :  { %s15461_s5 = smov 64   ;;  %s54_s16 = sshll.u32 %s16189_s2, 4  ;;  %s55_s16 = int_to_ptr.hbm [resolvable:$true] %s54_s16 }
  0x11   :  { %35 = dma.hbm_to_vmem [thread:$0]  %s28_s28, 2048, %s30_s12, [#allocation3], %s15460_s13, %s15460_s13, %s15461_s5  }
  0x12   :  { %s15462_s17 = smov [#allocation7]   ;;  %s78_s20 = sshll.u32 %s16191_s4, 4  ;;  %s79_s20 = int_to_ptr.hbm [resolvable:$true] %s78_s20 }
  0x13   :  { %s56_s18 = sshll.u32 %s15462_s17, 4  ;;  %s15463_s23 = smov [#allocation10]   ;;  %s57_s18 = int_to_ptr.vmem [resolvable:$true] %s56_s18 }
  0x14   :  { %59 = dma.hbm_to_vmem [thread:$0]  %s55_s16, 64, %s57_s18, [#allocation6]  }
  0x15   :  { %s80_s24 = sshll.u32 %s15463_s23, 4  ;;  %s99_s26 = sshll.u32 %s16193_s6, 4  ;;  %s81_s24 = int_to_ptr.vmem [resolvable:$true] %s80_s24  ;;  %s100_s26 = int_to_ptr.hbm [resolvable:$true] %s99_s26 }
  0x16   :  { %83 = dma.hbm_to_vmem [thread:$0]  %s79_s20, 64, %s81_s24, [#allocation9]  }
  0x17   :  { %s113_s27 = sshll.u32 %s16194_s7, 4  ;;  %s15464_s28 = smov [#allocation13]   ;;  %s114_s27 = int_to_ptr.hbm [resolvable:$true] %s113_s27 }
  0x18   :  { %s101_s29 = sshll.u32 %s15464_s28, 4  ;;  %s15465_s4 = smov [#allocation14]   ;;  %s102_s29 = int_to_ptr.vmem [resolvable:$true] %s101_s29 }
  0x19   :  { %107 = dma.hbm_to_vmem [thread:$0]  %s100_s26, 65536, %s102_s29, [#allocation12], %s15455_s21, %s15455_s21, %s15456_s22  }
  0x1a   :  { %s115_s30 = sshll.u32 %s15465_s4, 4  ;;  %s116_s30 = int_to_ptr.vmem [resolvable:$true] %s115_s30 }
  0x1b   :  { %118 = dma.hbm_to_vmem [thread:$0]  %s114_s27, 64, %s116_s30, [#allocation15]  }
  0x1c   :  { %15440 = dma.done.wait [#allocation3], 2048  }
  0x1d   :  { %15441 = vsyncadd [#allocation3], 4294965248 }
  0x1e   :  { %15442 = dma.done.wait [#allocation6], 65600  }
  0x1f   :  { %15443 = vsyncadd [#allocation6], 4294901696 }
  0x20   :  { %15444 = dma.done.wait [#allocation9], 16448  }
  0x21   :  { %15445 = vsyncadd [#allocation9], 4294950848 }
  0x22   :  { %15446 = dma.done.wait [#allocation12], 66560  }
  0x23   :  { %15447 = vsyncadd [#allocation12], 4294900736 }
  0x24   :  { %15448 = dma.done.wait [#allocation15], 64  }
  0x25   :  { %15449 = vsyncadd [#allocation15], 4294967232  ;;  %v9495_v0 = vld [vmem:[#allocation5 + $0xe0] sm:$0xf]  ;;  %v14035_v1 = vld [vmem:[#allocation5 + $0xec] sm:$0xf0] }
  0x26   :  { %v9623_v2 = vld [vmem:[#allocation5 + $0x1e0] sm:$0xf]  ;;  %v9496_v3 = vor.u32 %v14035_v1, %v9495_v0  ;;  %v14067_v4 = vld [vmem:[#allocation5 + $0x1ec] sm:$0xf0]  ;;  %s15466_s6 = smov [#allocation17]   ;;  %s9280_s13 = sshll.u32 %s16196_s9, 4  ;;  %s9281_s13 = int_to_ptr.hbm [resolvable:$true] %s9280_s13 }
  0x27   :  { %v9751_v5 = vld [vmem:[#allocation5 + $0x2e0] sm:$0xf]  ;;  %v14099_v6 = vld [vmem:[#allocation5 + $0x2ec] sm:$0xf0]  ;;  %v9624_v7 = vor.u32 %v14067_v4, %v9623_v2  ;;  %s9278_s7 = sshll.u32 %s15466_s6, 4  ;;  %s9267_s15 = sshll.u32 %s16195_s8, 4  ;;  %s9279_s7 = int_to_ptr.vmem [resolvable:$true] %s9278_s7  ;;  %s9268_s15 = int_to_ptr.hbm [resolvable:$true] %s9267_s15 }
  0x28   :  { %v9752_v8 = vor.u32 %v14099_v6, %v9751_v5  ;;  %v9879_v9 = vld [vmem:[#allocation5 + $0x3e0] sm:$0xf]  ;;  %v14131_v10 = vld [vmem:[#allocation5 + $0x3ec] sm:$0xf0]  ;;  %3329 = vmatpush.bf16.msra.mxu0 %v9496_v3  ;;  %s15467_s16 = smov [#allocation16]   ;;  %s15468_s8 = smov [#allocation19]  }
  0x29   :  { %v9479_v11 = vld [vmem:[#allocation5 + $0xc0] sm:$0xf]  ;;  %v9880_v12 = vor.u32 %v14131_v10, %v9879_v9  ;;  %v14031_v13 = vld [vmem:[#allocation5 + $0xcc] sm:$0xf0]  ;;  %3343 = vmatpush.bf16.msra.mxu1 %v9624_v7  ;;  %s9265_s17 = sshll.u32 %s15467_s16, 4  ;;  %s9292_s9 = sshll.u32 %s15468_s8, 4  ;;  %s9266_s17 = int_to_ptr.vmem [resolvable:$true] %s9265_s17  ;;  %s9293_s9 = int_to_ptr.vmem [resolvable:$true] %s9292_s9 }
  0x2a   :  { %v9607_v14 = vld [vmem:[#allocation5 + $0x1c0] sm:$0xf]  ;;  %v14063_v15 = vld [vmem:[#allocation5 + $0x1cc] sm:$0xf0]  ;;  %3357 = vmatpush.bf16.msra.mxu2 %v9752_v8  ;;  %v9480_v16 = vor.u32 %v14031_v13, %v9479_v11  ;;  %s9294_s18 = sshll.u32 %s16197_s10, 4  ;;  %s9295_s18 = int_to_ptr.hbm [resolvable:$true] %s9294_s18 }
  0x2b   :  { %v9608_v17 = vor.u32 %v14063_v15, %v9607_v14  ;;  %v9735_v18 = vld [vmem:[#allocation5 + $0x2c0] sm:$0xf]  ;;  %v14095_v19 = vld [vmem:[#allocation5 + $0x2cc] sm:$0xf0]  ;;  %3371 = vmatpush.bf16.msra.mxu3 %v9880_v12 }
  0x2c   :  { %v9863_v20 = vld [vmem:[#allocation5 + $0x3c0] sm:$0xf]  ;;  %v9736_v21 = vor.u32 %v14095_v19, %v9735_v18  ;;  %v14127_v22 = vld [vmem:[#allocation5 + $0x3cc] sm:$0xf0]  ;;  %3330 = vmatpush.bf16.msra.mxu0 %v9480_v16 }
  0x2d   :  { %v9463_v23 = vld [vmem:[#allocation5 + $0xa0] sm:$0xf]  ;;  %v14027_v24 = vld [vmem:[#allocation5 + $0xac] sm:$0xf0]  ;;  %v9864_v25 = vor.u32 %v14127_v22, %v9863_v20  ;;  %3344 = vmatpush.bf16.msra.mxu1 %v9608_v17 }
  0x2e   :  { %v9591_v26 = vld [vmem:[#allocation5 + $0x1a0] sm:$0xf]  ;;  %v14059_v27 = vld [vmem:[#allocation5 + $0x1ac] sm:$0xf0]  ;;  %v9464_v29 = vor.u32 %v14027_v24, %v9463_v23  ;;  %3358 = vmatpush.bf16.msra.mxu2 %v9736_v21 }
  0x2f   :  { %v9719_v28 = vld [vmem:[#allocation5 + $0x2a0] sm:$0xf]  ;;  %v14091_v30 = vld [vmem:[#allocation5 + $0x2ac] sm:$0xf0]  ;;  %v9592_v33 = vor.u32 %v14059_v27, %v9591_v26  ;;  %3372 = vmatpush.bf16.msra.mxu3 %v9864_v25 }
  0x30   :  { %v9847_v31 = vld [vmem:[#allocation5 + $0x3a0] sm:$0xf]  ;;  %v14123_v32 = vld [vmem:[#allocation5 + $0x3ac] sm:$0xf0]  ;;  %v9720_v34 = vor.u32 %v14091_v30, %v9719_v28  ;;  %3331 = vmatpush.bf16.msra.mxu0 %v9464_v29 }
  0x31   :  { %v9447_v35 = vld [vmem:[#allocation5 + $0x80] sm:$0xf]  ;;  %v14023_v36 = vld [vmem:[#allocation5 + $0x8c] sm:$0xf0]  ;;  %v9848_v38 = vor.u32 %v14123_v32, %v9847_v31  ;;  %3345 = vmatpush.bf16.msra.mxu1 %v9592_v33 }
  0x32   :  { %v9575_v37 = vld [vmem:[#allocation5 + $0x180] sm:$0xf]  ;;  %v14055_v39 = vld [vmem:[#allocation5 + $0x18c] sm:$0xf0]  ;;  %v9448_v44 = vor.u32 %v14023_v36, %v9447_v35  ;;  %3359 = vmatpush.bf16.msra.mxu2 %v9720_v34 }
  0x33   :  { %v9703_v40 = vld [vmem:[#allocation5 + $0x280] sm:$0xf]  ;;  %v14087_v41 = vld [vmem:[#allocation5 + $0x28c] sm:$0xf0]  ;;  %v9576_v45 = vor.u32 %v14055_v39, %v9575_v37  ;;  %3373 = vmatpush.bf16.msra.mxu3 %v9848_v38 }
  0x34   :  { %v9831_v42 = vld [vmem:[#allocation5 + $0x380] sm:$0xf]  ;;  %v14119_v43 = vld [vmem:[#allocation5 + $0x38c] sm:$0xf0]  ;;  %v9704_v46 = vor.u32 %v14087_v41, %v9703_v40  ;;  %3332 = vmatpush.bf16.msra.mxu0 %v9448_v44 }
  0x35   :  { %v9431_v47 = vld [vmem:[#allocation5 + $0x60] sm:$0xf]  ;;  %v14019_v48 = vld [vmem:[#allocation5 + $0x6c] sm:$0xf0]  ;;  %v9832_v50 = vor.u32 %v14119_v43, %v9831_v42  ;;  %3346 = vmatpush.bf16.msra.mxu1 %v9576_v45 }
  0x36   :  { %v9559_v49 = vld [vmem:[#allocation5 + $0x160] sm:$0xf]  ;;  %v14051_v51 = vld [vmem:[#allocation5 + $0x16c] sm:$0xf0]  ;;  %v9432_v56 = vor.u32 %v14019_v48, %v9431_v47  ;;  %3360 = vmatpush.bf16.msra.mxu2 %v9704_v46 }
  0x37   :  { %v9687_v52 = vld [vmem:[#allocation5 + $0x260] sm:$0xf]  ;;  %v14083_v53 = vld [vmem:[#allocation5 + $0x26c] sm:$0xf0]  ;;  %v9560_v57 = vor.u32 %v14051_v51, %v9559_v49  ;;  %3374 = vmatpush.bf16.msra.mxu3 %v9832_v50 }
  0x38   :  { %v9815_v54 = vld [vmem:[#allocation5 + $0x360] sm:$0xf]  ;;  %v14115_v55 = vld [vmem:[#allocation5 + $0x36c] sm:$0xf0]  ;;  %v9688_v58 = vor.u32 %v14083_v53, %v9687_v52  ;;  %3333 = vmatpush.bf16.msra.mxu0 %v9432_v56 }
  0x39   :  { %v9415_v59 = vld [vmem:[#allocation5 + $0x40] sm:$0xf]  ;;  %v14015_v60 = vld [vmem:[#allocation5 + $0x4c] sm:$0xf0]  ;;  %v9816_v62 = vor.u32 %v14115_v55, %v9815_v54  ;;  %3347 = vmatpush.bf16.msra.mxu1 %v9560_v57  ;;  %v9327_v54 = vld [vmem:[#allocation2 + $0x8] sm:$0xf] }
  0x3a   :  { %v9543_v61 = vld [vmem:[#allocation5 + $0x140] sm:$0xf]  ;;  %v14047_v63 = vld [vmem:[#allocation5 + $0x14c] sm:$0xf0]  ;;  %v9416_v4 = vor.u32 %v14015_v60, %v9415_v59  ;;  %3361 = vmatpush.bf16.msra.mxu2 %v9688_v58  ;;  %v13998_v59 = vld [vmem:[#allocation2 + $0x44] sm:$0xf0] }
  0x3b   :  { %v9671_v0 = vld [vmem:[#allocation5 + $0x240] sm:$0xf]  ;;  %v14079_v1 = vld [vmem:[#allocation5 + $0x24c] sm:$0xf0]  ;;  %v9544_v5 = vor.u32 %v14047_v63, %v9543_v61  ;;  %3375 = vmatpush.bf16.msra.mxu3 %v9816_v62 }
  0x3c   :  { %v9799_v2 = vld [vmem:[#allocation5 + $0x340] sm:$0xf]  ;;  %v14111_v3 = vld [vmem:[#allocation5 + $0x34c] sm:$0xf0]  ;;  %v9672_v6 = vor.u32 %v14079_v1, %v9671_v0  ;;  %3334 = vmatpush.bf16.msra.mxu0 %v9416_v4  ;;  %v15559_v1 = vor.u32 %v13998_v59, %v9327_v54 }
  0x3d   :  { %v9399_v7 = vld [vmem:[#allocation5 + $0x20] sm:$0xf]  ;;  %v14011_v8 = vld [vmem:[#allocation5 + $0x2c] sm:$0xf0]  ;;  %v9800_v10 = vor.u32 %v14111_v3, %v9799_v2  ;;  %3348 = vmatpush.bf16.msra.mxu1 %v9544_v5 }
  0x3e   :  { %v9527_v9 = vld [vmem:[#allocation5 + $0x120] sm:$0xf]  ;;  %v14043_v11 = vld [vmem:[#allocation5 + $0x12c] sm:$0xf0]  ;;  %v9400_v16 = vor.u32 %v14011_v8, %v9399_v7  ;;  %3362 = vmatpush.bf16.msra.mxu2 %v9672_v6  ;;  %16206 = vst [vmem:[#allocation27_spill] sm:$0xff] %v15559_v1 }
  0x3f   :  { %v9655_v12 = vld [vmem:[#allocation5 + $0x220] sm:$0xf]  ;;  %v14075_v13 = vld [vmem:[#allocation5 + $0x22c] sm:$0xf0]  ;;  %v9528_v19 = vor.u32 %v14043_v11, %v9527_v9  ;;  %3376 = vmatpush.bf16.msra.mxu3 %v9800_v10  ;;  %v13989_v6 = vld [vmem:[#allocation2 + $0x4] sm:$0xf] }
  0x40   :  { %v9783_v14 = vld [vmem:[#allocation5 + $0x320] sm:$0xf]  ;;  %v14107_v15 = vld [vmem:[#allocation5 + $0x32c] sm:$0xf0]  ;;  %v9656_v20 = vor.u32 %v14075_v13, %v9655_v12  ;;  %3335 = vmatpush.bf16.msra.mxu0 %v9400_v16  ;;  %v9321_v7 = vld [vmem:[#allocation2 + $0x40] sm:$0xf0] }
  0x41   :  { %v9383_v17 = vld [vmem:[#allocation5] sm:$0xf]  ;;  %v14007_v18 = vld [vmem:[#allocation5 + $0xc] sm:$0xf0]  ;;  %v9784_v24 = vor.u32 %v14107_v15, %v9783_v14  ;;  %3349 = vmatpush.bf16.msra.mxu1 %v9528_v19  ;;  %v13990_v8 = vld [vmem:[#allocation2 + $0xc] sm:$0xf]  ;;  %v15563_v10 = vor.u32 %v13989_v6, %v9321_v7 }
  0x42   :  { %v9511_v21 = vld [vmem:[#allocation5 + $0x100] sm:$0xf]  ;;  %v14039_v22 = vld [vmem:[#allocation5 + $0x10c] sm:$0xf0]  ;;  %v9384_v31 = vor.u32 %v14007_v18, %v9383_v17  ;;  %3363 = vmatpush.bf16.msra.mxu2 %v9656_v20  ;;  %v9329_v11 = vld [vmem:[#allocation2 + $0x48] sm:$0xf0] }
  0x43   :  { %v9639_v23 = vld [vmem:[#allocation5 + $0x200] sm:$0xf]  ;;  %v14071_v25 = vld [vmem:[#allocation5 + $0x20c] sm:$0xf0]  ;;  %v9512_v35 = vor.u32 %v14039_v22, %v9511_v21  ;;  %3377 = vmatpush.bf16.msra.mxu3 %v9784_v24  ;;  %16207 = vst [vmem:[#allocation28_spill] sm:$0xff] %v15563_v10  ;;  %v15565_v17 = vor.u32 %v13990_v8, %v9329_v11 }
  0x44   :  { %v9767_v26 = vld [vmem:[#allocation5 + $0x300] sm:$0xf]  ;;  %v14103_v27 = vld [vmem:[#allocation5 + $0x30c] sm:$0xf0]  ;;  %v9640_v36 = vor.u32 %v14071_v25, %v9639_v23  ;;  %3336 = vmatpush.bf16.msra.mxu0 %v9384_v31 }
  0x45   :  { %v10007_v28 = vld [vmem:[#allocation5 + $0x4e0] sm:$0xf]  ;;  %v14163_v29 = vld [vmem:[#allocation5 + $0x4ec] sm:$0xf0]  ;;  %v9768_v39 = vor.u32 %v14103_v27, %v9767_v26  ;;  %3350 = vmatpush.bf16.msra.mxu1 %v9512_v35  ;;  %16208 = vst [vmem:[#allocation29_spill] sm:$0xff] %v15565_v17 }
  0x46   :  { %v10135_v30 = vld [vmem:[#allocation5 + $0x5e0] sm:$0xf]  ;;  %v14195_v32 = vld [vmem:[#allocation5 + $0x5ec] sm:$0xf0]  ;;  %v10008_v40 = vor.u32 %v14163_v29, %v10007_v28  ;;  %3364 = vmatpush.bf16.msra.mxu2 %v9640_v36 }
  0x47   :  { %v10263_v33 = vld [vmem:[#allocation5 + $0x6e0] sm:$0xf]  ;;  %v14227_v34 = vld [vmem:[#allocation5 + $0x6ec] sm:$0xf0]  ;;  %v10136_v43 = vor.u32 %v14195_v32, %v10135_v30  ;;  %3378 = vmatpush.bf16.msra.mxu3 %v9768_v39 }
  0x48   :  { %v10391_v37 = vld [vmem:[#allocation5 + $0x7e0] sm:$0xf]  ;;  %v14259_v38 = vld [vmem:[#allocation5 + $0x7ec] sm:$0xf0]  ;;  %v10264_v44 = vor.u32 %v14227_v34, %v10263_v33  ;;  %3385 = vmatpush.bf16.msrb.mxu0 %v10008_v40  ;;  %3351 = vmatmul.bf16.vlgmr.msra.gmra.mxu1 %v15563_v10 }
  0x49   :  { %v9991_v41 = vld [vmem:[#allocation5 + $0x4c0] sm:$0xf]  ;;  %v14159_v42 = vld [vmem:[#allocation5 + $0x4cc] sm:$0xf0]  ;;  %v10392_v48 = vor.u32 %v14259_v38, %v10391_v37  ;;  %3399 = vmatpush.bf16.msrb.mxu1 %v10136_v43  ;;  %3365 = vmatmul.bf16.vlgmr.msra.gmra.mxu2 %v15559_v1 }
  0x4a   :  { %v10119_v45 = vld [vmem:[#allocation5 + $0x5c0] sm:$0xf]  ;;  %v14191_v46 = vld [vmem:[#allocation5 + $0x5cc] sm:$0xf0]  ;;  %v9992_v55 = vor.u32 %v14159_v42, %v9991_v41  ;;  %3413 = vmatpush.bf16.msrb.mxu2 %v10264_v44  ;;  %3379 = vmatmul.bf16.vlgmr.msra.gmra.mxu3 %v15565_v17 }
  0x4b   :  { %v10247_v47 = vld [vmem:[#allocation5 + $0x6c0] sm:$0xf]  ;;  %v14223_v49 = vld [vmem:[#allocation5 + $0x6cc] sm:$0xf0]  ;;  %v10120_v60 = vor.u32 %v14191_v46, %v10119_v45  ;;  %3427 = vmatpush.bf16.msrb.mxu3 %v10392_v48 }
  0x4c   :  { %v10375_v50 = vld [vmem:[#allocation5 + $0x7c0] sm:$0xf]  ;;  %v14255_v51 = vld [vmem:[#allocation5 + $0x7cc] sm:$0xf0]  ;;  %v10248_v61 = vor.u32 %v14223_v49, %v10247_v47  ;;  %3386 = vmatpush.bf16.msrb.mxu0 %v9992_v55 }
  0x4d   :  { %v9319_v52 = vld [vmem:[#allocation2] sm:$0xf]  ;;  %v14155_v57 = vld [vmem:[#allocation5 + $0x4ac] sm:$0xf0]  ;;  %v10376_v2 = vor.u32 %v14255_v51, %v10375_v50  ;;  %3400 = vmatpush.bf16.msrb.mxu1 %v10120_v60 }
  0x4e   :  { %v13997_v53 = vld [vmem:[#allocation2 + $0x3c] sm:$0xf0]  ;;  %v14187_v63 = vld [vmem:[#allocation5 + $0x5ac] sm:$0xf0]  ;;  %3414 = vmatpush.bf16.msrb.mxu2 %v10248_v61 }
  0x4f   :  { %v9975_v56 = vld [vmem:[#allocation5 + $0x4a0] sm:$0xf]  ;;  %v15557_v58 = vor.u32 %v13997_v53, %v9319_v52  ;;  %v14219_v3 = vld [vmem:[#allocation5 + $0x6ac] sm:$0xf0]  ;;  %3428 = vmatpush.bf16.msrb.mxu3 %v10376_v2 }
  0x50   :  { %v10103_v62 = vld [vmem:[#allocation5 + $0x5a0] sm:$0xf]  ;;  %v14251_v5 = vld [vmem:[#allocation5 + $0x7ac] sm:$0xf0]  ;;  %v9976_v9 = vor.u32 %v14155_v57, %v9975_v56 }
  0x51   :  { %v10231_v0 = vld [vmem:[#allocation5 + $0x6a0] sm:$0xf]  ;;  %3337 = vmatmul.bf16.vlgmr.msra.gmra.mxu0 %v15557_v58  ;;  %v10104_v12 = vor.u32 %v14187_v63, %v10103_v62  ;;  %v14151_v15 = vld [vmem:[#allocation5 + $0x48c] sm:$0xf0] }
  0x52   :  { %v10359_v4 = vld [vmem:[#allocation5 + $0x7a0] sm:$0xf]  ;;  %v10232_v13 = vor.u32 %v14219_v3, %v10231_v0  ;;  %v14183_v19 = vld [vmem:[#allocation5 + $0x58c] sm:$0xf0]  ;;  %3387 = vmatpush.bf16.msrb.mxu0 %v9976_v9 }
  0x53   :  { %v9959_v14 = vld [vmem:[#allocation5 + $0x480] sm:$0xf]  ;;  %v10360_v18 = vor.u32 %v14251_v5, %v10359_v4  ;;  %v14215_v21 = vld [vmem:[#allocation5 + $0x68c] sm:$0xf0]  ;;  %3401 = vmatpush.bf16.msrb.mxu1 %v10104_v12 }
  0x54   :  { %v10087_v16 = vld [vmem:[#allocation5 + $0x580] sm:$0xf]  ;;  %v14247_v23 = vld [vmem:[#allocation5 + $0x78c] sm:$0xf0]  ;;  %v9960_v24 = vor.u32 %v14151_v15, %v9959_v14  ;;  %3415 = vmatpush.bf16.msrb.mxu2 %v10232_v13 }
  0x55   :  { %v10215_v20 = vld [vmem:[#allocation5 + $0x680] sm:$0xf]  ;;  %v10088_v25 = vor.u32 %v14183_v19, %v10087_v16  ;;  %v14147_v28 = vld [vmem:[#allocation5 + $0x46c] sm:$0xf0]  ;;  %3429 = vmatpush.bf16.msrb.mxu3 %v10360_v18 }
  0x56   :  { %v10343_v22 = vld [vmem:[#allocation5 + $0x780] sm:$0xf]  ;;  %v10216_v26 = vor.u32 %v14215_v21, %v10215_v20  ;;  %v14179_v31 = vld [vmem:[#allocation5 + $0x56c] sm:$0xf0]  ;;  %3388 = vmatpush.bf16.msrb.mxu0 %v9960_v24 }
  0x57   :  { %v9943_v27 = vld [vmem:[#allocation5 + $0x460] sm:$0xf]  ;;  %v10344_v30 = vor.u32 %v14247_v23, %v10343_v22  ;;  %v14211_v33 = vld [vmem:[#allocation5 + $0x66c] sm:$0xf0]  ;;  %3402 = vmatpush.bf16.msrb.mxu1 %v10088_v25  ;;  %v9343_v25 = vld [vmem:[#allocation2 + $0x18] sm:$0xf] }
  0x58   :  { %v10071_v29 = vld [vmem:[#allocation5 + $0x560] sm:$0xf]  ;;  %v14243_v35 = vld [vmem:[#allocation5 + $0x76c] sm:$0xf0]  ;;  %v9944_v36 = vor.u32 %v14147_v28, %v9943_v27  ;;  %3416 = vmatpush.bf16.msrb.mxu2 %v10216_v26  ;;  %v14000_v26 = vld [vmem:[#allocation2 + $0x54] sm:$0xf0] }
  0x59   :  { %v10199_v32 = vld [vmem:[#allocation5 + $0x660] sm:$0xf]  ;;  %v10072_v37 = vor.u32 %v14179_v31, %v10071_v29  ;;  %v14143_v40 = vld [vmem:[#allocation5 + $0x44c] sm:$0xf0]  ;;  %3430 = vmatpush.bf16.msrb.mxu3 %v10344_v30  ;;  %v13991_v27 = vld [vmem:[#allocation2 + $0x14] sm:$0xf] }
  0x5a   :  { %v10327_v34 = vld [vmem:[#allocation5 + $0x760] sm:$0xf]  ;;  %v10200_v38 = vor.u32 %v14211_v33, %v10199_v32  ;;  %v14175_v43 = vld [vmem:[#allocation5 + $0x54c] sm:$0xf0]  ;;  %3389 = vmatpush.bf16.msrb.mxu0 %v9944_v36  ;;  %v9337_v30 = vld [vmem:[#allocation2 + $0x50] sm:$0xf0] }
  0x5b   :  { %v9927_v39 = vld [vmem:[#allocation5 + $0x440] sm:$0xf]  ;;  %v10328_v42 = vor.u32 %v14243_v35, %v10327_v34  ;;  %v14207_v45 = vld [vmem:[#allocation5 + $0x64c] sm:$0xf0]  ;;  %3403 = vmatpush.bf16.msrb.mxu1 %v10072_v37  ;;  %v13992_v31 = vld [vmem:[#allocation2 + $0x1c] sm:$0xf] }
  0x5c   :  { %v10055_v41 = vld [vmem:[#allocation5 + $0x540] sm:$0xf]  ;;  %v14239_v47 = vld [vmem:[#allocation5 + $0x74c] sm:$0xf0]  ;;  %v9928_v48 = vor.u32 %v14143_v40, %v9927_v39  ;;  %3417 = vmatpush.bf16.msrb.mxu2 %v10200_v38  ;;  %v9345_v32 = vld [vmem:[#allocation2 + $0x58] sm:$0xf0] }
  0x5d   :  { %v10183_v44 = vld [vmem:[#allocation5 + $0x640] sm:$0xf]  ;;  %v10056_v50 = vor.u32 %v14175_v43, %v10055_v41  ;;  %v14139_v52 = vld [vmem:[#allocation5 + $0x42c] sm:$0xf0]  ;;  %3431 = vmatpush.bf16.msrb.mxu3 %v10328_v42  ;;  %v15571_v43 = vor.u32 %v14000_v26, %v9343_v25 }
  0x5e   :  { %v10311_v46 = vld [vmem:[#allocation5 + $0x740] sm:$0xf]  ;;  %v10184_v51 = vor.u32 %v14207_v45, %v10183_v44  ;;  %v14171_v54 = vld [vmem:[#allocation5 + $0x52c] sm:$0xf0]  ;;  %3390 = vmatpush.bf16.msrb.mxu0 %v9928_v48  ;;  %v15573_v44 = vor.u32 %v13991_v27, %v9337_v30 }
  0x5f   :  { %v9911_v49 = vld [vmem:[#allocation5 + $0x420] sm:$0xf]  ;;  %v10312_v55 = vor.u32 %v14239_v47, %v10311_v46  ;;  %v14203_v57 = vld [vmem:[#allocation5 + $0x62c] sm:$0xf0]  ;;  %3404 = vmatpush.bf16.msrb.mxu1 %v10056_v50  ;;  %16210 = vst [vmem:[#allocation31_spill] sm:$0xff] %v15571_v43  ;;  %v15575_v47 = vor.u32 %v13992_v31, %v9345_v32 }
  0x60   :  { %v10039_v53 = vld [vmem:[#allocation5 + $0x520] sm:$0xf]  ;;  %v14235_v60 = vld [vmem:[#allocation5 + $0x72c] sm:$0xf0]  ;;  %v9912_v63 = vor.u32 %v14139_v52, %v9911_v49  ;;  %3418 = vmatpush.bf16.msrb.mxu2 %v10184_v51  ;;  %16211 = vst [vmem:[#allocation32_spill] sm:$0xff] %v15573_v44 }
  0x61   :  { %v10167_v56 = vld [vmem:[#allocation5 + $0x620] sm:$0xf]  ;;  %v14135_v62 = vld [vmem:[#allocation5 + $0x40c] sm:$0xf0]  ;;  %v10040_v5 = vor.u32 %v14171_v54, %v10039_v53  ;;  %3432 = vmatpush.bf16.msrb.mxu3 %v10312_v55  ;;  %16212 = vst [vmem:[#allocation33_spill] sm:$0xff] %v15575_v47 }
  0x62   :  { %v10295_v59 = vld [vmem:[#allocation5 + $0x720] sm:$0xf]  ;;  %v14167_v2 = vld [vmem:[#allocation5 + $0x50c] sm:$0xf0]  ;;  %v10168_v6 = vor.u32 %v14203_v57, %v10167_v56  ;;  %3391 = vmatpush.bf16.msrb.mxu0 %v9912_v63 }
  0x63   :  { %v9895_v61 = vld [vmem:[#allocation5 + $0x400] sm:$0xf]  ;;  %v14199_v4 = vld [vmem:[#allocation5 + $0x60c] sm:$0xf0]  ;;  %v10296_v11 = vor.u32 %v14235_v60, %v10295_v59  ;;  %3405 = vmatpush.bf16.msrb.mxu1 %v10040_v5 }
  0x64   :  { %v10023_v0 = vld [vmem:[#allocation5 + $0x500] sm:$0xf]  ;;  %v14231_v8 = vld [vmem:[#allocation5 + $0x70c] sm:$0xf0]  ;;  %v9896_v19 = vor.u32 %v14135_v62, %v9895_v61  ;;  %3419 = vmatpush.bf16.msrb.mxu2 %v10168_v6 }
  0x65   :  { %v10151_v3 = vld [vmem:[#allocation5 + $0x600] sm:$0xf]  ;;  %v14291_v12 = vld [vmem:[#allocation5 + $0x8ec] sm:$0xf0]  ;;  %v10024_v23 = vor.u32 %v14167_v2, %v10023_v0  ;;  %3433 = vmatpush.bf16.msrb.mxu3 %v10296_v11 }
  0x66   :  { %v10279_v7 = vld [vmem:[#allocation5 + $0x700] sm:$0xf]  ;;  %v14323_v14 = vld [vmem:[#allocation5 + $0x9ec] sm:$0xf0]  ;;  %v10152_v24 = vor.u32 %v14199_v4, %v10151_v3  ;;  %3392 = vmatpush.bf16.msrb.mxu0 %v9896_v19 }
  0x67   :  { %v10519_v9 = vld [vmem:[#allocation5 + $0x8e0] sm:$0xf]  ;;  %v14355_v16 = vld [vmem:[#allocation5 + $0xaec] sm:$0xf0]  ;;  %v10280_v28 = vor.u32 %v14231_v8, %v10279_v7  ;;  %3406 = vmatpush.bf16.msrb.mxu1 %v10024_v23 }
  0x68   :  { %v10647_v13 = vld [vmem:[#allocation5 + $0x9e0] sm:$0xf]  ;;  %v14387_v20 = vld [vmem:[#allocation5 + $0xbec] sm:$0xf0]  ;;  %v10520_v29 = vor.u32 %v14291_v12, %v10519_v9  ;;  %3420 = vmatpush.bf16.msrb.mxu2 %v10152_v24 }
  0x69   :  { %v10775_v15 = vld [vmem:[#allocation5 + $0xae0] sm:$0xf]  ;;  %v9335_v21 = vld [vmem:[#allocation2 + $0x10] sm:$0xf]  ;;  %v10648_v33 = vor.u32 %v14323_v14, %v10647_v13  ;;  %3434 = vmatpush.bf16.msrb.mxu3 %v10280_v28 }
  0x6a   :  { %v10903_v18 = vld [vmem:[#allocation5 + $0xbe0] sm:$0xf]  ;;  %v13999_v22 = vld [vmem:[#allocation2 + $0x4c] sm:$0xf0]  ;;  %v10776_v34 = vor.u32 %v14355_v16, %v10775_v15  ;;  %3441 = vmatpush.bf16.msra.mxu0 %v10520_v29  ;;  %3407 = vmatmul.bf16.vlgmr.msrb.gmra.mxu1 %v15573_v44 }
  0x6b   :  { %v10503_v35 = vld [vmem:[#allocation5 + $0x8c0] sm:$0xf]  ;;  %v14287_v36 = vld [vmem:[#allocation5 + $0x8cc] sm:$0xf0]  ;;  %v10904_v38 = vor.u32 %v14387_v20, %v10903_v18  ;;  %v15569_v39 = vor.u32 %v13999_v22, %v9335_v21  ;;  %3455 = vmatpush.bf16.msra.mxu1 %v10648_v33  ;;  %3421 = vmatmul.bf16.vlgmr.msrb.gmra.mxu2 %v15571_v43 }
  0x6c   :  { %v10631_v37 = vld [vmem:[#allocation5 + $0x9c0] sm:$0xf]  ;;  %v14319_v40 = vld [vmem:[#allocation5 + $0x9cc] sm:$0xf0]  ;;  %v10504_v48 = vor.u32 %v14287_v36, %v10503_v35  ;;  %3469 = vmatpush.bf16.msra.mxu2 %v10776_v34  ;;  %3435 = vmatmul.bf16.vlgmr.msrb.gmra.mxu3 %v15575_v47 }
  0x6d   :  { %16209 = vst [vmem:[#allocation30_spill] sm:$0xff] %v15569_v39  ;;  %v10759_v41 = vld [vmem:[#allocation5 + $0xac0] sm:$0xf]  ;;  %v14351_v42 = vld [vmem:[#allocation5 + $0xacc] sm:$0xf0]  ;;  %v10632_v49 = vor.u32 %v14319_v40, %v10631_v37  ;;  %3483 = vmatpush.bf16.msra.mxu3 %v10904_v38  ;;  %3393 = vmatmul.bf16.vlgmr.msrb.gmra.mxu0 %v15569_v39 }
  0x6e   :  { %v10887_v45 = vld [vmem:[#allocation5 + $0xbc0] sm:$0xf]  ;;  %v14383_v46 = vld [vmem:[#allocation5 + $0xbcc] sm:$0xf0]  ;;  %v10760_v50 = vor.u32 %v14351_v42, %v10759_v41  ;;  %3442 = vmatpush.bf16.msra.mxu0 %v10504_v48 }
  0x6f   :  { %v10487_v51 = vld [vmem:[#allocation5 + $0x8a0] sm:$0xf]  ;;  %v14283_v52 = vld [vmem:[#allocation5 + $0x8ac] sm:$0xf0]  ;;  %v10888_v54 = vor.u32 %v14383_v46, %v10887_v45  ;;  %3456 = vmatpush.bf16.msra.mxu1 %v10632_v49 }
  0x70   :  { %v10615_v53 = vld [vmem:[#allocation5 + $0x9a0] sm:$0xf]  ;;  %v14315_v55 = vld [vmem:[#allocation5 + $0x9ac] sm:$0xf0]  ;;  %v10488_v61 = vor.u32 %v14283_v52, %v10487_v51  ;;  %3470 = vmatpush.bf16.msra.mxu2 %v10760_v50 }
  0x71   :  { %v10743_v56 = vld [vmem:[#allocation5 + $0xaa0] sm:$0xf]  ;;  %v14347_v57 = vld [vmem:[#allocation5 + $0xaac] sm:$0xf0]  ;;  %v10616_v62 = vor.u32 %v14315_v55, %v10615_v53  ;;  %3484 = vmatpush.bf16.msra.mxu3 %v10888_v54 }
  0x72   :  { %v10871_v59 = vld [vmem:[#allocation5 + $0xba0] sm:$0xf]  ;;  %v14379_v60 = vld [vmem:[#allocation5 + $0xbac] sm:$0xf0]  ;;  %v10744_v63 = vor.u32 %v14347_v57, %v10743_v56  ;;  %3443 = vmatpush.bf16.msra.mxu0 %v10488_v61 }
  0x73   :  { %v10471_v0 = vld [vmem:[#allocation5 + $0x880] sm:$0xf]  ;;  %v14279_v2 = vld [vmem:[#allocation5 + $0x88c] sm:$0xf0]  ;;  %v10872_v4 = vor.u32 %v14379_v60, %v10871_v59  ;;  %3457 = vmatpush.bf16.msra.mxu1 %v10616_v62 }
  0x74   :  { %v10599_v3 = vld [vmem:[#allocation5 + $0x980] sm:$0xf]  ;;  %v14311_v5 = vld [vmem:[#allocation5 + $0x98c] sm:$0xf0]  ;;  %v10472_v11 = vor.u32 %v14279_v2, %v10471_v0  ;;  %3471 = vmatpush.bf16.msra.mxu2 %v10744_v63 }
  0x75   :  { %v10727_v6 = vld [vmem:[#allocation5 + $0xa80] sm:$0xf]  ;;  %v14343_v7 = vld [vmem:[#allocation5 + $0xa8c] sm:$0xf0]  ;;  %v10600_v12 = vor.u32 %v14311_v5, %v10599_v3  ;;  %3485 = vmatpush.bf16.msra.mxu3 %v10872_v4 }
  0x76   :  { %v10855_v8 = vld [vmem:[#allocation5 + $0xb80] sm:$0xf]  ;;  %v14375_v9 = vld [vmem:[#allocation5 + $0xb8c] sm:$0xf0]  ;;  %v10728_v13 = vor.u32 %v14343_v7, %v10727_v6  ;;  %3444 = vmatpush.bf16.msra.mxu0 %v10472_v11 }
  0x77   :  { %v10455_v14 = vld [vmem:[#allocation5 + $0x860] sm:$0xf]  ;;  %v14275_v15 = vld [vmem:[#allocation5 + $0x86c] sm:$0xf0]  ;;  %v10856_v18 = vor.u32 %v14375_v9, %v10855_v8  ;;  %3458 = vmatpush.bf16.msra.mxu1 %v10600_v12 }
  0x78   :  { %v10583_v16 = vld [vmem:[#allocation5 + $0x960] sm:$0xf]  ;;  %v14307_v19 = vld [vmem:[#allocation5 + $0x96c] sm:$0xf0]  ;;  %v10456_v24 = vor.u32 %v14275_v15, %v10455_v14  ;;  %3472 = vmatpush.bf16.msra.mxu2 %v10728_v13 }
  0x79   :  { %v10711_v20 = vld [vmem:[#allocation5 + $0xa60] sm:$0xf]  ;;  %v14339_v21 = vld [vmem:[#allocation5 + $0xa6c] sm:$0xf0]  ;;  %v10584_v25 = vor.u32 %v14307_v19, %v10583_v16  ;;  %3486 = vmatpush.bf16.msra.mxu3 %v10856_v18  ;;  %v9359_v16 = vld [vmem:[#allocation2 + $0x28] sm:$0xf] }
  0x7a   :  { %v10839_v22 = vld [vmem:[#allocation5 + $0xb60] sm:$0xf]  ;;  %v14371_v23 = vld [vmem:[#allocation5 + $0xb6c] sm:$0xf0]  ;;  %v10712_v26 = vor.u32 %v14339_v21, %v10711_v20  ;;  %3445 = vmatpush.bf16.msra.mxu0 %v10456_v24  ;;  %v14002_v18 = vld [vmem:[#allocation2 + $0x64] sm:$0xf0] }
  0x7b   :  { %v10439_v27 = vld [vmem:[#allocation5 + $0x840] sm:$0xf]  ;;  %v14271_v28 = vld [vmem:[#allocation5 + $0x84c] sm:$0xf0]  ;;  %v10840_v30 = vor.u32 %v14371_v23, %v10839_v22  ;;  %3459 = vmatpush.bf16.msra.mxu1 %v10584_v25  ;;  %v13993_v19 = vld [vmem:[#allocation2 + $0x24] sm:$0xf] }
  0x7c   :  { %v10567_v29 = vld [vmem:[#allocation5 + $0x940] sm:$0xf]  ;;  %v14303_v31 = vld [vmem:[#allocation5 + $0x94c] sm:$0xf0]  ;;  %v10440_v36 = vor.u32 %v14271_v28, %v10439_v27  ;;  %3473 = vmatpush.bf16.msra.mxu2 %v10712_v26  ;;  %v9353_v22 = vld [vmem:[#allocation2 + $0x60] sm:$0xf0] }
  0x7d   :  { %v10695_v32 = vld [vmem:[#allocation5 + $0xa40] sm:$0xf]  ;;  %v14335_v33 = vld [vmem:[#allocation5 + $0xa4c] sm:$0xf0]  ;;  %v10568_v38 = vor.u32 %v14303_v31, %v10567_v29  ;;  %3487 = vmatpush.bf16.msra.mxu3 %v10840_v30  ;;  %v13994_v23 = vld [vmem:[#allocation2 + $0x2c] sm:$0xf] }
  0x7e   :  { %v10823_v34 = vld [vmem:[#allocation5 + $0xb40] sm:$0xf]  ;;  %v14367_v35 = vld [vmem:[#allocation5 + $0xb4c] sm:$0xf0]  ;;  %v10696_v40 = vor.u32 %v14335_v33, %v10695_v32  ;;  %3446 = vmatpush.bf16.msra.mxu0 %v10440_v36  ;;  %v9361_v24 = vld [vmem:[#allocation2 + $0x68] sm:$0xf0]  ;;  %v15585_v36 = vor.u32 %v13993_v19, %v9353_v22 }
  0x7f   :  { %v10423_v37 = vld [vmem:[#allocation5 + $0x820] sm:$0xf]  ;;  %v14267_v41 = vld [vmem:[#allocation5 + $0x82c] sm:$0xf0]  ;;  %v10824_v46 = vor.u32 %v14367_v35, %v10823_v34  ;;  %3460 = vmatpush.bf16.msra.mxu1 %v10568_v38  ;;  %v15583_v35 = vor.u32 %v14002_v18, %v9359_v16 }
  0x80   :  { %v10551_v42 = vld [vmem:[#allocation5 + $0x920] sm:$0xf]  ;;  %v14299_v45 = vld [vmem:[#allocation5 + $0x92c] sm:$0xf0]  ;;  %v10424_v54 = vor.u32 %v14267_v41, %v10423_v37  ;;  %3474 = vmatpush.bf16.msra.mxu2 %v10696_v40  ;;  %v15587_v40 = vor.u32 %v13994_v23, %v9361_v24 }
  0x81   :  { %v10679_v48 = vld [vmem:[#allocation5 + $0xa20] sm:$0xf]  ;;  %v14331_v49 = vld [vmem:[#allocation5 + $0xa2c] sm:$0xf0]  ;;  %v10552_v60 = vor.u32 %v14299_v45, %v10551_v42  ;;  %3488 = vmatpush.bf16.msra.mxu3 %v10824_v46 }
  0x82   :  { %v10807_v50 = vld [vmem:[#allocation5 + $0xb20] sm:$0xf]  ;;  %v14363_v51 = vld [vmem:[#allocation5 + $0xb2c] sm:$0xf0]  ;;  %v10680_v61 = vor.u32 %v14331_v49, %v10679_v48  ;;  %3447 = vmatpush.bf16.msra.mxu0 %v10424_v54 }
  0x83   :  { %v10407_v52 = vld [vmem:[#allocation5 + $0x800] sm:$0xf]  ;;  %v14263_v53 = vld [vmem:[#allocation5 + $0x80c] sm:$0xf0]  ;;  %v10808_v2 = vor.u32 %v14363_v51, %v10807_v50  ;;  %3461 = vmatpush.bf16.msra.mxu1 %v10552_v60 }
  0x84   :  { %v10535_v55 = vld [vmem:[#allocation5 + $0x900] sm:$0xf]  ;;  %v14295_v56 = vld [vmem:[#allocation5 + $0x90c] sm:$0xf0]  ;;  %v10408_v9 = vor.u32 %v14263_v53, %v10407_v52  ;;  %3475 = vmatpush.bf16.msra.mxu2 %v10680_v61 }
  0x85   :  { %v10663_v57 = vld [vmem:[#allocation5 + $0xa00] sm:$0xf]  ;;  %v14327_v59 = vld [vmem:[#allocation5 + $0xa0c] sm:$0xf0]  ;;  %v10536_v14 = vor.u32 %v14295_v56, %v10535_v55  ;;  %3489 = vmatpush.bf16.msra.mxu3 %v10808_v2 }
  0x86   :  { %v10791_v62 = vld [vmem:[#allocation5 + $0xb00] sm:$0xf]  ;;  %v14359_v63 = vld [vmem:[#allocation5 + $0xb0c] sm:$0xf0]  ;;  %v10664_v15 = vor.u32 %v14327_v59, %v10663_v57  ;;  %3448 = vmatpush.bf16.msra.mxu0 %v10408_v9 }
  0x87   :  { %v11031_v0 = vld [vmem:[#allocation5 + $0xce0] sm:$0xf]  ;;  %v14419_v3 = vld [vmem:[#allocation5 + $0xcec] sm:$0xf0]  ;;  %v10792_v20 = vor.u32 %v14359_v63, %v10791_v62  ;;  %3462 = vmatpush.bf16.msra.mxu1 %v10536_v14 }
  0x88   :  { %v11159_v4 = vld [vmem:[#allocation5 + $0xde0] sm:$0xf]  ;;  %v14451_v5 = vld [vmem:[#allocation5 + $0xdec] sm:$0xf0]  ;;  %v11032_v21 = vor.u32 %v14419_v3, %v11031_v0  ;;  %3476 = vmatpush.bf16.msra.mxu2 %v10664_v15 }
  0x89   :  { %v11287_v6 = vld [vmem:[#allocation5 + $0xee0] sm:$0xf]  ;;  %v14483_v7 = vld [vmem:[#allocation5 + $0xeec] sm:$0xf0]  ;;  %v11160_v25 = vor.u32 %v14451_v5, %v11159_v4  ;;  %3490 = vmatpush.bf16.msra.mxu3 %v10792_v20 }
  0x8a   :  { %v11415_v8 = vld [vmem:[#allocation5 + $0xfe0] sm:$0xf]  ;;  %v14515_v11 = vld [vmem:[#allocation5 + $0xfec] sm:$0xf0]  ;;  %v11288_v26 = vor.u32 %v14483_v7, %v11287_v6  ;;  %3497 = vmatpush.bf16.msrb.mxu0 %v11032_v21  ;;  %3463 = vmatmul.bf16.vlgmr.msra.gmra.mxu1 %v15585_v36 }
  0x8b   :  { %v9351_v12 = vld [vmem:[#allocation2 + $0x20] sm:$0xf]  ;;  %v14415_v28 = vld [vmem:[#allocation5 + $0xccc] sm:$0xf0]  ;;  %v11416_v30 = vor.u32 %v14515_v11, %v11415_v8  ;;  %3511 = vmatpush.bf16.msrb.mxu1 %v11160_v25  ;;  %3477 = vmatmul.bf16.vlgmr.msra.gmra.mxu2 %v15583_v35 }
  0x8c   :  { %v14001_v13 = vld [vmem:[#allocation2 + $0x5c] sm:$0xf0]  ;;  %v14447_v32 = vld [vmem:[#allocation5 + $0xdcc] sm:$0xf0]  ;;  %3525 = vmatpush.bf16.msrb.mxu2 %v11288_v26  ;;  %3491 = vmatmul.bf16.vlgmr.msra.gmra.mxu3 %v15587_v40 }
  0x8d   :  { %v11015_v27 = vld [vmem:[#allocation5 + $0xcc0] sm:$0xf]  ;;  %v15581_v31 = vor.u32 %v14001_v13, %v9351_v12  ;;  %v14479_v34 = vld [vmem:[#allocation5 + $0xecc] sm:$0xf0]  ;;  %3539 = vmatpush.bf16.msrb.mxu3 %v11416_v30 }
  0x8e   :  { %v11143_v29 = vld [vmem:[#allocation5 + $0xdc0] sm:$0xf]  ;;  %v14511_v38 = vld [vmem:[#allocation5 + $0xfcc] sm:$0xf0]  ;;  %v11016_v41 = vor.u32 %v14415_v28, %v11015_v27 }
  0x8f   :  { %v11271_v33 = vld [vmem:[#allocation5 + $0xec0] sm:$0xf]  ;;  %v11144_v42 = vor.u32 %v14447_v32, %v11143_v29  ;;  %v14411_v48 = vld [vmem:[#allocation5 + $0xcac] sm:$0xf0]  ;;  %3449 = vmatmul.bf16.vlgmr.msra.gmra.mxu0 %v15581_v31 }
  0x90   :  { %v11399_v37 = vld [vmem:[#allocation5 + $0xfc0] sm:$0xf]  ;;  %v11272_v45 = vor.u32 %v14479_v34, %v11271_v33  ;;  %v14443_v51 = vld [vmem:[#allocation5 + $0xdac] sm:$0xf0]  ;;  %3498 = vmatpush.bf16.msrb.mxu0 %v11016_v41 }
  0x91   :  { %v10999_v46 = vld [vmem:[#allocation5 + $0xca0] sm:$0xf]  ;;  %v11400_v50 = vor.u32 %v14511_v38, %v11399_v37  ;;  %v14475_v53 = vld [vmem:[#allocation5 + $0xeac] sm:$0xf0]  ;;  %3512 = vmatpush.bf16.msrb.mxu1 %v11144_v42 }
  0x92   :  { %v11127_v49 = vld [vmem:[#allocation5 + $0xda0] sm:$0xf]  ;;  %v14507_v55 = vld [vmem:[#allocation5 + $0xfac] sm:$0xf0]  ;;  %v11000_v56 = vor.u32 %v14411_v48, %v10999_v46  ;;  %3526 = vmatpush.bf16.msrb.mxu2 %v11272_v45 }
  0x93   :  { %v11255_v52 = vld [vmem:[#allocation5 + $0xea0] sm:$0xf]  ;;  %v11128_v57 = vor.u32 %v14443_v51, %v11127_v49  ;;  %v14407_v61 = vld [vmem:[#allocation5 + $0xc8c] sm:$0xf0]  ;;  %3540 = vmatpush.bf16.msrb.mxu3 %v11400_v50 }
  0x94   :  { %v11383_v54 = vld [vmem:[#allocation5 + $0xfa0] sm:$0xf]  ;;  %v11256_v59 = vor.u32 %v14475_v53, %v11255_v52  ;;  %v14439_v0 = vld [vmem:[#allocation5 + $0xd8c] sm:$0xf0]  ;;  %3499 = vmatpush.bf16.msrb.mxu0 %v11000_v56 }
  0x95   :  { %v10983_v60 = vld [vmem:[#allocation5 + $0xc80] sm:$0xf]  ;;  %v11384_v63 = vor.u32 %v14507_v55, %v11383_v54  ;;  %v14471_v3 = vld [vmem:[#allocation5 + $0xe8c] sm:$0xf0]  ;;  %3513 = vmatpush.bf16.msrb.mxu1 %v11128_v57 }
  0x96   :  { %v11111_v62 = vld [vmem:[#allocation5 + $0xd80] sm:$0xf]  ;;  %v14503_v5 = vld [vmem:[#allocation5 + $0xf8c] sm:$0xf0]  ;;  %v10984_v6 = vor.u32 %v14407_v61, %v10983_v60  ;;  %3527 = vmatpush.bf16.msrb.mxu2 %v11256_v59 }
  0x97   :  { %v11239_v2 = vld [vmem:[#allocation5 + $0xe80] sm:$0xf]  ;;  %v11112_v7 = vor.u32 %v14439_v0, %v11111_v62  ;;  %v14403_v11 = vld [vmem:[#allocation5 + $0xc6c] sm:$0xf0]  ;;  %3541 = vmatpush.bf16.msrb.mxu3 %v11384_v63  ;;  %v14033_v0 = vld [vmem:[#allocation5 + $0xe4] sm:$0xf] }
  0x98   :  { %v11367_v4 = vld [vmem:[#allocation5 + $0xf80] sm:$0xf]  ;;  %v11240_v8 = vor.u32 %v14471_v3, %v11239_v2  ;;  %v14435_v14 = vld [vmem:[#allocation5 + $0xd6c] sm:$0xf0]  ;;  %3500 = vmatpush.bf16.msrb.mxu0 %v10984_v6  ;;  %v9497_v3 = vld [vmem:[#allocation5 + $0xf0] sm:$0xf0] }
  0x99   :  { %v10967_v9 = vld [vmem:[#allocation5 + $0xc60] sm:$0xf]  ;;  %v11368_v13 = vor.u32 %v14503_v5, %v11367_v4  ;;  %v14467_v16 = vld [vmem:[#allocation5 + $0xe6c] sm:$0xf0]  ;;  %3514 = vmatpush.bf16.msrb.mxu1 %v11112_v7  ;;  %v14065_v4 = vld [vmem:[#allocation5 + $0x1e4] sm:$0xf] }
  0x9a   :  { %v11095_v12 = vld [vmem:[#allocation5 + $0xd60] sm:$0xf]  ;;  %v14499_v19 = vld [vmem:[#allocation5 + $0xf6c] sm:$0xf0]  ;;  %v10968_v20 = vor.u32 %v14403_v11, %v10967_v9  ;;  %3528 = vmatpush.bf16.msrb.mxu2 %v11240_v8  ;;  %v9625_v5 = vld [vmem:[#allocation5 + $0x1f0] sm:$0xf0] }
  0x9b   :  { %v11223_v15 = vld [vmem:[#allocation5 + $0xe60] sm:$0xf]  ;;  %v11096_v21 = vor.u32 %v14435_v14, %v11095_v12  ;;  %v14399_v24 = vld [vmem:[#allocation5 + $0xc4c] sm:$0xf0]  ;;  %3542 = vmatpush.bf16.msrb.mxu3 %v11368_v13  ;;  %v14097_v6 = vld [vmem:[#allocation5 + $0x2e4] sm:$0xf] }
  0x9c   :  { %v11351_v18 = vld [vmem:[#allocation5 + $0xf60] sm:$0xf]  ;;  %v11224_v22 = vor.u32 %v14467_v16, %v11223_v15  ;;  %v14431_v27 = vld [vmem:[#allocation5 + $0xd4c] sm:$0xf0]  ;;  %3501 = vmatpush.bf16.msrb.mxu0 %v10968_v20  ;;  %v9753_v7 = vld [vmem:[#allocation5 + $0x2f0] sm:$0xf0] }
  0x9d   :  { %v10951_v23 = vld [vmem:[#allocation5 + $0xc40] sm:$0xf]  ;;  %v11352_v26 = vor.u32 %v14499_v19, %v11351_v18  ;;  %v14463_v29 = vld [vmem:[#allocation5 + $0xe4c] sm:$0xf0]  ;;  %3515 = vmatpush.bf16.msrb.mxu1 %v11096_v21  ;;  %v14129_v8 = vld [vmem:[#allocation5 + $0x3e4] sm:$0xf]  ;;  %v9500_v21 = vor.u32 %v14033_v0, %v9497_v3 }
  0x9e   :  { %v11079_v25 = vld [vmem:[#allocation5 + $0xd40] sm:$0xf]  ;;  %v14495_v32 = vld [vmem:[#allocation5 + $0xf4c] sm:$0xf0]  ;;  %v10952_v33 = vor.u32 %v14399_v24, %v10951_v23  ;;  %3529 = vmatpush.bf16.msrb.mxu2 %v11224_v22  ;;  %v9881_v11 = vld [vmem:[#allocation5 + $0x3f0] sm:$0xf0] }
  0x9f   :  { %v11207_v28 = vld [vmem:[#allocation5 + $0xe40] sm:$0xf]  ;;  %v11080_v37 = vor.u32 %v14431_v27, %v11079_v25  ;;  %v14395_v41 = vld [vmem:[#allocation5 + $0xc2c] sm:$0xf0]  ;;  %3543 = vmatpush.bf16.msrb.mxu3 %v11352_v26  ;;  %v9375_v16 = vld [vmem:[#allocation2 + $0x38] sm:$0xf]  ;;  %v9628_v25 = vor.u32 %v14065_v4, %v9625_v5  ;;  %v9756_v26 = vor.u32 %v14097_v6, %v9753_v7 }
  0xa0   :  { %v11335_v30 = vld [vmem:[#allocation5 + $0xf40] sm:$0xf]  ;;  %v11208_v38 = vor.u32 %v14463_v29, %v11207_v28  ;;  %v14427_v45 = vld [vmem:[#allocation5 + $0xd2c] sm:$0xf0]  ;;  %3502 = vmatpush.bf16.msrb.mxu0 %v10952_v33  ;;  %v14004_v18 = vld [vmem:[#allocation2 + $0x74] sm:$0xf0] }
  0xa1   :  { %v10935_v34 = vld [vmem:[#allocation5 + $0xc20] sm:$0xf]  ;;  %v11336_v46 = vor.u32 %v14495_v32, %v11335_v30  ;;  %v14459_v49 = vld [vmem:[#allocation5 + $0xe2c] sm:$0xf0]  ;;  %3516 = vmatpush.bf16.msrb.mxu1 %v11080_v37  ;;  %v13995_v19 = vld [vmem:[#allocation2 + $0x34] sm:$0xf]  ;;  %v9884_v30 = vor.u32 %v14129_v8, %v9881_v11 }
  0xa2   :  { %v11063_v42 = vld [vmem:[#allocation5 + $0xd20] sm:$0xf]  ;;  %v14491_v51 = vld [vmem:[#allocation5 + $0xf2c] sm:$0xf0]  ;;  %v10936_v54 = vor.u32 %v14395_v41, %v10935_v34  ;;  %3530 = vmatpush.bf16.msrb.mxu2 %v11208_v38  ;;  %v9369_v22 = vld [vmem:[#allocation2 + $0x70] sm:$0xf0]  ;;  %v15595_v38 = vor.u32 %v14004_v18, %v9375_v16 }
  0xa3   :  { %v11191_v48 = vld [vmem:[#allocation5 + $0xe20] sm:$0xf]  ;;  %v14391_v53 = vld [vmem:[#allocation5 + $0xc0c] sm:$0xf0]  ;;  %v11064_v60 = vor.u32 %v14427_v45, %v11063_v42  ;;  %3544 = vmatpush.bf16.msrb.mxu3 %v11336_v46  ;;  %v13996_v23 = vld [vmem:[#allocation2 + $0x3c] sm:$0xf]  ;;  %v15597_v41 = vor.u32 %v13995_v19, %v9369_v22 }
  0xa4   :  { %v11319_v50 = vld [vmem:[#allocation5 + $0xf20] sm:$0xf]  ;;  %v14423_v56 = vld [vmem:[#allocation5 + $0xd0c] sm:$0xf0]  ;;  %v11192_v61 = vor.u32 %v14459_v49, %v11191_v48  ;;  %3503 = vmatpush.bf16.msrb.mxu0 %v10936_v54  ;;  %v9377_v24 = vld [vmem:[#allocation2 + $0x78] sm:$0xf0] }
  0xa5   :  { %v10919_v52 = vld [vmem:[#allocation5 + $0xc00] sm:$0xf]  ;;  %v14455_v59 = vld [vmem:[#allocation5 + $0xe0c] sm:$0xf0]  ;;  %v11320_v2 = vor.u32 %v14491_v51, %v11319_v50  ;;  %3517 = vmatpush.bf16.msrb.mxu1 %v11064_v60  ;;  %v14029_v27 = vld [vmem:[#allocation5 + $0xc4] sm:$0xf]  ;;  %v15599_v46 = vor.u32 %v13996_v23, %v9377_v24 }
  0xa6   :  { %v11047_v55 = vld [vmem:[#allocation5 + $0xd00] sm:$0xf]  ;;  %v14487_v63 = vld [vmem:[#allocation5 + $0xf0c] sm:$0xf0]  ;;  %v10920_v9 = vor.u32 %v14391_v53, %v10919_v52  ;;  %3531 = vmatpush.bf16.msrb.mxu2 %v11192_v61  ;;  %v9481_v28 = vld [vmem:[#allocation5 + $0xd0] sm:$0xf0] }
  0xa7   :  { %v11175_v57 = vld [vmem:[#allocation5 + $0xe00] sm:$0xf]  ;;  %v9367_v12 = vld [vmem:[#allocation2 + $0x30] sm:$0xf]  ;;  %v11048_v14 = vor.u32 %v14423_v56, %v11047_v55  ;;  %3545 = vmatpush.bf16.msrb.mxu3 %v11320_v2  ;;  %v14061_v29 = vld [vmem:[#allocation5 + $0x1c4] sm:$0xf]  ;;  %v9484_v48 = vor.u32 %v14029_v27, %v9481_v28 }
  0xa8   :  { %v11303_v62 = vld [vmem:[#allocation5 + $0xf00] sm:$0xf]  ;;  %v14003_v13 = vld [vmem:[#allocation2 + $0x6c] sm:$0xf0]  ;;  %v11176_v15 = vor.u32 %v14455_v59, %v11175_v57  ;;  %3504 = vmatpush.bf16.msrb.mxu0 %v10920_v9  ;;  %v9609_v33 = vld [vmem:[#allocation5 + $0x1d0] sm:$0xf0] }
  0xa9   :  { %v11304_v20 = vor.u32 %v14487_v63, %v11303_v62  ;;  %v15593_v32 = vor.u32 %v14003_v13, %v9367_v12  ;;  %v14093_v34 = vld [vmem:[#allocation5 + $0x2c4] sm:$0xf]  ;;  %v9737_v37 = vld [vmem:[#allocation5 + $0x2d0] sm:$0xf0]  ;;  %3518 = vmatpush.bf16.msrb.mxu1 %v11048_v14  ;;  %v9612_v49 = vor.u32 %v14061_v29, %v9609_v33 }
  0xaa   :  { %3532 = vmatpush.bf16.msrb.mxu2 %v11176_v15  ;;  %v14125_v42 = vld [vmem:[#allocation5 + $0x3c4] sm:$0xf]  ;;  %v9865_v45 = vld [vmem:[#allocation5 + $0x3d0] sm:$0xf0]  ;;  %v9740_v50 = vor.u32 %v14093_v34, %v9737_v37 }
  0xab   :  { %3546 = vmatpush.bf16.msrb.mxu3 %v11304_v20  ;;  %v14025_v51 = vld [vmem:[#allocation5 + $0xa4] sm:$0xf]  ;;  %v9465_v52 = vld [vmem:[#allocation5 + $0xb0] sm:$0xf0]  ;;  %3505 = vmatmul.bf16.vlgmr.msrb.gmra.mxu0 %v15593_v32  ;;  %v9868_v54 = vor.u32 %v14125_v42, %v9865_v45 }
  0xac   :  { %3553 = vmatpush.bf16.msra.mxu0 %v9500_v21  ;;  %v14057_v53 = vld [vmem:[#allocation5 + $0x1a4] sm:$0xf]  ;;  %v9593_v55 = vld [vmem:[#allocation5 + $0x1b0] sm:$0xf0]  ;;  %3519 = vmatmul.bf16.vlgmr.msrb.gmra.mxu1 %v15597_v41  ;;  %v9468_v61 = vor.u32 %v14025_v51, %v9465_v52 }
  0xad   :  { %3567 = vmatpush.bf16.msra.mxu1 %v9628_v25  ;;  %v14089_v56 = vld [vmem:[#allocation5 + $0x2a4] sm:$0xf]  ;;  %v9721_v57 = vld [vmem:[#allocation5 + $0x2b0] sm:$0xf0]  ;;  %3533 = vmatmul.bf16.vlgmr.msrb.gmra.mxu2 %v15595_v38  ;;  %v9596_v62 = vor.u32 %v14057_v53, %v9593_v55 }
  0xae   :  { %3581 = vmatpush.bf16.msra.mxu2 %v9756_v26  ;;  %v14121_v59 = vld [vmem:[#allocation5 + $0x3a4] sm:$0xf]  ;;  %v9849_v60 = vld [vmem:[#allocation5 + $0x3b0] sm:$0xf0]  ;;  %3547 = vmatmul.bf16.vlgmr.msrb.gmra.mxu3 %v15599_v46  ;;  %v9724_v63 = vor.u32 %v14089_v56, %v9721_v57 }
  0xaf   :  { %3595 = vmatpush.bf16.msra.mxu3 %v9884_v30  ;;  %v14021_v0 = vld [vmem:[#allocation5 + $0x84] sm:$0xf]  ;;  %v9449_v2 = vld [vmem:[#allocation5 + $0x90] sm:$0xf0]  ;;  %v9852_v4 = vor.u32 %v14121_v59, %v9849_v60 }
  0xb0   :  { %3554 = vmatpush.bf16.msra.mxu0 %v9484_v48  ;;  %v14053_v3 = vld [vmem:[#allocation5 + $0x184] sm:$0xf]  ;;  %v9577_v5 = vld [vmem:[#allocation5 + $0x190] sm:$0xf0]  ;;  %v9452_v11 = vor.u32 %v14021_v0, %v9449_v2 }
  0xb1   :  { %3568 = vmatpush.bf16.msra.mxu1 %v9612_v49  ;;  %v14085_v6 = vld [vmem:[#allocation5 + $0x284] sm:$0xf]  ;;  %v9705_v7 = vld [vmem:[#allocation5 + $0x290] sm:$0xf0]  ;;  %v9580_v12 = vor.u32 %v14053_v3, %v9577_v5 }
  0xb2   :  { %3582 = vmatpush.bf16.msra.mxu2 %v9740_v50  ;;  %v14117_v8 = vld [vmem:[#allocation5 + $0x384] sm:$0xf]  ;;  %v9833_v9 = vld [vmem:[#allocation5 + $0x390] sm:$0xf0]  ;;  %v9708_v13 = vor.u32 %v14085_v6, %v9705_v7 }
  0xb3   :  { %3596 = vmatpush.bf16.msra.mxu3 %v9868_v54  ;;  %v14017_v14 = vld [vmem:[#allocation5 + $0x64] sm:$0xf]  ;;  %v9433_v15 = vld [vmem:[#allocation5 + $0x70] sm:$0xf0]  ;;  %v9836_v18 = vor.u32 %v14117_v8, %v9833_v9 }
  0xb4   :  { %3555 = vmatpush.bf16.msra.mxu0 %v9468_v61  ;;  %v14049_v16 = vld [vmem:[#allocation5 + $0x164] sm:$0xf]  ;;  %v9561_v19 = vld [vmem:[#allocation5 + $0x170] sm:$0xf0]  ;;  %v9436_v24 = vor.u32 %v14017_v14, %v9433_v15 }
  0xb5   :  { %3569 = vmatpush.bf16.msra.mxu1 %v9596_v62  ;;  %v14081_v20 = vld [vmem:[#allocation5 + $0x264] sm:$0xf]  ;;  %v9689_v21 = vld [vmem:[#allocation5 + $0x270] sm:$0xf0]  ;;  %v9564_v25 = vor.u32 %v14049_v16, %v9561_v19 }
  0xb6   :  { %3583 = vmatpush.bf16.msra.mxu2 %v9724_v63  ;;  %v14113_v22 = vld [vmem:[#allocation5 + $0x364] sm:$0xf]  ;;  %v9817_v23 = vld [vmem:[#allocation5 + $0x370] sm:$0xf0]  ;;  %v9692_v26 = vor.u32 %v14081_v20, %v9689_v21 }
  0xb7   :  { %3597 = vmatpush.bf16.msra.mxu3 %v9852_v4  ;;  %v14013_v27 = vld [vmem:[#allocation5 + $0x44] sm:$0xf]  ;;  %v9417_v28 = vld [vmem:[#allocation5 + $0x50] sm:$0xf0]  ;;  %v9820_v30 = vor.u32 %v14113_v22, %v9817_v23 }
  0xb8   :  { %3556 = vmatpush.bf16.msra.mxu0 %v9452_v11  ;;  %v14045_v29 = vld [vmem:[#allocation5 + $0x144] sm:$0xf]  ;;  %v9545_v33 = vld [vmem:[#allocation5 + $0x150] sm:$0xf0]  ;;  %v9420_v48 = vor.u32 %v14013_v27, %v9417_v28 }
  0xb9   :  { %3570 = vmatpush.bf16.msra.mxu1 %v9580_v12  ;;  %v14077_v34 = vld [vmem:[#allocation5 + $0x244] sm:$0xf]  ;;  %v9673_v37 = vld [vmem:[#allocation5 + $0x250] sm:$0xf0]  ;;  %v9548_v49 = vor.u32 %v14045_v29, %v9545_v33 }
  0xba   :  { %3584 = vmatpush.bf16.msra.mxu2 %v9708_v13  ;;  %v14109_v42 = vld [vmem:[#allocation5 + $0x344] sm:$0xf]  ;;  %v9801_v45 = vld [vmem:[#allocation5 + $0x350] sm:$0xf0]  ;;  %v9676_v50 = vor.u32 %v14077_v34, %v9673_v37 }
  0xbb   :  { %3598 = vmatpush.bf16.msra.mxu3 %v9836_v18  ;;  %v14009_v51 = vld [vmem:[#allocation5 + $0x24] sm:$0xf]  ;;  %v9401_v52 = vld [vmem:[#allocation5 + $0x30] sm:$0xf0]  ;;  %v9804_v54 = vor.u32 %v14109_v42, %v9801_v45 }
  0xbc   :  { %3557 = vmatpush.bf16.msra.mxu0 %v9436_v24  ;;  %v14041_v53 = vld [vmem:[#allocation5 + $0x124] sm:$0xf]  ;;  %v9529_v55 = vld [vmem:[#allocation5 + $0x130] sm:$0xf0]  ;;  %v9404_v61 = vor.u32 %v14009_v51, %v9401_v52 }
  0xbd   :  { %3571 = vmatpush.bf16.msra.mxu1 %v9564_v25  ;;  %v14073_v56 = vld [vmem:[#allocation5 + $0x224] sm:$0xf]  ;;  %v9657_v57 = vld [vmem:[#allocation5 + $0x230] sm:$0xf0]  ;;  %v9532_v0 = vor.u32 %v14041_v53, %v9529_v55 }
  0xbe   :  { %3585 = vmatpush.bf16.msra.mxu2 %v9692_v26  ;;  %v14105_v59 = vld [vmem:[#allocation5 + $0x324] sm:$0xf]  ;;  %v9785_v60 = vld [vmem:[#allocation5 + $0x330] sm:$0xf0]  ;;  %v9660_v2 = vor.u32 %v14073_v56, %v9657_v57 }
  0xbf   :  { %3599 = vmatpush.bf16.msra.mxu3 %v9820_v30  ;;  %v14005_v62 = vld [vmem:[#allocation5 + $0x4] sm:$0xf]  ;;  %v9385_v63 = vld [vmem:[#allocation5 + $0x10] sm:$0xf0]  ;;  %v9788_v6 = vor.u32 %v14105_v59, %v9785_v60 }
  0xc0   :  { %3558 = vmatpush.bf16.msra.mxu0 %v9420_v48  ;;  %v14037_v3 = vld [vmem:[#allocation5 + $0x104] sm:$0xf]  ;;  %v9513_v4 = vld [vmem:[#allocation5 + $0x110] sm:$0xf0]  ;;  %v9388_v14 = vor.u32 %v14005_v62, %v9385_v63 }
  0xc1   :  { %3572 = vmatpush.bf16.msra.mxu1 %v9548_v49  ;;  %v14069_v5 = vld [vmem:[#allocation5 + $0x204] sm:$0xf]  ;;  %v9641_v7 = vld [vmem:[#allocation5 + $0x210] sm:$0xf0]  ;;  %v9516_v19 = vor.u32 %v14037_v3, %v9513_v4 }
  0xc2   :  { %3586 = vmatpush.bf16.msra.mxu2 %v9676_v50  ;;  %v14101_v8 = vld [vmem:[#allocation5 + $0x304] sm:$0xf]  ;;  %v9769_v9 = vld [vmem:[#allocation5 + $0x310] sm:$0xf0]  ;;  %v9644_v20 = vor.u32 %v14069_v5, %v9641_v7 }
  0xc3   :  { %3600 = vmatpush.bf16.msra.mxu3 %v9804_v54  ;;  %v14161_v11 = vld [vmem:[#allocation5 + $0x4e4] sm:$0xf]  ;;  %v10009_v12 = vld [vmem:[#allocation5 + $0x4f0] sm:$0xf0]  ;;  %v9772_v23 = vor.u32 %v14101_v8, %v9769_v9  ;;  %v15605_v54 = vld [vmem:[#allocation7] sm:$0xf] }
  0xc4   :  { %v14193_v13 = vld [vmem:[#allocation5 + $0x5e4] sm:$0xf]  ;;  %3559 = vmatpush.bf16.msra.mxu0 %v9404_v61  ;;  %v10137_v15 = vld [vmem:[#allocation5 + $0x5f0] sm:$0xf0]  ;;  %v10012_v24 = vor.u32 %v14161_v11, %v10009_v12  ;;  %v16198_v63 = vperm.slane %v15605_v54, 0 }
  0xc5   :  { %v14225_v16 = vld [vmem:[#allocation5 + $0x6e4] sm:$0xf]  ;;  %v10265_v18 = vld [vmem:[#allocation5 + $0x6f0] sm:$0xf0]  ;;  %3573 = vmatpush.bf16.msra.mxu1 %v9532_v0  ;;  %v10140_v25 = vor.u32 %v14193_v13, %v10137_v15 }
  0xc6   :  { %3587 = vmatpush.bf16.msra.mxu2 %v9660_v2  ;;  %v14257_v21 = vld [vmem:[#allocation5 + $0x7e4] sm:$0xf]  ;;  %v10393_v22 = vld [vmem:[#allocation5 + $0x7f0] sm:$0xf0]  ;;  %v10268_v26 = vor.u32 %v14225_v16, %v10265_v18 }
  0xc7   :  { %3601 = vmatpush.bf16.msra.mxu3 %v9788_v6  ;;  %v14157_v27 = vld [vmem:[#allocation5 + $0x4c4] sm:$0xf]  ;;  %v9993_v28 = vld [vmem:[#allocation5 + $0x4d0] sm:$0xf0]  ;;  %v10396_v30 = vor.u32 %v14257_v21, %v10393_v22 }
  0xc8   :  { %v14189_v29 = vld [vmem:[#allocation5 + $0x5c4] sm:$0xf]  ;;  %3560 = vmatpush.bf16.msra.mxu0 %v9388_v14  ;;  %v10121_v33 = vld [vmem:[#allocation5 + $0x5d0] sm:$0xf0]  ;;  %v9996_v48 = vor.u32 %v14157_v27, %v9993_v28  ;;  %v3352_v28 = vpop.f32.mrf.mxu1 }
  0xc9   :  { %v14221_v34 = vld [vmem:[#allocation5 + $0x6c4] sm:$0xf]  ;;  %v10249_v37 = vld [vmem:[#allocation5 + $0x6d0] sm:$0xf0]  ;;  %3574 = vmatpush.bf16.msra.mxu1 %v9516_v19  ;;  %v10124_v50 = vor.u32 %v14189_v29, %v10121_v33 }
  0xca   :  { %3588 = vmatpush.bf16.msra.mxu2 %v9644_v20  ;;  %v14253_v42 = vld [vmem:[#allocation5 + $0x7c4] sm:$0xf]  ;;  %v10377_v45 = vld [vmem:[#allocation5 + $0x7d0] sm:$0xf0]  ;;  %v10252_v51 = vor.u32 %v14221_v34, %v10249_v37 }
  0xcb   :  { %3602 = vmatpush.bf16.msra.mxu3 %v9772_v23  ;;  %v14153_v49 = vld [vmem:[#allocation5 + $0x4a4] sm:$0xf]  ;;  %v9977_v52 = vld [vmem:[#allocation5 + $0x4b0] sm:$0xf0]  ;;  %v10380_v55 = vor.u32 %v14253_v42, %v10377_v45  ;;  %3561 = vmatmul.bf16.vlgmr.msra.gmra.mxu0 %v15557_v58 }
  0xcc   :  { %3609 = vmatpush.bf16.msrb.mxu0 %v10012_v24  ;;  %v14185_v53 = vld [vmem:[#allocation5 + $0x5a4] sm:$0xf]  ;;  %v10105_v56 = vld [vmem:[#allocation5 + $0x5b0] sm:$0xf0]  ;;  %3575 = vmatmul.bf16.vlgmr.msra.gmra.mxu1 %v15563_v10  ;;  %v9980_v62 = vor.u32 %v14153_v49, %v9977_v52  ;;  %v3366_v52 = vpop.f32.mrf.mxu2 }
  0xcd   :  { %3623 = vmatpush.bf16.msrb.mxu1 %v10140_v25  ;;  %v14217_v57 = vld [vmem:[#allocation5 + $0x6a4] sm:$0xf]  ;;  %v10233_v59 = vld [vmem:[#allocation5 + $0x6b0] sm:$0xf0]  ;;  %3589 = vmatmul.bf16.vlgmr.msra.gmra.mxu2 %v15559_v1  ;;  %v10108_v0 = vor.u32 %v14185_v53, %v10105_v56 }
  0xce   :  { %3637 = vmatpush.bf16.msrb.mxu2 %v10268_v26  ;;  %v14249_v60 = vld [vmem:[#allocation5 + $0x7a4] sm:$0xf]  ;;  %v10361_v61 = vld [vmem:[#allocation5 + $0x7b0] sm:$0xf0]  ;;  %3603 = vmatmul.bf16.vlgmr.msra.gmra.mxu3 %v15565_v17  ;;  %v10236_v2 = vor.u32 %v14217_v57, %v10233_v59  ;;  %v3338_v13 = vpop.f32.mrf.mxu0 }
  0xcf   :  { %3651 = vmatpush.bf16.msrb.mxu3 %v10396_v30  ;;  %v14149_v3 = vld [vmem:[#allocation5 + $0x484] sm:$0xf]  ;;  %v9961_v4 = vld [vmem:[#allocation5 + $0x490] sm:$0xf0]  ;;  %v10364_v6 = vor.u32 %v14249_v60, %v10361_v61  ;;  %v3339_v15 = vadd.f32 %v3338_v13, %v16198_v63  ;;  %v14328_v63 = vld [vmem:[#allocation5 + $0xa14] sm:$0xf0] }
  0xd0   :  { %3610 = vmatpush.bf16.msrb.mxu0 %v9996_v48  ;;  %v14181_v5 = vld [vmem:[#allocation5 + $0x584] sm:$0xf]  ;;  %v10089_v7 = vld [vmem:[#allocation5 + $0x590] sm:$0xf0]  ;;  %v9964_v14 = vor.u32 %v14149_v3, %v9961_v4 }
  0xd1   :  { %3624 = vmatpush.bf16.msrb.mxu1 %v10124_v50  ;;  %v14213_v8 = vld [vmem:[#allocation5 + $0x684] sm:$0xf]  ;;  %v10217_v9 = vld [vmem:[#allocation5 + $0x690] sm:$0xf0]  ;;  %v10092_v16 = vor.u32 %v14181_v5, %v10089_v7  ;;  %v3353_v30 = vadd.f32 %v3352_v28, %v3339_v15 }
  0xd2   :  { %3638 = vmatpush.bf16.msrb.mxu2 %v10252_v51  ;;  %v14245_v11 = vld [vmem:[#allocation5 + $0x784] sm:$0xf]  ;;  %v10345_v12 = vld [vmem:[#allocation5 + $0x790] sm:$0xf0]  ;;  %v10220_v18 = vor.u32 %v14213_v8, %v10217_v9 }
  0xd3   :  { %3652 = vmatpush.bf16.msrb.mxu3 %v10380_v55  ;;  %v14145_v19 = vld [vmem:[#allocation5 + $0x464] sm:$0xf]  ;;  %v9945_v20 = vld [vmem:[#allocation5 + $0x470] sm:$0xf0]  ;;  %v10348_v22 = vor.u32 %v14245_v11, %v10345_v12  ;;  %v3367_v56 = vadd.f32 %v3366_v52, %v3353_v30 }
  0xd4   :  { %3611 = vmatpush.bf16.msrb.mxu0 %v9980_v62  ;;  %v14177_v21 = vld [vmem:[#allocation5 + $0x564] sm:$0xf]  ;;  %v10073_v23 = vld [vmem:[#allocation5 + $0x570] sm:$0xf0]  ;;  %v9948_v29 = vor.u32 %v14145_v19, %v9945_v20 }
  0xd5   :  { %3625 = vmatpush.bf16.msrb.mxu1 %v10108_v0  ;;  %v14209_v24 = vld [vmem:[#allocation5 + $0x664] sm:$0xf]  ;;  %v10201_v25 = vld [vmem:[#allocation5 + $0x670] sm:$0xf0]  ;;  %v10076_v33 = vor.u32 %v14177_v21, %v10073_v23 }
  0xd6   :  { %3639 = vmatpush.bf16.msrb.mxu2 %v10236_v2  ;;  %v14241_v26 = vld [vmem:[#allocation5 + $0x764] sm:$0xf]  ;;  %v10329_v27 = vld [vmem:[#allocation5 + $0x770] sm:$0xf0]  ;;  %v10204_v34 = vor.u32 %v14209_v24, %v10201_v25 }
  0xd7   :  { %3653 = vmatpush.bf16.msrb.mxu3 %v10364_v6  ;;  %v14141_v37 = vld [vmem:[#allocation5 + $0x444] sm:$0xf]  ;;  %v9929_v42 = vld [vmem:[#allocation5 + $0x450] sm:$0xf0]  ;;  %v10332_v48 = vor.u32 %v14241_v26, %v10329_v27  ;;  %v3380_v6 = vpop.f32.mrf.mxu3 }
  0xd8   :  { %3612 = vmatpush.bf16.msrb.mxu0 %v9964_v14  ;;  %v14173_v45 = vld [vmem:[#allocation5 + $0x544] sm:$0xf]  ;;  %v10057_v49 = vld [vmem:[#allocation5 + $0x550] sm:$0xf0]  ;;  %v9932_v57 = vor.u32 %v14141_v37, %v9929_v42  ;;  %v15614_v9 = vadd.f32 %v3380_v6, %v3367_v56 }
  0xd9   :  { %3626 = vmatpush.bf16.msrb.mxu1 %v10092_v16  ;;  %v14205_v50 = vld [vmem:[#allocation5 + $0x644] sm:$0xf]  ;;  %v10185_v51 = vld [vmem:[#allocation5 + $0x650] sm:$0xf0]  ;;  %v10060_v59 = vor.u32 %v14173_v45, %v10057_v49 }
  0xda   :  { %3640 = vmatpush.bf16.msrb.mxu2 %v10220_v18  ;;  %v14237_v53 = vld [vmem:[#allocation5 + $0x744] sm:$0xf]  ;;  %v10313_v55 = vld [vmem:[#allocation5 + $0x750] sm:$0xf0]  ;;  %v10188_v60 = vor.u32 %v14205_v50, %v10185_v51  ;;  %v15616_v51 = vpop.f32.mrf.mxu0 }
  0xdb   :  { %3654 = vmatpush.bf16.msrb.mxu3 %v10348_v22  ;;  %v14137_v61 = vld [vmem:[#allocation5 + $0x424] sm:$0xf]  ;;  %v9913_v62 = vld [vmem:[#allocation5 + $0x430] sm:$0xf0]  ;;  %v10316_v2 = vor.u32 %v14237_v53, %v10313_v55 }
  0xdc   :  { %3613 = vmatpush.bf16.msrb.mxu0 %v9948_v29  ;;  %v14169_v0 = vld [vmem:[#allocation5 + $0x524] sm:$0xf]  ;;  %v10041_v3 = vld [vmem:[#allocation5 + $0x530] sm:$0xf0]  ;;  %v9916_v11 = vor.u32 %v14137_v61, %v9913_v62 }
  0xdd   :  { %3627 = vmatpush.bf16.msrb.mxu1 %v10076_v33  ;;  %v14201_v4 = vld [vmem:[#allocation5 + $0x624] sm:$0xf]  ;;  %v10169_v5 = vld [vmem:[#allocation5 + $0x630] sm:$0xf0]  ;;  %v10044_v14 = vor.u32 %v14169_v0, %v10041_v3  ;;  %v15618_v0 = vpop.f32.mrf.mxu1 }
  0xde   :  { %3641 = vmatpush.bf16.msrb.mxu2 %v10204_v34  ;;  %v14233_v7 = vld [vmem:[#allocation5 + $0x724] sm:$0xf]  ;;  %v10297_v8 = vld [vmem:[#allocation5 + $0x730] sm:$0xf0]  ;;  %v10172_v15 = vor.u32 %v14201_v4, %v10169_v5 }
  0xdf   :  { %3655 = vmatpush.bf16.msrb.mxu3 %v10332_v48  ;;  %v14133_v12 = vld [vmem:[#allocation5 + $0x404] sm:$0xf]  ;;  %v9897_v13 = vld [vmem:[#allocation5 + $0x410] sm:$0xf0]  ;;  %v10300_v20 = vor.u32 %v14233_v7, %v10297_v8 }
  0xe0   :  { %3614 = vmatpush.bf16.msrb.mxu0 %v9932_v57  ;;  %v14165_v16 = vld [vmem:[#allocation5 + $0x504] sm:$0xf]  ;;  %v10025_v18 = vld [vmem:[#allocation5 + $0x510] sm:$0xf0]  ;;  %v9900_v27 = vor.u32 %v14133_v12, %v9897_v13 }
  0xe1   :  { %3628 = vmatpush.bf16.msrb.mxu1 %v10060_v59  ;;  %v14197_v19 = vld [vmem:[#allocation5 + $0x604] sm:$0xf]  ;;  %v10153_v21 = vld [vmem:[#allocation5 + $0x610] sm:$0xf0]  ;;  %v10028_v33 = vor.u32 %v14165_v16, %v10025_v18  ;;  %v15624_v18 = vpop.f32.mrf.mxu2 }
  0xe2   :  { %3642 = vmatpush.bf16.msrb.mxu2 %v10188_v60  ;;  %v14229_v22 = vld [vmem:[#allocation5 + $0x704] sm:$0xf]  ;;  %v10281_v23 = vld [vmem:[#allocation5 + $0x710] sm:$0xf0]  ;;  %v10156_v34 = vor.u32 %v14197_v19, %v10153_v21 }
  0xe3   :  { %3656 = vmatpush.bf16.msrb.mxu3 %v10316_v2  ;;  %v14289_v24 = vld [vmem:[#allocation5 + $0x8e4] sm:$0xf]  ;;  %v10521_v25 = vld [vmem:[#allocation5 + $0x8f0] sm:$0xf0]  ;;  %v10284_v45 = vor.u32 %v14229_v22, %v10281_v23 }
  0xe4   :  { %v14321_v26 = vld [vmem:[#allocation5 + $0x9e4] sm:$0xf]  ;;  %3615 = vmatpush.bf16.msrb.mxu0 %v9916_v11  ;;  %v10649_v28 = vld [vmem:[#allocation5 + $0x9f0] sm:$0xf0]  ;;  %v10524_v48 = vor.u32 %v14289_v24, %v10521_v25  ;;  %v15626_v25 = vpop.f32.mrf.mxu3 }
  0xe5   :  { %v14353_v29 = vld [vmem:[#allocation5 + $0xae4] sm:$0xf]  ;;  %v10777_v30 = vld [vmem:[#allocation5 + $0xaf0] sm:$0xf0]  ;;  %3629 = vmatpush.bf16.msrb.mxu1 %v10044_v14  ;;  %v10652_v49 = vor.u32 %v14321_v26, %v10649_v28 }
  0xe6   :  { %3643 = vmatpush.bf16.msrb.mxu2 %v10172_v15  ;;  %v14385_v37 = vld [vmem:[#allocation5 + $0xbe4] sm:$0xf]  ;;  %v10905_v42 = vld [vmem:[#allocation5 + $0xbf0] sm:$0xf0]  ;;  %v10780_v50 = vor.u32 %v14353_v29, %v10777_v30 }
  0xe7   :  { %3657 = vmatpush.bf16.msrb.mxu3 %v10300_v20  ;;  %v14285_v52 = vld [vmem:[#allocation5 + $0x8c4] sm:$0xf]  ;;  %v10505_v53 = vld [vmem:[#allocation5 + $0x8d0] sm:$0xf0]  ;;  %v10908_v56 = vor.u32 %v14385_v37, %v10905_v42 }
  0xe8   :  { %v14317_v55 = vld [vmem:[#allocation5 + $0x9c4] sm:$0xf]  ;;  %3616 = vmatpush.bf16.msrb.mxu0 %v9900_v27  ;;  %v10633_v57 = vld [vmem:[#allocation5 + $0x9d0] sm:$0xf0]  ;;  %v10508_v2 = vor.u32 %v14285_v52, %v10505_v53 }
  0xe9   :  { %v14349_v59 = vld [vmem:[#allocation5 + $0xac4] sm:$0xf]  ;;  %v10761_v60 = vld [vmem:[#allocation5 + $0xad0] sm:$0xf0]  ;;  %3630 = vmatpush.bf16.msrb.mxu1 %v10028_v33  ;;  %v10636_v3 = vor.u32 %v14317_v55, %v10633_v57 }
  0xea   :  { %3644 = vmatpush.bf16.msrb.mxu2 %v10156_v34  ;;  %v14381_v61 = vld [vmem:[#allocation5 + $0xbc4] sm:$0xf]  ;;  %v10889_v62 = vld [vmem:[#allocation5 + $0xbd0] sm:$0xf0]  ;;  %v10764_v4 = vor.u32 %v14349_v59, %v10761_v60  ;;  %v3394_v29 = vpop.f32.mrf.mxu0 }
  0xeb   :  { %3658 = vmatpush.bf16.msrb.mxu3 %v10284_v45  ;;  %v14281_v5 = vld [vmem:[#allocation5 + $0x8a4] sm:$0xf]  ;;  %v10489_v6 = vld [vmem:[#allocation5 + $0x8b0] sm:$0xf0]  ;;  %3617 = vmatmul.bf16.vlgmr.msrb.gmra.mxu0 %v15569_v39  ;;  %v10892_v8 = vor.u32 %v14381_v61, %v10889_v62  ;;  %v3395_v34 = vadd.f32 %v3394_v29, %v15614_v9 }
  0xec   :  { %3665 = vmatpush.bf16.msra.mxu0 %v10524_v48  ;;  %v14313_v7 = vld [vmem:[#allocation5 + $0x9a4] sm:$0xf]  ;;  %v10617_v11 = vld [vmem:[#allocation5 + $0x9b0] sm:$0xf0]  ;;  %3631 = vmatmul.bf16.vlgmr.msrb.gmra.mxu1 %v15573_v44  ;;  %v10492_v16 = vor.u32 %v14281_v5, %v10489_v6  ;;  %v3408_v48 = vpop.f32.mrf.mxu1 }
  0xed   :  { %3679 = vmatpush.bf16.msra.mxu1 %v10652_v49  ;;  %v14345_v12 = vld [vmem:[#allocation5 + $0xaa4] sm:$0xf]  ;;  %v10745_v13 = vld [vmem:[#allocation5 + $0xab0] sm:$0xf0]  ;;  %3645 = vmatmul.bf16.vlgmr.msrb.gmra.mxu2 %v15571_v43  ;;  %v10620_v19 = vor.u32 %v14313_v7, %v10617_v11  ;;  %v3409_v55 = vadd.f32 %v3408_v48, %v3395_v34 }
  0xee   :  { %3693 = vmatpush.bf16.msra.mxu2 %v10780_v50  ;;  %v14377_v14 = vld [vmem:[#allocation5 + $0xba4] sm:$0xf]  ;;  %v10873_v15 = vld [vmem:[#allocation5 + $0xbb0] sm:$0xf0]  ;;  %3659 = vmatmul.bf16.vlgmr.msrb.gmra.mxu3 %v15575_v47  ;;  %v10748_v20 = vor.u32 %v14345_v12, %v10745_v13  ;;  %v3422_v7 = vpop.f32.mrf.mxu2 }
  0xef   :  { %3707 = vmatpush.bf16.msra.mxu3 %v10908_v56  ;;  %v14277_v21 = vld [vmem:[#allocation5 + $0x884] sm:$0xf]  ;;  %v10473_v22 = vld [vmem:[#allocation5 + $0x890] sm:$0xf0]  ;;  %v10876_v24 = vor.u32 %v14377_v14, %v10873_v15  ;;  %v3423_v13 = vadd.f32 %v3422_v7, %v3409_v55 }
  0xf0   :  { %3666 = vmatpush.bf16.msra.mxu0 %v10508_v2  ;;  %v14309_v23 = vld [vmem:[#allocation5 + $0x984] sm:$0xf]  ;;  %v10601_v26 = vld [vmem:[#allocation5 + $0x990] sm:$0xf0]  ;;  %v10476_v37 = vor.u32 %v14277_v21, %v10473_v22 }
  0xf1   :  { %3680 = vmatpush.bf16.msra.mxu1 %v10636_v3  ;;  %v14341_v27 = vld [vmem:[#allocation5 + $0xa84] sm:$0xf]  ;;  %v10729_v28 = vld [vmem:[#allocation5 + $0xa90] sm:$0xf0]  ;;  %v10604_v42 = vor.u32 %v14309_v23, %v10601_v26 }
  0xf2   :  { %3694 = vmatpush.bf16.msra.mxu2 %v10764_v4  ;;  %v14373_v30 = vld [vmem:[#allocation5 + $0xb84] sm:$0xf]  ;;  %v10857_v33 = vld [vmem:[#allocation5 + $0xb90] sm:$0xf0]  ;;  %v10732_v45 = vor.u32 %v14341_v27, %v10729_v28 }
  0xf3   :  { %3708 = vmatpush.bf16.msra.mxu3 %v10892_v8  ;;  %v14273_v49 = vld [vmem:[#allocation5 + $0x864] sm:$0xf]  ;;  %v10457_v50 = vld [vmem:[#allocation5 + $0x870] sm:$0xf0]  ;;  %v10860_v53 = vor.u32 %v14373_v30, %v10857_v33 }
  0xf4   :  { %3667 = vmatpush.bf16.msra.mxu0 %v10492_v16  ;;  %v14305_v52 = vld [vmem:[#allocation5 + $0x964] sm:$0xf]  ;;  %v10585_v56 = vld [vmem:[#allocation5 + $0x970] sm:$0xf0]  ;;  %v10460_v62 = vor.u32 %v14273_v49, %v10457_v50  ;;  %v3436_v16 = vpop.f32.mrf.mxu3 }
  0xf5   :  { %3681 = vmatpush.bf16.msra.mxu1 %v10620_v19  ;;  %v14337_v57 = vld [vmem:[#allocation5 + $0xa64] sm:$0xf]  ;;  %v10713_v59 = vld [vmem:[#allocation5 + $0xa70] sm:$0xf0]  ;;  %v10588_v9 = vor.u32 %v14305_v52, %v10585_v56 }
  0xf6   :  { %3695 = vmatpush.bf16.msra.mxu2 %v10748_v20  ;;  %v14369_v60 = vld [vmem:[#allocation5 + $0xb64] sm:$0xf]  ;;  %v10841_v61 = vld [vmem:[#allocation5 + $0xb70] sm:$0xf0]  ;;  %v10716_v2 = vor.u32 %v14337_v57, %v10713_v59  ;;  %v15629_v20 = vadd.f32 %v3436_v16, %v3423_v13 }
  0xf7   :  { %3709 = vmatpush.bf16.msra.mxu3 %v10876_v24  ;;  %v14269_v3 = vld [vmem:[#allocation5 + $0x844] sm:$0xf]  ;;  %v10441_v4 = vld [vmem:[#allocation5 + $0x850] sm:$0xf0]  ;;  %v10844_v6 = vor.u32 %v14369_v60, %v10841_v61 }
  0xf8   :  { %3668 = vmatpush.bf16.msra.mxu0 %v10476_v37  ;;  %v14301_v5 = vld [vmem:[#allocation5 + $0x944] sm:$0xf]  ;;  %v10569_v8 = vld [vmem:[#allocation5 + $0x950] sm:$0xf0]  ;;  %v10444_v19 = vor.u32 %v14269_v3, %v10441_v4 }
  0xf9   :  { %3682 = vmatpush.bf16.msra.mxu1 %v10604_v42  ;;  %v14333_v11 = vld [vmem:[#allocation5 + $0xa44] sm:$0xf]  ;;  %v10697_v12 = vld [vmem:[#allocation5 + $0xa50] sm:$0xf0]  ;;  %v10572_v21 = vor.u32 %v14301_v5, %v10569_v8 }
  0xfa   :  { %3696 = vmatpush.bf16.msra.mxu2 %v10732_v45  ;;  %v14365_v14 = vld [vmem:[#allocation5 + $0xb44] sm:$0xf]  ;;  %v10825_v15 = vld [vmem:[#allocation5 + $0xb50] sm:$0xf0]  ;;  %v10700_v22 = vor.u32 %v14333_v11, %v10697_v12 }
  0xfb   :  { %3710 = vmatpush.bf16.msra.mxu3 %v10860_v53  ;;  %v14265_v23 = vld [vmem:[#allocation5 + $0x824] sm:$0xf]  ;;  %v10425_v24 = vld [vmem:[#allocation5 + $0x830] sm:$0xf0]  ;;  %v10828_v27 = vor.u32 %v14365_v14, %v10825_v15 }
  0xfc   :  { %3669 = vmatpush.bf16.msra.mxu0 %v10460_v62  ;;  %v14297_v26 = vld [vmem:[#allocation5 + $0x924] sm:$0xf]  ;;  %v10553_v28 = vld [vmem:[#allocation5 + $0x930] sm:$0xf0]  ;;  %v10428_v37 = vor.u32 %v14265_v23, %v10425_v24 }
  0xfd   :  { %3683 = vmatpush.bf16.msra.mxu1 %v10588_v9  ;;  %v14329_v29 = vld [vmem:[#allocation5 + $0xa24] sm:$0xf]  ;;  %v10681_v30 = vld [vmem:[#allocation5 + $0xa30] sm:$0xf0]  ;;  %v10556_v48 = vor.u32 %v14297_v26, %v10553_v28  ;;  %v15631_v26 = vpop.f32.mrf.mxu0 }
  0xfe   :  { %3697 = vmatpush.bf16.msra.mxu2 %v10716_v2  ;;  %v14361_v33 = vld [vmem:[#allocation5 + $0xb24] sm:$0xf]  ;;  %v10809_v34 = vld [vmem:[#allocation5 + $0xb30] sm:$0xf0]  ;;  %v10684_v49 = vor.u32 %v14329_v29, %v10681_v30  ;;  %v15633_v29 = vpop.f32.mrf.mxu1 }
  0xff   :  { %3711 = vmatpush.bf16.msra.mxu3 %v10844_v6  ;;  %v14261_v42 = vld [vmem:[#allocation5 + $0x804] sm:$0xf]  ;;  %v10409_v45 = vld [vmem:[#allocation5 + $0x810] sm:$0xf0]  ;;  %v10812_v55 = vor.u32 %v14361_v33, %v10809_v34 }
 0x100   :  { %3670 = vmatpush.bf16.msra.mxu0 %v10444_v19  ;;  %v14293_v50 = vld [vmem:[#allocation5 + $0x904] sm:$0xf]  ;;  %v10537_v52 = vld [vmem:[#allocation5 + $0x910] sm:$0xf0]  ;;  %v10412_v9 = vor.u32 %v14261_v42, %v10409_v45 }
 0x101   :  { %3684 = vmatpush.bf16.msra.mxu1 %v10572_v21  ;;  %v14325_v53 = vld [vmem:[#allocation5 + $0xa04] sm:$0xf]  ;;  %v10665_v56 = vld [vmem:[#allocation5 + $0xa10] sm:$0xf0]  ;;  %v10540_v5 = vor.u32 %v14293_v50, %v10537_v52 }
 0x102   :  { %3698 = vmatpush.bf16.msra.mxu2 %v10700_v22  ;;  %v14357_v57 = vld [vmem:[#allocation5 + $0xb04] sm:$0xf]  ;;  %v10793_v59 = vld [vmem:[#allocation5 + $0xb10] sm:$0xf0]  ;;  %v10668_v6 = vor.u32 %v14325_v53, %v10665_v56 }
 0x103   :  { %3712 = vmatpush.bf16.msra.mxu3 %v10828_v27  ;;  %v14417_v60 = vld [vmem:[#allocation5 + $0xce4] sm:$0xf]  ;;  %v11033_v61 = vld [vmem:[#allocation5 + $0xcf0] sm:$0xf0]  ;;  %v10796_v11 = vor.u32 %v14357_v57, %v10793_v59 }
 0x104   :  { %v14449_v62 = vld [vmem:[#allocation5 + $0xde4] sm:$0xf]  ;;  %3671 = vmatpush.bf16.msra.mxu0 %v10428_v37  ;;  %v11161_v2 = vld [vmem:[#allocation5 + $0xdf0] sm:$0xf0]  ;;  %v11036_v12 = vor.u32 %v14417_v60, %v11033_v61 }
 0x105   :  { %v14481_v3 = vld [vmem:[#allocation5 + $0xee4] sm:$0xf]  ;;  %v11289_v4 = vld [vmem:[#allocation5 + $0xef0] sm:$0xf0]  ;;  %3685 = vmatpush.bf16.msra.mxu1 %v10556_v48  ;;  %v11164_v13 = vor.u32 %v14449_v62, %v11161_v2 }
 0x106   :  { %3699 = vmatpush.bf16.msra.mxu2 %v10684_v49  ;;  %v14513_v7 = vld [vmem:[#allocation5 + $0xfe4] sm:$0xf]  ;;  %v11417_v8 = vld [vmem:[#allocation5 + $0xff0] sm:$0xf0]  ;;  %v11292_v14 = vor.u32 %v14481_v3, %v11289_v4 }
 0x107   :  { %3713 = vmatpush.bf16.msra.mxu3 %v10812_v55  ;;  %v14413_v15 = vld [vmem:[#allocation5 + $0xcc4] sm:$0xf]  ;;  %v11017_v16 = vld [vmem:[#allocation5 + $0xcd0] sm:$0xf0]  ;;  %v11420_v21 = vor.u32 %v14513_v7, %v11417_v8 }
 0x108   :  { %v14445_v19 = vld [vmem:[#allocation5 + $0xdc4] sm:$0xf]  ;;  %3672 = vmatpush.bf16.msra.mxu0 %v10412_v9  ;;  %v11145_v22 = vld [vmem:[#allocation5 + $0xdd0] sm:$0xf0]  ;;  %v11020_v30 = vor.u32 %v14413_v15, %v11017_v16  ;;  %v15639_v9 = vpop.f32.mrf.mxu2 }
 0x109   :  { %v14477_v23 = vld [vmem:[#allocation5 + $0xec4] sm:$0xf]  ;;  %v11273_v24 = vld [vmem:[#allocation5 + $0xed0] sm:$0xf0]  ;;  %3686 = vmatpush.bf16.msra.mxu1 %v10540_v5  ;;  %v11148_v33 = vor.u32 %v14445_v19, %v11145_v22 }
 0x10a   :  { %3700 = vmatpush.bf16.msra.mxu2 %v10668_v6  ;;  %v14509_v27 = vld [vmem:[#allocation5 + $0xfc4] sm:$0xf]  ;;  %v11401_v28 = vld [vmem:[#allocation5 + $0xfd0] sm:$0xf0]  ;;  %v11276_v34 = vor.u32 %v14477_v23, %v11273_v24  ;;  %v15641_v6 = vpop.f32.mrf.mxu3 }
 0x10b   :  { %3714 = vmatpush.bf16.msra.mxu3 %v10796_v11  ;;  %v14409_v37 = vld [vmem:[#allocation5 + $0xca4] sm:$0xf]  ;;  %v11001_v42 = vld [vmem:[#allocation5 + $0xcb0] sm:$0xf0]  ;;  %3673 = vmatmul.bf16.vlgmr.msra.gmra.mxu0 %v15581_v31  ;;  %v11404_v48 = vor.u32 %v14509_v27, %v11401_v28 }
 0x10c   :  { %3721 = vmatpush.bf16.msrb.mxu0 %v11036_v12  ;;  %v14441_v45 = vld [vmem:[#allocation5 + $0xda4] sm:$0xf]  ;;  %v11129_v49 = vld [vmem:[#allocation5 + $0xdb0] sm:$0xf0]  ;;  %3687 = vmatmul.bf16.vlgmr.msra.gmra.mxu1 %v15585_v36  ;;  %v11004_v56 = vor.u32 %v14409_v37, %v11001_v42  ;;  %v3450_v7 = vpop.f32.mrf.mxu0 }
 0x10d   :  { %3735 = vmatpush.bf16.msrb.mxu1 %v11164_v13  ;;  %v14473_v50 = vld [vmem:[#allocation5 + $0xea4] sm:$0xf]  ;;  %v11257_v52 = vld [vmem:[#allocation5 + $0xeb0] sm:$0xf0]  ;;  %3701 = vmatmul.bf16.vlgmr.msra.gmra.mxu2 %v15583_v35  ;;  %v11132_v57 = vor.u32 %v14441_v45, %v11129_v49  ;;  %v3451_v12 = vadd.f32 %v3450_v7, %v15629_v20 }
 0x10e   :  { %3749 = vmatpush.bf16.msrb.mxu2 %v11292_v14  ;;  %v14505_v53 = vld [vmem:[#allocation5 + $0xfa4] sm:$0xf]  ;;  %v11385_v55 = vld [vmem:[#allocation5 + $0xfb0] sm:$0xf0]  ;;  %3715 = vmatmul.bf16.vlgmr.msra.gmra.mxu3 %v15587_v40  ;;  %v11260_v59 = vor.u32 %v14473_v50, %v11257_v52  ;;  %v3464_v14 = vpop.f32.mrf.mxu1 }
 0x10f   :  { %3763 = vmatpush.bf16.msrb.mxu3 %v11420_v21  ;;  %v14405_v60 = vld [vmem:[#allocation5 + $0xc84] sm:$0xf]  ;;  %v10985_v61 = vld [vmem:[#allocation5 + $0xc90] sm:$0xf0]  ;;  %v11388_v2 = vor.u32 %v14505_v53, %v11385_v55  ;;  %v3465_v24 = vadd.f32 %v3464_v14, %v3451_v12 }
 0x110   :  { %3722 = vmatpush.bf16.msrb.mxu0 %v11020_v30  ;;  %v14437_v62 = vld [vmem:[#allocation5 + $0xd84] sm:$0xf]  ;;  %v11113_v3 = vld [vmem:[#allocation5 + $0xd90] sm:$0xf0]  ;;  %v10988_v13 = vor.u32 %v14405_v60, %v10985_v61  ;;  %v3478_v52 = vpop.f32.mrf.mxu2 }
 0x111   :  { %3736 = vmatpush.bf16.msrb.mxu1 %v11148_v33  ;;  %v14469_v4 = vld [vmem:[#allocation5 + $0xe84] sm:$0xf]  ;;  %v11241_v5 = vld [vmem:[#allocation5 + $0xe90] sm:$0xf0]  ;;  %v11116_v15 = vor.u32 %v14437_v62, %v11113_v3 }
 0x112   :  { %3750 = vmatpush.bf16.msrb.mxu2 %v11276_v34  ;;  %v14501_v8 = vld [vmem:[#allocation5 + $0xf84] sm:$0xf]  ;;  %v11369_v11 = vld [vmem:[#allocation5 + $0xf90] sm:$0xf0]  ;;  %v11244_v16 = vor.u32 %v14469_v4, %v11241_v5 }
 0x113   :  { %3764 = vmatpush.bf16.msrb.mxu3 %v11404_v48  ;;  %v14401_v19 = vld [vmem:[#allocation5 + $0xc64] sm:$0xf]  ;;  %v10969_v21 = vld [vmem:[#allocation5 + $0xc70] sm:$0xf0]  ;;  %v11372_v23 = vor.u32 %v14501_v8, %v11369_v11 }
 0x114   :  { %3723 = vmatpush.bf16.msrb.mxu0 %v11004_v56  ;;  %v14433_v22 = vld [vmem:[#allocation5 + $0xd64] sm:$0xf]  ;;  %v11097_v27 = vld [vmem:[#allocation5 + $0xd70] sm:$0xf0]  ;;  %v10972_v37 = vor.u32 %v14401_v19, %v10969_v21 }
 0x115   :  { %3737 = vmatpush.bf16.msrb.mxu1 %v11132_v57  ;;  %v14465_v28 = vld [vmem:[#allocation5 + $0xe64] sm:$0xf]  ;;  %v11225_v30 = vld [vmem:[#allocation5 + $0xe70] sm:$0xf0]  ;;  %v11100_v20 = vor.u32 %v14433_v22, %v11097_v27  ;;  %v3479_v57 = vadd.f32 %v3478_v52, %v3465_v24  ;;  %v9759_v52 = vld [vmem:[#allocation5 + $0x2e8] sm:$0xf] }
 0x116   :  { %3751 = vmatpush.bf16.msrb.mxu2 %v11260_v59  ;;  %v14497_v33 = vld [vmem:[#allocation5 + $0xf64] sm:$0xf]  ;;  %v11353_v34 = vld [vmem:[#allocation5 + $0xf70] sm:$0xf0]  ;;  %v11228_v42 = vor.u32 %v14465_v28, %v11225_v30  ;;  %v3492_v59 = vpop.f32.mrf.mxu3 }
 0x117   :  { %3765 = vmatpush.bf16.msrb.mxu3 %v11388_v2  ;;  %v14397_v45 = vld [vmem:[#allocation5 + $0xc44] sm:$0xf]  ;;  %v10953_v48 = vld [vmem:[#allocation5 + $0xc50] sm:$0xf0]  ;;  %v11356_v50 = vor.u32 %v14497_v33, %v11353_v34  ;;  %v15644_v2 = vadd.f32 %v3492_v59, %v3479_v57  ;;  %v9887_v57 = vld [vmem:[#allocation5 + $0x3e8] sm:$0xf] }
 0x118   :  { %3724 = vmatpush.bf16.msrb.mxu0 %v10988_v13  ;;  %v14429_v49 = vld [vmem:[#allocation5 + $0xd44] sm:$0xf]  ;;  %v11081_v53 = vld [vmem:[#allocation5 + $0xd50] sm:$0xf0]  ;;  %v10956_v62 = vor.u32 %v14397_v45, %v10953_v48  ;;  %v14036_v45 = vld [vmem:[#allocation5 + $0xf4] sm:$0xf0] }
 0x119   :  { %3738 = vmatpush.bf16.msrb.mxu1 %v11116_v15  ;;  %v14461_v55 = vld [vmem:[#allocation5 + $0xe44] sm:$0xf]  ;;  %v11209_v56 = vld [vmem:[#allocation5 + $0xe50] sm:$0xf0]  ;;  %v11084_v3 = vor.u32 %v14429_v49, %v11081_v53  ;;  %v9631_v48 = vld [vmem:[#allocation5 + $0x1e8] sm:$0xf] }
 0x11a   :  { %3752 = vmatpush.bf16.msrb.mxu2 %v11244_v16  ;;  %v14493_v60 = vld [vmem:[#allocation5 + $0xf44] sm:$0xf]  ;;  %v11337_v61 = vld [vmem:[#allocation5 + $0xf50] sm:$0xf0]  ;;  %v11212_v4 = vor.u32 %v14461_v55, %v11209_v56  ;;  %v14100_v53 = vld [vmem:[#allocation5 + $0x2f4] sm:$0xf0] }
 0x11b   :  { %3766 = vmatpush.bf16.msrb.mxu3 %v11372_v23  ;;  %v14393_v5 = vld [vmem:[#allocation5 + $0xc24] sm:$0xf]  ;;  %v10937_v7 = vld [vmem:[#allocation5 + $0xc30] sm:$0xf0]  ;;  %v11340_v11 = vor.u32 %v14493_v60, %v11337_v61  ;;  %v14132_v59 = vld [vmem:[#allocation5 + $0x3f4] sm:$0xf0] }
 0x11c   :  { %3725 = vmatpush.bf16.msrb.mxu0 %v10972_v37  ;;  %v14425_v8 = vld [vmem:[#allocation5 + $0xd24] sm:$0xf]  ;;  %v11065_v12 = vld [vmem:[#allocation5 + $0xd30] sm:$0xf0]  ;;  %v10940_v19 = vor.u32 %v14393_v5, %v10937_v7  ;;  %v14032_v5 = vld [vmem:[#allocation5 + $0xd4] sm:$0xf0] }
 0x11d   :  { %3739 = vmatpush.bf16.msrb.mxu1 %v11100_v20  ;;  %v14457_v13 = vld [vmem:[#allocation5 + $0xe24] sm:$0xf]  ;;  %v11193_v14 = vld [vmem:[#allocation5 + $0xe30] sm:$0xf0]  ;;  %v11068_v23 = vor.u32 %v14425_v8, %v11065_v12  ;;  %v9615_v7 = vld [vmem:[#allocation5 + $0x1c8] sm:$0xf]  ;;  %v9888_v8 = vor.u32 %v14132_v59, %v9887_v57 }
 0x11e   :  { %3753 = vmatpush.bf16.msrb.mxu2 %v11228_v42  ;;  %v14489_v15 = vld [vmem:[#allocation5 + $0xf24] sm:$0xf]  ;;  %v11321_v16 = vld [vmem:[#allocation5 + $0xf30] sm:$0xf0]  ;;  %v11196_v24 = vor.u32 %v14457_v13, %v11193_v14  ;;  %v9503_v42 = vld [vmem:[#allocation5 + $0xe8] sm:$0xf]  ;;  %v15646_v14 = vpop.f32.mrf.mxu0 }
 0x11f   :  { %3767 = vmatpush.bf16.msrb.mxu3 %v11356_v50  ;;  %v14389_v21 = vld [vmem:[#allocation5 + $0xc04] sm:$0xf]  ;;  %v10921_v22 = vld [vmem:[#allocation5 + $0xc10] sm:$0xf0]  ;;  %v11324_v33 = vor.u32 %v14489_v15, %v11321_v16  ;;  %v14068_v50 = vld [vmem:[#allocation5 + $0x1f4] sm:$0xf0]  ;;  %v9504_v61 = vor.u32 %v14036_v45, %v9503_v42 }
 0x120   :  { %3726 = vmatpush.bf16.msrb.mxu0 %v10956_v62  ;;  %v14421_v27 = vld [vmem:[#allocation5 + $0xd04] sm:$0xf]  ;;  %v11049_v28 = vld [vmem:[#allocation5 + $0xd10] sm:$0xf0]  ;;  %v10924_v49 = vor.u32 %v14389_v21, %v10921_v22  ;;  %v9632_v62 = vor.u32 %v14068_v50, %v9631_v48  ;;  %v9743_v12 = vld [vmem:[#allocation5 + $0x2c8] sm:$0xf] }
 0x121   :  { %3740 = vmatpush.bf16.msrb.mxu1 %v11084_v3  ;;  %v14453_v30 = vld [vmem:[#allocation5 + $0xe04] sm:$0xf]  ;;  %v11177_v34 = vld [vmem:[#allocation5 + $0xe10] sm:$0xf0]  ;;  %v11052_v55 = vor.u32 %v14421_v27, %v11049_v28  ;;  %v9760_v3 = vor.u32 %v14100_v53, %v9759_v52  ;;  %v14096_v13 = vld [vmem:[#allocation5 + $0x2d4] sm:$0xf0] }
 0x122   :  { %3754 = vmatpush.bf16.msrb.mxu2 %v11212_v4  ;;  %v14485_v37 = vld [vmem:[#allocation5 + $0xf04] sm:$0xf]  ;;  %v11305_v20 = vld [vmem:[#allocation5 + $0xf10] sm:$0xf0]  ;;  %v11180_v56 = vor.u32 %v14453_v30, %v11177_v34  ;;  %v9487_v4 = vld [vmem:[#allocation5 + $0xc8] sm:$0xf] }
 0x123   :  { %3768 = vmatpush.bf16.msrb.mxu3 %v11340_v11  ;;  %v11308_v60 = vor.u32 %v14485_v37, %v11305_v20  ;;  %v14064_v11 = vld [vmem:[#allocation5 + $0x1d4] sm:$0xf0]  ;;  %v9871_v15 = vld [vmem:[#allocation5 + $0x3c8] sm:$0xf]  ;;  %v9488_v21 = vor.u32 %v14032_v5, %v9487_v4 }
 0x124   :  { %3727 = vmatpush.bf16.msrb.mxu0 %v10940_v19  ;;  %v14128_v16 = vld [vmem:[#allocation5 + $0x3d4] sm:$0xf0]  ;;  %v15648_v19 = vpop.f32.mrf.mxu1  ;;  %v9616_v22 = vor.u32 %v14064_v11, %v9615_v7  ;;  %v9599_v28 = vld [vmem:[#allocation5 + $0x1a8] sm:$0xf] }
 0x125   :  { %3741 = vmatpush.bf16.msrb.mxu1 %v11068_v23  ;;  %v9744_v23 = vor.u32 %v14096_v13, %v9743_v12  ;;  %v14028_v27 = vld [vmem:[#allocation5 + $0xb4] sm:$0xf0]  ;;  %v9872_v30 = vor.u32 %v14128_v16, %v9871_v15  ;;  %v9727_v34 = vld [vmem:[#allocation5 + $0x2a8] sm:$0xf] }
 0x126   :  { %3755 = vmatpush.bf16.msrb.mxu2 %v11196_v24  ;;  %v9471_v24 = vld [vmem:[#allocation5 + $0xa8] sm:$0xf]  ;;  %v14092_v37 = vld [vmem:[#allocation5 + $0x2b4] sm:$0xf0] }
 0x127   :  { %3769 = vmatpush.bf16.msrb.mxu3 %v11324_v33  ;;  %v14060_v33 = vld [vmem:[#allocation5 + $0x1b4] sm:$0xf0]  ;;  %v9855_v20 = vld [vmem:[#allocation5 + $0x3a8] sm:$0xf]  ;;  %v9472_v45 = vor.u32 %v14028_v27, %v9471_v24 }
 0x128   :  { %3728 = vmatpush.bf16.msrb.mxu0 %v10924_v49  ;;  %v14124_v42 = vld [vmem:[#allocation5 + $0x3b4] sm:$0xf0]  ;;  %v9600_v48 = vor.u32 %v14060_v33, %v9599_v28  ;;  %v9728_v49 = vor.u32 %v14092_v37, %v9727_v34  ;;  %v9455_v50 = vld [vmem:[#allocation5 + $0x88] sm:$0xf] }
 0x129   :  { %3742 = vmatpush.bf16.msrb.mxu1 %v11052_v55  ;;  %v14024_v52 = vld [vmem:[#allocation5 + $0x94] sm:$0xf0]  ;;  %v9583_v53 = vld [vmem:[#allocation5 + $0x188] sm:$0xf]  ;;  %v15654_v55 = vpop.f32.mrf.mxu2 }
 0x12a   :  { %3756 = vmatpush.bf16.msrb.mxu2 %v11180_v56  ;;  %v9856_v56 = vor.u32 %v14124_v42, %v9855_v20  ;;  %v14056_v57 = vld [vmem:[#allocation5 + $0x194] sm:$0xf0]  ;;  %v9711_v59 = vld [vmem:[#allocation5 + $0x288] sm:$0xf]  ;;  %v9456_v7 = vor.u32 %v14024_v52, %v9455_v50 }
 0x12b   :  { %3770 = vmatpush.bf16.msrb.mxu3 %v11308_v60  ;;  %3729 = vmatmul.bf16.vlgmr.msrb.gmra.mxu0 %v15593_v32  ;;  %v14088_v60 = vld [vmem:[#allocation5 + $0x294] sm:$0xf0]  ;;  %v9584_v11 = vor.u32 %v14056_v57, %v9583_v53  ;;  %v9439_v13 = vld [vmem:[#allocation5 + $0x68] sm:$0xf] }
 0x12c   :  { %3777 = vmatpush.bf16.msra.mxu0 %v9504_v61  ;;  %3743 = vmatmul.bf16.vlgmr.msrb.gmra.mxu1 %v15597_v41  ;;  %v15656_v61 = vpop.f32.mrf.mxu3  ;;  %v14120_v4 = vld [vmem:[#allocation5 + $0x394] sm:$0xf0]  ;;  %v9712_v12 = vor.u32 %v14088_v60, %v9711_v59  ;;  %v9567_v16 = vld [vmem:[#allocation5 + $0x168] sm:$0xf] }
 0x12d   :  { %3791 = vmatpush.bf16.msra.mxu1 %v9632_v62  ;;  %3757 = vmatmul.bf16.vlgmr.msrb.gmra.mxu2 %v15595_v38  ;;  %v3506_v62 = vpop.f32.mrf.mxu0  ;;  %v14020_v15 = vld [vmem:[#allocation5 + $0x74] sm:$0xf0]  ;;  %v9695_v24 = vld [vmem:[#allocation5 + $0x268] sm:$0xf] }
 0x12e   :  { %3805 = vmatpush.bf16.msra.mxu2 %v9760_v3  ;;  %3771 = vmatmul.bf16.vlgmr.msrb.gmra.mxu3 %v15599_v46  ;;  %v9839_v3 = vld [vmem:[#allocation5 + $0x388] sm:$0xf]  ;;  %v3507_v5 = vadd.f32 %v3506_v62, %v15644_v2  ;;  %v14084_v27 = vld [vmem:[#allocation5 + $0x274] sm:$0xf0]  ;;  %v9440_v33 = vor.u32 %v14020_v15, %v9439_v13 }
 0x12f   :  { %3819 = vmatpush.bf16.msra.mxu3 %v9888_v8  ;;  %v3520_v8 = vpop.f32.mrf.mxu1  ;;  %v9823_v28 = vld [vmem:[#allocation5 + $0x368] sm:$0xf]  ;;  %v9696_v34 = vor.u32 %v14084_v27, %v9695_v24  ;;  %v14016_v20 = vld [vmem:[#allocation5 + $0x54] sm:$0xf0] }
 0x130   :  { %3778 = vmatpush.bf16.msra.mxu0 %v9488_v21  ;;  %v9840_v21 = vor.u32 %v14120_v4, %v9839_v3  ;;  %v9423_v37 = vld [vmem:[#allocation5 + $0x48] sm:$0xf]  ;;  %v14080_v52 = vld [vmem:[#allocation5 + $0x254] sm:$0xf0] }
 0x131   :  { %3792 = vmatpush.bf16.msra.mxu1 %v9616_v22  ;;  %v3521_v22 = vadd.f32 %v3520_v8, %v3507_v5  ;;  %v9551_v42 = vld [vmem:[#allocation5 + $0x148] sm:$0xf]  ;;  %v14112_v59 = vld [vmem:[#allocation5 + $0x354] sm:$0xf0]  ;;  %v9424_v60 = vor.u32 %v14016_v20, %v9423_v37 }
 0x132   :  { %3806 = vmatpush.bf16.msra.mxu2 %v9744_v23  ;;  %v14052_v23 = vld [vmem:[#allocation5 + $0x174] sm:$0xf0]  ;;  %v9679_v50 = vld [vmem:[#allocation5 + $0x248] sm:$0xf] }
 0x133   :  { %3820 = vmatpush.bf16.msra.mxu3 %v9872_v30  ;;  %v14116_v30 = vld [vmem:[#allocation5 + $0x374] sm:$0xf0]  ;;  %v9568_v2 = vor.u32 %v14052_v23, %v9567_v16  ;;  %v9807_v57 = vld [vmem:[#allocation5 + $0x348] sm:$0xf]  ;;  %v9680_v4 = vor.u32 %v14080_v52, %v9679_v50 }
 0x134   :  { %3779 = vmatpush.bf16.msra.mxu0 %v9472_v45  ;;  %v9824_v45 = vor.u32 %v14116_v30, %v9823_v28  ;;  %v9407_v5 = vld [vmem:[#allocation5 + $0x28] sm:$0xf]  ;;  %v14076_v15 = vld [vmem:[#allocation5 + $0x234] sm:$0xf0] }
 0x135   :  { %3793 = vmatpush.bf16.msra.mxu1 %v9600_v48  ;;  %v3534_v48 = vpop.f32.mrf.mxu2  ;;  %v9535_v8 = vld [vmem:[#allocation5 + $0x128] sm:$0xf]  ;;  %v14008_v24 = vld [vmem:[#allocation5 + $0x14] sm:$0xf0] }
 0x136   :  { %3807 = vmatpush.bf16.msra.mxu2 %v9728_v49  ;;  %v14048_v49 = vld [vmem:[#allocation5 + $0x154] sm:$0xf0]  ;;  %v3535_v53 = vadd.f32 %v3534_v48, %v3521_v22  ;;  %v9663_v13 = vld [vmem:[#allocation5 + $0x228] sm:$0xf] }
 0x137   :  { %3821 = vmatpush.bf16.msra.mxu3 %v9856_v56  ;;  %v3548_v56 = vpop.f32.mrf.mxu3  ;;  %v9552_v3 = vor.u32 %v14048_v49, %v9551_v42  ;;  %v9791_v16 = vld [vmem:[#allocation5 + $0x328] sm:$0xf]  ;;  %v9664_v28 = vor.u32 %v14076_v15, %v9663_v13  ;;  %v14072_v37 = vld [vmem:[#allocation5 + $0x214] sm:$0xf0] }
 0x138   :  { %3780 = vmatpush.bf16.msra.mxu0 %v9456_v7  ;;  %v15659_v62 = vadd.f32 %v3548_v56, %v3535_v53  ;;  %v14012_v7 = vld [vmem:[#allocation5 + $0x34] sm:$0xf0]  ;;  %v9391_v23 = vld [vmem:[#allocation5 + $0x8] sm:$0xf] }
 0x139   :  { %3794 = vmatpush.bf16.msra.mxu1 %v9584_v11  ;;  %v9808_v11 = vor.u32 %v14112_v59, %v9807_v57  ;;  %v9408_v22 = vor.u32 %v14012_v7, %v9407_v5  ;;  %v9519_v30 = vld [vmem:[#allocation5 + $0x108] sm:$0xf]  ;;  %v14104_v42 = vld [vmem:[#allocation5 + $0x314] sm:$0xf0]  ;;  %v9392_v50 = vor.u32 %v14008_v24, %v9391_v23 }
 0x13a   :  { %3808 = vmatpush.bf16.msra.mxu2 %v9712_v12  ;;  %v14044_v12 = vld [vmem:[#allocation5 + $0x134] sm:$0xf0]  ;;  %v9775_v20 = vld [vmem:[#allocation5 + $0x308] sm:$0xf] }
 0x13b   :  { %3822 = vmatpush.bf16.msra.mxu3 %v9840_v21  ;;  %v14108_v21 = vld [vmem:[#allocation5 + $0x334] sm:$0xf0]  ;;  %v9536_v27 = vor.u32 %v14044_v12, %v9535_v8  ;;  %v10143_v49 = vld [vmem:[#allocation5 + $0x5e8] sm:$0xf] }
 0x13c   :  { %3781 = vmatpush.bf16.msra.mxu0 %v9440_v33  ;;  %v14040_v33 = vld [vmem:[#allocation5 + $0x114] sm:$0xf0]  ;;  %v10271_v53 = vld [vmem:[#allocation5 + $0x6e8] sm:$0xf] }
 0x13d   :  { %3795 = vmatpush.bf16.msra.mxu1 %v9568_v2  ;;  %v9647_v2 = vld [vmem:[#allocation5 + $0x208] sm:$0xf]  ;;  %v14164_v48 = vld [vmem:[#allocation5 + $0x4f4] sm:$0xf0]  ;;  %v9520_v57 = vor.u32 %v14040_v33, %v9519_v30 }
 0x13e   :  { %3809 = vmatpush.bf16.msra.mxu2 %v9696_v34  ;;  %v9792_v34 = vor.u32 %v14108_v21, %v9791_v16  ;;  %v14196_v52 = vld [vmem:[#allocation5 + $0x5f4] sm:$0xf0]  ;;  %v9648_v59 = vor.u32 %v14072_v37, %v9647_v2  ;;  %v10127_v13 = vld [vmem:[#allocation5 + $0x5c8] sm:$0xf] }
 0x13f   :  { %3823 = vmatpush.bf16.msra.mxu3 %v9824_v45  ;;  %v10015_v45 = vld [vmem:[#allocation5 + $0x4e8] sm:$0xf]  ;;  %v14228_v56 = vld [vmem:[#allocation5 + $0x6f4] sm:$0xf0]  ;;  %v10144_v7 = vor.u32 %v14196_v52, %v10143_v49 }
 0x140   :  { %3782 = vmatpush.bf16.msra.mxu0 %v9424_v60  ;;  %v10399_v60 = vld [vmem:[#allocation5 + $0x7e8] sm:$0xf]  ;;  %v10016_v5 = vor.u32 %v14164_v48, %v10015_v45  ;;  %v10272_v8 = vor.u32 %v14228_v56, %v10271_v53  ;;  %v14160_v12 = vld [vmem:[#allocation5 + $0x4d4] sm:$0xf0] }
 0x141   :  { %3796 = vmatpush.bf16.msra.mxu1 %v9552_v3  ;;  %v14260_v3 = vld [vmem:[#allocation5 + $0x7f4] sm:$0xf0]  ;;  %v10255_v21 = vld [vmem:[#allocation5 + $0x6c8] sm:$0xf] }
 0x142   :  { %3810 = vmatpush.bf16.msra.mxu2 %v9680_v4  ;;  %v9776_v4 = vor.u32 %v14104_v42, %v9775_v20  ;;  %v10400_v15 = vor.u32 %v14260_v3, %v10399_v60  ;;  %v14192_v16 = vld [vmem:[#allocation5 + $0x5d4] sm:$0xf0]  ;;  %v10383_v23 = vld [vmem:[#allocation5 + $0x7c8] sm:$0xf] }
 0x143   :  { %3824 = vmatpush.bf16.msra.mxu3 %v9808_v11  ;;  %v9999_v11 = vld [vmem:[#allocation5 + $0x4c8] sm:$0xf]  ;;  %v14256_v24 = vld [vmem:[#allocation5 + $0x7d4] sm:$0xf0] }
 0x144   :  { %3783 = vmatpush.bf16.msra.mxu0 %v9408_v22  ;;  %v14224_v22 = vld [vmem:[#allocation5 + $0x6d4] sm:$0xf0]  ;;  %v9983_v33 = vld [vmem:[#allocation5 + $0x4a8] sm:$0xf]  ;;  %v10384_v37 = vor.u32 %v14256_v24, %v10383_v23 }
 0x145   :  { %3797 = vmatpush.bf16.msra.mxu1 %v9536_v27  ;;  %v10000_v27 = vor.u32 %v14160_v12, %v9999_v11  ;;  %v10256_v30 = vor.u32 %v14224_v22, %v10255_v21  ;;  %v14156_v2 = vld [vmem:[#allocation5 + $0x4b4] sm:$0xf0]  ;;  %v10239_v42 = vld [vmem:[#allocation5 + $0x6a8] sm:$0xf] }
 0x146   :  { %3811 = vmatpush.bf16.msra.mxu2 %v9664_v28  ;;  %v10128_v28 = vor.u32 %v14192_v16, %v10127_v13  ;;  %v14188_v20 = vld [vmem:[#allocation5 + $0x5b4] sm:$0xf0]  ;;  %v10367_v48 = vld [vmem:[#allocation5 + $0x7a8] sm:$0xf] }
 0x147   :  { %3825 = vmatpush.bf16.msra.mxu3 %v9792_v34  ;;  %v10111_v34 = vld [vmem:[#allocation5 + $0x5a8] sm:$0xf]  ;;  %v14220_v45 = vld [vmem:[#allocation5 + $0x6b4] sm:$0xf0] }
 0x148   :  { %3784 = vmatpush.bf16.msra.mxu0 %v9392_v50  ;;  %v14252_v49 = vld [vmem:[#allocation5 + $0x7b4] sm:$0xf0]  ;;  %v9984_v50 = vor.u32 %v14156_v2, %v9983_v33  ;;  %v10112_v52 = vor.u32 %v14188_v20, %v10111_v34  ;;  %v10240_v53 = vor.u32 %v14220_v45, %v10239_v42  ;;  %v9967_v56 = vld [vmem:[#allocation5 + $0x488] sm:$0xf] }
 0x149   :  { %3798 = vmatpush.bf16.msra.mxu1 %v9520_v57  ;;  %v14152_v57 = vld [vmem:[#allocation5 + $0x494] sm:$0xf0]  ;;  %v10368_v60 = vor.u32 %v14252_v49, %v10367_v48  ;;  %v10079_v21 = vld [vmem:[#allocation5 + $0x568] sm:$0xf] }
 0x14a   :  { %3812 = vmatpush.bf16.msra.mxu2 %v9648_v59  ;;  %v10095_v59 = vld [vmem:[#allocation5 + $0x588] sm:$0xf]  ;;  %v14184_v3 = vld [vmem:[#allocation5 + $0x594] sm:$0xf0]  ;;  %v9968_v11 = vor.u32 %v14152_v57, %v9967_v56 }
 0x14b   :  { %3826 = vmatpush.bf16.msra.mxu3 %v9776_v4  ;;  %3785 = vmatmul.bf16.vlgmr.msra.gmra.mxu0 %v15557_v58  ;;  %v10223_v4 = vld [vmem:[#allocation5 + $0x688] sm:$0xf]  ;;  %v10096_v12 = vor.u32 %v14184_v3, %v10095_v59  ;;  %v14148_v16 = vld [vmem:[#allocation5 + $0x474] sm:$0xf0] }
 0x14c   :  { %3833 = vmatpush.bf16.msrb.mxu0 %v10016_v5  ;;  %3799 = vmatmul.bf16.vlgmr.msra.gmra.mxu1 %v15563_v10  ;;  %v14216_v5 = vld [vmem:[#allocation5 + $0x694] sm:$0xf0]  ;;  %v10207_v24 = vld [vmem:[#allocation5 + $0x668] sm:$0xf] }
 0x14d   :  { %3847 = vmatpush.bf16.msrb.mxu1 %v10144_v7  ;;  %3813 = vmatmul.bf16.vlgmr.msra.gmra.mxu2 %v15559_v1  ;;  %v10351_v7 = vld [vmem:[#allocation5 + $0x788] sm:$0xf]  ;;  %v10224_v13 = vor.u32 %v14216_v5, %v10223_v4  ;;  %v14180_v23 = vld [vmem:[#allocation5 + $0x574] sm:$0xf0] }
 0x14e   :  { %3861 = vmatpush.bf16.msrb.mxu2 %v10272_v8  ;;  %3827 = vmatmul.bf16.vlgmr.msra.gmra.mxu3 %v15565_v17  ;;  %v14248_v8 = vld [vmem:[#allocation5 + $0x794] sm:$0xf0]  ;;  %v10080_v2 = vor.u32 %v14180_v23, %v10079_v21  ;;  %v10063_v42 = vld [vmem:[#allocation5 + $0x548] sm:$0xf] }
 0x14f   :  { %3875 = vmatpush.bf16.msrb.mxu3 %v10400_v15  ;;  %v9951_v15 = vld [vmem:[#allocation5 + $0x468] sm:$0xf]  ;;  %v10352_v22 = vor.u32 %v14248_v8, %v10351_v7  ;;  %v14144_v20 = vld [vmem:[#allocation5 + $0x454] sm:$0xf0] }
 0x150   :  { %3834 = vmatpush.bf16.msrb.mxu0 %v10000_v27  ;;  %v14212_v27 = vld [vmem:[#allocation5 + $0x674] sm:$0xf0]  ;;  %v9952_v33 = vor.u32 %v14148_v16, %v9951_v15  ;;  %v10191_v49 = vld [vmem:[#allocation5 + $0x648] sm:$0xf] }
 0x151   :  { %3848 = vmatpush.bf16.msrb.mxu1 %v10128_v28  ;;  %v10335_v28 = vld [vmem:[#allocation5 + $0x768] sm:$0xf]  ;;  %v10208_v34 = vor.u32 %v14212_v27, %v10207_v24  ;;  %v14176_v48 = vld [vmem:[#allocation5 + $0x554] sm:$0xf0] }
 0x152   :  { %3862 = vmatpush.bf16.msrb.mxu2 %v10256_v30  ;;  %v14244_v30 = vld [vmem:[#allocation5 + $0x774] sm:$0xf0]  ;;  %v10064_v57 = vor.u32 %v14176_v48, %v10063_v42  ;;  %v10047_v4 = vld [vmem:[#allocation5 + $0x528] sm:$0xf] }
 0x153   :  { %3876 = vmatpush.bf16.msrb.mxu3 %v10384_v37  ;;  %v9935_v37 = vld [vmem:[#allocation5 + $0x448] sm:$0xf]  ;;  %v10336_v45 = vor.u32 %v14244_v30, %v10335_v28  ;;  %v14140_v3 = vld [vmem:[#allocation5 + $0x434] sm:$0xf0] }
 0x154   :  { %3835 = vmatpush.bf16.msrb.mxu0 %v9984_v50  ;;  %v14208_v50 = vld [vmem:[#allocation5 + $0x654] sm:$0xf0]  ;;  %v9936_v56 = vor.u32 %v14144_v20, %v9935_v37  ;;  %v10175_v8 = vld [vmem:[#allocation5 + $0x628] sm:$0xf] }
 0x155   :  { %3849 = vmatpush.bf16.msrb.mxu1 %v10112_v52  ;;  %v10319_v52 = vld [vmem:[#allocation5 + $0x748] sm:$0xf]  ;;  %v10192_v59 = vor.u32 %v14208_v50, %v10191_v49  ;;  %v14172_v7 = vld [vmem:[#allocation5 + $0x534] sm:$0xf0] }
 0x156   :  { %3863 = vmatpush.bf16.msrb.mxu2 %v10240_v53  ;;  %v14240_v53 = vld [vmem:[#allocation5 + $0x754] sm:$0xf0]  ;;  %v9903_v16 = vld [vmem:[#allocation5 + $0x408] sm:$0xf] }
 0x157   :  { %3877 = vmatpush.bf16.msrb.mxu3 %v10368_v60  ;;  %v9919_v60 = vld [vmem:[#allocation5 + $0x428] sm:$0xf]  ;;  %v10320_v5 = vor.u32 %v14240_v53, %v10319_v52  ;;  %v14136_v21 = vld [vmem:[#allocation5 + $0x414] sm:$0xf0] }
 0x158   :  { %3836 = vmatpush.bf16.msrb.mxu0 %v9968_v11  ;;  %v14204_v11 = vld [vmem:[#allocation5 + $0x634] sm:$0xf0]  ;;  %v9920_v15 = vor.u32 %v14140_v3, %v9919_v60  ;;  %v10031_v24 = vld [vmem:[#allocation5 + $0x508] sm:$0xf] }
 0x159   :  { %3850 = vmatpush.bf16.msrb.mxu1 %v10096_v12  ;;  %v10303_v12 = vld [vmem:[#allocation5 + $0x728] sm:$0xf]  ;;  %v10176_v23 = vor.u32 %v14204_v11, %v10175_v8  ;;  %v14168_v27 = vld [vmem:[#allocation5 + $0x514] sm:$0xf0] }
 0x15a   :  { %3864 = vmatpush.bf16.msrb.mxu2 %v10224_v13  ;;  %v14236_v13 = vld [vmem:[#allocation5 + $0x734] sm:$0xf0]  ;;  %v10159_v28 = vld [vmem:[#allocation5 + $0x608] sm:$0xf]  ;;  %v10032_v52 = vor.u32 %v14168_v27, %v10031_v24 }
 0x15b   :  { %3878 = vmatpush.bf16.msrb.mxu3 %v10352_v22  ;;  %v10048_v22 = vor.u32 %v14172_v7, %v10047_v4  ;;  %v10304_v30 = vor.u32 %v14236_v13, %v10303_v12  ;;  %v10527_v37 = vld [vmem:[#allocation5 + $0x8e8] sm:$0xf]  ;;  %v14292_v20 = vld [vmem:[#allocation5 + $0x8f4] sm:$0xf0] }
 0x15c   :  { %3837 = vmatpush.bf16.msrb.mxu0 %v9952_v33  ;;  %v14200_v33 = vld [vmem:[#allocation5 + $0x614] sm:$0xf0]  ;;  %v10655_v42 = vld [vmem:[#allocation5 + $0x9e8] sm:$0xf]  ;;  %v10528_v60 = vor.u32 %v14292_v20, %v10527_v37  ;;  %v15666_v20 = vpop.f32.mrf.mxu0 }
 0x15d   :  { %3851 = vmatpush.bf16.msrb.mxu1 %v10080_v2  ;;  %v10287_v2 = vld [vmem:[#allocation5 + $0x708] sm:$0xf]  ;;  %v14324_v48 = vld [vmem:[#allocation5 + $0x9f4] sm:$0xf0]  ;;  %v10160_v53 = vor.u32 %v14200_v33, %v10159_v28 }
 0x15e   :  { %3865 = vmatpush.bf16.msrb.mxu2 %v10208_v34  ;;  %v14232_v34 = vld [vmem:[#allocation5 + $0x714] sm:$0xf0]  ;;  %v10783_v49 = vld [vmem:[#allocation5 + $0xae8] sm:$0xf]  ;;  %v10656_v3 = vor.u32 %v14324_v48, %v10655_v42  ;;  %v15670_v48 = vpop.f32.mrf.mxu1 }
 0x15f   :  { %3879 = vmatpush.bf16.msrb.mxu3 %v10336_v45  ;;  %v9904_v45 = vor.u32 %v14136_v21, %v9903_v16  ;;  %v14356_v50 = vld [vmem:[#allocation5 + $0xaf4] sm:$0xf0]  ;;  %v10639_v8 = vld [vmem:[#allocation5 + $0x9c8] sm:$0xf] }
 0x160   :  { %3838 = vmatpush.bf16.msrb.mxu0 %v9936_v56  ;;  %v10911_v56 = vld [vmem:[#allocation5 + $0xbe8] sm:$0xf]  ;;  %v10784_v4 = vor.u32 %v14356_v50, %v10783_v49  ;;  %v14288_v7 = vld [vmem:[#allocation5 + $0x8d4] sm:$0xf0] }
 0x161   :  { %3852 = vmatpush.bf16.msrb.mxu1 %v10064_v57  ;;  %v14388_v57 = vld [vmem:[#allocation5 + $0xbf4] sm:$0xf0]  ;;  %v10767_v13 = vld [vmem:[#allocation5 + $0xac8] sm:$0xf] }
 0x162   :  { %3866 = vmatpush.bf16.msrb.mxu2 %v10192_v59  ;;  %v10288_v59 = vor.u32 %v14232_v34, %v10287_v2  ;;  %v10912_v11 = vor.u32 %v14388_v57, %v10911_v56  ;;  %v14320_v12 = vld [vmem:[#allocation5 + $0x9d4] sm:$0xf0]  ;;  %v10895_v16 = vld [vmem:[#allocation5 + $0xbc8] sm:$0xf] }
 0x163   :  { %3880 = vmatpush.bf16.msrb.mxu3 %v10320_v5  ;;  %v10511_v5 = vld [vmem:[#allocation5 + $0x8c8] sm:$0xf]  ;;  %v14384_v21 = vld [vmem:[#allocation5 + $0xbd4] sm:$0xf0] }
 0x164   :  { %3839 = vmatpush.bf16.msrb.mxu0 %v9920_v15  ;;  %v14352_v15 = vld [vmem:[#allocation5 + $0xad4] sm:$0xf0]  ;;  %v10495_v27 = vld [vmem:[#allocation5 + $0x8a8] sm:$0xf]  ;;  %v10896_v33 = vor.u32 %v14384_v21, %v10895_v16  ;;  %v15673_v21 = vpop.f32.mrf.mxu2 }
 0x165   :  { %3853 = vmatpush.bf16.msrb.mxu1 %v10048_v22  ;;  %v10512_v22 = vor.u32 %v14288_v7, %v10511_v5  ;;  %v10768_v24 = vor.u32 %v14352_v15, %v10767_v13  ;;  %v14284_v28 = vld [vmem:[#allocation5 + $0x8b4] sm:$0xf0]  ;;  %v10751_v34 = vld [vmem:[#allocation5 + $0xaa8] sm:$0xf] }
 0x166   :  { %3867 = vmatpush.bf16.msrb.mxu2 %v10176_v23  ;;  %v10640_v23 = vor.u32 %v14320_v12, %v10639_v8  ;;  %v14316_v2 = vld [vmem:[#allocation5 + $0x9b4] sm:$0xf0]  ;;  %v10879_v42 = vld [vmem:[#allocation5 + $0xba8] sm:$0xf]  ;;  %v10496_v49 = vor.u32 %v14284_v28, %v10495_v27  ;;  %v15675_v28 = vpop.f32.mrf.mxu3 }
 0x167   :  { %3881 = vmatpush.bf16.msrb.mxu3 %v10304_v30  ;;  %v10623_v30 = vld [vmem:[#allocation5 + $0x9a8] sm:$0xf]  ;;  %v14348_v37 = vld [vmem:[#allocation5 + $0xab4] sm:$0xf0] }
 0x168   :  { %3840 = vmatpush.bf16.msrb.mxu0 %v9904_v45  ;;  %v14380_v45 = vld [vmem:[#allocation5 + $0xbb4] sm:$0xf0]  ;;  %v10624_v50 = vor.u32 %v14316_v2, %v10623_v30  ;;  %v10607_v57 = vld [vmem:[#allocation5 + $0x988] sm:$0xf]  ;;  %v15677_v30 = vpop.f32.mrf.mxu0 }
 0x169   :  { %3854 = vmatpush.bf16.msrb.mxu1 %v10032_v52  ;;  %v10752_v52 = vor.u32 %v14348_v37, %v10751_v34  ;;  %v14280_v56 = vld [vmem:[#allocation5 + $0x894] sm:$0xf0]  ;;  %v10863_v5 = vld [vmem:[#allocation5 + $0xb88] sm:$0xf]  ;;  %v15679_v34 = vpop.f32.mrf.mxu1 }
 0x16a   :  { %3868 = vmatpush.bf16.msrb.mxu2 %v10160_v53  ;;  %v10479_v53 = vld [vmem:[#allocation5 + $0x888] sm:$0xf]  ;;  %v14376_v7 = vld [vmem:[#allocation5 + $0xb94] sm:$0xf0] }
 0x16b   :  { %3882 = vmatpush.bf16.msrb.mxu3 %v10288_v59  ;;  %3841 = vmatmul.bf16.vlgmr.msrb.gmra.mxu0 %v15569_v39  ;;  %v10880_v59 = vor.u32 %v14380_v45, %v10879_v42  ;;  %v10480_v8 = vor.u32 %v14280_v56, %v10479_v53  ;;  %v10463_v13 = vld [vmem:[#allocation5 + $0x868] sm:$0xf]  ;;  %v14276_v15 = vld [vmem:[#allocation5 + $0x874] sm:$0xf0] }
 0x16c   :  { %3889 = vmatpush.bf16.msra.mxu0 %v10528_v60  ;;  %3855 = vmatmul.bf16.vlgmr.msrb.gmra.mxu1 %v15573_v44  ;;  %v14312_v60 = vld [vmem:[#allocation5 + $0x994] sm:$0xf0]  ;;  %v10591_v16 = vld [vmem:[#allocation5 + $0x968] sm:$0xf]  ;;  %v10464_v37 = vor.u32 %v14276_v15, %v10463_v13  ;;  %v15681_v13 = vpop.f32.mrf.mxu2 }
 0x16d   :  { %3903 = vmatpush.bf16.msra.mxu1 %v10656_v3  ;;  %3869 = vmatmul.bf16.vlgmr.msrb.gmra.mxu2 %v15571_v43  ;;  %v10735_v3 = vld [vmem:[#allocation5 + $0xa88] sm:$0xf]  ;;  %v14340_v27 = vld [vmem:[#allocation5 + $0xa74] sm:$0xf0] }
 0x16e   :  { %3917 = vmatpush.bf16.msra.mxu2 %v10784_v4  ;;  %3883 = vmatmul.bf16.vlgmr.msrb.gmra.mxu3 %v15575_v47  ;;  %v14344_v4 = vld [vmem:[#allocation5 + $0xa94] sm:$0xf0]  ;;  %v10799_v47 = vld [vmem:[#allocation5 + $0xb08] sm:$0xf] }
 0x16f   :  { %3931 = vmatpush.bf16.msra.mxu3 %v10912_v11  ;;  %v10608_v11 = vor.u32 %v14312_v60, %v10607_v57  ;;  %v10736_v12 = vor.u32 %v14344_v4, %v10735_v3  ;;  %v14372_v2 = vld [vmem:[#allocation5 + $0xb74] sm:$0xf0]  ;;  %v10703_v57 = vld [vmem:[#allocation5 + $0xa48] sm:$0xf] }
 0x170   :  { %3890 = vmatpush.bf16.msra.mxu0 %v10512_v22  ;;  %v10864_v22 = vor.u32 %v14376_v7, %v10863_v5  ;;  %v14304_v56 = vld [vmem:[#allocation5 + $0x954] sm:$0xf0]  ;;  %v10831_v60 = vld [vmem:[#allocation5 + $0xb48] sm:$0xf] }
 0x171   :  { %3904 = vmatpush.bf16.msra.mxu1 %v10640_v23  ;;  %v14308_v23 = vld [vmem:[#allocation5 + $0x974] sm:$0xf0] }
 0x172   :  { %3918 = vmatpush.bf16.msra.mxu2 %v10768_v24  ;;  %v10719_v24 = vld [vmem:[#allocation5 + $0xa68] sm:$0xf]  ;;  %v10592_v42 = vor.u32 %v14308_v23, %v10591_v16  ;;  %v14368_v3 = vld [vmem:[#allocation5 + $0xb54] sm:$0xf0] }
 0x173   :  { %3932 = vmatpush.bf16.msra.mxu3 %v10896_v33  ;;  %v10847_v33 = vld [vmem:[#allocation5 + $0xb68] sm:$0xf]  ;;  %v10720_v45 = vor.u32 %v14340_v27, %v10719_v24  ;;  %v10832_v15 = vor.u32 %v14368_v3, %v10831_v60  ;;  %v14300_v16 = vld [vmem:[#allocation5 + $0x934] sm:$0xf0]  ;;  %v15683_v24 = vpop.f32.mrf.mxu3  ;;  %v15690_v60 = vpop.f32.mrf.mxu1 }
 0x174   :  { %3891 = vmatpush.bf16.msra.mxu0 %v10496_v49  ;;  %v10447_v49 = vld [vmem:[#allocation5 + $0x848] sm:$0xf]  ;;  %v10848_v53 = vor.u32 %v14372_v2, %v10847_v33  ;;  %v14332_v23 = vld [vmem:[#allocation5 + $0xa34] sm:$0xf0]  ;;  %v15685_v2 = vld [vmem:[#allocation7] sm:$0xf]  ;;  %v15695_v1 = vpop.f32.mrf.mxu2 }
 0x175   :  { %3905 = vmatpush.bf16.msra.mxu1 %v10624_v50  ;;  %v14272_v50 = vld [vmem:[#allocation5 + $0x854] sm:$0xf0]  ;;  %v10815_v27 = vld [vmem:[#allocation5 + $0xb28] sm:$0xf] }
 0x176   :  { %3919 = vmatpush.bf16.msra.mxu2 %v10752_v52  ;;  %v10575_v52 = vld [vmem:[#allocation5 + $0x948] sm:$0xf]  ;;  %v10448_v4 = vor.u32 %v14272_v50, %v10447_v49  ;;  %v14364_v33 = vld [vmem:[#allocation5 + $0xb34] sm:$0xf0]  ;;  %v15688_v50 = vpop.f32.mrf.mxu0 }
 0x177   :  { %3933 = vmatpush.bf16.msra.mxu3 %v10880_v59  ;;  %v14336_v59 = vld [vmem:[#allocation5 + $0xa54] sm:$0xf0]  ;;  %v10576_v5 = vor.u32 %v14304_v56, %v10575_v52  ;;  %v10543_v56 = vld [vmem:[#allocation5 + $0x908] sm:$0xf]  ;;  %v10816_v3 = vor.u32 %v14364_v33, %v10815_v27  ;;  %v16213_v33 = vperm.slane %v15685_v2, 1 }
 0x178   :  { %3892 = vmatpush.bf16.msra.mxu0 %v10480_v8  ;;  %v10704_v7 = vor.u32 %v14336_v59, %v10703_v57  ;;  %v10431_v8 = vld [vmem:[#allocation5 + $0x828] sm:$0xf]  ;;  %v14264_v49 = vld [vmem:[#allocation5 + $0x814] sm:$0xf0] }
 0x179   :  { %3906 = vmatpush.bf16.msra.mxu1 %v10608_v11  ;;  %v14268_v11 = vld [vmem:[#allocation5 + $0x834] sm:$0xf0]  ;;  %v10671_v59 = vld [vmem:[#allocation5 + $0xa08] sm:$0xf]  ;;  %v3563_v39 = vadd.f32 %v15677_v30, %v16213_v33 }
 0x17a   :  { %3920 = vmatpush.bf16.msra.mxu2 %v10736_v12  ;;  %v10559_v12 = vld [vmem:[#allocation5 + $0x928] sm:$0xf]  ;;  %v14296_v57 = vld [vmem:[#allocation5 + $0x914] sm:$0xf0] }
 0x17b   :  { %3934 = vmatpush.bf16.msra.mxu3 %v10864_v22  ;;  %v10687_v22 = vld [vmem:[#allocation5 + $0xa28] sm:$0xf]  ;;  %v10560_v52 = vor.u32 %v14300_v16, %v10559_v12  ;;  %v14452_v43 = vld [vmem:[#allocation5 + $0xdf4] sm:$0xf0]  ;;  %v10544_v12 = vor.u32 %v14296_v57, %v10543_v56  ;;  %v10672_v16 = vor.u32 %v14328_v63, %v10671_v59  ;;  %v15697_v57 = vpop.f32.mrf.mxu3  ;;  %v3577_v30 = vadd.f32 %v15679_v34, %v3563_v39 }
 0x17c   :  { %3893 = vmatpush.bf16.msra.mxu0 %v10464_v37  ;;  %v14360_v37 = vld [vmem:[#allocation5 + $0xb14] sm:$0xf0]  ;;  %v11279_v63 = vld [vmem:[#allocation5 + $0xec8] sm:$0xf] }
 0x17d   :  { %3907 = vmatpush.bf16.msra.mxu1 %v10592_v42  ;;  %v10432_v42 = vor.u32 %v14268_v11, %v10431_v8  ;;  %v14420_v8 = vld [vmem:[#allocation5 + $0xcf4] sm:$0xf0]  ;;  %v11167_v11 = vld [vmem:[#allocation5 + $0xde8] sm:$0xf] }
 0x17e   :  { %3921 = vmatpush.bf16.msra.mxu2 %v10720_v45  ;;  %v10415_v45 = vld [vmem:[#allocation5 + $0x808] sm:$0xf]  ;;  %v11168_v17 = vor.u32 %v14452_v43, %v11167_v11  ;;  %v14480_v56 = vld [vmem:[#allocation5 + $0xed4] sm:$0xf0]  ;;  %v15700_v59 = vpop.f32.mrf.mxu0 }
 0x17f   :  { %3935 = vmatpush.bf16.msra.mxu3 %v10848_v53  ;;  %v10688_v53 = vor.u32 %v14332_v23, %v10687_v22  ;;  %v10416_v44 = vor.u32 %v14264_v49, %v10415_v45  ;;  %v11423_v22 = vld [vmem:[#allocation5 + $0xfe8] sm:$0xf]  ;;  %v14516_v23 = vld [vmem:[#allocation5 + $0xff4] sm:$0xf0] }
 0x180   :  { %3894 = vmatpush.bf16.msra.mxu0 %v10448_v4  ;;  %v11039_v4 = vld [vmem:[#allocation5 + $0xce8] sm:$0xf]  ;;  %v14416_v45 = vld [vmem:[#allocation5 + $0xcd4] sm:$0xf0] }
 0x181   :  { %3908 = vmatpush.bf16.msra.mxu1 %v10576_v5  ;;  %v11295_v5 = vld [vmem:[#allocation5 + $0xee8] sm:$0xf]  ;;  %v11040_v27 = vor.u32 %v14420_v8, %v11039_v4  ;;  %v14412_v8 = vld [vmem:[#allocation5 + $0xcb4] sm:$0xf0] }
 0x182   :  { %3922 = vmatpush.bf16.msra.mxu2 %v10704_v7  ;;  %v14484_v7 = vld [vmem:[#allocation5 + $0xef4] sm:$0xf0]  ;;  %v11151_v49 = vld [vmem:[#allocation5 + $0xdc8] sm:$0xf] }
 0x183   :  { %3936 = vmatpush.bf16.msra.mxu3 %v10832_v15  ;;  %v10800_v15 = vor.u32 %v14360_v37, %v10799_v47  ;;  %v11296_v10 = vor.u32 %v14484_v7, %v11295_v5  ;;  %v11407_v47 = vld [vmem:[#allocation5 + $0xfc8] sm:$0xf]  ;;  %v14512_v37 = vld [vmem:[#allocation5 + $0xfd4] sm:$0xf0]  ;;  %v16214_v5 = vperm.slane %v15605_v54, 0 }
 0x184   :  { %3895 = vmatpush.bf16.msra.mxu0 %v10432_v42  ;;  %v11023_v42 = vld [vmem:[#allocation5 + $0xcc8] sm:$0xf]  ;;  %v14444_v39 = vld [vmem:[#allocation5 + $0xdb4] sm:$0xf0] }
 0x185   :  { %3909 = vmatpush.bf16.msra.mxu1 %v10560_v52  ;;  %v11424_v52 = vor.u32 %v14516_v23, %v11423_v22  ;;  %v11024_v43 = vor.u32 %v14416_v45, %v11023_v42  ;;  %v11007_v4 = vld [vmem:[#allocation5 + $0xca8] sm:$0xf]  ;;  %v3341_v7 = vadd.f32 %v15616_v51, %v16214_v5  ;;  %v14476_v22 = vld [vmem:[#allocation5 + $0xeb4] sm:$0xf0]  ;;  %v3591_v51 = vadd.f32 %v15681_v13, %v3577_v30 }
 0x186   :  { %3923 = vmatpush.bf16.msra.mxu2 %v10688_v53  ;;  %v14448_v53 = vld [vmem:[#allocation5 + $0xdd4] sm:$0xf0]  ;;  %v11135_v11 = vld [vmem:[#allocation5 + $0xda8] sm:$0xf]  ;;  %v11008_v54 = vor.u32 %v14412_v8, %v11007_v4 }
 0x187   :  { %3937 = vmatpush.bf16.msra.mxu3 %v10816_v3  ;;  %v11280_v3 = vor.u32 %v14480_v56, %v11279_v63  ;;  %v11263_v34 = vld [vmem:[#allocation5 + $0xea8] sm:$0xf]  ;;  %v11136_v23 = vor.u32 %v14444_v39, %v11135_v11  ;;  %v14408_v33 = vld [vmem:[#allocation5 + $0xc94] sm:$0xf0]  ;;  %v3355_v45 = vadd.f32 %v15618_v0, %v3341_v7  ;;  %v16215_v56 = vperm.slane %v15685_v2, 1 }
 0x188   :  { %3896 = vmatpush.bf16.msra.mxu0 %v10416_v44  ;;  %v11152_v44 = vor.u32 %v14448_v53, %v11151_v49  ;;  %v11119_v42 = vld [vmem:[#allocation5 + $0xd88] sm:$0xf]  ;;  %v14472_v63 = vld [vmem:[#allocation5 + $0xe94] sm:$0xf0] }
 0x189   :  { %3910 = vmatpush.bf16.msra.mxu1 %v10544_v12  ;;  %v15705_v12 = vpop.f32.mrf.mxu1  ;;  %v11247_v53 = vld [vmem:[#allocation5 + $0xe88] sm:$0xf]  ;;  %v14504_v13 = vld [vmem:[#allocation5 + $0xf94] sm:$0xf0]  ;;  %v3369_v7 = vadd.f32 %v15624_v18, %v3355_v45 }
 0x18a   :  { %3924 = vmatpush.bf16.msra.mxu2 %v10672_v16  ;;  %v11408_v16 = vor.u32 %v14512_v37, %v11407_v47  ;;  %v3565_v47 = vadd.f32 %v15688_v50, %v16215_v56  ;;  %v11375_v37 = vld [vmem:[#allocation5 + $0xf88] sm:$0xf]  ;;  %v11248_v4 = vor.u32 %v14472_v63, %v11247_v53  ;;  %v14404_v11 = vld [vmem:[#allocation5 + $0xc74] sm:$0xf0] }
 0x18b   :  { %3938 = vmatpush.bf16.msra.mxu3 %v10800_v15  ;;  %3897 = vmatmul.bf16.vlgmr.msra.gmra.mxu0 %v15581_v31  ;;  %v11264_v15 = vor.u32 %v14476_v22, %v11263_v34  ;;  %v10975_v8 = vld [vmem:[#allocation5 + $0xc68] sm:$0xf]  ;;  %v11376_v50 = vor.u32 %v14504_v13, %v11375_v37  ;;  %v14468_v34 = vld [vmem:[#allocation5 + $0xe74] sm:$0xf0]  ;;  %v3383_v45 = vadd.f32 %v15626_v25, %v3369_v7 }
 0x18c   :  { %3945 = vmatpush.bf16.msrb.mxu0 %v11040_v27  ;;  %3911 = vmatmul.bf16.vlgmr.msra.gmra.mxu1 %v15585_v36  ;;  %v10991_v27 = vld [vmem:[#allocation5 + $0xc88] sm:$0xf]  ;;  %v3579_v22 = vadd.f32 %v15690_v60, %v3565_v47  ;;  %v14464_v53 = vld [vmem:[#allocation5 + $0xe54] sm:$0xf0] }
 0x18d   :  { %3959 = vmatpush.bf16.msrb.mxu1 %v11168_v17  ;;  %3925 = vmatmul.bf16.vlgmr.msra.gmra.mxu2 %v15583_v35  ;;  %v14508_v17 = vld [vmem:[#allocation5 + $0xfb4] sm:$0xf0]  ;;  %v10992_v30 = vor.u32 %v14408_v33, %v10991_v27  ;;  %v11103_v5 = vld [vmem:[#allocation5 + $0xd68] sm:$0xf] }
 0x18e   :  { %3973 = vmatpush.bf16.msrb.mxu2 %v11296_v10  ;;  %v11391_v10 = vld [vmem:[#allocation5 + $0xfa8] sm:$0xf]  ;;  %3939 = vmatmul.bf16.vlgmr.msra.gmra.mxu3 %v15587_v40  ;;  %v14400_v33 = vld [vmem:[#allocation5 + $0xc54] sm:$0xf0]  ;;  %v3593_v63 = vadd.f32 %v15695_v1, %v3579_v22 }
 0x18f   :  { %3987 = vmatpush.bf16.msrb.mxu3 %v11424_v52  ;;  %v11392_v49 = vor.u32 %v14508_v17, %v11391_v10  ;;  %v14440_v52 = vld [vmem:[#allocation5 + $0xd94] sm:$0xf0]  ;;  %v11231_v39 = vld [vmem:[#allocation5 + $0xe68] sm:$0xf]  ;;  %v15723_v10 = vpop.f32.mrf.mxu0 }
 0x190   :  { %3946 = vmatpush.bf16.msrb.mxu0 %v11024_v43  ;;  %v15716_v43 = vpop.f32.mrf.mxu2  ;;  %v11120_v0 = vor.u32 %v14440_v52, %v11119_v42  ;;  %v14500_v17 = vld [vmem:[#allocation5 + $0xf74] sm:$0xf0]  ;;  %v10959_v27 = vld [vmem:[#allocation5 + $0xc48] sm:$0xf] }
 0x191   :  { %3960 = vmatpush.bf16.msrb.mxu1 %v11152_v44  ;;  %v3605_v44 = vadd.f32 %v15683_v24, %v3591_v51  ;;  %v11359_v24 = vld [vmem:[#allocation5 + $0xf68] sm:$0xf]  ;;  %v10976_v51 = vor.u32 %v14404_v11, %v10975_v8  ;;  %v14496_v47 = vld [vmem:[#allocation5 + $0xf54] sm:$0xf0] }
 0x192   :  { %3974 = vmatpush.bf16.msrb.mxu2 %v11280_v3  ;;  %v15719_v3 = vpop.f32.mrf.mxu3  ;;  %v11087_v42 = vld [vmem:[#allocation5 + $0xd48] sm:$0xf]  ;;  %v11360_v60 = vor.u32 %v14500_v17, %v11359_v24  ;;  %v14428_v1 = vld [vmem:[#allocation5 + $0xd34] sm:$0xf0] }
 0x193   :  { %3988 = vmatpush.bf16.msrb.mxu3 %v11408_v16  ;;  %v14436_v16 = vld [vmem:[#allocation5 + $0xd74] sm:$0xf0]  ;;  %v11215_v52 = vld [vmem:[#allocation5 + $0xe48] sm:$0xf] }
 0x194   :  { %3947 = vmatpush.bf16.msrb.mxu0 %v11008_v54  ;;  %v15725_v54 = vpop.f32.mrf.mxu1  ;;  %v11104_v18 = vor.u32 %v14436_v16, %v11103_v5  ;;  %v11343_v56 = vld [vmem:[#allocation5 + $0xf48] sm:$0xf]  ;;  %v14460_v7 = vld [vmem:[#allocation5 + $0xe34] sm:$0xf0] }
 0x195   :  { %3961 = vmatpush.bf16.msrb.mxu1 %v11136_v23  ;;  %v3619_v23 = vadd.f32 %v15700_v59, %v3605_v44  ;;  %v10960_v59 = vor.u32 %v14400_v33, %v10959_v27  ;;  %v10943_v44 = vld [vmem:[#allocation5 + $0xc28] sm:$0xf]  ;;  %v11344_v11 = vor.u32 %v14496_v47, %v11343_v56  ;;  %v14424_v27 = vld [vmem:[#allocation5 + $0xd14] sm:$0xf0]  ;;  %v14066_v56 = vld [vmem:[#allocation5 + $0x1ec] sm:$0xf] }
 0x196   :  { %3975 = vmatpush.bf16.msrb.mxu2 %v11264_v15  ;;  %v11232_v15 = vor.u32 %v14468_v34, %v11231_v39  ;;  %v11071_v25 = vld [vmem:[#allocation5 + $0xd28] sm:$0xf]  ;;  %v14492_v34 = vld [vmem:[#allocation5 + $0xf34] sm:$0xf0] }
 0x197   :  { %3989 = vmatpush.bf16.msrb.mxu3 %v11392_v49  ;;  %v14432_v49 = vld [vmem:[#allocation5 + $0xd54] sm:$0xf0]  ;;  %v3633_v37 = vadd.f32 %v15705_v12, %v3619_v23  ;;  %v11199_v5 = vld [vmem:[#allocation5 + $0xe28] sm:$0xf]  ;;  %v3674_v12 = vpop.f32.mrf.mxu0  ;;  %v11072_v23 = vor.u32 %v14428_v1, %v11071_v25  ;;  %v9889_v25 = vld [vmem:[#allocation5 + $0x3f8] sm:$0xf0] }
 0x198   :  { %3948 = vmatpush.bf16.msrb.mxu0 %v10992_v30  ;;  %v11088_v13 = vor.u32 %v14432_v49, %v11087_v42  ;;  %v11216_v30 = vor.u32 %v14464_v53, %v11215_v52  ;;  %v15732_v8 = vpop.f32.mrf.mxu2  ;;  %v11327_v39 = vld [vmem:[#allocation5 + $0xf28] sm:$0xf]  ;;  %v14488_v49 = vld [vmem:[#allocation5 + $0xf14] sm:$0xf0]  ;;  %v14034_v53 = vld [vmem:[#allocation5 + $0xec] sm:$0xf] }
 0x199   :  { %3962 = vmatpush.bf16.msrb.mxu1 %v11120_v0  ;;  %v14396_v0 = vld [vmem:[#allocation5 + $0xc34] sm:$0xf0]  ;;  %v10927_v17 = vld [vmem:[#allocation5 + $0xc08] sm:$0xf]  ;;  %v11328_v42 = vor.u32 %v14492_v34, %v11327_v39  ;;  %v14030_v39 = vld [vmem:[#allocation5 + $0xcc] sm:$0xf] }
 0x19a   :  { %3976 = vmatpush.bf16.msrb.mxu2 %v11248_v4  ;;  %v3397_v4 = vadd.f32 %v15631_v26, %v3383_v45  ;;  %v15735_v16 = vpop.f32.mrf.mxu3  ;;  %v10944_v24 = vor.u32 %v14396_v0, %v10943_v44  ;;  %v14392_v26 = vld [vmem:[#allocation5 + $0xc14] sm:$0xf0]  ;;  %v14130_v0 = vld [vmem:[#allocation5 + $0x3ec] sm:$0xf]  ;;  %v9489_v34 = vld [vmem:[#allocation5 + $0xd8] sm:$0xf0] }
 0x19b   :  { %3990 = vmatpush.bf16.msrb.mxu3 %v11376_v50  ;;  %v3607_v50 = vadd.f32 %v15697_v57, %v3593_v63  ;;  %v11183_v57 = vld [vmem:[#allocation5 + $0xe08] sm:$0xf]  ;;  %v14456_v45 = vld [vmem:[#allocation5 + $0xe14] sm:$0xf0]  ;;  %v9505_v63 = vld [vmem:[#allocation5 + $0xf8] sm:$0xf0]  ;;  %v10928_v47 = vor.u32 %v14392_v26, %v10927_v17  ;;  %v9892_v17 = vor.u32 %v14130_v0, %v9889_v25 }
 0x19c   :  { %3949 = vmatpush.bf16.msrb.mxu0 %v10976_v51  ;;  %v15737_v22 = vpop.f32.mrf.mxu1  ;;  %v3647_v51 = vadd.f32 %v15716_v43, %v3633_v37  ;;  %v3411_v33 = vadd.f32 %v15633_v29, %v3397_v4  ;;  %v14098_v37 = vld [vmem:[#allocation5 + $0x2ec] sm:$0xf]  ;;  %v11184_v44 = vor.u32 %v14456_v45, %v11183_v57  ;;  %v9617_v26 = vld [vmem:[#allocation5 + $0x1d8] sm:$0xf0] }
 0x19d   :  { %3963 = vmatpush.bf16.msrb.mxu1 %v11104_v18  ;;  %v11200_v18 = vor.u32 %v14460_v7, %v11199_v5  ;;  %v3621_v52 = vadd.f32 %v15723_v10, %v3607_v50  ;;  %v14054_v0 = vld [vmem:[#allocation5 + $0x18c] sm:$0xf]  ;;  %v9585_v25 = vld [vmem:[#allocation5 + $0x198] sm:$0xf0] }
 0x19e   :  { %3977 = vmatpush.bf16.msrb.mxu2 %v11232_v15  ;;  %v11055_v15 = vld [vmem:[#allocation5 + $0xd08] sm:$0xf]  ;;  %v3425_v43 = vadd.f32 %v15639_v9, %v3411_v33  ;;  %v9492_v33 = vor.u32 %v14030_v39, %v9489_v34  ;;  %v14118_v39 = vld [vmem:[#allocation5 + $0x38c] sm:$0xf]  ;;  %v9841_v34 = vld [vmem:[#allocation5 + $0x398] sm:$0xf0] }
 0x19f   :  { %3991 = vmatpush.bf16.msrb.mxu3 %v11360_v60  ;;  %v11311_v60 = vld [vmem:[#allocation5 + $0xf08] sm:$0xf]  ;;  %v11056_v29 = vor.u32 %v14424_v27, %v11055_v15  ;;  %v3635_v1 = vadd.f32 %v15725_v54, %v3621_v52  ;;  %v3676_v15 = vpop.f32.mrf.mxu0  ;;  %v14126_v54 = vld [vmem:[#allocation5 + $0x3cc] sm:$0xf] }
 0x1a0   :  { %3950 = vmatpush.bf16.msrb.mxu0 %v10960_v59  ;;  %v9633_v59 = vld [vmem:[#allocation5 + $0x1f8] sm:$0xf0]  ;;  %v3702_v4 = vpop.f32.mrf.mxu2  ;;  %v11312_v10 = vor.u32 %v14488_v49, %v11311_v60  ;;  %v14026_v60 = vld [vmem:[#allocation5 + $0xac] sm:$0xf] }
 0x1a1   :  { %3964 = vmatpush.bf16.msrb.mxu1 %v11088_v13  ;;  %v9761_v13 = vld [vmem:[#allocation5 + $0x2f8] sm:$0xf0]  ;;  %v9636_v7 = vor.u32 %v14066_v56, %v9633_v59 }
 0x1a2   :  { %3978 = vmatpush.bf16.msrb.mxu2 %v11216_v30  ;;  %v3661_v30 = vadd.f32 %v15719_v3, %v3647_v51  ;;  %v3716_v5 = vpop.f32.mrf.mxu3  ;;  %v9764_v50 = vor.u32 %v14098_v37, %v9761_v13  ;;  %v3439_v3 = vadd.f32 %v15641_v6, %v3425_v43  ;;  %v14094_v51 = vld [vmem:[#allocation5 + $0x2cc] sm:$0xf]  ;;  %v9473_v49 = vld [vmem:[#allocation5 + $0xb8] sm:$0xf0] }
 0x1a3   :  { %3992 = vmatpush.bf16.msrb.mxu3 %v11344_v11  ;;  %v9508_v11 = vor.u32 %v14034_v53, %v9505_v63  ;;  %v9601_v53 = vld [vmem:[#allocation5 + $0x1b8] sm:$0xf0]  ;;  %v14090_v63 = vld [vmem:[#allocation5 + $0x2ac] sm:$0xf]  ;;  %v9476_v37 = vor.u32 %v14026_v60, %v9473_v49 }
 0x1a4   :  { %3951 = vmatpush.bf16.msrb.mxu0 %v10944_v24  ;;  %v3675_v9 = vadd.f32 %v3674_v12, %v3661_v30  ;;  %v14062_v24 = vld [vmem:[#allocation5 + $0x1cc] sm:$0xf]  ;;  %v9873_v12 = vld [vmem:[#allocation5 + $0x3d8] sm:$0xf0]  ;;  %v3453_v27 = vadd.f32 %v15646_v14, %v3439_v3  ;;  %v3690_v57 = vpop.f32.mrf.mxu1  ;;  %v9588_v3 = vor.u32 %v14054_v0, %v9585_v25 }
 0x1a5   :  { %3965 = vmatpush.bf16.msrb.mxu1 %v11072_v23  ;;  %v9745_v23 = vld [vmem:[#allocation5 + $0x2d8] sm:$0xf0]  ;;  %v9876_v52 = vor.u32 %v14126_v54, %v9873_v12  ;;  %v14022_v13 = vld [vmem:[#allocation5 + $0x8c] sm:$0xf] }
 0x1a6   :  { %3979 = vmatpush.bf16.msrb.mxu2 %v11200_v18  ;;  %v3649_v18 = vadd.f32 %v15732_v8, %v3635_v1  ;;  %v3689_v6 = vadd.f32 %v15737_v22, %v3675_v9  ;;  %v9748_v45 = vor.u32 %v14094_v51, %v9745_v23  ;;  %v14058_v8 = vld [vmem:[#allocation5 + $0x1ac] sm:$0xf]  ;;  %v9729_v14 = vld [vmem:[#allocation5 + $0x2b8] sm:$0xf0]  ;;  %v3467_v59 = vadd.f32 %v15648_v19, %v3453_v27 }
 0x1a7   :  { %3993 = vmatpush.bf16.msrb.mxu3 %v11328_v42  ;;  %v9620_v42 = vor.u32 %v14062_v24, %v9617_v26  ;;  %v14122_v22 = vld [vmem:[#allocation5 + $0x3ac] sm:$0xf]  ;;  %v9713_v19 = vld [vmem:[#allocation5 + $0x298] sm:$0xf0] }
 0x1a8   :  { %3952 = vmatpush.bf16.msrb.mxu0 %v10928_v47  ;;  %v3663_v56 = vadd.f32 %v15735_v16, %v3649_v18  ;;  %v3703_v43 = vadd.f32 %v3702_v4, %v3689_v6  ;;  %v9857_v47 = vld [vmem:[#allocation5 + $0x3b8] sm:$0xf0]  ;;  %v3481_v4 = vadd.f32 %v15654_v55, %v3467_v59  ;;  %v14086_v1 = vld [vmem:[#allocation5 + $0x28c] sm:$0xf] }
 0x1a9   :  { %3966 = vmatpush.bf16.msrb.mxu1 %v11056_v29  ;;  %v9604_v29 = vor.u32 %v14058_v8, %v9601_v53  ;;  %v9457_v16 = vld [vmem:[#allocation5 + $0x98] sm:$0xf0]  ;;  %v9716_v23 = vor.u32 %v14086_v1, %v9713_v19  ;;  %v14018_v55 = vld [vmem:[#allocation5 + $0x6c] sm:$0xf] }
 0x1aa   :  { %3980 = vmatpush.bf16.msrb.mxu2 %v11184_v44  ;;  %v3677_v30 = vadd.f32 %v3676_v15, %v3663_v56  ;;  %v9732_v44 = vor.u32 %v14090_v63, %v9729_v14  ;;  %v3717_v9 = vadd.f32 %v3716_v5, %v3703_v43  ;;  %v9460_v24 = vor.u32 %v14022_v13, %v9457_v16  ;;  %v9441_v18 = vld [vmem:[#allocation5 + $0x78] sm:$0xf0]  ;;  %v14050_v15 = vld [vmem:[#allocation5 + $0x16c] sm:$0xf] }
 0x1ab   :  { %3994 = vmatpush.bf16.msrb.mxu3 %v11312_v10  ;;  %3953 = vmatmul.bf16.vlgmr.msrb.gmra.mxu0 %v15593_v32  ;;  %v3704_v10 = vpop.f32.mrf.mxu2  ;;  %v3495_v54 = vadd.f32 %v15656_v61, %v3481_v4  ;;  %v9844_v5 = vor.u32 %v14118_v39, %v9841_v34  ;;  %v9569_v12 = vld [vmem:[#allocation5 + $0x178] sm:$0xf0]  ;;  %v14082_v27 = vld [vmem:[#allocation5 + $0x26c] sm:$0xf] }
 0x1ac   :  { %4001 = vmatpush.bf16.msra.mxu0 %v9508_v11  ;;  %3967 = vmatmul.bf16.vlgmr.msrb.gmra.mxu1 %v15597_v41  ;;  %v9860_v11 = vor.u32 %v14122_v22, %v9857_v47  ;;  %v3691_v26 = vadd.f32 %v3690_v57, %v3677_v30  ;;  %v9444_v57 = vor.u32 %v14018_v55, %v9441_v18  ;;  %v14014_v49 = vld [vmem:[#allocation5 + $0x4c] sm:$0xf]  ;;  %v9425_v63 = vld [vmem:[#allocation5 + $0x58] sm:$0xf0] }
 0x1ad   :  { %4015 = vmatpush.bf16.msra.mxu1 %v9636_v7  ;;  %3981 = vmatmul.bf16.vlgmr.msrb.gmra.mxu2 %v15595_v38  ;;  %v3718_v7 = vpop.f32.mrf.mxu3  ;;  %v3509_v60 = vadd.f32 %v15666_v20, %v3495_v54  ;;  %v14046_v61 = vld [vmem:[#allocation5 + $0x14c] sm:$0xf]  ;;  %v9553_v14 = vld [vmem:[#allocation5 + $0x158] sm:$0xf0]  ;;  %v9428_v16 = vor.u32 %v14014_v49, %v9425_v63 }
 0x1ae   :  { %4029 = vmatpush.bf16.msra.mxu2 %v9764_v50  ;;  %3995 = vmatmul.bf16.vlgmr.msrb.gmra.mxu3 %v15599_v46  ;;  %v3730_v50 = vpop.f32.mrf.mxu0  ;;  %v3705_v6 = vadd.f32 %v3704_v10, %v3691_v26  ;;  %v14078_v22 = vld [vmem:[#allocation5 + $0x24c] sm:$0xf]  ;;  %v9681_v47 = vld [vmem:[#allocation5 + $0x258] sm:$0xf0]  ;;  %v9556_v0 = vor.u32 %v14046_v61, %v9553_v14 }
 0x1af   :  { %4043 = vmatpush.bf16.msra.mxu3 %v9892_v17  ;;  %v3744_v17 = vpop.f32.mrf.mxu1  ;;  %v3731_v51 = vadd.f32 %v3730_v50, %v3717_v9  ;;  %v14110_v30 = vld [vmem:[#allocation5 + $0x34c] sm:$0xf]  ;;  %v9409_v1 = vld [vmem:[#allocation5 + $0x38] sm:$0xf0] }
 0x1b0   :  { %4002 = vmatpush.bf16.msra.mxu0 %v9492_v33  ;;  %v9697_v33 = vld [vmem:[#allocation5 + $0x278] sm:$0xf0]  ;;  %v3719_v59 = vadd.f32 %v3718_v7, %v3705_v6  ;;  %v14010_v25 = vld [vmem:[#allocation5 + $0x2c] sm:$0xf] }
 0x1b1   :  { %4016 = vmatpush.bf16.msra.mxu1 %v9620_v42  ;;  %v14114_v42 = vld [vmem:[#allocation5 + $0x36c] sm:$0xf]  ;;  %v3745_v8 = vadd.f32 %v3744_v17, %v3731_v51  ;;  %v9700_v53 = vor.u32 %v14082_v27, %v9697_v33  ;;  %v9537_v9 = vld [vmem:[#allocation5 + $0x138] sm:$0xf0]  ;;  %v9412_v51 = vor.u32 %v14010_v25, %v9409_v1 }
 0x1b2   :  { %4030 = vmatpush.bf16.msra.mxu2 %v9748_v45  ;;  %v9825_v45 = vld [vmem:[#allocation5 + $0x378] sm:$0xf0]  ;;  %v14042_v19 = vld [vmem:[#allocation5 + $0x12c] sm:$0xf] }
 0x1b3   :  { %4044 = vmatpush.bf16.msra.mxu3 %v9876_v52  ;;  %v9572_v52 = vor.u32 %v14050_v15, %v9569_v12  ;;  %v9828_v56 = vor.u32 %v14114_v42, %v9825_v45  ;;  %v3758_v43 = vpop.f32.mrf.mxu2  ;;  %v14074_v39 = vld [vmem:[#allocation5 + $0x22c] sm:$0xf]  ;;  %v9665_v34 = vld [vmem:[#allocation5 + $0x238] sm:$0xf0] }
 0x1b4   :  { %4003 = vmatpush.bf16.msra.mxu0 %v9476_v37  ;;  %v3759_v37 = vadd.f32 %v3758_v43, %v3745_v8  ;;  %v14106_v17 = vld [vmem:[#allocation5 + $0x32c] sm:$0xf]  ;;  %v9793_v26 = vld [vmem:[#allocation5 + $0x338] sm:$0xf0]  ;;  %v9668_v12 = vor.u32 %v14074_v39, %v9665_v34 }
 0x1b5   :  { %4017 = vmatpush.bf16.msra.mxu1 %v9604_v29  ;;  %v3772_v20 = vpop.f32.mrf.mxu3  ;;  %v9809_v29 = vld [vmem:[#allocation5 + $0x358] sm:$0xf0]  ;;  %v14006_v55 = vld [vmem:[#allocation5 + $0xc] sm:$0xf] }
 0x1b6   :  { %4031 = vmatpush.bf16.msra.mxu2 %v9732_v44  ;;  %v3732_v13 = vpop.f32.mrf.mxu0  ;;  %v3523_v44 = vadd.f32 %v15670_v48, %v3509_v60  ;;  %v3773_v10 = vadd.f32 %v3772_v20, %v3759_v37  ;;  %v9812_v7 = vor.u32 %v14110_v30, %v9809_v29  ;;  %v9393_v18 = vld [vmem:[#allocation5 + $0x18] sm:$0xf0]  ;;  %v14038_v15 = vld [vmem:[#allocation5 + $0x10c] sm:$0xf] }
 0x1b7   :  { %4045 = vmatpush.bf16.msra.mxu3 %v9860_v11  ;;  %v3733_v4 = vadd.f32 %v3732_v13, %v3719_v59  ;;  %v9684_v11 = vor.u32 %v14078_v22, %v9681_v47  ;;  %v3746_v50 = vpop.f32.mrf.mxu1  ;;  %v9521_v27 = vld [vmem:[#allocation5 + $0x118] sm:$0xf0]  ;;  %v14070_v33 = vld [vmem:[#allocation5 + $0x20c] sm:$0xf]  ;;  %v9396_v63 = vor.u32 %v14006_v55, %v9393_v18 }
 0x1b8   :  { %4004 = vmatpush.bf16.msra.mxu0 %v9460_v24  ;;  %v4225_v24 = vmax.f32 %v15659_v62, 0.0  ;;  %v3537_v48 = vadd.f32 %v15673_v21, %v3523_v44  ;;  %v9649_v62 = vld [vmem:[#allocation5 + $0x218] sm:$0xf0]  ;;  %v9796_v21 = vor.u32 %v14106_v17, %v9793_v26  ;;  %v14102_v42 = vld [vmem:[#allocation5 + $0x30c] sm:$0xf]  ;;  %v9524_v22 = vor.u32 %v14038_v15, %v9521_v27 }
 0x1b9   :  { %4018 = vmatpush.bf16.msra.mxu1 %v9588_v3  ;;  %v4226_v3 = vmax.f32 %v3773_v10, 0.0  ;;  %v9777_v45 = vld [vmem:[#allocation5 + $0x318] sm:$0xf0]  ;;  %v14162_v60 = vld [vmem:[#allocation5 + $0x4ec] sm:$0xf]  ;;  %v9652_v47 = vor.u32 %v14070_v33, %v9649_v62 }
 0x1ba   :  { %4032 = vmatpush.bf16.msra.mxu2 %v9716_v23  ;;  %v9540_v23 = vor.u32 %v14042_v19, %v9537_v9  ;;  %v10145_v61 = vld [vmem:[#allocation5 + $0x5f8] sm:$0xf0]  ;;  %v14226_v14 = vld [vmem:[#allocation5 + $0x6ec] sm:$0xf] }
 0x1bb   :  { %4046 = vmatpush.bf16.msra.mxu3 %v9844_v5  ;;  %v15761_v54 = vpack.c.bf16 %v4226_v3, %v4225_v24  ;;  %v3747_v5 = vadd.f32 %v3746_v50, %v3733_v4  ;;  %v3760_v6 = vpop.f32.mrf.mxu2  ;;  %v14258_v59 = vld [vmem:[#allocation5 + $0x7ec] sm:$0xf]  ;;  %v10401_v37 = vld [vmem:[#allocation5 + $0x7f8] sm:$0xf0] }
 0x1bc   :  { %4005 = vmatpush.bf16.msra.mxu0 %v9444_v57  ;;  %v3551_v57 = vadd.f32 %v15675_v28, %v3537_v48  ;;  %v14158_v13 = vld [vmem:[#allocation5 + $0x4cc] sm:$0xf]  ;;  %v9780_v28 = vor.u32 %v14102_v42, %v9777_v45  ;;  %v10001_v30 = vld [vmem:[#allocation5 + $0x4d8] sm:$0xf0]  ;;  %v10404_v1 = vor.u32 %v14258_v59, %v10401_v37  ;;  %v683_v45 = vperm.slane %v15685_v2, 2 }
 0x1bd   :  { %4019 = vmatpush.bf16.msra.mxu1 %v9572_v52  ;;  %4237 = vst [vmem:[#allocation16] sm:$0xff] %v15761_v54  ;;  %v3761_v49 = vadd.f32 %v3760_v6, %v3747_v5  ;;  %v3774_v8 = vpop.f32.mrf.mxu3  ;;  %v10017_v52 = vld [vmem:[#allocation5 + $0x4f8] sm:$0xf0]  ;;  %v14190_v29 = vld [vmem:[#allocation5 + $0x5cc] sm:$0xf]  ;;  %v10004_v50 = vor.u32 %v14158_v13, %v10001_v30  ;;  %v4383_v48 = vunpack.c.l.b16 %v15761_v54  ;;  %v4384_v3 = vunpack.c.h.b16 %v15761_v54 }
 0x1be   :  { %4033 = vmatpush.bf16.msra.mxu2 %v9700_v53  ;;  %v14194_v53 = vld [vmem:[#allocation5 + $0x5ec] sm:$0xf]  ;;  %v10020_v20 = vor.u32 %v14162_v60, %v10017_v52  ;;  %v10129_v44 = vld [vmem:[#allocation5 + $0x5d8] sm:$0xf0]  ;;  %v11785_v2 = vld [vmem:[#allocation8 + $0x2d0] sm:$0xf0] }
 0x1bf   :  { %4047 = vmatpush.bf16.msra.mxu3 %v9828_v56  ;;  %v10273_v56 = vld [vmem:[#allocation5 + $0x6f8] sm:$0xf0]  ;;  %v3775_v43 = vadd.f32 %v3774_v8, %v3761_v49  ;;  %v10148_v25 = vor.u32 %v14194_v53, %v10145_v61  ;;  %v14222_v10 = vld [vmem:[#allocation5 + $0x6cc] sm:$0xf]  ;;  %v10132_v39 = vor.u32 %v14190_v29, %v10129_v44 }
 0x1c0   :  { %4006 = vmatpush.bf16.msra.mxu0 %v9428_v16  ;;  %v4229_v16 = vmax.f32 %v3551_v57, 0.0  ;;  %v10276_v4 = vor.u32 %v14226_v14, %v10273_v56  ;;  %v14254_v9 = vld [vmem:[#allocation5 + $0x7cc] sm:$0xf]  ;;  %v10113_v18 = vld [vmem:[#allocation5 + $0x5b8] sm:$0xf0] }
 0x1c1   :  { %4020 = vmatpush.bf16.msra.mxu1 %v9556_v0  ;;  %v4230_v0 = vmax.f32 %v3775_v43, 0.0  ;;  %v14154_v24 = vld [vmem:[#allocation5 + $0x4ac] sm:$0xf]  ;;  %v10241_v5 = vld [vmem:[#allocation5 + $0x6b8] sm:$0xf0] }
 0x1c2   :  { %4034 = vmatpush.bf16.msra.mxu2 %v9684_v11  ;;  %v10257_v11 = vld [vmem:[#allocation5 + $0x6d8] sm:$0xf0]  ;;  %v14218_v15 = vld [vmem:[#allocation5 + $0x6ac] sm:$0xf] }
 0x1c3   :  { %4048 = vmatpush.bf16.msra.mxu3 %v9812_v7  ;;  %v4235_v19 = vpack.c.bf16 %v4230_v0, %v4229_v16  ;;  %v10385_v7 = vld [vmem:[#allocation5 + $0x7d8] sm:$0xf0]  ;;  %v10260_v34 = vor.u32 %v14222_v10, %v10257_v11  ;;  %v14250_v33 = vld [vmem:[#allocation5 + $0x7ac] sm:$0xf] }
 0x1c4   :  { %4007 = vmatpush.bf16.msra.mxu0 %v9412_v51  ;;  %v9985_v51 = vld [vmem:[#allocation5 + $0x4b8] sm:$0xf0]  ;;  %v10388_v55 = vor.u32 %v14254_v9, %v10385_v7  ;;  %v16218_v42 = vld [vmem:[#allocation29_spill] sm:$0xff] }
 0x1c5   :  { %4021 = vmatpush.bf16.msra.mxu1 %v9540_v23  ;;  %4239 = vst [vmem:[#allocation16 + $0x10] sm:$0xff] %v4235_v19  ;;  %v4387_v17 = vunpack.c.l.b16 %v4235_v19  ;;  %v4388_v26 = vunpack.c.h.b16 %v4235_v19  ;;  %v14186_v23 = vld [vmem:[#allocation5 + $0x5ac] sm:$0xf]  ;;  %v10369_v54 = vld [vmem:[#allocation5 + $0x7b8] sm:$0xf0]  ;;  %v9988_v6 = vor.u32 %v14154_v24, %v9985_v51 }
 0x1c6   :  { %4035 = vmatpush.bf16.msra.mxu2 %v9668_v12  ;;  %v16216_v62 = vld [vmem:[#allocation27_spill] sm:$0xff]  ;;  %v10116_v60 = vor.u32 %v14186_v23, %v10113_v18  ;;  %v14150_v57 = vld [vmem:[#allocation5 + $0x48c] sm:$0xf]  ;;  %v10372_v52 = vor.u32 %v14250_v33, %v10369_v54 }
 0x1c7   :  { %4049 = vmatpush.bf16.msra.mxu3 %v9796_v21  ;;  %v15768_v12 = vpack.c.b16 %v4387_v17, %v4383_v48  ;;  %v15770_v27 = vpack.c.b16 %v4388_v26, %v4384_v3  ;;  %v16217_v21 = vld [vmem:[#allocation28_spill] sm:$0xff]  ;;  %v9969_v49 = vld [vmem:[#allocation5 + $0x498] sm:$0xf0]  ;;  %v14182_v8 = vld [vmem:[#allocation5 + $0x58c] sm:$0xf] }
 0x1c8   :  { %4008 = vmatpush.bf16.msra.mxu0 %v9396_v63  ;;  %v10097_v53 = vld [vmem:[#allocation5 + $0x598] sm:$0xf0]  ;;  %v14214_v63 = vld [vmem:[#allocation5 + $0x68c] sm:$0xf]  ;;  %v3786_v43 = vpop.f32.mrf.mxu0 }
 0x1c9   :  { %4022 = vmatpush.bf16.msra.mxu1 %v9524_v22  ;;  %v10225_v61 = vld [vmem:[#allocation5 + $0x698] sm:$0xf0]  ;;  %v14246_v14 = vld [vmem:[#allocation5 + $0x78c] sm:$0xf]  ;;  %v9972_v22 = vor.u32 %v14150_v57, %v9969_v49  ;;  %v10100_v59 = vor.u32 %v14182_v8, %v10097_v53  ;;  %v3800_v30 = vpop.f32.mrf.mxu1 }
 0x1ca   :  { %4036 = vmatpush.bf16.msra.mxu2 %v9652_v47  ;;  %v10353_v56 = vld [vmem:[#allocation5 + $0x798] sm:$0xf0]  ;;  %v3787_v47 = vadd.f32 %v3786_v43, %v683_v45  ;;  %v10228_v37 = vor.u32 %v14214_v63, %v10225_v61  ;;  %v14146_v13 = vld [vmem:[#allocation5 + $0x46c] sm:$0xf] }
 0x1cb   :  { %4050 = vmatpush.bf16.msra.mxu3 %v9780_v28  ;;  %4009 = vmatmul.bf16.vlgmr.msra.gmra.mxu0 %v15557_v58  ;;  %v10244_v58 = vor.u32 %v14218_v15, %v10241_v5  ;;  %v9953_v28 = vld [vmem:[#allocation5 + $0x478] sm:$0xf0]  ;;  %v10356_v29 = vor.u32 %v14246_v14, %v10353_v56  ;;  %v14210_v16 = vld [vmem:[#allocation5 + $0x66c] sm:$0xf] }
 0x1cc   :  { %4057 = vmatpush.bf16.msrb.mxu0 %v10020_v20  ;;  %4023 = vmatmul.bf16.vlgmr.msra.gmra.mxu1 %v16217_v21  ;;  %v14178_v20 = vld [vmem:[#allocation5 + $0x56c] sm:$0xf]  ;;  %v10081_v44 = vld [vmem:[#allocation5 + $0x578] sm:$0xf0]  ;;  %v9956_v11 = vor.u32 %v14146_v13, %v9953_v28 }
 0x1cd   :  { %4071 = vmatpush.bf16.msrb.mxu1 %v10148_v25  ;;  %4037 = vmatmul.bf16.vlgmr.msra.gmra.mxu2 %v16216_v62  ;;  %v10209_v0 = vld [vmem:[#allocation5 + $0x678] sm:$0xf0]  ;;  %v3801_v25 = vadd.f32 %v3800_v30, %v3787_v47  ;;  %v14142_v9 = vld [vmem:[#allocation5 + $0x44c] sm:$0xf] }
 0x1ce   :  { %4085 = vmatpush.bf16.msrb.mxu2 %v10276_v4  ;;  %4051 = vmatmul.bf16.vlgmr.msra.gmra.mxu3 %v16218_v42  ;;  %v14242_v4 = vld [vmem:[#allocation5 + $0x76c] sm:$0xf]  ;;  %v10337_v10 = vld [vmem:[#allocation5 + $0x778] sm:$0xf0]  ;;  %v10212_v19 = vor.u32 %v14210_v16, %v10209_v0 }
 0x1cf   :  { %4099 = vmatpush.bf16.msrb.mxu3 %v10404_v1  ;;  %v10084_v1 = vor.u32 %v14178_v20, %v10081_v44  ;;  %v9937_v7 = vld [vmem:[#allocation5 + $0x458] sm:$0xf0]  ;;  %v14206_v24 = vld [vmem:[#allocation5 + $0x64c] sm:$0xf] }
 0x1d0   :  { %4058 = vmatpush.bf16.msrb.mxu0 %v10004_v50  ;;  %v14174_v50 = vld [vmem:[#allocation5 + $0x54c] sm:$0xf]  ;;  %v10193_v48 = vld [vmem:[#allocation5 + $0x658] sm:$0xf0]  ;;  %v3814_v3 = vpop.f32.mrf.mxu2  ;;  %v9940_v23 = vor.u32 %v14142_v9, %v9937_v7  ;;  %v15780_v9 = vpop.f32.mrf.mxu0 }
 0x1d1   :  { %4072 = vmatpush.bf16.msrb.mxu1 %v10132_v39  ;;  %v10340_v39 = vor.u32 %v14242_v4, %v10337_v10  ;;  %v14238_v17 = vld [vmem:[#allocation5 + $0x74c] sm:$0xf]  ;;  %v10321_v26 = vld [vmem:[#allocation5 + $0x758] sm:$0xf0]  ;;  %v3815_v51 = vadd.f32 %v3814_v3, %v3801_v25  ;;  %v10196_v15 = vor.u32 %v14206_v24, %v10193_v48 }
 0x1d2   :  { %4086 = vmatpush.bf16.msrb.mxu2 %v10260_v34  ;;  %v10065_v34 = vld [vmem:[#allocation5 + $0x558] sm:$0xf0]  ;;  %v14138_v5 = vld [vmem:[#allocation5 + $0x42c] sm:$0xf]  ;;  %v10324_v21 = vor.u32 %v14238_v17, %v10321_v26 }
 0x1d3   :  { %4100 = vmatpush.bf16.msrb.mxu3 %v10388_v55  ;;  %v3828_v55 = vpop.f32.mrf.mxu3  ;;  %v10068_v18 = vor.u32 %v14174_v50, %v10065_v34  ;;  %v9921_v33 = vld [vmem:[#allocation5 + $0x438] sm:$0xf0]  ;;  %v14170_v54 = vld [vmem:[#allocation5 + $0x52c] sm:$0xf] }
 0x1d4   :  { %4059 = vmatpush.bf16.msrb.mxu0 %v9988_v6  ;;  %v15778_v62 = vadd.f32 %v3828_v55, %v3815_v51  ;;  %v10049_v6 = vld [vmem:[#allocation5 + $0x538] sm:$0xf0]  ;;  %v14202_v42 = vld [vmem:[#allocation5 + $0x62c] sm:$0xf]  ;;  %v9924_v49 = vor.u32 %v14138_v5, %v9921_v33  ;;  %v15782_v51 = vpop.f32.mrf.mxu1 }
 0x1d5   :  { %4073 = vmatpush.bf16.msrb.mxu1 %v10116_v60  ;;  %v10177_v60 = vld [vmem:[#allocation5 + $0x638] sm:$0xf0]  ;;  %v14134_v8 = vld [vmem:[#allocation5 + $0x40c] sm:$0xf]  ;;  %v10052_v53 = vor.u32 %v14170_v54, %v10049_v6  ;;  %v16219_v54 = vld [vmem:[#allocation30_spill] sm:$0xff] }
 0x1d6   :  { %4087 = vmatpush.bf16.msrb.mxu2 %v10244_v58  ;;  %v14234_v58 = vld [vmem:[#allocation5 + $0x72c] sm:$0xf]  ;;  %v10305_v57 = vld [vmem:[#allocation5 + $0x738] sm:$0xf0]  ;;  %v10180_v63 = vor.u32 %v14202_v42, %v10177_v60 }
 0x1d7   :  { %4101 = vmatpush.bf16.msrb.mxu3 %v10372_v52  ;;  %v9905_v52 = vld [vmem:[#allocation5 + $0x418] sm:$0xf0]  ;;  %v14166_v61 = vld [vmem:[#allocation5 + $0x50c] sm:$0xf]  ;;  %v10308_v43 = vor.u32 %v14234_v58, %v10305_v57  ;;  %v16221_v57 = vld [vmem:[#allocation32_spill] sm:$0xff] }
 0x1d8   :  { %4060 = vmatpush.bf16.msrb.mxu0 %v9972_v22  ;;  %v10033_v14 = vld [vmem:[#allocation5 + $0x518] sm:$0xf0]  ;;  %v14198_v56 = vld [vmem:[#allocation5 + $0x60c] sm:$0xf]  ;;  %v9908_v20 = vor.u32 %v14134_v8, %v9905_v52 }
 0x1d9   :  { %4074 = vmatpush.bf16.msrb.mxu1 %v10100_v59  ;;  %v10161_v22 = vld [vmem:[#allocation5 + $0x618] sm:$0xf0]  ;;  %v14230_v47 = vld [vmem:[#allocation5 + $0x70c] sm:$0xf]  ;;  %v10036_v16 = vor.u32 %v14166_v61, %v10033_v14 }
 0x1da   :  { %4088 = vmatpush.bf16.msrb.mxu2 %v10228_v37  ;;  %v10289_v59 = vld [vmem:[#allocation5 + $0x718] sm:$0xf0]  ;;  %v14290_v37 = vld [vmem:[#allocation5 + $0x8ec] sm:$0xf]  ;;  %v10164_v0 = vor.u32 %v14198_v56, %v10161_v22 }
 0x1db   :  { %4102 = vmatpush.bf16.msrb.mxu3 %v10356_v29  ;;  %v10529_v13 = vld [vmem:[#allocation5 + $0x8f8] sm:$0xf0]  ;;  %v14322_v28 = vld [vmem:[#allocation5 + $0x9ec] sm:$0xf]  ;;  %v10292_v10 = vor.u32 %v14230_v47, %v10289_v59  ;;  %v15790_v59 = vpop.f32.mrf.mxu3 }
 0x1dc   :  { %4061 = vmatpush.bf16.msrb.mxu0 %v9956_v11  ;;  %v10657_v30 = vld [vmem:[#allocation5 + $0x9f8] sm:$0xf0]  ;;  %v14354_v29 = vld [vmem:[#allocation5 + $0xaec] sm:$0xf]  ;;  %v10532_v11 = vor.u32 %v14290_v37, %v10529_v13 }
 0x1dd   :  { %4075 = vmatpush.bf16.msrb.mxu1 %v10084_v1  ;;  %v10785_v44 = vld [vmem:[#allocation5 + $0xaf8] sm:$0xf0]  ;;  %v14386_v25 = vld [vmem:[#allocation5 + $0xbec] sm:$0xf]  ;;  %v10660_v1 = vor.u32 %v14322_v28, %v10657_v30 }
 0x1de   :  { %4089 = vmatpush.bf16.msrb.mxu2 %v10212_v19  ;;  %v10913_v4 = vld [vmem:[#allocation5 + $0xbf8] sm:$0xf0]  ;;  %v10788_v19 = vor.u32 %v14354_v29, %v10785_v44  ;;  %v14286_v7 = vld [vmem:[#allocation5 + $0x8cc] sm:$0xf] }
 0x1df   :  { %4103 = vmatpush.bf16.msrb.mxu3 %v10340_v39  ;;  %v10513_v50 = vld [vmem:[#allocation5 + $0x8d8] sm:$0xf0]  ;;  %v14318_v39 = vld [vmem:[#allocation5 + $0x9cc] sm:$0xf]  ;;  %v10916_v34 = vor.u32 %v14386_v25, %v10913_v4 }
 0x1e0   :  { %4062 = vmatpush.bf16.msrb.mxu0 %v9940_v23  ;;  %v10641_v24 = vld [vmem:[#allocation5 + $0x9d8] sm:$0xf0]  ;;  %v14350_v48 = vld [vmem:[#allocation5 + $0xacc] sm:$0xf]  ;;  %v10516_v23 = vor.u32 %v14286_v7, %v10513_v50 }
 0x1e1   :  { %4076 = vmatpush.bf16.msrb.mxu1 %v10068_v18  ;;  %v10769_v3 = vld [vmem:[#allocation5 + $0xad8] sm:$0xf0]  ;;  %v14382_v17 = vld [vmem:[#allocation5 + $0xbcc] sm:$0xf]  ;;  %v10644_v55 = vor.u32 %v14318_v39, %v10641_v24 }
 0x1e2   :  { %4090 = vmatpush.bf16.msrb.mxu2 %v10196_v15  ;;  %v10897_v26 = vld [vmem:[#allocation5 + $0xbd8] sm:$0xf0]  ;;  %v10772_v18 = vor.u32 %v14350_v48, %v10769_v3  ;;  %v14282_v15 = vld [vmem:[#allocation5 + $0x8ac] sm:$0xf] }
 0x1e3   :  { %4104 = vmatpush.bf16.msrb.mxu3 %v10324_v21  ;;  %v10497_v5 = vld [vmem:[#allocation5 + $0x8b8] sm:$0xf0]  ;;  %v14314_v33 = vld [vmem:[#allocation5 + $0x9ac] sm:$0xf]  ;;  %v10900_v21 = vor.u32 %v14382_v17, %v10897_v26 }
 0x1e4   :  { %4063 = vmatpush.bf16.msrb.mxu0 %v9924_v49  ;;  %v10625_v6 = vld [vmem:[#allocation5 + $0x9b8] sm:$0xf0]  ;;  %v14346_v42 = vld [vmem:[#allocation5 + $0xaac] sm:$0xf] }
 0x1e5   :  { %4077 = vmatpush.bf16.msrb.mxu1 %v10052_v53  ;;  %v10753_v60 = vld [vmem:[#allocation5 + $0xab8] sm:$0xf0]  ;;  %v14378_v49 = vld [vmem:[#allocation5 + $0xbac] sm:$0xf]  ;;  %v10500_v53 = vor.u32 %v14282_v15, %v10497_v5  ;;  %v10628_v61 = vor.u32 %v14314_v33, %v10625_v6 }
 0x1e6   :  { %4091 = vmatpush.bf16.msrb.mxu2 %v10180_v63  ;;  %v16220_v58 = vld [vmem:[#allocation31_spill] sm:$0xff]  ;;  %v16222_v52 = vld [vmem:[#allocation33_spill] sm:$0xff]  ;;  %v15788_v63 = vpop.f32.mrf.mxu2  ;;  %v10756_v14 = vor.u32 %v14346_v42, %v10753_v60 }
 0x1e7   :  { %4105 = vmatpush.bf16.msrb.mxu3 %v10308_v43  ;;  %v10881_v8 = vld [vmem:[#allocation5 + $0xbb8] sm:$0xf0]  ;;  %v14278_v56 = vld [vmem:[#allocation5 + $0x88c] sm:$0xf] }
 0x1e8   :  { %4064 = vmatpush.bf16.msrb.mxu0 %v9908_v20  ;;  %v10481_v43 = vld [vmem:[#allocation5 + $0x898] sm:$0xf0]  ;;  %v14310_v22 = vld [vmem:[#allocation5 + $0x98c] sm:$0xf]  ;;  %v10884_v47 = vor.u32 %v14378_v49, %v10881_v8  ;;  %v3842_v20 = vpop.f32.mrf.mxu0 }
 0x1e9   :  { %4078 = vmatpush.bf16.msrb.mxu1 %v10036_v16  ;;  %v10609_v37 = vld [vmem:[#allocation5 + $0x998] sm:$0xf0]  ;;  %v14342_v13 = vld [vmem:[#allocation5 + $0xa8c] sm:$0xf]  ;;  %v3843_v44 = vadd.f32 %v3842_v20, %v15778_v62  ;;  %v10484_v16 = vor.u32 %v14278_v56, %v10481_v43  ;;  %v3856_v4 = vpop.f32.mrf.mxu1 }
 0x1ea   :  { %4092 = vmatpush.bf16.msrb.mxu2 %v10164_v0  ;;  %v10737_v28 = vld [vmem:[#allocation5 + $0xa98] sm:$0xf0]  ;;  %v14374_v30 = vld [vmem:[#allocation5 + $0xb8c] sm:$0xf]  ;;  %v10612_v0 = vor.u32 %v14310_v22, %v10609_v37 }
 0x1eb   :  { %4106 = vmatpush.bf16.msrb.mxu3 %v10292_v10  ;;  %4065 = vmatmul.bf16.vlgmr.msrb.gmra.mxu0 %v16219_v54  ;;  %v10865_v29 = vld [vmem:[#allocation5 + $0xb98] sm:$0xf0]  ;;  %v10740_v25 = vor.u32 %v14342_v13, %v10737_v28  ;;  %v14274_v10 = vld [vmem:[#allocation5 + $0x86c] sm:$0xf]  ;;  %v3857_v7 = vadd.f32 %v3856_v4, %v3843_v44 }
 0x1ec   :  { %4113 = vmatpush.bf16.msra.mxu0 %v10532_v11  ;;  %4079 = vmatmul.bf16.vlgmr.msrb.gmra.mxu1 %v16221_v57  ;;  %v10465_v11 = vld [vmem:[#allocation5 + $0x878] sm:$0xf0]  ;;  %v14338_v39 = vld [vmem:[#allocation5 + $0xa6c] sm:$0xf] }
 0x1ed   :  { %4127 = vmatpush.bf16.msra.mxu1 %v10660_v1  ;;  %4093 = vmatmul.bf16.vlgmr.msrb.gmra.mxu2 %v16220_v58  ;;  %v14306_v1 = vld [vmem:[#allocation5 + $0x96c] sm:$0xf]  ;;  %v10593_v50 = vld [vmem:[#allocation5 + $0x978] sm:$0xf0]  ;;  %v10468_v3 = vor.u32 %v14274_v10, %v10465_v11 }
 0x1ee   :  { %4141 = vmatpush.bf16.msra.mxu2 %v10788_v19  ;;  %4107 = vmatmul.bf16.vlgmr.msrb.gmra.mxu3 %v16222_v52  ;;  %v10868_v19 = vor.u32 %v14374_v30, %v10865_v29  ;;  %v14370_v24 = vld [vmem:[#allocation5 + $0xb6c] sm:$0xf]  ;;  %v10849_v48 = vld [vmem:[#allocation5 + $0xb78] sm:$0xf0]  ;;  %v10596_v62 = vor.u32 %v14306_v1, %v10593_v50 }
 0x1ef   :  { %4155 = vmatpush.bf16.msra.mxu3 %v10916_v34  ;;  %v10721_v34 = vld [vmem:[#allocation5 + $0xa78] sm:$0xf0]  ;;  %v14270_v26 = vld [vmem:[#allocation5 + $0x84c] sm:$0xf] }
 0x1f0   :  { %4114 = vmatpush.bf16.msra.mxu0 %v10516_v23  ;;  %v10724_v17 = vor.u32 %v14338_v39, %v10721_v34  ;;  %v10449_v23 = vld [vmem:[#allocation5 + $0x858] sm:$0xf0]  ;;  %v3870_v15 = vpop.f32.mrf.mxu2  ;;  %v14334_v33 = vld [vmem:[#allocation5 + $0xa4c] sm:$0xf] }
 0x1f1   :  { %4128 = vmatpush.bf16.msra.mxu1 %v10644_v55  ;;  %v14302_v55 = vld [vmem:[#allocation5 + $0x94c] sm:$0xf]  ;;  %v10577_v5 = vld [vmem:[#allocation5 + $0x958] sm:$0xf0]  ;;  %v3884_v60 = vpop.f32.mrf.mxu3  ;;  %v10452_v58 = vor.u32 %v14270_v26, %v10449_v23 }
 0x1f2   :  { %4142 = vmatpush.bf16.msra.mxu2 %v10772_v18  ;;  %v10852_v18 = vor.u32 %v14370_v24, %v10849_v48  ;;  %v10705_v54 = vld [vmem:[#allocation5 + $0xa58] sm:$0xf0]  ;;  %v14366_v6 = vld [vmem:[#allocation5 + $0xb4c] sm:$0xf]  ;;  %v10580_v49 = vor.u32 %v14302_v55, %v10577_v5 }
 0x1f3   :  { %4156 = vmatpush.bf16.msra.mxu3 %v10900_v21  ;;  %v3871_v21 = vadd.f32 %v3870_v15, %v3857_v7  ;;  %v10833_v42 = vld [vmem:[#allocation5 + $0xb58] sm:$0xf0]  ;;  %v10708_v8 = vor.u32 %v14334_v33, %v10705_v54  ;;  %v14266_v52 = vld [vmem:[#allocation5 + $0x82c] sm:$0xf] }
 0x1f4   :  { %4115 = vmatpush.bf16.msra.mxu0 %v10500_v53  ;;  %v10433_v53 = vld [vmem:[#allocation5 + $0x838] sm:$0xf0]  ;;  %v14330_v43 = vld [vmem:[#allocation5 + $0xa2c] sm:$0xf] }
 0x1f5   :  { %4129 = vmatpush.bf16.msra.mxu1 %v10628_v61  ;;  %v15793_v57 = vadd.f32 %v3884_v60, %v3871_v21  ;;  %v14298_v61 = vld [vmem:[#allocation5 + $0x92c] sm:$0xf]  ;;  %v10561_v56 = vld [vmem:[#allocation5 + $0x938] sm:$0xf0]  ;;  %v10436_v13 = vor.u32 %v14266_v52, %v10433_v53  ;;  %v15795_v60 = vpop.f32.mrf.mxu0 }
 0x1f6   :  { %4143 = vmatpush.bf16.msra.mxu2 %v10756_v14  ;;  %v10836_v14 = vor.u32 %v14366_v6, %v10833_v42  ;;  %v10689_v22 = vld [vmem:[#allocation5 + $0xa38] sm:$0xf0]  ;;  %v14262_v28 = vld [vmem:[#allocation5 + $0x80c] sm:$0xf]  ;;  %v10564_v30 = vor.u32 %v14298_v61, %v10561_v56 }
 0x1f7   :  { %4157 = vmatpush.bf16.msra.mxu3 %v10884_v47  ;;  %v14362_v47 = vld [vmem:[#allocation5 + $0xb2c] sm:$0xf]  ;;  %v10817_v37 = vld [vmem:[#allocation5 + $0xb38] sm:$0xf0]  ;;  %v10692_v29 = vor.u32 %v14330_v43, %v10689_v22 }
 0x1f8   :  { %4116 = vmatpush.bf16.msra.mxu0 %v10484_v16  ;;  %v10417_v20 = vld [vmem:[#allocation5 + $0x818] sm:$0xf0]  ;;  %v14294_v44 = vld [vmem:[#allocation5 + $0x90c] sm:$0xf] }
 0x1f9   :  { %4130 = vmatpush.bf16.msra.mxu1 %v10612_v0  ;;  %v10545_v16 = vld [vmem:[#allocation5 + $0x918] sm:$0xf0]  ;;  %v14326_v0 = vld [vmem:[#allocation5 + $0xa0c] sm:$0xf]  ;;  %v10420_v50 = vor.u32 %v14262_v28, %v10417_v20 }
 0x1fa   :  { %4144 = vmatpush.bf16.msra.mxu2 %v10740_v25  ;;  %v10820_v25 = vor.u32 %v14362_v47, %v10817_v37  ;;  %v10673_v4 = vld [vmem:[#allocation5 + $0xa18] sm:$0xf0]  ;;  %v14358_v10 = vld [vmem:[#allocation5 + $0xb0c] sm:$0xf]  ;;  %v10548_v48 = vor.u32 %v14294_v44, %v10545_v16 }
 0x1fb   :  { %4158 = vmatpush.bf16.msra.mxu3 %v10868_v19  ;;  %v10801_v11 = vld [vmem:[#allocation5 + $0xb18] sm:$0xf0]  ;;  %v14418_v1 = vld [vmem:[#allocation5 + $0xcec] sm:$0xf] }
 0x1fc   :  { %4117 = vmatpush.bf16.msra.mxu0 %v10468_v3  ;;  %v11041_v19 = vld [vmem:[#allocation5 + $0xcf8] sm:$0xf0]  ;;  %v14450_v7 = vld [vmem:[#allocation5 + $0xdec] sm:$0xf]  ;;  %v10676_v3 = vor.u32 %v14326_v0, %v10673_v4  ;;  %v10804_v26 = vor.u32 %v14358_v10, %v10801_v11  ;;  %v15805_v11 = vpop.f32.mrf.mxu3 }
 0x1fd   :  { %4131 = vmatpush.bf16.msra.mxu1 %v10596_v62  ;;  %v11169_v39 = vld [vmem:[#allocation5 + $0xdf8] sm:$0xf0]  ;;  %v14482_v34 = vld [vmem:[#allocation5 + $0xeec] sm:$0xf]  ;;  %v11044_v23 = vor.u32 %v14418_v1, %v11041_v19 }
 0x1fe   :  { %4145 = vmatpush.bf16.msra.mxu2 %v10724_v17  ;;  %v11297_v24 = vld [vmem:[#allocation5 + $0xef8] sm:$0xf0]  ;;  %v14514_v62 = vld [vmem:[#allocation5 + $0xfec] sm:$0xf]  ;;  %v11172_v55 = vor.u32 %v14450_v7, %v11169_v39 }
 0x1ff   :  { %4159 = vmatpush.bf16.msra.mxu3 %v10852_v18  ;;  %v11425_v17 = vld [vmem:[#allocation5 + $0xff8] sm:$0xf0]  ;;  %v11300_v18 = vor.u32 %v14482_v34, %v11297_v24  ;;  %v14414_v15 = vld [vmem:[#allocation5 + $0xccc] sm:$0xf] }
 0x200   :  { %4118 = vmatpush.bf16.msra.mxu0 %v10452_v58  ;;  %v11025_v5 = vld [vmem:[#allocation5 + $0xcd8] sm:$0xf0]  ;;  %v14446_v33 = vld [vmem:[#allocation5 + $0xdcc] sm:$0xf]  ;;  %v11428_v54 = vor.u32 %v14514_v62, %v11425_v17 }
 0x201   :  { %4132 = vmatpush.bf16.msra.mxu1 %v10580_v49  ;;  %v11153_v21 = vld [vmem:[#allocation5 + $0xdd8] sm:$0xf0]  ;;  %v14478_v6 = vld [vmem:[#allocation5 + $0xecc] sm:$0xf]  ;;  %v11028_v52 = vor.u32 %v14414_v15, %v11025_v5 }
 0x202   :  { %4146 = vmatpush.bf16.msra.mxu2 %v10708_v8  ;;  %v11281_v42 = vld [vmem:[#allocation5 + $0xed8] sm:$0xf0]  ;;  %v14510_v58 = vld [vmem:[#allocation5 + $0xfcc] sm:$0xf]  ;;  %v15797_v8 = vpop.f32.mrf.mxu1  ;;  %v11156_v53 = vor.u32 %v14446_v33, %v11153_v21 }
 0x203   :  { %4160 = vmatpush.bf16.msra.mxu3 %v10836_v14  ;;  %v11409_v49 = vld [vmem:[#allocation5 + $0xfd8] sm:$0xf0]  ;;  %v11284_v61 = vor.u32 %v14478_v6, %v11281_v42  ;;  %v14410_v14 = vld [vmem:[#allocation5 + $0xcac] sm:$0xf] }
 0x204   :  { %4119 = vmatpush.bf16.msra.mxu0 %v10436_v13  ;;  %v11009_v56 = vld [vmem:[#allocation5 + $0xcb8] sm:$0xf0]  ;;  %v14442_v43 = vld [vmem:[#allocation5 + $0xdac] sm:$0xf]  ;;  %v11412_v22 = vor.u32 %v14510_v58, %v11409_v49 }
 0x205   :  { %4133 = vmatpush.bf16.msra.mxu1 %v10564_v30  ;;  %v11137_v47 = vld [vmem:[#allocation5 + $0xdb8] sm:$0xf0]  ;;  %v14474_v37 = vld [vmem:[#allocation5 + $0xeac] sm:$0xf]  ;;  %v11012_v30 = vor.u32 %v14410_v14, %v11009_v56 }
 0x206   :  { %4147 = vmatpush.bf16.msra.mxu2 %v10692_v29  ;;  %v11265_v13 = vld [vmem:[#allocation5 + $0xeb8] sm:$0xf0]  ;;  %v14506_v28 = vld [vmem:[#allocation5 + $0xfac] sm:$0xf]  ;;  %v11140_v29 = vor.u32 %v14442_v43, %v11137_v47 }
 0x207   :  { %4161 = vmatpush.bf16.msra.mxu3 %v10820_v25  ;;  %v11393_v20 = vld [vmem:[#allocation5 + $0xfb8] sm:$0xf0]  ;;  %v11268_v44 = vor.u32 %v14474_v37, %v11265_v13  ;;  %v14406_v16 = vld [vmem:[#allocation5 + $0xc8c] sm:$0xf]  ;;  %v15803_v25 = vpop.f32.mrf.mxu2 }
 0x208   :  { %4120 = vmatpush.bf16.msra.mxu0 %v10420_v50  ;;  %v14438_v0 = vld [vmem:[#allocation5 + $0xd8c] sm:$0xf]  ;;  %v11396_v4 = vor.u32 %v14506_v28, %v11393_v20  ;;  %v3898_v1 = vpop.f32.mrf.mxu0  ;;  %v11377_v19 = vld [vmem:[#allocation5 + $0xf98] sm:$0xf0] }
 0x209   :  { %4134 = vmatpush.bf16.msra.mxu1 %v10548_v48  ;;  %v14470_v10 = vld [vmem:[#allocation5 + $0xe8c] sm:$0xf]  ;;  %v3899_v7 = vadd.f32 %v3898_v1, %v15793_v57  ;;  %v11361_v5 = vld [vmem:[#allocation5 + $0xf78] sm:$0xf0] }
 0x20a   :  { %4148 = vmatpush.bf16.msra.mxu2 %v10676_v3  ;;  %v3912_v39 = vpop.f32.mrf.mxu1  ;;  %v14402_v48 = vld [vmem:[#allocation5 + $0xc6c] sm:$0xf]  ;;  %v10977_v3 = vld [vmem:[#allocation5 + $0xc78] sm:$0xf0] }
 0x20b   :  { %4162 = vmatpush.bf16.msra.mxu3 %v10804_v26  ;;  %4121 = vmatmul.bf16.vlgmr.msra.gmra.mxu0 %v15581_v31  ;;  %v10993_v31 = vld [vmem:[#allocation5 + $0xc98] sm:$0xf0]  ;;  %v14434_v62 = vld [vmem:[#allocation5 + $0xd6c] sm:$0xf]  ;;  %v3913_v26 = vadd.f32 %v3912_v39, %v3899_v7  ;;  %v10980_v33 = vor.u32 %v14402_v48, %v10977_v3 }
 0x20c   :  { %4169 = vmatpush.bf16.msrb.mxu0 %v11044_v23  ;;  %4135 = vmatmul.bf16.vlgmr.msra.gmra.mxu1 %v15585_v36  ;;  %v11249_v36 = vld [vmem:[#allocation5 + $0xe98] sm:$0xf0]  ;;  %v10996_v50 = vor.u32 %v14406_v16, %v10993_v31  ;;  %v14498_v15 = vld [vmem:[#allocation5 + $0xf6c] sm:$0xf] }
 0x20d   :  { %4183 = vmatpush.bf16.msrb.mxu1 %v11172_v55  ;;  %4149 = vmatmul.bf16.vlgmr.msra.gmra.mxu2 %v15583_v35  ;;  %v11121_v35 = vld [vmem:[#allocation5 + $0xd98] sm:$0xf0]  ;;  %v11252_v24 = vor.u32 %v14470_v10, %v11249_v36  ;;  %v14466_v55 = vld [vmem:[#allocation5 + $0xe6c] sm:$0xf]  ;;  %v11364_v58 = vor.u32 %v14498_v15, %v11361_v5 }
 0x20e   :  { %4197 = vmatpush.bf16.msrb.mxu2 %v11300_v18  ;;  %4163 = vmatmul.bf16.vlgmr.msra.gmra.mxu3 %v15587_v40  ;;  %v14502_v40 = vld [vmem:[#allocation5 + $0xf8c] sm:$0xf]  ;;  %v11124_v34 = vor.u32 %v14438_v0, %v11121_v35  ;;  %v11105_v23 = vld [vmem:[#allocation5 + $0xd78] sm:$0xf0] }
 0x20f   :  { %4211 = vmatpush.bf16.msrb.mxu3 %v11428_v54  ;;  %v11380_v17 = vor.u32 %v14502_v40, %v11377_v19  ;;  %v11233_v18 = vld [vmem:[#allocation5 + $0xe78] sm:$0xf0]  ;;  %v11108_v57 = vor.u32 %v14434_v62, %v11105_v23  ;;  %v14398_v21 = vld [vmem:[#allocation5 + $0xc4c] sm:$0xf]  ;;  %v11543_v62 = vld [vmem:[#allocation8 + $0xe0] sm:$0xf] }
 0x210   :  { %4170 = vmatpush.bf16.msrb.mxu0 %v11028_v52  ;;  %v11236_v54 = vor.u32 %v14466_v55, %v11233_v18  ;;  %v10961_v6 = vld [vmem:[#allocation5 + $0xc58] sm:$0xf0]  ;;  %v14430_v42 = vld [vmem:[#allocation5 + $0xd4c] sm:$0xf]  ;;  %v3926_v49 = vpop.f32.mrf.mxu2  ;;  %v11671_v23 = vld [vmem:[#allocation8 + $0x1e0] sm:$0xf] }
 0x211   :  { %4184 = vmatpush.bf16.msrb.mxu1 %v11156_v53  ;;  %v11089_v52 = vld [vmem:[#allocation5 + $0xd58] sm:$0xf0]  ;;  %v14462_v53 = vld [vmem:[#allocation5 + $0xe4c] sm:$0xf]  ;;  %v3927_v14 = vadd.f32 %v3926_v49, %v3913_v26  ;;  %v3940_v56 = vpop.f32.mrf.mxu3  ;;  %v10964_v47 = vor.u32 %v14398_v21, %v10961_v6  ;;  %v14579_v55 = vld [vmem:[#allocation8 + $0x1ec] sm:$0xf0] }
 0x212   :  { %4198 = vmatpush.bf16.msrb.mxu2 %v11284_v61  ;;  %v11217_v61 = vld [vmem:[#allocation5 + $0xe58] sm:$0xf0]  ;;  %v14494_v43 = vld [vmem:[#allocation5 + $0xf4c] sm:$0xf]  ;;  %v11092_v13 = vor.u32 %v14430_v42, %v11089_v52  ;;  %v14543_v21 = vld [vmem:[#allocation8 + $0xcc] sm:$0xf0]  ;;  %v15812_v49 = vpop.f32.mrf.mxu1 }
 0x213   :  { %4212 = vmatpush.bf16.msrb.mxu3 %v11412_v22  ;;  %v11345_v22 = vld [vmem:[#allocation5 + $0xf58] sm:$0xf0]  ;;  %v15808_v37 = vadd.f32 %v3940_v56, %v3927_v14  ;;  %v11220_v28 = vor.u32 %v14462_v53, %v11217_v61  ;;  %v14394_v20 = vld [vmem:[#allocation5 + $0xc2c] sm:$0xf]  ;;  %v11655_v6 = vld [vmem:[#allocation8 + $0x1c0] sm:$0xf] }
 0x214   :  { %4171 = vmatpush.bf16.msrb.mxu0 %v11012_v30  ;;  %v10945_v30 = vld [vmem:[#allocation5 + $0xc38] sm:$0xf0]  ;;  %v14458_v31 = vld [vmem:[#allocation5 + $0xe2c] sm:$0xf]  ;;  %v14575_v42 = vld [vmem:[#allocation8 + $0x1cc] sm:$0xf0] }
 0x215   :  { %4185 = vmatpush.bf16.msrb.mxu1 %v11140_v29  ;;  %v14426_v29 = vld [vmem:[#allocation5 + $0xd2c] sm:$0xf]  ;;  %v11073_v16 = vld [vmem:[#allocation5 + $0xd38] sm:$0xf0]  ;;  %v10948_v10 = vor.u32 %v14394_v20, %v10945_v30  ;;  %v11656_v53 = vor.u32 %v14575_v42, %v11655_v6  ;;  %v11511_v61 = vld [vmem:[#allocation8 + $0xa0] sm:$0xf] }
 0x216   :  { %4199 = vmatpush.bf16.msrb.mxu2 %v11268_v44  ;;  %v11348_v44 = vor.u32 %v14494_v43, %v11345_v22  ;;  %v11201_v0 = vld [vmem:[#allocation5 + $0xe38] sm:$0xf0]  ;;  %v14390_v36 = vld [vmem:[#allocation5 + $0xc0c] sm:$0xf]  ;;  %v11076_v1 = vor.u32 %v14426_v29, %v11073_v16  ;;  %v14539_v14 = vld [vmem:[#allocation8 + $0xac] sm:$0xf0] }
 0x217   :  { %4213 = vmatpush.bf16.msrb.mxu3 %v11396_v4  ;;  %v14490_v4 = vld [vmem:[#allocation5 + $0xf2c] sm:$0xf]  ;;  %v11329_v35 = vld [vmem:[#allocation5 + $0xf38] sm:$0xf0]  ;;  %v11204_v40 = vor.u32 %v14458_v31, %v11201_v0  ;;  %v11639_v56 = vld [vmem:[#allocation8 + $0x1a0] sm:$0xf]  ;;  %v11512_v22 = vor.u32 %v14539_v14, %v11511_v61 }
 0x218   :  { %4172 = vmatpush.bf16.msrb.mxu0 %v10996_v50  ;;  %v10929_v19 = vld [vmem:[#allocation5 + $0xc18] sm:$0xf0]  ;;  %v14422_v7 = vld [vmem:[#allocation5 + $0xd0c] sm:$0xf]  ;;  %v11332_v39 = vor.u32 %v14490_v4, %v11329_v35  ;;  %v14571_v43 = vld [vmem:[#allocation8 + $0x1ac] sm:$0xf0]  ;;  %v15818_v20 = vpop.f32.mrf.mxu2 }
 0x219   :  { %4186 = vmatpush.bf16.msrb.mxu1 %v11124_v34  ;;  %v11057_v50 = vld [vmem:[#allocation5 + $0xd18] sm:$0xf0]  ;;  %v14454_v34 = vld [vmem:[#allocation5 + $0xe0c] sm:$0xf]  ;;  %v10932_v26 = vor.u32 %v14390_v36, %v10929_v19  ;;  %v14567_v30 = vld [vmem:[#allocation8 + $0x18c] sm:$0xf0]  ;;  %v15820_v29 = vpop.f32.mrf.mxu3 }
 0x21a   :  { %4200 = vmatpush.bf16.msrb.mxu2 %v11252_v24  ;;  %v11185_v24 = vld [vmem:[#allocation5 + $0xe18] sm:$0xf0]  ;;  %v14486_v48 = vld [vmem:[#allocation5 + $0xf0c] sm:$0xf]  ;;  %v11060_v18 = vor.u32 %v14422_v7, %v11057_v50  ;;  %v11479_v31 = vld [vmem:[#allocation8 + $0x60] sm:$0xf] }
 0x21b   :  { %4214 = vmatpush.bf16.msrb.mxu3 %v11380_v17  ;;  %v11313_v3 = vld [vmem:[#allocation5 + $0xf18] sm:$0xf0]  ;;  %v14547_v17 = vld [vmem:[#allocation8 + $0xec] sm:$0xf0]  ;;  %v11188_v15 = vor.u32 %v14454_v34, %v11185_v24  ;;  %v11607_v35 = vld [vmem:[#allocation8 + $0x160] sm:$0xf] }
 0x21c   :  { %4173 = vmatpush.bf16.msrb.mxu0 %v10980_v33  ;;  %v11316_v5 = vor.u32 %v14486_v48, %v11313_v3  ;;  %v11544_v33 = vor.u32 %v14547_v17, %v11543_v62  ;;  %v14531_v0 = vld [vmem:[#allocation8 + $0x6c] sm:$0xf0]  ;;  %v11591_v50 = vld [vmem:[#allocation8 + $0x140] sm:$0xf]  ;;  %v14577_v6 = vld [vmem:[#allocation8 + $0x1e4] sm:$0xf] }
 0x21d   :  { %4187 = vmatpush.bf16.msrb.mxu1 %v11108_v57  ;;  %v11672_v57 = vor.u32 %v14579_v55, %v11671_v23  ;;  %v11480_v36 = vor.u32 %v14531_v0, %v11479_v31  ;;  %v14527_v19 = vld [vmem:[#allocation8 + $0x4c] sm:$0xf0]  ;;  %v11447_v62 = vld [vmem:[#allocation8 + $0x20] sm:$0xf]  ;;  %v11673_v42 = vld [vmem:[#allocation8 + $0x1f0] sm:$0xf0] }
 0x21e   :  { %4201 = vmatpush.bf16.msrb.mxu2 %v11236_v54  ;;  %v11527_v54 = vld [vmem:[#allocation8 + $0xc0] sm:$0xf]  ;;  %v14523_v17 = vld [vmem:[#allocation8 + $0x2c] sm:$0xf0]  ;;  %v11676_v14 = vor.u32 %v14577_v6, %v11673_v42  ;;  %v11497_v31 = vld [vmem:[#allocation8 + $0x90] sm:$0xf0] }
 0x21f   :  { %4215 = vmatpush.bf16.msrb.mxu3 %v11364_v58  ;;  %v15810_v58 = vpop.f32.mrf.mxu0  ;;  %v11528_v52 = vor.u32 %v14543_v21, %v11527_v54  ;;  %v14555_v23 = vld [vmem:[#allocation8 + $0x12c] sm:$0xf0]  ;;  %v11448_v55 = vor.u32 %v14523_v17, %v11447_v62  ;;  %v14545_v54 = vld [vmem:[#allocation8 + $0xe4] sm:$0xf]  ;;  %v11545_v21 = vld [vmem:[#allocation8 + $0xf0] sm:$0xf0] }
 0x220   :  { %4174 = vmatpush.bf16.msrb.mxu0 %v10964_v47  ;;  %v11640_v47 = vor.u32 %v14571_v43, %v11639_v56  ;;  %v11548_v61 = vor.u32 %v14545_v54, %v11545_v21  ;;  %v14541_v56 = vld [vmem:[#allocation8 + $0xc4] sm:$0xf]  ;;  %v11529_v43 = vld [vmem:[#allocation8 + $0xd0] sm:$0xf0]  ;;  %v11551_v21 = vld [vmem:[#allocation8 + $0xe8] sm:$0xf] }
 0x221   :  { %4188 = vmatpush.bf16.msrb.mxu1 %v11092_v13  ;;  %v11495_v13 = vld [vmem:[#allocation8 + $0x80] sm:$0xf]  ;;  %v14565_v0 = vld [vmem:[#allocation8 + $0x184] sm:$0xf]  ;;  %v11561_v54 = vld [vmem:[#allocation8 + $0x110] sm:$0xf0] }
 0x222   :  { %4202 = vmatpush.bf16.msrb.mxu2 %v11220_v28  ;;  %v14535_v28 = vld [vmem:[#allocation8 + $0x8c] sm:$0xf0]  ;;  %v14521_v17 = vld [vmem:[#allocation8 + $0x24] sm:$0xf]  ;;  %v14548_v6 = vld [vmem:[#allocation8 + $0xf4] sm:$0xf0] }
 0x223   :  { %4216 = vmatpush.bf16.msrb.mxu3 %v11348_v44  ;;  %v11679_v42 = vld [vmem:[#allocation8 + $0x1e8] sm:$0xf] }
 0x224   :  { %4175 = vmatpush.bf16.msrb.mxu0 %v10948_v10  ;;  %v14563_v10 = vld [vmem:[#allocation8 + $0x16c] sm:$0xf0] }
 0x225   :  { %4189 = vmatpush.bf16.msrb.mxu1 %v11076_v1  ;;  %v11608_v1 = vor.u32 %v14563_v10, %v11607_v35 }
 0x226   :  { %4203 = vmatpush.bf16.msrb.mxu2 %v11204_v40  ;;  %v11463_v40 = vld [vmem:[#allocation8 + $0x40] sm:$0xf] }
 0x227   :  { %4217 = vmatpush.bf16.msrb.mxu3 %v11332_v39  ;;  %v14559_v39 = vld [vmem:[#allocation8 + $0x14c] sm:$0xf0]  ;;  %v11464_v24 = vor.u32 %v14527_v19, %v11463_v40  ;;  %v14561_v40 = vld [vmem:[#allocation8 + $0x164] sm:$0xf]  ;;  %v11609_v19 = vld [vmem:[#allocation8 + $0x170] sm:$0xf0] }
 0x228   :  { %4176 = vmatpush.bf16.msrb.mxu0 %v10932_v26  ;;  %v3954_v44 = vpop.f32.mrf.mxu0  ;;  %v11592_v3 = vor.u32 %v14559_v39, %v11591_v50  ;;  %v11575_v26 = vld [vmem:[#allocation8 + $0x120] sm:$0xf]  ;;  %v11612_v50 = vor.u32 %v14561_v40, %v11609_v19  ;;  %v14525_v39 = vld [vmem:[#allocation8 + $0x44] sm:$0xf]  ;;  %v14643_v40 = vld [vmem:[#allocation8 + $0x3ec] sm:$0xf0] }
 0x229   :  { %4190 = vmatpush.bf16.msrb.mxu1 %v11060_v18  ;;  %v3968_v16 = vpop.f32.mrf.mxu1  ;;  %v11576_v18 = vor.u32 %v14555_v23, %v11575_v26  ;;  %v11449_v26 = vld [vmem:[#allocation8 + $0x30] sm:$0xf0]  ;;  %v14553_v23 = vld [vmem:[#allocation8 + $0x124] sm:$0xf]  ;;  %v11631_v19 = vld [vmem:[#allocation8 + $0x188] sm:$0xf] }
 0x22a   :  { %4204 = vmatpush.bf16.msrb.mxu2 %v11188_v15  ;;  %v11431_v15 = vld [vmem:[#allocation8] sm:$0xf] }
 0x22b   :  { %4218 = vmatpush.bf16.msrb.mxu3 %v11316_v5  ;;  %4177 = vmatmul.bf16.vlgmr.msrb.gmra.mxu0 %v15593_v32  ;;  %v11623_v32 = vld [vmem:[#allocation8 + $0x180] sm:$0xf]  ;;  %v14519_v5 = vld [vmem:[#allocation8 + $0xc] sm:$0xf0] }
 0x22c   :  { %5039 = vmatpush.bf16.msra.mxu0 %v11544_v33  ;;  %4191 = vmatmul.bf16.vlgmr.msrb.gmra.mxu1 %v15597_v41  ;;  %v11496_v41 = vor.u32 %v14535_v28, %v11495_v13  ;;  %v11559_v33 = vld [vmem:[#allocation8 + $0x100] sm:$0xf]  ;;  %v11532_v13 = vor.u32 %v14541_v56, %v11529_v43  ;;  %v11535_v43 = vld [vmem:[#allocation8 + $0xc8] sm:$0xf] }
 0x22d   :  { %5053 = vmatpush.bf16.msra.mxu1 %v11672_v57  ;;  %4205 = vmatmul.bf16.vlgmr.msrb.gmra.mxu2 %v15595_v38  ;;  %v3955_v38 = vadd.f32 %v3954_v44, %v15808_v37  ;;  %v14551_v57 = vld [vmem:[#allocation8 + $0x10c] sm:$0xf0]  ;;  %v14569_v44 = vld [vmem:[#allocation8 + $0x1a4] sm:$0xf] }
 0x22e   :  { %4219 = vmatmul.bf16.vlgmr.msrb.gmra.mxu3 %v15599_v46  ;;  %v11624_v46 = vor.u32 %v14567_v30, %v11623_v32  ;;  %v14537_v32 = vld [vmem:[#allocation8 + $0xa4] sm:$0xf]  ;;  %v11513_v30 = vld [vmem:[#allocation8 + $0xb0] sm:$0xf0] }
 0x22f   :  { %v3969_v4 = vadd.f32 %v3968_v16, %v3955_v38  ;;  %v11641_v38 = vld [vmem:[#allocation8 + $0x1b0] sm:$0xf0] }
 0x230   :  { %5040 = vmatpush.bf16.msra.mxu0 %v11528_v52  ;;  %v3982_v7 = vpop.f32.mrf.mxu2  ;;  %v11432_v52 = vor.u32 %v14519_v5, %v11431_v15  ;;  %v11644_v16 = vor.u32 %v14569_v44, %v11641_v38  ;;  %v14517_v5 = vld [vmem:[#allocation8 + $0x4] sm:$0xf]  ;;  %v14540_v44 = vld [vmem:[#allocation8 + $0xb4] sm:$0xf0]  ;;  %v11647_v38 = vld [vmem:[#allocation8 + $0x1a8] sm:$0xf] }
 0x231   :  { %5054 = vmatpush.bf16.msra.mxu1 %v11656_v53  ;;  %v3983_v34 = vadd.f32 %v3982_v7, %v3969_v4  ;;  %v3996_v37 = vpop.f32.mrf.mxu3  ;;  %v11560_v53 = vor.u32 %v14551_v57, %v11559_v33  ;;  %v11625_v4 = vld [vmem:[#allocation8 + $0x190] sm:$0xf0]  ;;  %v14549_v57 = vld [vmem:[#allocation8 + $0x104] sm:$0xf] }
 0x232   :  { %v11628_v10 = vor.u32 %v14565_v0, %v11625_v4  ;;  %v11433_v33 = vld [vmem:[#allocation8 + $0x10] sm:$0xf0]  ;;  %v14611_v0 = vld [vmem:[#allocation8 + $0x2ec] sm:$0xf0]  ;;  %v11927_v4 = vld [vmem:[#allocation8 + $0x3e0] sm:$0xf] }
 0x233   :  { %v15823_v48 = vadd.f32 %v3996_v37, %v3983_v34  ;;  %v11465_v34 = vld [vmem:[#allocation8 + $0x50] sm:$0xf0]  ;;  %v14557_v37 = vld [vmem:[#allocation8 + $0x144] sm:$0xf] }
 0x234   :  { %5041 = vmatpush.bf16.msra.mxu0 %v11512_v22  ;;  %v14573_v22 = vld [vmem:[#allocation8 + $0x1c4] sm:$0xf] }
 0x235   :  { %5055 = vmatpush.bf16.msra.mxu1 %v11640_v47  ;;  %v11657_v47 = vld [vmem:[#allocation8 + $0x1d0] sm:$0xf0] }
 0x236   :  { %v11660_v28 = vor.u32 %v14573_v22, %v11657_v47  ;;  %v14544_v22 = vld [vmem:[#allocation8 + $0xd4] sm:$0xf0]  ;;  %v11663_v47 = vld [vmem:[#allocation8 + $0x1c8] sm:$0xf] }
 0x238   :  { %5042 = vmatpush.bf16.msra.mxu0 %v11496_v41  ;;  %v11516_v41 = vor.u32 %v14537_v32, %v11513_v30  ;;  %v11519_v30 = vld [vmem:[#allocation8 + $0xa8] sm:$0xf] }
 0x239   :  { %5056 = vmatpush.bf16.msra.mxu1 %v11624_v46  ;;  %v14533_v46 = vld [vmem:[#allocation8 + $0x84] sm:$0xf] }
 0x23a   :  { %v11500_v35 = vor.u32 %v14533_v46, %v11497_v31  ;;  %v11520_v46 = vor.u32 %v14540_v44, %v11519_v30  ;;  %v11799_v31 = vld [vmem:[#allocation8 + $0x2e0] sm:$0xf]  ;;  %v11455_v30 = vld [vmem:[#allocation8 + $0x28] sm:$0xf] }
 0x23b   :  { %v11751_v44 = vld [vmem:[#allocation8 + $0x280] sm:$0xf] }
 0x23c   :  { %5043 = vmatpush.bf16.msra.mxu0 %v11480_v36  ;;  %v14529_v36 = vld [vmem:[#allocation8 + $0x64] sm:$0xf] }
 0x23d   :  { %5057 = vmatpush.bf16.msra.mxu1 %v11608_v1  ;;  %v11481_v1 = vld [vmem:[#allocation8 + $0x70] sm:$0xf0] }
 0x23e   :  { %v11484_v7 = vor.u32 %v14529_v36, %v11481_v1  ;;  %v14536_v36 = vld [vmem:[#allocation8 + $0x94] sm:$0xf0]  ;;  %v11800_v1 = vor.u32 %v14611_v0, %v11799_v31  ;;  %v11879_v0 = vld [vmem:[#allocation8 + $0x380] sm:$0xf] }
 0x240   :  { %5044 = vmatpush.bf16.msra.mxu0 %v11464_v24  ;;  %v11593_v24 = vld [vmem:[#allocation8 + $0x150] sm:$0xf0]  ;;  %5067 = vmatpush.bf16.msra.mxu2 %v11800_v1 }
 0x241   :  { %5058 = vmatpush.bf16.msra.mxu1 %v11592_v3  ;;  %v11468_v3 = vor.u32 %v14525_v39, %v11465_v34  ;;  %v11596_v62 = vor.u32 %v14557_v37, %v11593_v24  ;;  %v15831_v39 = vpop.f32.mrf.mxu1  ;;  %v11487_v37 = vld [vmem:[#allocation8 + $0x68] sm:$0xf]  ;;  %v11783_v24 = vld [vmem:[#allocation8 + $0x2c0] sm:$0xf] }
 0x244   :  { %5045 = vmatpush.bf16.msra.mxu0 %v11448_v55  ;;  %v11577_v55 = vld [vmem:[#allocation8 + $0x130] sm:$0xf0] }
 0x245   :  { %5059 = vmatpush.bf16.msra.mxu1 %v11576_v18  ;;  %v11452_v18 = vor.u32 %v14521_v17, %v11449_v26  ;;  %v11580_v15 = vor.u32 %v14553_v23, %v11577_v55  ;;  %v14532_v17 = vld [vmem:[#allocation8 + $0x74] sm:$0xf0]  ;;  %v11911_v23 = vld [vmem:[#allocation8 + $0x3c0] sm:$0xf]  ;;  %v14639_v55 = vld [vmem:[#allocation8 + $0x3cc] sm:$0xf0] }
 0x248   :  { %5046 = vmatpush.bf16.msra.mxu0 %v11432_v52  ;;  %v14580_v52 = vld [vmem:[#allocation8 + $0x1f4] sm:$0xf0] }
 0x249   :  { %5060 = vmatpush.bf16.msra.mxu1 %v11560_v53  ;;  %v11436_v53 = vor.u32 %v14517_v5, %v11433_v33  ;;  %v11680_v56 = vor.u32 %v14580_v52, %v11679_v42  ;;  %v11912_v5 = vor.u32 %v14639_v55, %v11911_v23  ;;  %v15833_v33 = vpop.f32.mrf.mxu2  ;;  %v14603_v42 = vld [vmem:[#allocation8 + $0x2ac] sm:$0xf0]  ;;  %v11895_v52 = vld [vmem:[#allocation8 + $0x3a0] sm:$0xf]  ;;  %v14552_v55 = vld [vmem:[#allocation8 + $0x114] sm:$0xf0] }
 0x24b   :  { %5047 = vmatmul.bf16.vlgmr.msra.gmra.mxu0 %v15768_v12 }
 0x24c   :  { %5095 = vmatpush.bf16.msrb.mxu0 %v11548_v61  ;;  %5061 = vmatmul.bf16.vlgmr.msra.gmra.mxu1 %v15770_v27  ;;  %v11564_v61 = vor.u32 %v14549_v57, %v11561_v54  ;;  %v15835_v57 = vpop.f32.mrf.mxu3 }
 0x24d   :  { %5109 = vmatpush.bf16.msrb.mxu1 %v11676_v14  ;;  %v11552_v14 = vor.u32 %v14548_v6, %v11551_v21  ;;  %v11488_v21 = vor.u32 %v14532_v17, %v11487_v37  ;;  %v11767_v6 = vld [vmem:[#allocation8 + $0x2a0] sm:$0xf] }
 0x24e   :  { %v11863_v37 = vld [vmem:[#allocation8 + $0x360] sm:$0xf] }
 0x250   :  { %5096 = vmatpush.bf16.msrb.mxu0 %v11532_v13  ;;  %v14576_v13 = vld [vmem:[#allocation8 + $0x1d4] sm:$0xf0] }
 0x251   :  { %5110 = vmatpush.bf16.msrb.mxu1 %v11660_v28  ;;  %v11536_v28 = vor.u32 %v14544_v22, %v11535_v43  ;;  %v11664_v32 = vor.u32 %v14576_v13, %v11663_v47  ;;  %v14635_v43 = vld [vmem:[#allocation8 + $0x3ac] sm:$0xf0]  ;;  %v11599_v22 = vld [vmem:[#allocation8 + $0x148] sm:$0xf]  ;;  %v14560_v47 = vld [vmem:[#allocation8 + $0x154] sm:$0xf0]  ;;  %v15841_v1 = vpop.f32.mrf.mxu2 }
 0x252   :  { %v11896_v13 = vor.u32 %v14635_v43, %v11895_v52 }
 0x254   :  { %5097 = vmatpush.bf16.msrb.mxu0 %v11516_v41  ;;  %v14572_v41 = vld [vmem:[#allocation8 + $0x1b4] sm:$0xf0] }
 0x255   :  { %5111 = vmatpush.bf16.msrb.mxu1 %v11644_v16  ;;  %v15829_v16 = vpop.f32.mrf.mxu0 }
 0x258   :  { %5098 = vmatpush.bf16.msrb.mxu0 %v11500_v35  ;;  %v11648_v35 = vor.u32 %v14572_v41, %v11647_v38  ;;  %v14599_v38 = vld [vmem:[#allocation8 + $0x28c] sm:$0xf0]  ;;  %v11600_v41 = vor.u32 %v14560_v47, %v11599_v22 }
 0x259   :  { %5112 = vmatpush.bf16.msrb.mxu1 %v11628_v10  ;;  %v11503_v10 = vld [vmem:[#allocation8 + $0x88] sm:$0xf]  ;;  %v11752_v31 = vor.u32 %v14599_v38, %v11751_v44  ;;  %v14542_v44 = vld [vmem:[#allocation8 + $0xcc] sm:$0xf]  ;;  %v11537_v38 = vld [vmem:[#allocation8 + $0xd8] sm:$0xf0] }
 0x25a   :  { %v11504_v34 = vor.u32 %v14536_v36, %v11503_v10  ;;  %v14556_v10 = vld [vmem:[#allocation8 + $0x134] sm:$0xf0] }
 0x25c   :  { %5099 = vmatpush.bf16.msrb.mxu0 %v11484_v7  ;;  %v14568_v7 = vld [vmem:[#allocation8 + $0x194] sm:$0xf0] }
 0x25d   :  { %5113 = vmatpush.bf16.msrb.mxu1 %v11612_v50  ;;  %v11928_v50 = vor.u32 %v14643_v40, %v11927_v4  ;;  %v15837_v54 = vpop.f32.mrf.mxu0  ;;  %v14631_v4 = vld [vmem:[#allocation8 + $0x38c] sm:$0xf0]  ;;  %v11439_v40 = vld [vmem:[#allocation8 + $0x8] sm:$0xf] }
 0x25e   :  { %v11880_v36 = vor.u32 %v14631_v4, %v11879_v0  ;;  %v14538_v4 = vld [vmem:[#allocation8 + $0xac] sm:$0xf] }
 0x25f   :  { %5081 = vmatpush.bf16.msra.mxu3 %v11928_v50  ;;  %v11735_v50 = vld [vmem:[#allocation8 + $0x260] sm:$0xf] }
 0x260   :  { %5100 = vmatpush.bf16.msrb.mxu0 %v11468_v3  ;;  %v14607_v3 = vld [vmem:[#allocation8 + $0x2cc] sm:$0xf0] }
 0x261   :  { %5114 = vmatpush.bf16.msrb.mxu1 %v11596_v62  ;;  %v11632_v62 = vor.u32 %v14568_v7, %v11631_v19  ;;  %v11784_v26 = vor.u32 %v14607_v3, %v11783_v24  ;;  %v15843_v19 = vpop.f32.mrf.mxu3  ;;  %v14520_v3 = vld [vmem:[#allocation8 + $0x14] sm:$0xf0] }
 0x263   :  { %5068 = vmatpush.bf16.msra.mxu2 %v11784_v26  ;;  %5082 = vmatpush.bf16.msra.mxu3 %v11912_v5  ;;  %v14627_v26 = vld [vmem:[#allocation8 + $0x36c] sm:$0xf0] }
 0x264   :  { %5101 = vmatpush.bf16.msrb.mxu0 %v11452_v18  ;;  %v11615_v18 = vld [vmem:[#allocation8 + $0x168] sm:$0xf]  ;;  %v11864_v5 = vor.u32 %v14627_v26, %v11863_v37  ;;  %v11649_v37 = vld [vmem:[#allocation8 + $0x1b8] sm:$0xf0] }
 0x265   :  { %5115 = vmatpush.bf16.msrb.mxu1 %v11580_v15  ;;  %v14564_v15 = vld [vmem:[#allocation8 + $0x174] sm:$0xf0]  ;;  %v15845_v23 = vpop.f32.mrf.mxu0 }
 0x267   :  { %5083 = vmatpush.bf16.msra.mxu3 %v11896_v13  ;;  %v11847_v13 = vld [vmem:[#allocation8 + $0x340] sm:$0xf] }
 0x268   :  { %5102 = vmatpush.bf16.msrb.mxu0 %v11436_v53  ;;  %v11616_v53 = vor.u32 %v14564_v15, %v11615_v18  ;;  %v14546_v18 = vld [vmem:[#allocation8 + $0xec] sm:$0xf]  ;;  %v11553_v15 = vld [vmem:[#allocation8 + $0xf8] sm:$0xf0] }
 0x269   :  { %5116 = vmatpush.bf16.msrb.mxu1 %v11564_v61  ;;  %v11471_v61 = vld [vmem:[#allocation8 + $0x48] sm:$0xf]  ;;  %v11556_v22 = vor.u32 %v14546_v18, %v11553_v15  ;;  %v15857_v26 = vpop.f32.mrf.mxu3  ;;  %v11815_v18 = vld [vmem:[#allocation8 + $0x300] sm:$0xf]  ;;  %v14615_v15 = vld [vmem:[#allocation8 + $0x30c] sm:$0xf0] }
 0x26b   :  { %5103 = vmatmul.bf16.vlgmr.msrb.gmra.mxu0 %v15768_v12  ;;  %5084 = vmatpush.bf16.msra.mxu3 %v11880_v36  ;;  %v14587_v36 = vld [vmem:[#allocation8 + $0x22c] sm:$0xf0] }
 0x26c   :  { %5151 = vmatpush.bf16.msra.mxu0 %v11552_v14  ;;  %5117 = vmatmul.bf16.vlgmr.msrb.gmra.mxu1 %v15770_v27  ;;  %v14528_v14 = vld [vmem:[#allocation8 + $0x54] sm:$0xf0] }
 0x26d   :  { %5165 = vmatpush.bf16.msra.mxu1 %v11680_v56  ;;  %v11768_v56 = vor.u32 %v14603_v42, %v11767_v6  ;;  %v11681_v6 = vld [vmem:[#allocation8 + $0x1f8] sm:$0xf0] }
 0x26e   :  { %v15847_v42 = vld [vmem:[#allocation7] sm:$0xf] }
 0x26f   :  { %5069 = vmatpush.bf16.msra.mxu2 %v11768_v56  ;;  %v684_v52 = vperm.slane %v15847_v42, 3  ;;  %5085 = vmatpush.bf16.msra.mxu3 %v11864_v5  ;;  %v14609_v5 = vld [vmem:[#allocation8 + $0x2e4] sm:$0xf]  ;;  %v11769_v42 = vld [vmem:[#allocation8 + $0x2b0] sm:$0xf0] }
 0x270   :  { %5152 = vmatpush.bf16.msra.mxu0 %v11536_v28  ;;  %v15839_v28 = vpop.f32.mrf.mxu1 }
 0x271   :  { %5166 = vmatpush.bf16.msra.mxu1 %v11664_v32  ;;  %v11472_v32 = vor.u32 %v14528_v14, %v11471_v61  ;;  %v11719_v61 = vld [vmem:[#allocation8 + $0x240] sm:$0xf]  ;;  %v14591_v14 = vld [vmem:[#allocation8 + $0x24c] sm:$0xf0]  ;;  %v4011_v0 = vadd.f32 %v15837_v54, %v684_v52 }
 0x272   :  { %v11720_v47 = vor.u32 %v14591_v14, %v11719_v61  ;;  %v11929_v61 = vld [vmem:[#allocation8 + $0x3f0] sm:$0xf0] }
 0x273   :  { %5070 = vmatpush.bf16.msra.mxu2 %v11752_v31  ;;  %v11665_v31 = vld [vmem:[#allocation8 + $0x1d8] sm:$0xf0]  ;;  %v4025_v14 = vadd.f32 %v15839_v28, %v4011_v0  ;;  %v14566_v28 = vld [vmem:[#allocation8 + $0x18c] sm:$0xf] }
 0x274   :  { %5153 = vmatpush.bf16.msra.mxu0 %v11520_v46  ;;  %v14524_v46 = vld [vmem:[#allocation8 + $0x34] sm:$0xf0] }
 0x275   :  { %5167 = vmatpush.bf16.msra.mxu1 %v11648_v35  ;;  %v11583_v35 = vld [vmem:[#allocation8 + $0x128] sm:$0xf]  ;;  %v11456_v7 = vor.u32 %v14524_v46, %v11455_v30  ;;  %v14574_v46 = vld [vmem:[#allocation8 + $0x1cc] sm:$0xf]  ;;  %v4039_v0 = vadd.f32 %v15841_v1, %v4025_v14  ;;  %v11913_v1 = vld [vmem:[#allocation8 + $0x3d0] sm:$0xf0] }
 0x276   :  { %v11584_v24 = vor.u32 %v14556_v10, %v11583_v35  ;;  %v11521_v35 = vld [vmem:[#allocation8 + $0xb8] sm:$0xf0]  ;;  %v11703_v10 = vld [vmem:[#allocation8 + $0x220] sm:$0xf]  ;;  %v11668_v54 = vor.u32 %v14574_v46, %v11665_v31 }
 0x277   :  { %v11633_v31 = vld [vmem:[#allocation8 + $0x198] sm:$0xf0] }
 0x278   :  { %5154 = vmatpush.bf16.msra.mxu0 %v11504_v34  ;;  %v14595_v34 = vld [vmem:[#allocation8 + $0x26c] sm:$0xf0]  ;;  %v15850_v56 = vpop.f32.mrf.mxu1  ;;  %v11601_v14 = vld [vmem:[#allocation8 + $0x158] sm:$0xf0] }
 0x279   :  { %5168 = vmatpush.bf16.msra.mxu1 %v11632_v62  ;;  %v11567_v62 = vld [vmem:[#allocation8 + $0x108] sm:$0xf]  ;;  %v11736_v17 = vor.u32 %v14595_v34, %v11735_v50  ;;  %v11540_v50 = vor.u32 %v14542_v44, %v11537_v38  ;;  %v14570_v34 = vld [vmem:[#allocation8 + $0x1ac] sm:$0xf] }
 0x27a   :  { %v11568_v43 = vor.u32 %v14552_v55, %v11567_v62  ;;  %v11687_v62 = vld [vmem:[#allocation8 + $0x200] sm:$0xf]  ;;  %v11652_v44 = vor.u32 %v14570_v34, %v11649_v37  ;;  %v14534_v38 = vld [vmem:[#allocation8 + $0x8c] sm:$0xf] }
 0x27b   :  { %5071 = vmatpush.bf16.msra.mxu2 %v11736_v17  ;;  %v14583_v17 = vld [vmem:[#allocation8 + $0x20c] sm:$0xf0] }
 0x27c   :  { %5155 = vmatpush.bf16.msra.mxu0 %v11488_v21  ;;  %v14578_v21 = vld [vmem:[#allocation8 + $0x1ec] sm:$0xf] }
 0x27d   :  { %5169 = vmatpush.bf16.msra.mxu1 %v11616_v53  ;;  %v11440_v53 = vor.u32 %v14520_v3, %v11439_v40  ;;  %v11684_v30 = vor.u32 %v14578_v21, %v11681_v6  ;;  %v11831_v40 = vld [vmem:[#allocation8 + $0x320] sm:$0xf]  ;;  %v14619_v3 = vld [vmem:[#allocation8 + $0x32c] sm:$0xf0]  ;;  %v11688_v21 = vor.u32 %v14583_v17, %v11687_v62  ;;  %v11801_v6 = vld [vmem:[#allocation8 + $0x2f0] sm:$0xf0]  ;;  %v4053_v17 = vadd.f32 %v15843_v19, %v4039_v0 }
 0x27e   :  { %v11832_v55 = vor.u32 %v14619_v3, %v11831_v40  ;;  %v14530_v40 = vld [vmem:[#allocation8 + $0x6c] sm:$0xf]  ;;  %v11617_v3 = vld [vmem:[#allocation8 + $0x178] sm:$0xf0]  ;;  %v11897_v19 = vld [vmem:[#allocation8 + $0x3b0] sm:$0xf0] }
 0x27f   :  { %5072 = vmatpush.bf16.msra.mxu2 %v11720_v47  ;;  %v11804_v47 = vor.u32 %v14609_v5, %v11801_v6  ;;  %v11473_v6 = vld [vmem:[#allocation8 + $0x58] sm:$0xf0] }
 0x280   :  { %5156 = vmatpush.bf16.msra.mxu0 %v11472_v32  ;;  %v14623_v32 = vld [vmem:[#allocation8 + $0x34c] sm:$0xf0]  ;;  %v15865_v46 = vpop.f32.mrf.mxu1 }
 0x281   :  { %5170 = vmatpush.bf16.msra.mxu1 %v11600_v41  ;;  %v11848_v41 = vor.u32 %v14623_v32, %v11847_v13  ;;  %v11524_v13 = vor.u32 %v14538_v4, %v11521_v35  ;;  %v14605_v35 = vld [vmem:[#allocation8 + $0x2c4] sm:$0xf] }
 0x282   :  { %v11788_v34 = vor.u32 %v14605_v35, %v11785_v2  ;;  %v11585_v35 = vld [vmem:[#allocation8 + $0x138] sm:$0xf0] }
 0x283   :  { %5086 = vmatpush.bf16.msra.mxu3 %v11848_v41  ;;  %v11505_v41 = vld [vmem:[#allocation8 + $0x98] sm:$0xf0] }
 0x284   :  { %5157 = vmatpush.bf16.msra.mxu0 %v11456_v7  ;;  %v15855_v7 = vpop.f32.mrf.mxu2  ;;  %v11508_v4 = vor.u32 %v14534_v38, %v11505_v41 }
 0x285   :  { %5171 = vmatpush.bf16.msra.mxu1 %v11584_v24  ;;  %v11704_v24 = vor.u32 %v14587_v36, %v11703_v10  ;;  %v14637_v10 = vld [vmem:[#allocation8 + $0x3c4] sm:$0xf]  ;;  %v11636_v36 = vor.u32 %v14566_v28, %v11633_v31  ;;  %v14522_v28 = vld [vmem:[#allocation8 + $0x2c] sm:$0xf]  ;;  %v11457_v31 = vld [vmem:[#allocation8 + $0x38] sm:$0xf0] }
 0x286   :  { %v11916_v62 = vor.u32 %v14637_v10, %v11913_v1 }
 0x287   :  { %5073 = vmatpush.bf16.msra.mxu2 %v11704_v24  ;;  %5087 = vmatpush.bf16.msra.mxu3 %v11832_v55  ;;  %v14562_v24 = vld [vmem:[#allocation8 + $0x16c] sm:$0xf] }
 0x288   :  { %5158 = vmatpush.bf16.msra.mxu0 %v11440_v53  ;;  %v14641_v53 = vld [vmem:[#allocation8 + $0x3e4] sm:$0xf]  ;;  %v11620_v5 = vor.u32 %v14562_v24, %v11617_v3  ;;  %v14518_v3 = vld [vmem:[#allocation8 + $0xc] sm:$0xf] }
 0x289   :  { %5172 = vmatpush.bf16.msra.mxu1 %v11568_v43  ;;  %v4066_v43 = vpop.f32.mrf.mxu0  ;;  %v11932_v32 = vor.u32 %v14641_v53, %v11929_v61  ;;  %v14558_v61 = vld [vmem:[#allocation8 + $0x14c] sm:$0xf] }
 0x28a   :  { %v11604_v41 = vor.u32 %v14558_v61, %v11601_v14  ;;  %v11849_v61 = vld [vmem:[#allocation8 + $0x350] sm:$0xf0] }
 0x28b   :  { %5159 = vmatmul.bf16.vlgmr.msra.gmra.mxu0 %v15768_v12  ;;  %5074 = vmatpush.bf16.msra.mxu2 %v11688_v21  ;;  %v14526_v21 = vld [vmem:[#allocation8 + $0x4c] sm:$0xf] }
 0x28c   :  { %5207 = vmatpush.bf16.msrb.mxu0 %v11556_v22  ;;  %5173 = vmatmul.bf16.vlgmr.msra.gmra.mxu1 %v15770_v27  ;;  %v11816_v22 = vor.u32 %v14615_v15, %v11815_v18  ;;  %v15872_v37 = vpop.f32.mrf.mxu2 }
 0x28d   :  { %5221 = vmatpush.bf16.msrb.mxu1 %v11684_v30  ;;  %v3789_v30 = vadd.f32 %v15780_v9, %v683_v45  ;;  %v4013_v9 = vadd.f32 %v15845_v23, %v684_v52  ;;  %v14601_v23 = vld [vmem:[#allocation8 + $0x2a4] sm:$0xf] }
 0x28e   :  { %5088 = vmatpush.bf16.msra.mxu3 %v11816_v22  ;;  %v14633_v52 = vld [vmem:[#allocation8 + $0x3a4] sm:$0xf]  ;;  %v11772_v53 = vor.u32 %v14601_v23, %v11769_v42  ;;  %v11569_v23 = vld [vmem:[#allocation8 + $0x118] sm:$0xf0] }
 0x28f   :  { %5123 = vmatpush.bf16.msrb.mxu2 %v11804_v47  ;;  %v3803_v45 = vadd.f32 %v15782_v51, %v3789_v30  ;;  %v4027_v18 = vadd.f32 %v15850_v56, %v4013_v9  ;;  %v11900_v22 = vor.u32 %v14633_v52, %v11897_v19  ;;  %v4067_v47 = vadd.f32 %v4066_v43, %v4053_v17  ;;  %v11753_v30 = vld [vmem:[#allocation8 + $0x290] sm:$0xf0]  ;;  %v14629_v56 = vld [vmem:[#allocation8 + $0x384] sm:$0xf]  ;;  %v14554_v43 = vld [vmem:[#allocation8 + $0x12c] sm:$0xf] }
 0x290   :  { %5208 = vmatpush.bf16.msrb.mxu0 %v11540_v50  ;;  %v11489_v50 = vld [vmem:[#allocation8 + $0x78] sm:$0xf0]  ;;  %v11460_v9 = vor.u32 %v14522_v28, %v11457_v31  ;;  %v11588_v24 = vor.u32 %v14554_v43, %v11585_v35 }
 0x291   :  { %5222 = vmatpush.bf16.msrb.mxu1 %v11668_v54  ;;  %v15875_v54 = vpop.f32.mrf.mxu3  ;;  %v11492_v51 = vor.u32 %v14530_v40, %v11489_v50  ;;  %v3817_v55 = vadd.f32 %v15788_v63, %v3803_v45  ;;  %v4068_v15 = vpop.f32.mrf.mxu0  ;;  %v14597_v63 = vld [vmem:[#allocation8 + $0x284] sm:$0xf]  ;;  %v4041_v38 = vadd.f32 %v15855_v7, %v4027_v18  ;;  %v4081_v10 = vadd.f32 %v15865_v46, %v4067_v47  ;;  %v11865_v46 = vld [vmem:[#allocation8 + $0x370] sm:$0xf0] }
 0x292   :  { %5137 = vmatpush.bf16.msrb.mxu3 %v11932_v32  ;;  %v11476_v32 = vor.u32 %v14526_v21, %v11473_v6  ;;  %v11756_v0 = vor.u32 %v14597_v63, %v11753_v30  ;;  %v14625_v40 = vld [vmem:[#allocation8 + $0x364] sm:$0xf]  ;;  %v11705_v63 = vld [vmem:[#allocation8 + $0x230] sm:$0xf0] }
 0x293   :  { %5124 = vmatpush.bf16.msrb.mxu2 %v11788_v34  ;;  %v4055_v50 = vadd.f32 %v15857_v26, %v4041_v38  ;;  %v11868_v42 = vor.u32 %v14625_v40, %v11865_v46  ;;  %v4095_v52 = vadd.f32 %v15872_v37, %v4081_v10  ;;  %v11721_v26 = vld [vmem:[#allocation8 + $0x250] sm:$0xf0]  ;;  %v14617_v30 = vld [vmem:[#allocation8 + $0x324] sm:$0xf] }
 0x294   :  { %5209 = vmatpush.bf16.msrb.mxu0 %v11524_v13  ;;  %v15879_v13 = vpop.f32.mrf.mxu1  ;;  %v4096_v45 = vpop.f32.mrf.mxu2  ;;  %v11833_v38 = vld [vmem:[#allocation8 + $0x330] sm:$0xf0] }
 0x295   :  { %5223 = vmatpush.bf16.msrb.mxu1 %v11652_v44  ;;  %v3831_v44 = vadd.f32 %v15790_v59, %v3817_v55  ;;  %v11737_v59 = vld [vmem:[#allocation8 + $0x270] sm:$0xf0]  ;;  %v4069_v6 = vadd.f32 %v4068_v15, %v4055_v50  ;;  %v4109_v37 = vadd.f32 %v15875_v54, %v4095_v52  ;;  %v14581_v54 = vld [vmem:[#allocation8 + $0x204] sm:$0xf] }
 0x296   :  { %5138 = vmatpush.bf16.msrb.mxu3 %v11916_v62  ;;  %v11441_v62 = vld [vmem:[#allocation8 + $0x18] sm:$0xf0] }
 0x297   :  { %5125 = vmatpush.bf16.msrb.mxu2 %v11772_v53  ;;  %v3845_v7 = vadd.f32 %v15795_v60, %v3831_v44  ;;  %v11444_v18 = vor.u32 %v14518_v3, %v11441_v62  ;;  %v14589_v60 = vld [vmem:[#allocation8 + $0x244] sm:$0xf] }
 0x298   :  { %5210 = vmatpush.bf16.msrb.mxu0 %v11508_v4  ;;  %v11881_v4 = vld [vmem:[#allocation8 + $0x390] sm:$0xf0]  ;;  %v11724_v19 = vor.u32 %v14589_v60, %v11721_v26 }
 0x299   :  { %5224 = vmatpush.bf16.msrb.mxu1 %v11636_v36  ;;  %v11884_v2 = vor.u32 %v14629_v56, %v11881_v4  ;;  %v14593_v36 = vld [vmem:[#allocation8 + $0x264] sm:$0xf]  ;;  %v4110_v34 = vpop.f32.mrf.mxu3  ;;  %v4122_v1 = vpop.f32.mrf.mxu0  ;;  %v3859_v21 = vadd.f32 %v15797_v8, %v3845_v7  ;;  %v4083_v56 = vadd.f32 %v15879_v13, %v4069_v6 }
 0x29a   :  { %5139 = vmatpush.bf16.msrb.mxu3 %v11900_v22  ;;  %v11740_v17 = vor.u32 %v14593_v36, %v11737_v59  ;;  %v4123_v8 = vadd.f32 %v4122_v1, %v4109_v37  ;;  %v14613_v4 = vld [vmem:[#allocation8 + $0x304] sm:$0xf] }
 0x29b   :  { %5126 = vmatpush.bf16.msrb.mxu2 %v11756_v0  ;;  %v3873_v22 = vadd.f32 %v15803_v25, %v3859_v21  ;;  %v4097_v25 = vadd.f32 %v4096_v45, %v4083_v56  ;;  %v11689_v0 = vld [vmem:[#allocation8 + $0x210] sm:$0xf0] }
 0x29c   :  { %5211 = vmatpush.bf16.msrb.mxu0 %v11492_v51  ;;  %v14550_v51 = vld [vmem:[#allocation8 + $0x10c] sm:$0xf]  ;;  %v4136_v55 = vpop.f32.mrf.mxu1  ;;  %v4150_v47 = vpop.f32.mrf.mxu2  ;;  %v11692_v35 = vor.u32 %v14581_v54, %v11689_v0  ;;  %v11775_v0 = vld [vmem:[#allocation8 + $0x2a8] sm:$0xf] }
 0x29d   :  { %5225 = vmatpush.bf16.msrb.mxu1 %v11620_v5  ;;  %v14621_v5 = vld [vmem:[#allocation8 + $0x344] sm:$0xf]  ;;  %v11572_v53 = vor.u32 %v14550_v51, %v11569_v23  ;;  %v3887_v28 = vadd.f32 %v15805_v11, %v3873_v22  ;;  %v4137_v43 = vadd.f32 %v4136_v55, %v4123_v8  ;;  %v4111_v36 = vadd.f32 %v4110_v34, %v4097_v25  ;;  %v14640_v25 = vld [vmem:[#allocation8 + $0x3d4] sm:$0xf0] }
 0x29e   :  { %5140 = vmatpush.bf16.msrb.mxu3 %v11884_v2  ;;  %v11852_v14 = vor.u32 %v14621_v5, %v11849_v61  ;;  %v11817_v2 = vld [vmem:[#allocation8 + $0x310] sm:$0xf0] }
 0x29f   :  { %5127 = vmatpush.bf16.msrb.mxu2 %v11740_v17  ;;  %v3901_v13 = vadd.f32 %v15810_v58, %v3887_v28  ;;  %v4151_v11 = vadd.f32 %v4150_v47, %v4137_v43  ;;  %v14612_v47 = vld [vmem:[#allocation8 + $0x2f4] sm:$0xf0]  ;;  %v11919_v28 = vld [vmem:[#allocation8 + $0x3c8] sm:$0xf] }
 0x2a0   :  { %5212 = vmatpush.bf16.msrb.mxu0 %v11476_v32  ;;  %v14585_v32 = vld [vmem:[#allocation8 + $0x224] sm:$0xf]  ;;  %v11920_v54 = vor.u32 %v14640_v25, %v11919_v28  ;;  %v14636_v43 = vld [vmem:[#allocation8 + $0x3b4] sm:$0xf0]  ;;  %v14659_v28 = vld [vmem:[#allocation13 + $0x6c] sm:$0xf0] }
 0x2a1   :  { %5226 = vmatpush.bf16.msrb.mxu1 %v11604_v41  ;;  %v4164_v15 = vpop.f32.mrf.mxu3  ;;  %v11708_v44 = vor.u32 %v14585_v32, %v11705_v63  ;;  %v11836_v41 = vor.u32 %v14617_v30, %v11833_v38  ;;  %v4124_v31 = vpop.f32.mrf.mxu0  ;;  %v11935_v32 = vld [vmem:[#allocation8 + $0x3e8] sm:$0xf]  ;;  %v14616_v25 = vld [vmem:[#allocation8 + $0x314] sm:$0xf0] }
 0x2a2   :  { %5141 = vmatpush.bf16.msrb.mxu3 %v11868_v42  ;;  %v4125_v45 = vadd.f32 %v4124_v31, %v4111_v36  ;;  %v4165_v40 = vadd.f32 %v4164_v15, %v4151_v11  ;;  %v14675_v36 = vld [vmem:[#allocation13 + $0xec] sm:$0xf0]  ;;  %v14600_v11 = vld [vmem:[#allocation8 + $0x294] sm:$0xf0] }
 0x2a3   :  { %5128 = vmatpush.bf16.msrb.mxu2 %v11724_v19 }
 0x2a4   :  { %5213 = vmatpush.bf16.msrb.mxu0 %v11460_v9  ;;  %v4138_v10 = vpop.f32.mrf.mxu1  ;;  %v11820_v9 = vor.u32 %v14613_v4, %v11817_v2  ;;  %v4152_v59 = vpop.f32.mrf.mxu2  ;;  %v14604_v4 = vld [vmem:[#allocation8 + $0x2b4] sm:$0xf0] }
 0x2a5   :  { %5227 = vmatpush.bf16.msrb.mxu1 %v11588_v24  ;;  %v4139_v1 = vadd.f32 %v4138_v10, %v4125_v45  ;;  %v11759_v10 = vld [vmem:[#allocation8 + $0x288] sm:$0xf]  ;;  %v14632_v45 = vld [vmem:[#allocation8 + $0x394] sm:$0xf0] }
 0x2a6   :  { %5142 = vmatpush.bf16.msrb.mxu3 %v11852_v14 }
 0x2a7   :  { %5129 = vmatpush.bf16.msrb.mxu2 %v11708_v44  ;;  %v4153_v62 = vadd.f32 %v4152_v59, %v4139_v1  ;;  %v11791_v44 = vld [vmem:[#allocation8 + $0x2c8] sm:$0xf] }
 0x2a8   :  { %5214 = vmatpush.bf16.msrb.mxu0 %v11444_v18  ;;  %v4227_v18 = vmax.f32 %v15823_v48, 0.0  ;;  %v14644_v48 = vld [vmem:[#allocation8 + $0x3f4] sm:$0xf0]  ;;  %v11743_v1 = vld [vmem:[#allocation8 + $0x268] sm:$0xf] }
 0x2a9   :  { %5228 = vmatpush.bf16.msrb.mxu1 %v11572_v53  ;;  %v4166_v7 = vpop.f32.mrf.mxu3  ;;  %v4178_v50 = vpop.f32.mrf.mxu0  ;;  %v11936_v15 = vor.u32 %v14644_v48, %v11935_v32  ;;  %v12135_v48 = vld [vmem:[#allocation13 + $0x180] sm:$0xf] }
 0x2aa   :  { %5143 = vmatpush.bf16.msrb.mxu3 %v11836_v41  ;;  %v4179_v58 = vadd.f32 %v4178_v50, %v4165_v40  ;;  %v4167_v51 = vadd.f32 %v4166_v7, %v4153_v62  ;;  %v14608_v41 = vld [vmem:[#allocation8 + $0x2d4] sm:$0xf0]  ;;  %v14707_v40 = vld [vmem:[#allocation13 + $0x1ec] sm:$0xf0]  ;;  %v11760_v7 = vor.u32 %v14600_v11, %v11759_v10  ;;  %v11975_v11 = vld [vmem:[#allocation13 + $0x40] sm:$0xf] }
 0x2ab   :  { %5215 = vmatmul.bf16.vlgmr.msrb.gmra.mxu0 %v15768_v12  ;;  %5130 = vmatpush.bf16.msrb.mxu2 %v11692_v35  ;;  %v3915_v12 = vadd.f32 %v15812_v49, %v3901_v13  ;;  %v11792_v31 = vor.u32 %v14608_v41, %v11791_v44  ;;  %v11903_v13 = vld [vmem:[#allocation8 + $0x3a8] sm:$0xf]  ;;  %v11776_v35 = vor.u32 %v14604_v4, %v11775_v0  ;;  %v14596_v62 = vld [vmem:[#allocation8 + $0x274] sm:$0xf0]  ;;  %v11991_v41 = vld [vmem:[#allocation13 + $0x60] sm:$0xf] }
 0x2ac   :  { %5229 = vmatmul.bf16.vlgmr.msrb.gmra.mxu1 %v15770_v27  ;;  %v4192_v24 = vpop.f32.mrf.mxu1  ;;  %v11904_v2 = vor.u32 %v14636_v43, %v11903_v13  ;;  %v11992_v0 = vor.u32 %v14659_v28, %v11991_v41  ;;  %v14642_v4 = vld [vmem:[#allocation8 + $0x3ec] sm:$0xf]  ;;  %v11937_v13 = vld [vmem:[#allocation8 + $0x3f8] sm:$0xf0]  ;;  %v12119_v43 = vld [vmem:[#allocation13 + $0x160] sm:$0xf] }
 0x2ad   :  { %v3929_v27 = vadd.f32 %v15818_v20, %v3915_v12  ;;  %v4193_v17 = vadd.f32 %v4192_v24, %v4179_v58  ;;  %v11887_v12 = vld [vmem:[#allocation8 + $0x388] sm:$0xf]  ;;  %v12039_v24 = vld [vmem:[#allocation13 + $0xc0] sm:$0xf]  ;;  %v11873_v41 = vld [vmem:[#allocation8 + $0x378] sm:$0xf0] }
 0x2ae   :  { %5144 = vmatpush.bf16.msrb.mxu3 %v11820_v9  ;;  %v12055_v9 = vld [vmem:[#allocation13 + $0xe0] sm:$0xf]  ;;  %v11888_v50 = vor.u32 %v14632_v45, %v11887_v12  ;;  %v11940_v45 = vor.u32 %v14642_v4, %v11937_v13  ;;  %v14590_v4 = vld [vmem:[#allocation8 + $0x24c] sm:$0xf] }
 0x2af   :  { %v3943_v3 = vadd.f32 %v15820_v29, %v3929_v27  ;;  %v12056_v59 = vor.u32 %v14675_v36, %v12055_v9  ;;  %v12183_v27 = vld [vmem:[#allocation13 + $0x1e0] sm:$0xf]  ;;  %v14606_v9 = vld [vmem:[#allocation8 + $0x2cc] sm:$0xf] }
 0x2b0   :  { %v4206_v46 = vpop.f32.mrf.mxu2  ;;  %v12184_v58 = vor.u32 %v14707_v40, %v12183_v27  ;;  %v14638_v27 = vld [vmem:[#allocation8 + $0x3cc] sm:$0xf]  ;;  %v14655_v40 = vld [vmem:[#allocation13 + $0x4c] sm:$0xf0] }
 0x2b1   :  { %v3957_v34 = vadd.f32 %v15829_v16, %v3943_v3  ;;  %v4207_v23 = vadd.f32 %v4206_v46, %v4193_v17  ;;  %v4220_v49 = vpop.f32.mrf.mxu3  ;;  %v4180_v42 = vpop.f32.mrf.mxu0  ;;  %8421 = vmatpush.bf16.msra.mxu0 %v12056_v59  ;;  %v14671_v3 = vld [vmem:[#allocation13 + $0xcc] sm:$0xf0]  ;;  %v14628_v17 = vld [vmem:[#allocation8 + $0x374] sm:$0xf0]  ;;  %v11793_v59 = vld [vmem:[#allocation8 + $0x2d8] sm:$0xf0] }
 0x2b2   :  { %v4181_v55 = vadd.f32 %v4180_v42, %v4167_v51  ;;  %v12040_v46 = vor.u32 %v14671_v3, %v12039_v24  ;;  %8434 = vmatpush.bf16.msra.mxu1 %v12184_v58  ;;  %v12167_v51 = vld [vmem:[#allocation13 + $0x1c0] sm:$0xf]  ;;  %v14687_v58 = vld [vmem:[#allocation13 + $0x14c] sm:$0xf0] }
 0x2b3   :  { %v3971_v52 = vadd.f32 %v15831_v39, %v3957_v34  ;;  %v4221_v20 = vadd.f32 %v4220_v49, %v4207_v23  ;;  %v11807_v39 = vld [vmem:[#allocation8 + $0x2e8] sm:$0xf]  ;;  %v14703_v23 = vld [vmem:[#allocation13 + $0x1cc] sm:$0xf0]  ;;  %v11744_v49 = vor.u32 %v14596_v62, %v11743_v1  ;;  %v12103_v1 = vld [vmem:[#allocation13 + $0x140] sm:$0xf] }
 0x2b4   :  { %v4194_v5 = vpop.f32.mrf.mxu1  ;;  %v11808_v8 = vor.u32 %v14612_v47, %v11807_v39  ;;  %v11871_v34 = vld [vmem:[#allocation8 + $0x368] sm:$0xf]  ;;  %v14588_v39 = vld [vmem:[#allocation8 + $0x234] sm:$0xf0]  ;;  %v12104_v24 = vor.u32 %v14687_v58, %v12103_v1  ;;  %v11959_v3 = vld [vmem:[#allocation13 + $0x20] sm:$0xf] }
 0x2b5   :  { %v3985_v60 = vadd.f32 %v15833_v33, %v3971_v52  ;;  %v4228_v26 = vmax.f32 %v4221_v20, 0.0  ;;  %v4195_v21 = vadd.f32 %v4194_v5, %v4181_v55  ;;  %8422 = vmatpush.bf16.msra.mxu0 %v12040_v46  ;;  %v11872_v42 = vor.u32 %v14628_v17, %v11871_v34  ;;  %v11727_v52 = vld [vmem:[#allocation8 + $0x248] sm:$0xf]  ;;  %v12023_v55 = vld [vmem:[#allocation13 + $0xa0] sm:$0xf] }
 0x2b6   :  { %v12168_v20 = vor.u32 %v14703_v23, %v12167_v51  ;;  %v14624_v5 = vld [vmem:[#allocation8 + $0x354] sm:$0xf0]  ;;  %v14651_v62 = vld [vmem:[#allocation13 + $0x2c] sm:$0xf0]  ;;  %v11796_v34 = vor.u32 %v14606_v9, %v11793_v59  ;;  %v14602_v46 = vld [vmem:[#allocation8 + $0x2ac] sm:$0xf] }
 0x2b7   :  { %v4234_v29 = vpack.c.bf16 %v4228_v26, %v4227_v18  ;;  %v3999_v16 = vadd.f32 %v15835_v57, %v3985_v60  ;;  %v14667_v18 = vld [vmem:[#allocation13 + $0xac] sm:$0xf0]  ;;  %v14592_v60 = vld [vmem:[#allocation8 + $0x254] sm:$0xf0]  ;;  %v11855_v26 = vld [vmem:[#allocation8 + $0x348] sm:$0xf] }
 0x2b8   :  { %v4208_v6 = vpop.f32.mrf.mxu2  ;;  %8435 = vmatpush.bf16.msra.mxu1 %v12168_v20  ;;  %v14620_v47 = vld [vmem:[#allocation8 + $0x334] sm:$0xf0]  ;;  %v11777_v51 = vld [vmem:[#allocation8 + $0x2b8] sm:$0xf0]  ;;  %v14634_v23 = vld [vmem:[#allocation8 + $0x3ac] sm:$0xf] }
 0x2b9   :  { %4238 = vst [vmem:[#allocation16 + $0x8] sm:$0xff] %v4234_v29  ;;  %v4209_v53 = vadd.f32 %v4208_v6, %v4195_v21  ;;  %v4222_v19 = vpop.f32.mrf.mxu3  ;;  %v4231_v14 = vmax.f32 %v3999_v16, 0.0  ;;  %v4385_v63 = vunpack.c.l.b16 %v4234_v29  ;;  %v4386_v33 = vunpack.c.h.b16 %v4234_v29  ;;  %v12151_v21 = vld [vmem:[#allocation13 + $0x1a0] sm:$0xf]  ;;  %v14699_v6 = vld [vmem:[#allocation13 + $0x1ac] sm:$0xf0] }
 0x2ba   :  { %v12024_v29 = vor.u32 %v14667_v18, %v12023_v55  ;;  %v11728_v16 = vor.u32 %v14592_v60, %v11727_v52  ;;  %v12087_v52 = vld [vmem:[#allocation13 + $0x120] sm:$0xf]  ;;  %v14683_v20 = vld [vmem:[#allocation13 + $0x12c] sm:$0xf0]  ;;  %v14598_v18 = vld [vmem:[#allocation8 + $0x28c] sm:$0xf] }
 0x2bb   :  { %v4223_v61 = vadd.f32 %v4222_v19, %v4209_v53  ;;  %v11856_v53 = vor.u32 %v14624_v5, %v11855_v26  ;;  %v11711_v19 = vld [vmem:[#allocation8 + $0x228] sm:$0xf]  ;;  %v12088_v55 = vor.u32 %v14683_v20, %v12087_v52  ;;  %v11761_v60 = vld [vmem:[#allocation8 + $0x298] sm:$0xf0]  ;;  %v11943_v26 = vld [vmem:[#allocation13] sm:$0xf] }
 0x2bc   :  { %8423 = vmatpush.bf16.msra.mxu0 %v12024_v29  ;;  %v14647_v5 = vld [vmem:[#allocation13 + $0xc] sm:$0xf0]  ;;  %v11780_v29 = vor.u32 %v14602_v46, %v11777_v51  ;;  %v11857_v9 = vld [vmem:[#allocation8 + $0x358] sm:$0xf0]  ;;  %v14618_v58 = vld [vmem:[#allocation8 + $0x32c] sm:$0xf] }
 0x2bd   :  { %v4232_v22 = vmax.f32 %v4223_v61, 0.0  ;;  %v12152_v61 = vor.u32 %v14699_v6, %v12151_v21  ;;  %v14630_v6 = vld [vmem:[#allocation8 + $0x38c] sm:$0xf]  ;;  %v11713_v1 = vld [vmem:[#allocation8 + $0x238] sm:$0xf0] }
 0x2be   :  { %v14823_v46 = vld [vmem:[#allocation13 + $0x58c] sm:$0xf0]  ;;  %v12503_v52 = vld [vmem:[#allocation13 + $0x460] sm:$0xf] }
 0x2bf   :  { %v4236_v37 = vpack.c.bf16 %v4232_v22, %v4231_v14  ;;  %v12007_v14 = vld [vmem:[#allocation13 + $0x80] sm:$0xf]  ;;  %v14663_v22 = vld [vmem:[#allocation13 + $0x8c] sm:$0xf0]  ;;  %8436 = vmatpush.bf16.msra.mxu1 %v12152_v61  ;;  %v11944_v61 = vor.u32 %v14647_v5, %v11943_v26 }
 0x2c0   :  { %v12008_v32 = vor.u32 %v14663_v22, %v12007_v14  ;;  %v12071_v14 = vld [vmem:[#allocation13 + $0x100] sm:$0xf]  ;;  %v14679_v22 = vld [vmem:[#allocation13 + $0x10c] sm:$0xf0] }
 0x2c1   :  { %4240 = vst [vmem:[#allocation16 + $0x18] sm:$0xff] %v4236_v37  ;;  %v4389_v30 = vunpack.c.l.b16 %v4236_v37  ;;  %v4390_v56 = vunpack.c.h.b16 %v4236_v37  ;;  %v11839_v37 = vld [vmem:[#allocation8 + $0x328] sm:$0xf]  ;;  %v14787_v20 = vld [vmem:[#allocation13 + $0x46c] sm:$0xf0] }
 0x2c2   :  { %8424 = vmatpush.bf16.msra.mxu0 %v12008_v32  ;;  %v14835_v32 = vld [vmem:[#allocation13 + $0x5ec] sm:$0xf0]  ;;  %v12439_v26 = vld [vmem:[#allocation13 + $0x3e0] sm:$0xf]  ;;  %9273 = dma.vmem_to_hbm [thread:$0]  %s9266_s17, 512, %s9268_s15, [#allocation4], %s15455_s21, %s15455_s21, %s15456_s22  }
 0x2c3   :  { %v15903_v57 = vpack.c.b16 %v4389_v30, %v4385_v63  ;;  %v15905_v38 = vpack.c.b16 %v4390_v56, %v4386_v33  ;;  %v11695_v63 = vld [vmem:[#allocation8 + $0x208] sm:$0xf]  ;;  %v14584_v33 = vld [vmem:[#allocation8 + $0x214] sm:$0xf0]  ;;  %v14695_v30 = vld [vmem:[#allocation13 + $0x18c] sm:$0xf0]  ;;  %v11712_v56 = vor.u32 %v14588_v39, %v11711_v19 }
 0x2c4   :  { %v12136_v44 = vor.u32 %v14695_v30, %v12135_v48  ;;  %v11889_v19 = vld [vmem:[#allocation8 + $0x398] sm:$0xf0]  ;;  %v11764_v48 = vor.u32 %v14598_v18, %v11761_v60  ;;  %v12311_v18 = vld [vmem:[#allocation13 + $0x2e0] sm:$0xf]  ;;  %v14739_v60 = vld [vmem:[#allocation13 + $0x2ec] sm:$0xf0] }
 0x2c5   :  { %5075 = vmatmul.bf16.vlgmr.msra.gmra.mxu2 %v15903_v57  ;;  %5089 = vmatmul.bf16.vlgmr.msra.gmra.mxu3 %v15905_v38  ;;  %v14771_v5 = vld [vmem:[#allocation13 + $0x3ec] sm:$0xf0] }
 0x2c6   :  { %5179 = vmatpush.bf16.msra.mxu2 %v11808_v8  ;;  %5193 = vmatpush.bf16.msra.mxu3 %v11936_v15  ;;  %v11840_v8 = vor.u32 %v14620_v47, %v11839_v37  ;;  %v11823_v15 = vld [vmem:[#allocation8 + $0x308] sm:$0xf]  ;;  %v12072_v37 = vor.u32 %v14679_v22, %v12071_v14  ;;  %v12695_v47 = vld [vmem:[#allocation13 + $0x5e0] sm:$0xf]  ;;  %v12312_v22 = vor.u32 %v14739_v60, %v12311_v18  ;;  %v14755_v18 = vld [vmem:[#allocation13 + $0x36c] sm:$0xf0] }
 0x2c7   :  { %8437 = vmatpush.bf16.msra.mxu1 %v12136_v44  ;;  %v11824_v10 = vor.u32 %v14616_v25, %v11823_v15  ;;  %8425 = vmatpush.bf16.msra.mxu0 %v11992_v0  ;;  %v12696_v30 = vor.u32 %v14835_v32, %v12695_v47  ;;  %v11745_v15 = vld [vmem:[#allocation8 + $0x278] sm:$0xf0]  ;;  %v14626_v44 = vld [vmem:[#allocation8 + $0x36c] sm:$0xf]  ;;  %v12679_v25 = vld [vmem:[#allocation13 + $0x5c0] sm:$0xf] }
 0x2c8   :  { %v11876_v0 = vor.u32 %v14626_v44, %v11873_v41  ;;  %v12487_v14 = vld [vmem:[#allocation13 + $0x440] sm:$0xf]  ;;  %v14783_v32 = vld [vmem:[#allocation13 + $0x44c] sm:$0xf0] }
 0x2c9   :  { %v12423_v47 = vld [vmem:[#allocation13 + $0x3c0] sm:$0xf] }
 0x2ca   :  { %5180 = vmatpush.bf16.msra.mxu2 %v11792_v31  ;;  %5194 = vmatpush.bf16.msra.mxu3 %v11920_v54  ;;  %v14610_v31 = vld [vmem:[#allocation8 + $0x2ec] sm:$0xf]  ;;  %v11809_v54 = vld [vmem:[#allocation8 + $0x2f8] sm:$0xf0]  ;;  %v13191_v60 = vld [vmem:[#allocation13 + $0x9c0] sm:$0xf] }
 0x2cb   :  { %v11812_v12 = vor.u32 %v14610_v31, %v11809_v54  ;;  %v14831_v31 = vld [vmem:[#allocation13 + $0x5cc] sm:$0xf0] }
 0x2cc   :  { %v12680_v13 = vor.u32 %v14831_v31, %v12679_v25  ;;  %v14731_v25 = vld [vmem:[#allocation13 + $0x2ac] sm:$0xf0]  ;;  %v12407_v31 = vld [vmem:[#allocation13 + $0x3a0] sm:$0xf] }
 0x2ce   :  { %5181 = vmatpush.bf16.msra.mxu2 %v11776_v35  ;;  %5195 = vmatpush.bf16.msra.mxu3 %v11904_v2  ;;  %v14691_v35 = vld [vmem:[#allocation13 + $0x16c] sm:$0xf0]  ;;  %v11696_v2 = vor.u32 %v14584_v33, %v11695_v63  ;;  %v11892_v63 = vor.u32 %v14630_v6, %v11889_v19  ;;  %v14594_v33 = vld [vmem:[#allocation8 + $0x26c] sm:$0xf]  ;;  %v12295_v19 = vld [vmem:[#allocation13 + $0x2c0] sm:$0xf] }
 0x2cf   :  { %v12120_v36 = vor.u32 %v14691_v35, %v12119_v43  ;;  %v11748_v54 = vor.u32 %v14594_v33, %v11745_v15  ;;  %v12535_v43 = vld [vmem:[#allocation13 + $0x4a0] sm:$0xf]  ;;  %v14795_v35 = vld [vmem:[#allocation13 + $0x4ac] sm:$0xf0] }
 0x2d0   :  { %v14819_v6 = vld [vmem:[#allocation13 + $0x56c] sm:$0xf0]  ;;  %v12615_v33 = vld [vmem:[#allocation13 + $0x540] sm:$0xf] }
 0x2d1   :  { %8438 = vmatpush.bf16.msra.mxu1 %v12120_v36  ;;  %v12536_v36 = vor.u32 %v14795_v35, %v12535_v43  ;;  %v14779_v15 = vld [vmem:[#allocation13 + $0x42c] sm:$0xf0]  ;;  %v12263_v35 = vld [vmem:[#allocation13 + $0x280] sm:$0xf] }
 0x2d2   :  { %5182 = vmatpush.bf16.msra.mxu2 %v11760_v7  ;;  %5196 = vmatpush.bf16.msra.mxu3 %v11888_v50  ;;  %v11921_v7 = vld [vmem:[#allocation8 + $0x3d8] sm:$0xf0]  ;;  %v11976_v50 = vor.u32 %v14655_v40, %v11975_v11  ;;  %v12663_v11 = vld [vmem:[#allocation13 + $0x5a0] sm:$0xf] }
 0x2d3   :  { %v11924_v17 = vor.u32 %v14638_v27, %v11921_v7  ;;  %v14586_v27 = vld [vmem:[#allocation8 + $0x22c] sm:$0xf]  ;;  %v12519_v7 = vld [vmem:[#allocation13 + $0x480] sm:$0xf] }
 0x2d4   :  { %8426 = vmatpush.bf16.msra.mxu0 %v11976_v50  ;;  %v14791_v50 = vld [vmem:[#allocation13 + $0x48c] sm:$0xf0]  ;;  %v11716_v51 = vor.u32 %v14586_v27, %v11713_v1  ;;  %v13079_v27 = vld [vmem:[#allocation13 + $0x8e0] sm:$0xf] }
 0x2d5   :  { %5131 = vmatmul.bf16.vlgmr.msrb.gmra.mxu2 %v15903_v57  ;;  %5145 = vmatmul.bf16.vlgmr.msrb.gmra.mxu3 %v15905_v38 }
 0x2d6   :  { %5183 = vmatpush.bf16.msra.mxu2 %v11744_v49  ;;  %5197 = vmatpush.bf16.msra.mxu3 %v11872_v42  ;;  %v11905_v49 = vld [vmem:[#allocation8 + $0x3b8] sm:$0xf0]  ;;  %v11960_v42 = vor.u32 %v14651_v62, %v11959_v3  ;;  %v12520_v3 = vor.u32 %v14791_v50, %v12519_v7  ;;  %v12647_v62 = vld [vmem:[#allocation13 + $0x580] sm:$0xf]  ;;  %v14759_v7 = vld [vmem:[#allocation13 + $0x38c] sm:$0xf0] }
 0x2d7   :  { %8439 = vmatpush.bf16.msra.mxu1 %v12104_v24  ;;  %v11908_v21 = vor.u32 %v14634_v23, %v11905_v49  ;;  %v11841_v24 = vld [vmem:[#allocation8 + $0x338] sm:$0xf0]  ;;  %v14614_v49 = vld [vmem:[#allocation8 + $0x30c] sm:$0xf]  ;;  %v12583_v50 = vld [vmem:[#allocation13 + $0x500] sm:$0xf] }
 0x2d8   :  { %8427 = vmatpush.bf16.msra.mxu0 %v11960_v42  ;;  %v11844_v23 = vor.u32 %v14618_v58, %v11841_v24  ;;  %v12648_v42 = vor.u32 %v14823_v46, %v12647_v62 }
 0x2da   :  { %5184 = vmatpush.bf16.msra.mxu2 %v11728_v16  ;;  %5198 = vmatpush.bf16.msra.mxu3 %v11856_v53  ;;  %v12567_v16 = vld [vmem:[#allocation13 + $0x4e0] sm:$0xf]  ;;  %v14803_v53 = vld [vmem:[#allocation13 + $0x4ec] sm:$0xf0] }
 0x2db   :  { %8440 = vmatpush.bf16.msra.mxu1 %v12088_v55  ;;  %v12568_v39 = vor.u32 %v14803_v53, %v12567_v16  ;;  %v11825_v55 = vld [vmem:[#allocation8 + $0x318] sm:$0xf0] }
 0x2dc   :  { %8428 = vmatpush.bf16.msra.mxu0 %v11944_v61  ;;  %v11828_v53 = vor.u32 %v14614_v49, %v11825_v55  ;;  %v12375_v55 = vld [vmem:[#allocation13 + $0x360] sm:$0xf] }
 0x2de   :  { %5185 = vmatpush.bf16.msra.mxu2 %v11712_v56  ;;  %5199 = vmatpush.bf16.msra.mxu3 %v11840_v8  ;;  %v12551_v56 = vld [vmem:[#allocation13 + $0x4c0] sm:$0xf]  ;;  %v14799_v8 = vld [vmem:[#allocation13 + $0x4cc] sm:$0xf0] }
 0x2df   :  { %8441 = vmatpush.bf16.msra.mxu1 %v12072_v37  ;;  %v12552_v28 = vor.u32 %v14799_v8, %v12551_v56  ;;  %v14735_v37 = vld [vmem:[#allocation13 + $0x2cc] sm:$0xf0]  ;;  %v12471_v8 = vld [vmem:[#allocation13 + $0x420] sm:$0xf] }
 0x2e0   :  { %8473 = vmatpush.bf16.msrb.mxu0 %v12568_v39  ;;  %v12440_v39 = vor.u32 %v14771_v5, %v12439_v26  ;;  %v12296_v44 = vor.u32 %v14735_v37, %v12295_v19  ;;  %v14959_v5 = vld [vmem:[#allocation13 + $0x9cc] sm:$0xf0] }
 0x2e1   :  { %v14923_v19 = vld [vmem:[#allocation13 + $0x8ac] sm:$0xf0] }
 0x2e2   :  { %5186 = vmatpush.bf16.msra.mxu2 %v11696_v2  ;;  %5200 = vmatpush.bf16.msra.mxu3 %v11824_v10  ;;  %v11729_v2 = vld [vmem:[#allocation8 + $0x258] sm:$0xf0]  ;;  %v14622_v10 = vld [vmem:[#allocation8 + $0x34c] sm:$0xf] }
 0x2e3   :  { %8486 = vmatpush.bf16.msrb.mxu1 %v12696_v30  ;;  %v11860_v59 = vor.u32 %v14622_v10, %v11857_v9  ;;  %v14815_v30 = vld [vmem:[#allocation13 + $0x54c] sm:$0xf0]  ;;  %v12455_v10 = vld [vmem:[#allocation13 + $0x400] sm:$0xf] }
 0x2e4   :  { %8474 = vmatpush.bf16.msrb.mxu0 %v12552_v28  ;;  %v12616_v56 = vor.u32 %v14815_v30, %v12615_v33  ;;  %v12279_v28 = vld [vmem:[#allocation13 + $0x2a0] sm:$0xf]  ;;  %v14775_v9 = vld [vmem:[#allocation13 + $0x40c] sm:$0xf0] }
 0x2e5   :  { %5187 = vmatmul.bf16.vlgmr.msra.gmra.mxu2 %v15903_v57  ;;  %5201 = vmatmul.bf16.vlgmr.msra.gmra.mxu3 %v15905_v38  ;;  %v13031_v30 = vld [vmem:[#allocation13 + $0x880] sm:$0xf] }
 0x2e6   :  { %5235 = vmatpush.bf16.msrb.mxu2 %v11812_v12  ;;  %5249 = vmatpush.bf16.msrb.mxu3 %v11940_v45  ;;  %v14827_v12 = vld [vmem:[#allocation13 + $0x5ac] sm:$0xf0]  ;;  %v11732_v45 = vor.u32 %v14590_v4, %v11729_v2  ;;  %v12599_v4 = vld [vmem:[#allocation13 + $0x520] sm:$0xf] }
 0x2e7   :  { %8487 = vmatpush.bf16.msrb.mxu1 %v12680_v13  ;;  %v12664_v40 = vor.u32 %v14827_v12, %v12663_v11  ;;  %v14811_v13 = vld [vmem:[#allocation13 + $0x52c] sm:$0xf0]  ;;  %v12280_v11 = vor.u32 %v14731_v25, %v12279_v28  ;;  %v12199_v28 = vld [vmem:[#allocation13 + $0x200] sm:$0xf] }
 0x2e8   :  { %8475 = vmatpush.bf16.msrb.mxu0 %v12536_v36  ;;  %v12600_v43 = vor.u32 %v14811_v13, %v12599_v4  ;;  %v14727_v2 = vld [vmem:[#allocation13 + $0x28c] sm:$0xf0]  ;;  %v5275_v36 = vld [vmem:[#allocation11] sm:$0xff] }
 0x2e9   :  { %v5814_v1 = vunpack.c.h.b16 %v5275_v36  ;;  %v12264_v46 = vor.u32 %v14727_v2, %v12263_v35  ;;  %v14711_v25 = vld [vmem:[#allocation13 + $0x20c] sm:$0xf0]  ;;  %v13015_v2 = vld [vmem:[#allocation13 + $0x860] sm:$0xf] }
 0x2ea   :  { %5236 = vmatpush.bf16.msrb.mxu2 %v11796_v34  ;;  %5250 = vmatpush.bf16.msrb.mxu3 %v11924_v17  ;;  %v14582_v34 = vld [vmem:[#allocation8 + $0x20c] sm:$0xf]  ;;  %v11697_v17 = vld [vmem:[#allocation8 + $0x218] sm:$0xf0] }
 0x2eb   :  { %8488 = vmatpush.bf16.msrb.mxu1 %v12664_v40  ;;  %v11700_v16 = vor.u32 %v14582_v34, %v11697_v17  ;;  %v14931_v40 = vld [vmem:[#allocation13 + $0x8ec] sm:$0xf0]  ;;  %v15917_v62 = vpack.c.b16 %v5814_v1, %v5814_v1  ;;  %v13207_v34 = vld [vmem:[#allocation13 + $0x9e0] sm:$0xf] }
 0x2ec   :  { %8476 = vmatpush.bf16.msrb.mxu0 %v12520_v3  ;;  %v13080_v3 = vor.u32 %v14931_v40, %v13079_v27  ;;  %v14963_v17 = vld [vmem:[#allocation13 + $0x9ec] sm:$0xf0]  ;;  %v12807_v1 = vld [vmem:[#allocation13 + $0x6c0] sm:$0xf] }
 0x2ed   :  { %v13208_v49 = vor.u32 %v14963_v17, %v13207_v34  ;;  %8442 = vmatmul.bf16.vlgmr.msra.gmra.mxu1 %v15917_v62  ;;  %v12999_v34 = vld [vmem:[#allocation13 + $0x840] sm:$0xf] }
 0x2ee   :  { %5237 = vmatpush.bf16.msrb.mxu2 %v11780_v29  ;;  %5251 = vmatpush.bf16.msrb.mxu3 %v11908_v21  ;;  %v12504_v29 = vor.u32 %v14787_v20, %v12503_v52  ;;  %v12631_v21 = vld [vmem:[#allocation13 + $0x560] sm:$0xf]  ;;  %v14927_v52 = vld [vmem:[#allocation13 + $0x8cc] sm:$0xf0] }
 0x2ef   :  { %8489 = vmatpush.bf16.msrb.mxu1 %v12648_v42  ;;  %v12632_v61 = vor.u32 %v14819_v6, %v12631_v21  ;;  %v13063_v42 = vld [vmem:[#allocation13 + $0x8c0] sm:$0xf]  ;;  %v14723_v20 = vld [vmem:[#allocation13 + $0x26c] sm:$0xf0]  ;;  %v12376_v21 = vor.u32 %v14755_v18, %v12375_v55 }
 0x2f0   :  { %8477 = vmatpush.bf16.msrb.mxu0 %v12504_v29  ;;  %v13064_v26 = vor.u32 %v14927_v52, %v13063_v42  ;;  %v12231_v6 = vld [vmem:[#allocation13 + $0x240] sm:$0xf]  ;;  %v14895_v42 = vld [vmem:[#allocation13 + $0x7cc] sm:$0xf0] }
 0x2f1   :  { %v14943_v55 = vld [vmem:[#allocation13 + $0x94c] sm:$0xf0] }
 0x2f2   :  { %5238 = vmatpush.bf16.msrb.mxu2 %v11764_v48  ;;  %5252 = vmatpush.bf16.msrb.mxu3 %v11892_v63  ;;  %v14767_v48 = vld [vmem:[#allocation13 + $0x3cc] sm:$0xf0]  ;;  %v12488_v63 = vor.u32 %v14783_v32, %v12487_v14  ;;  %v12359_v14 = vld [vmem:[#allocation13 + $0x340] sm:$0xf] }
 0x2f3   :  { %8490 = vmatpush.bf16.msrb.mxu1 %v12632_v61  ;;  %v12424_v41 = vor.u32 %v14767_v48, %v12423_v47  ;;  %v14719_v61 = vld [vmem:[#allocation13 + $0x24c] sm:$0xf0] }
 0x2f4   :  { %8478 = vmatpush.bf16.msrb.mxu0 %v12488_v63  ;;  %v14955_v47 = vld [vmem:[#allocation13 + $0x9ac] sm:$0xf0]  ;;  %v12232_v32 = vor.u32 %v14719_v61, %v12231_v6  ;;  %v12215_v63 = vld [vmem:[#allocation13 + $0x220] sm:$0xf] }
 0x2f6   :  { %5239 = vmatpush.bf16.msrb.mxu2 %v11748_v54  ;;  %5253 = vmatpush.bf16.msrb.mxu3 %v11876_v0  ;;  %v14763_v54 = vld [vmem:[#allocation13 + $0x3ac] sm:$0xf0]  ;;  %v12472_v0 = vor.u32 %v14779_v15, %v12471_v8  ;;  %v12343_v15 = vld [vmem:[#allocation13 + $0x320] sm:$0xf] }
 0x2f7   :  { %8491 = vmatpush.bf16.msrb.mxu1 %v12616_v56  ;;  %v12408_v12 = vor.u32 %v14763_v54, %v12407_v31  ;;  %v14919_v56 = vld [vmem:[#allocation13 + $0x88c] sm:$0xf0]  ;;  %v12327_v31 = vld [vmem:[#allocation13 + $0x300] sm:$0xf] }
 0x2f8   :  { %8479 = vmatpush.bf16.msrb.mxu0 %v12472_v0  ;;  %v14715_v8 = vld [vmem:[#allocation13 + $0x22c] sm:$0xf0]  ;;  %v13032_v54 = vor.u32 %v14919_v56, %v13031_v30 }
 0x2f9   :  { %v14951_v0 = vld [vmem:[#allocation13 + $0x98c] sm:$0xf0]  ;;  %v12216_v4 = vor.u32 %v14715_v8, %v12215_v63 }
 0x2fa   :  { %5240 = vmatpush.bf16.msrb.mxu2 %v11732_v45  ;;  %5254 = vmatpush.bf16.msrb.mxu3 %v11860_v59  ;;  %v12391_v45 = vld [vmem:[#allocation13 + $0x380] sm:$0xf]  ;;  %v5813_v59 = vunpack.c.l.b16 %v5275_v36  ;;  %v14855_v63 = vld [vmem:[#allocation13 + $0x68c] sm:$0xf0] }
 0x2fb   :  { %8492 = vmatpush.bf16.msrb.mxu1 %v12600_v43  ;;  %v5276_v43 = vld [vmem:[#allocation11 + $0x8] sm:$0xff]  ;;  %v12823_v36 = vld [vmem:[#allocation13 + $0x6e0] sm:$0xf] }
 0x2fc   :  { %v15915_v58 = vpack.c.b16 %v5813_v59, %v5813_v59  ;;  %v13143_v59 = vld [vmem:[#allocation13 + $0x960] sm:$0xf]  ;;  %v5815_v27 = vunpack.c.l.b16 %v5276_v43  ;;  %v5816_v40 = vunpack.c.h.b16 %v5276_v43 }
 0x2fd   :  { %v13719_v43 = vld [vmem:[#allocation13 + $0xde0] sm:$0xf] }
 0x2fe   :  { %5241 = vmatpush.bf16.msrb.mxu2 %v11716_v51  ;;  %5255 = vmatpush.bf16.msrb.mxu3 %v11844_v23  ;;  %v12392_v51 = vor.u32 %v14759_v7, %v12391_v45  ;;  %v12247_v23 = vld [vmem:[#allocation13 + $0x260] sm:$0xf]  ;;  %v14899_v45 = vld [vmem:[#allocation13 + $0x7ec] sm:$0xf0] }
 0x2ff   :  { %8429 = vmatmul.bf16.vlgmr.msra.gmra.mxu0 %v15915_v58  ;;  %v12248_v29 = vor.u32 %v14723_v20, %v12247_v23  ;;  %v14911_v23 = vld [vmem:[#allocation13 + $0x84c] sm:$0xf0]  ;;  %v13127_v20 = vld [vmem:[#allocation13 + $0x940] sm:$0xf] }
 0x302   :  { %5242 = vmatpush.bf16.msrb.mxu2 %v11700_v16  ;;  %5256 = vmatpush.bf16.msrb.mxu3 %v11828_v53  ;;  %v13192_v16 = vor.u32 %v14959_v5, %v13191_v60  ;;  %v13047_v53 = vld [vmem:[#allocation13 + $0x8a0] sm:$0xf]  ;;  %v15921_v60 = vpack.c.b16 %v5815_v27, %v5815_v27  ;;  %v13000_v5 = vor.u32 %v14911_v23, %v12999_v34 }
 0x303   :  { %v13048_v37 = vor.u32 %v14923_v19, %v13047_v53  ;;  %v13575_v27 = vld [vmem:[#allocation13 + $0xcc0] sm:$0xf] }
 0x304   :  { %v12871_v34 = vld [vmem:[#allocation13 + $0x740] sm:$0xf] }
 0x305   :  { %5243 = vmatmul.bf16.vlgmr.msrb.gmra.mxu2 %v15903_v57  ;;  %5257 = vmatmul.bf16.vlgmr.msrb.gmra.mxu3 %v15905_v38  ;;  %v12456_v57 = vor.u32 %v14775_v9, %v12455_v10  ;;  %v14807_v38 = vld [vmem:[#allocation13 + $0x50c] sm:$0xf0] }
 0x306   :  { %8447 = vmatpush.bf16.msra.mxu2 %v12312_v22  ;;  %8460 = vmatpush.bf16.msra.mxu3 %v12440_v39  ;;  %v12584_v24 = vor.u32 %v14807_v38, %v12583_v50  ;;  %v14751_v22 = vld [vmem:[#allocation13 + $0x34c] sm:$0xf0]  ;;  %v13175_v39 = vld [vmem:[#allocation13 + $0x9a0] sm:$0xf]  ;;  %v12200_v50 = vor.u32 %v14711_v25, %v12199_v28 }
 0x307   :  { %8480 = vmatpush.bf16.msrb.mxu0 %v12456_v57  ;;  %v12360_v48 = vor.u32 %v14751_v22, %v12359_v14  ;;  %v13176_v33 = vor.u32 %v14955_v47, %v13175_v39  ;;  %v14915_v10 = vld [vmem:[#allocation13 + $0x86c] sm:$0xf0]  ;;  %v12919_v14 = vld [vmem:[#allocation13 + $0x7a0] sm:$0xf] }
 0x308   :  { %8493 = vmatpush.bf16.msrb.mxu1 %v12584_v24  ;;  %v14743_v9 = vld [vmem:[#allocation13 + $0x30c] sm:$0xf0]  ;;  %v13016_v7 = vor.u32 %v14915_v10, %v13015_v2  ;;  %v12983_v22 = vld [vmem:[#allocation13 + $0x820] sm:$0xf] }
 0x309   :  { %v14947_v57 = vld [vmem:[#allocation13 + $0x96c] sm:$0xf0]  ;;  %v12328_v38 = vor.u32 %v14743_v9, %v12327_v31  ;;  %v13111_v47 = vld [vmem:[#allocation13 + $0x920] sm:$0xf] }
 0x30a   :  { %8448 = vmatpush.bf16.msra.mxu2 %v12296_v44  ;;  %8461 = vmatpush.bf16.msra.mxu3 %v12424_v41  ;;  %v14747_v44 = vld [vmem:[#allocation13 + $0x32c] sm:$0xf0]  ;;  %v13159_v41 = vld [vmem:[#allocation13 + $0x980] sm:$0xf] }
 0x30b   :  { %8525 = vmatpush.bf16.msra.mxu0 %v13080_v3  ;;  %v12344_v13 = vor.u32 %v14747_v44, %v12343_v15  ;;  %v13160_v35 = vor.u32 %v14951_v0, %v13159_v41  ;;  %v14863_v24 = vld [vmem:[#allocation13 + $0x6cc] sm:$0xf0]  ;;  %v13144_v3 = vor.u32 %v14947_v57, %v13143_v59  ;;  %v12903_v15 = vld [vmem:[#allocation13 + $0x780] sm:$0xf] }
 0x30c   :  { %8538 = vmatpush.bf16.msra.mxu1 %v13208_v49  ;;  %v5277_v49 = vld [vmem:[#allocation11 + $0x10] sm:$0xff]  ;;  %v12808_v19 = vor.u32 %v14863_v24, %v12807_v1  ;;  %v12967_v44 = vld [vmem:[#allocation13 + $0x800] sm:$0xf] }
 0x30d   :  { %v5817_v52 = vunpack.c.l.b16 %v5277_v49  ;;  %v5818_v18 = vunpack.c.h.b16 %v5277_v49  ;;  %v14907_v39 = vld [vmem:[#allocation13 + $0x82c] sm:$0xf0]  ;;  %v13095_v25 = vld [vmem:[#allocation13 + $0x900] sm:$0xf] }
 0x30e   :  { %8449 = vmatpush.bf16.msra.mxu2 %v12280_v11  ;;  %8462 = vmatpush.bf16.msra.mxu3 %v12408_v12  ;;  %v14867_v11 = vld [vmem:[#allocation13 + $0x6ec] sm:$0xf0]  ;;  %v12951_v12 = vld [vmem:[#allocation13 + $0x7e0] sm:$0xf] }
 0x30f   :  { %8526 = vmatpush.bf16.msra.mxu0 %v13064_v26  ;;  %v12824_v17 = vor.u32 %v14867_v11, %v12823_v36  ;;  %v15923_v26 = vpack.c.b16 %v5816_v40, %v5816_v40  ;;  %v15925_v6 = vpack.c.b16 %v5817_v52, %v5817_v52  ;;  %v15927_v53 = vpack.c.b16 %v5818_v18, %v5818_v18  ;;  %v14903_v41 = vld [vmem:[#allocation13 + $0x80c] sm:$0xf0]  ;;  %v12759_v9 = vld [vmem:[#allocation13 + $0x660] sm:$0xf] }
 0x310   :  { %8539 = vmatpush.bf16.msra.mxu1 %v13192_v16  ;;  %v13128_v16 = vor.u32 %v14943_v55, %v13127_v20  ;;  %v14887_v28 = vld [vmem:[#allocation13 + $0x78c] sm:$0xf0]  ;;  %v12887_v11 = vld [vmem:[#allocation13 + $0x760] sm:$0xf] }
 0x311   :  { %8481 = vmatmul.bf16.vlgmr.msrb.gmra.mxu0 %v15925_v6  ;;  %8494 = vmatmul.bf16.vlgmr.msrb.gmra.mxu1 %v15927_v53  ;;  %v14935_v31 = vld [vmem:[#allocation13 + $0x90c] sm:$0xf0]  ;;  %v12904_v10 = vor.u32 %v14887_v28, %v12903_v15  ;;  %v12743_v1 = vld [vmem:[#allocation13 + $0x640] sm:$0xf]  ;;  %v5278_v15 = vld [vmem:[#allocation11 + $0x18] sm:$0xff] }
 0x312   :  { %8450 = vmatpush.bf16.msra.mxu2 %v12264_v46  ;;  %8463 = vmatpush.bf16.msra.mxu3 %v12392_v51  ;;  %v12952_v46 = vor.u32 %v14899_v45, %v12951_v12  ;;  %v12935_v51 = vld [vmem:[#allocation13 + $0x7c0] sm:$0xf]  ;;  %v15059_v0 = vld [vmem:[#allocation13 + $0xcec] sm:$0xf0] }
 0x313   :  { %8527 = vmatpush.bf16.msra.mxu0 %v13048_v37  ;;  %v12936_v61 = vor.u32 %v14895_v42, %v12935_v51  ;;  %v14891_v37 = vld [vmem:[#allocation13 + $0x7ac] sm:$0xf0]  ;;  %v5279_v24 = vld [vmem:[#allocation11 + $0x20] sm:$0xff] }
 0x314   :  { %8540 = vmatpush.bf16.msra.mxu1 %v13176_v33  ;;  %v12984_v33 = vor.u32 %v14907_v39, %v12983_v22  ;;  %v12920_v8 = vor.u32 %v14891_v37, %v12919_v14  ;;  %v14851_v36 = vld [vmem:[#allocation13 + $0x66c] sm:$0xf0]  ;;  %v5821_v23 = vunpack.c.l.b16 %v5279_v24  ;;  %v5822_v49 = vunpack.c.h.b16 %v5279_v24  ;;  %v13559_v42 = vld [vmem:[#allocation13 + $0xca0] sm:$0xf] }
 0x315   :  { %v14883_v12 = vld [vmem:[#allocation13 + $0x76c] sm:$0xf0]  ;;  %v13687_v18 = vld [vmem:[#allocation13 + $0xda0] sm:$0xf] }
 0x316   :  { %8451 = vmatpush.bf16.msra.mxu2 %v12248_v29  ;;  %8464 = vmatpush.bf16.msra.mxu3 %v12376_v21  ;;  %v12791_v29 = vld [vmem:[#allocation13 + $0x6a0] sm:$0xf]  ;;  %v14859_v21 = vld [vmem:[#allocation13 + $0x6ac] sm:$0xf0]  ;;  %v15933_v20 = vpack.c.b16 %v5821_v23, %v5821_v23  ;;  %v15935_v55 = vpack.c.b16 %v5822_v49, %v5822_v49  ;;  %v15943_v49 = vpop.f32.mrf.mxu0 }
 0x317   :  { %8528 = vmatpush.bf16.msra.mxu0 %v13032_v54  ;;  %v12792_v56 = vor.u32 %v14859_v21, %v12791_v29  ;;  %v13591_v54 = vld [vmem:[#allocation13 + $0xce0] sm:$0xf]  ;;  %v15055_v40 = vld [vmem:[#allocation13 + $0xccc] sm:$0xf0] }
 0x318   :  { %8541 = vmatpush.bf16.msra.mxu1 %v13160_v35  ;;  %v15091_v35 = vld [vmem:[#allocation13 + $0xdec] sm:$0xf0]  ;;  %v13592_v45 = vor.u32 %v15059_v0, %v13591_v54  ;;  %v13543_v37 = vld [vmem:[#allocation13 + $0xc80] sm:$0xf] }
 0x319   :  { %v13720_v59 = vor.u32 %v15091_v35, %v13719_v43  ;;  %v15087_v57 = vld [vmem:[#allocation13 + $0xdcc] sm:$0xf0]  ;;  %v13463_v54 = vld [vmem:[#allocation13 + $0xbe0] sm:$0xf]  ;;  %v5820_v43 = vunpack.c.h.b16 %v5278_v15 }
 0x31a   :  { %8452 = vmatpush.bf16.msra.mxu2 %v12232_v32  ;;  %8465 = vmatpush.bf16.msra.mxu3 %v12360_v48  ;;  %v14939_v32 = vld [vmem:[#allocation13 + $0x92c] sm:$0xf0]  ;;  %v12775_v48 = vld [vmem:[#allocation13 + $0x680] sm:$0xf] }
 0x31b   :  { %8529 = vmatpush.bf16.msra.mxu0 %v13016_v7  ;;  %v13112_v30 = vor.u32 %v14939_v32, %v13111_v47  ;;  %v12776_v2 = vor.u32 %v14855_v63, %v12775_v48  ;;  %v13703_v7 = vld [vmem:[#allocation13 + $0xdc0] sm:$0xf]  ;;  %v15051_v52 = vld [vmem:[#allocation13 + $0xcac] sm:$0xf0] }
 0x31c   :  { %8542 = vmatpush.bf16.msra.mxu1 %v13144_v3  ;;  %v14847_v3 = vld [vmem:[#allocation13 + $0x64c] sm:$0xf0]  ;;  %v13704_v51 = vor.u32 %v15087_v57, %v13703_v7  ;;  %v13560_v22 = vor.u32 %v15051_v52, %v13559_v42  ;;  %v12711_v32 = vld [vmem:[#allocation13 + $0x600] sm:$0xf] }
 0x31d   :  { %v12744_v29 = vor.u32 %v14847_v3, %v12743_v1  ;;  %v14875_v14 = vld [vmem:[#allocation13 + $0x72c] sm:$0xf0]  ;;  %v13671_v48 = vld [vmem:[#allocation13 + $0xd80] sm:$0xf]  ;;  %v15941_v1 = vpack.c.b16 %v5820_v43, %v5820_v43 }
 0x31e   :  { %8453 = vmatpush.bf16.msra.mxu2 %v12216_v4  ;;  %8466 = vmatpush.bf16.msra.mxu3 %v12344_v13  ;;  %v12968_v4 = vor.u32 %v14903_v41, %v12967_v44  ;;  %v13096_v13 = vor.u32 %v14935_v31, %v13095_v25  ;;  %v15047_v47 = vld [vmem:[#allocation13 + $0xc8c] sm:$0xf0]  ;;  %v13335_v41 = vld [vmem:[#allocation13 + $0xae0] sm:$0xf] }
 0x31f   :  { %8530 = vmatpush.bf16.msra.mxu0 %v13000_v5  ;;  %v15083_v5 = vld [vmem:[#allocation13 + $0xdac] sm:$0xf0]  ;;  %v13544_v25 = vor.u32 %v15047_v47, %v13543_v37  ;;  %v13639_v3 = vld [vmem:[#allocation13 + $0xd40] sm:$0xf] }
 0x320   :  { %8543 = vmatpush.bf16.msra.mxu1 %v13128_v16  ;;  %v12727_v16 = vld [vmem:[#allocation13 + $0x620] sm:$0xf]  ;;  %v13688_v39 = vor.u32 %v15083_v5, %v13687_v18  ;;  %v15079_v63 = vld [vmem:[#allocation13 + $0xd8c] sm:$0xf0] }
 0x321   :  { %v14871_v44 = vld [vmem:[#allocation13 + $0x70c] sm:$0xf0]  ;;  %v13672_v31 = vor.u32 %v15079_v63, %v13671_v48  ;;  %v13431_v42 = vld [vmem:[#allocation13 + $0xba0] sm:$0xf] }
 0x322   :  { %8454 = vmatpush.bf16.msra.mxu2 %v12200_v50  ;;  %8467 = vmatpush.bf16.msra.mxu3 %v12328_v38  ;;  %v12760_v50 = vor.u32 %v14851_v36, %v12759_v9  ;;  %v12888_v38 = vor.u32 %v14883_v12, %v12887_v11  ;;  %v14995_v28 = vld [vmem:[#allocation13 + $0xaec] sm:$0xf0]  ;;  %v13415_v37 = vld [vmem:[#allocation13 + $0xb80] sm:$0xf] }
 0x323   :  { %8531 = vmatpush.bf16.msra.mxu0 %v12984_v33  ;;  %v15027_v0 = vld [vmem:[#allocation13 + $0xbec] sm:$0xf0]  ;;  %v13336_v11 = vor.u32 %v14995_v28, %v13335_v41  ;;  %v13479_v63 = vld [vmem:[#allocation13 + $0xc00] sm:$0xf]  ;;  %v12057_v41 = vld [vmem:[#allocation13 + $0xf0] sm:$0xf0] }
 0x324   :  { %8544 = vmatpush.bf16.msra.mxu1 %v13112_v30  ;;  %v15043_v35 = vld [vmem:[#allocation13 + $0xc6c] sm:$0xf0]  ;;  %v13464_v12 = vor.u32 %v15027_v0, %v13463_v54  ;;  %v14705_v28 = vld [vmem:[#allocation13 + $0x1e4] sm:$0xf]  ;;  %v13271_v0 = vld [vmem:[#allocation13 + $0xa60] sm:$0xf] }
 0x325   :  { %8455 = vmatmul.bf16.vlgmr.msra.gmra.mxu2 %v15921_v60  ;;  %8468 = vmatmul.bf16.vlgmr.msra.gmra.mxu3 %v15923_v26  ;;  %v15039_v24 = vld [vmem:[#allocation13 + $0xc4c] sm:$0xf0] }
 0x326   :  { %8499 = vmatpush.bf16.msrb.mxu2 %v12824_v17  ;;  %8512 = vmatpush.bf16.msrb.mxu3 %v12952_v46  ;;  %v14879_v17 = vld [vmem:[#allocation13 + $0x74c] sm:$0xf0]  ;;  %v13576_v46 = vor.u32 %v15055_v40, %v13575_v27  ;;  %v13447_v27 = vld [vmem:[#allocation13 + $0xbc0] sm:$0xf] }
 0x327   :  { %8532 = vmatpush.bf16.msra.mxu0 %v12968_v4  ;;  %v12872_v21 = vor.u32 %v14879_v17, %v12871_v34  ;;  %v13527_v4 = vld [vmem:[#allocation13 + $0xc60] sm:$0xf]  ;;  %v15023_v40 = vld [vmem:[#allocation13 + $0xbcc] sm:$0xf0] }
 0x328   :  { %8545 = vmatpush.bf16.msra.mxu1 %v13096_v13  ;;  %v5819_v13 = vunpack.c.l.b16 %v5278_v15  ;;  %v13528_v7 = vor.u32 %v15043_v35, %v13527_v4  ;;  %v15071_v34 = vld [vmem:[#allocation13 + $0xd4c] sm:$0xf0] }
 0x329   :  { %v14987_v23 = vld [vmem:[#allocation13 + $0xaac] sm:$0xf0]  ;;  %v13640_v5 = vor.u32 %v15071_v34, %v13639_v3  ;;  %v13383_v3 = vld [vmem:[#allocation13 + $0xb40] sm:$0xf] }
 0x32a   :  { %8500 = vmatpush.bf16.msrb.mxu2 %v12808_v19  ;;  %8513 = vmatpush.bf16.msrb.mxu3 %v12936_v61  ;;  %v14843_v19 = vld [vmem:[#allocation13 + $0x62c] sm:$0xf0]  ;;  %v12855_v61 = vld [vmem:[#allocation13 + $0x720] sm:$0xf] }
 0x32b   :  { %8577 = vmatpush.bf16.msrb.mxu0 %v13592_v45  ;;  %8546 = vmatmul.bf16.vlgmr.msra.gmra.mxu1 %v15935_v55  ;;  %v12728_v33 = vor.u32 %v14843_v19, %v12727_v16  ;;  %v12856_v30 = vor.u32 %v14875_v14, %v12855_v61  ;;  %v13319_v45 = vld [vmem:[#allocation13 + $0xac0] sm:$0xf]  ;;  %v15019_v52 = vld [vmem:[#allocation13 + $0xbac] sm:$0xf0] }
 0x32c   :  { %8590 = vmatpush.bf16.msrb.mxu1 %v13720_v59  ;;  %8533 = vmatmul.bf16.vlgmr.msra.gmra.mxu0 %v15933_v20  ;;  %v14991_v59 = vld [vmem:[#allocation13 + $0xacc] sm:$0xf0]  ;;  %v13623_v16 = vld [vmem:[#allocation13 + $0xd20] sm:$0xf] }
 0x32d   :  { %v13320_v17 = vor.u32 %v14991_v59, %v13319_v45  ;;  %v15067_v19 = vld [vmem:[#allocation13 + $0xd2c] sm:$0xf0]  ;;  %v13287_v61 = vld [vmem:[#allocation13 + $0xa80] sm:$0xf]  ;;  %v15949_v45 = vpop.f32.mrf.mxu0  ;;  %v12041_v59 = vld [vmem:[#allocation13 + $0xd0] sm:$0xf0] }
 0x32e   :  { %8501 = vmatpush.bf16.msrb.mxu2 %v12792_v56  ;;  %8514 = vmatpush.bf16.msrb.mxu3 %v12920_v8  ;;  %v14839_v56 = vld [vmem:[#allocation13 + $0x60c] sm:$0xf0]  ;;  %v12839_v8 = vld [vmem:[#allocation13 + $0x700] sm:$0xf]  ;;  %v13624_v48 = vor.u32 %v15067_v19, %v13623_v16  ;;  %v12153_v16 = vld [vmem:[#allocation13 + $0x1b0] sm:$0xf0] }
 0x32f   :  { %8578 = vmatpush.bf16.msrb.mxu0 %v13576_v46  ;;  %v12712_v9 = vor.u32 %v14839_v56, %v12711_v32  ;;  %v12840_v36 = vor.u32 %v14871_v44, %v12839_v8  ;;  %v13448_v46 = vor.u32 %v15023_v40, %v13447_v27  ;;  %v15015_v47 = vld [vmem:[#allocation13 + $0xb8c] sm:$0xf0]  ;;  %v13607_v56 = vld [vmem:[#allocation13 + $0xd00] sm:$0xf]  ;;  %v15947_v44 = vpop.f32.mrf.mxu1  ;;  %v14701_v27 = vld [vmem:[#allocation13 + $0x1c4] sm:$0xf] }
 0x330   :  { %8591 = vmatpush.bf16.msrb.mxu1 %v13704_v51  ;;  %v13303_v51 = vld [vmem:[#allocation13 + $0xaa0] sm:$0xf]  ;;  %v15063_v8 = vld [vmem:[#allocation13 + $0xd0c] sm:$0xf0]  ;;  %v13416_v54 = vor.u32 %v15015_v47, %v13415_v37  ;;  %v12169_v40 = vld [vmem:[#allocation13 + $0x1d0] sm:$0xf0] }
 0x331   :  { %v13304_v14 = vor.u32 %v14987_v23, %v13303_v51  ;;  %v5281_v15 = vld [vmem:[#allocation11 + $0x30] sm:$0xff]  ;;  %v15955_v51 = vld [vmem:[#allocation10] sm:$0xf]  ;;  %v13367_v37 = vld [vmem:[#allocation13 + $0xb20] sm:$0xf] }
 0x332   :  { %8502 = vmatpush.bf16.msrb.mxu2 %v12776_v2  ;;  %8515 = vmatpush.bf16.msrb.mxu3 %v12904_v10  ;;  %v13655_v2 = vld [vmem:[#allocation13 + $0xd60] sm:$0xf]  ;;  %v15075_v10 = vld [vmem:[#allocation13 + $0xd6c] sm:$0xf0] }
 0x333   :  { %8579 = vmatpush.bf16.msrb.mxu0 %v13560_v22  ;;  %v13656_v57 = vor.u32 %v15075_v10, %v13655_v2  ;;  %v13432_v22 = vor.u32 %v15019_v52, %v13431_v42  ;;  %v14979_v4 = vld [vmem:[#allocation13 + $0xa6c] sm:$0xf0]  ;;  %v13608_v2 = vor.u32 %v15063_v8, %v13607_v56  ;;  %v5825_v10 = vunpack.c.l.b16 %v5281_v15  ;;  %v13223_v56 = vld [vmem:[#allocation13 + $0xa00] sm:$0xf]  ;;  %v12009_v8 = vld [vmem:[#allocation13 + $0x90] sm:$0xf0] }
 0x334   :  { %8592 = vmatpush.bf16.msrb.mxu1 %v13688_v39  ;;  %v14983_v39 = vld [vmem:[#allocation13 + $0xa8c] sm:$0xf0] }
 0x335   :  { %v15011_v43 = vld [vmem:[#allocation13 + $0xb6c] sm:$0xf0] }
 0x336   :  { %8503 = vmatpush.bf16.msrb.mxu2 %v12760_v50  ;;  %8516 = vmatpush.bf16.msrb.mxu3 %v12888_v38  ;;  %v13511_v50 = vld [vmem:[#allocation13 + $0xc40] sm:$0xf]  ;;  %v15939_v38 = vpack.c.b16 %v5819_v13, %v5819_v13  ;;  %v15007_v34 = vld [vmem:[#allocation13 + $0xb4c] sm:$0xf0] }
 0x337   :  { %8580 = vmatpush.bf16.msrb.mxu0 %v13544_v25  ;;  %v13512_v18 = vor.u32 %v15039_v24, %v13511_v50  ;;  %v12185_v25 = vld [vmem:[#allocation13 + $0x1f0] sm:$0xf0]  ;;  %v13399_v13 = vld [vmem:[#allocation13 + $0xb60] sm:$0xf]  ;;  %v14975_v24 = vld [vmem:[#allocation13 + $0xa4c] sm:$0xf0] }
 0x338   :  { %8593 = vmatpush.bf16.msrb.mxu1 %v13672_v31  ;;  %v13288_v31 = vor.u32 %v14983_v39, %v13287_v61  ;;  %v13255_v50 = vld [vmem:[#allocation13 + $0xa40] sm:$0xf]  ;;  %v13384_v61 = vor.u32 %v15007_v34, %v13383_v3  ;;  %v14971_v39 = vld [vmem:[#allocation13 + $0xa2c] sm:$0xf0] }
 0x339   :  { %v13256_v19 = vor.u32 %v14975_v24, %v13255_v50  ;;  %v15003_v47 = vld [vmem:[#allocation13 + $0xb2c] sm:$0xf0]  ;;  %v14689_v50 = vld [vmem:[#allocation13 + $0x164] sm:$0xf]  ;;  %v12121_v24 = vld [vmem:[#allocation13 + $0x170] sm:$0xf0] }
 0x33a   :  { %8504 = vmatpush.bf16.msrb.mxu2 %v12744_v29  ;;  %8517 = vmatpush.bf16.msrb.mxu3 %v12872_v21  ;;  %v13495_v29 = vld [vmem:[#allocation13 + $0xc20] sm:$0xf]  ;;  %v15035_v21 = vld [vmem:[#allocation13 + $0xc2c] sm:$0xf0] }
 0x33b   :  { %8581 = vmatpush.bf16.msrb.mxu0 %v13528_v7  ;;  %v13496_v32 = vor.u32 %v15035_v21, %v13495_v29  ;;  %v13272_v7 = vor.u32 %v14979_v4, %v13271_v0  ;;  %v12025_v29 = vld [vmem:[#allocation13 + $0xb0] sm:$0xf0]  ;;  %v14697_v21 = vld [vmem:[#allocation13 + $0x1a4] sm:$0xf]  ;;  %v13351_v0 = vld [vmem:[#allocation13 + $0xb00] sm:$0xf] }
 0x33c   :  { %8594 = vmatpush.bf16.msrb.mxu1 %v13656_v57  ;;  %v13400_v57 = vor.u32 %v15011_v43, %v13399_v13  ;;  %v5280_v4 = vld [vmem:[#allocation11 + $0x28] sm:$0xff]  ;;  %v14999_v13 = vld [vmem:[#allocation13 + $0xb0c] sm:$0xf0]  ;;  %v13847_v43 = vld [vmem:[#allocation13 + $0xee0] sm:$0xf] }
 0x33e   :  { %8505 = vmatpush.bf16.msrb.mxu2 %v12728_v33  ;;  %8518 = vmatpush.bf16.msrb.mxu3 %v12856_v30  ;;  %v15031_v33 = vld [vmem:[#allocation13 + $0xc0c] sm:$0xf0]  ;;  %v14673_v30 = vld [vmem:[#allocation13 + $0xe4] sm:$0xf] }
 0x33f   :  { %8582 = vmatpush.bf16.msrb.mxu0 %v13512_v18  ;;  %v13480_v35 = vor.u32 %v15031_v33, %v13479_v63  ;;  %v12172_v18 = vor.u32 %v14701_v27, %v12169_v40  ;;  %v12156_v63 = vor.u32 %v14697_v21, %v12153_v16  ;;  %v14661_v33 = vld [vmem:[#allocation13 + $0x84] sm:$0xf]  ;;  %v5823_v40 = vunpack.c.l.b16 %v5280_v4  ;;  %v13831_v21 = vld [vmem:[#allocation13 + $0xec0] sm:$0xf]  ;;  %v15119_v16 = vld [vmem:[#allocation13 + $0xecc] sm:$0xf0] }
 0x340   :  { %8595 = vmatpush.bf16.msrb.mxu1 %v13640_v5  ;;  %v14665_v5 = vld [vmem:[#allocation13 + $0xa4] sm:$0xf] }
 0x342   :  { %8506 = vmatpush.bf16.msrb.mxu2 %v12712_v9  ;;  %8519 = vmatpush.bf16.msrb.mxu3 %v12840_v36  ;;  %v5826_v9 = vunpack.c.h.b16 %v5281_v15  ;;  %v12060_v36 = vor.u32 %v14673_v30, %v12057_v41  ;;  %v5104_v30 = vpop.f32.mrf.mxu0  ;;  %v14693_v15 = vld [vmem:[#allocation13 + $0x184] sm:$0xf]  ;;  %v12137_v41 = vld [vmem:[#allocation13 + $0x190] sm:$0xf0] }
 0x343   :  { %8583 = vmatpush.bf16.msrb.mxu0 %v13496_v32  ;;  %v4371_v32 = vperm.slane %v15955_v51, 0 }
 0x344   :  { %8596 = vmatpush.bf16.msrb.mxu1 %v13624_v48  ;;  %v12028_v48 = vor.u32 %v14665_v5, %v12025_v29 }
 0x345   :  { %8507 = vmatmul.bf16.vlgmr.msrb.gmra.mxu2 %v15939_v38  ;;  %8520 = vmatmul.bf16.vlgmr.msrb.gmra.mxu3 %v15941_v1  ;;  %v5049_v27 = vadd.f32 %v15943_v49, %v4371_v32 }
 0x346   :  { %8551 = vmatpush.bf16.msra.mxu2 %v13336_v11  ;;  %8564 = vmatpush.bf16.msra.mxu3 %v13464_v12  ;;  %v12188_v11 = vor.u32 %v14705_v28, %v12185_v25  ;;  %v14669_v12 = vld [vmem:[#allocation13 + $0xc4] sm:$0xf]  ;;  %v4372_v28 = vperm.slane %v15955_v51, 1 }
 0x347   :  { %8584 = vmatpush.bf16.msrb.mxu0 %v13480_v35  ;;  %v12044_v52 = vor.u32 %v14669_v12, %v12041_v59  ;;  %v15123_v35 = vld [vmem:[#allocation13 + $0xeec] sm:$0xf0]  ;;  %v12140_v12 = vor.u32 %v14693_v15, %v12137_v41  ;;  %v14657_v59 = vld [vmem:[#allocation13 + $0x64] sm:$0xf]  ;;  %v13832_v41 = vor.u32 %v15119_v16, %v13831_v21 }
 0x348   :  { %8597 = vmatpush.bf16.msrb.mxu1 %v13608_v2  ;;  %v15957_v23 = vpop.f32.mrf.mxu2  ;;  %v15959_v42 = vpop.f32.mrf.mxu3  ;;  %v5105_v3 = vadd.f32 %v5104_v30, %v4372_v28  ;;  %v13848_v5 = vor.u32 %v15123_v35, %v13847_v43  ;;  %v12105_v30 = vld [vmem:[#allocation13 + $0x150] sm:$0xf0]  ;;  %v14801_v16 = vld [vmem:[#allocation13 + $0x4e4] sm:$0xf] }
 0x34a   :  { %8552 = vmatpush.bf16.msra.mxu2 %v13320_v17  ;;  %8565 = vmatpush.bf16.msra.mxu3 %v13448_v46  ;;  %v15951_v17 = vpack.c.b16 %v5825_v10, %v5825_v10  ;;  %v15953_v46 = vpack.c.b16 %v5826_v9, %v5826_v9  ;;  %v13975_v9 = vld [vmem:[#allocation13 + $0xfe0] sm:$0xf] }
 0x34b   :  { %8629 = vmatpush.bf16.msra.mxu0 %v12060_v36  ;;  %v15155_v36 = vld [vmem:[#allocation13 + $0xfec] sm:$0xf0] }
 0x34c   :  { %8642 = vmatpush.bf16.msra.mxu1 %v12188_v11  ;;  %8585 = vmatmul.bf16.vlgmr.msrb.gmra.mxu0 %v15951_v17  ;;  %v12012_v11 = vor.u32 %v14661_v33, %v12009_v8  ;;  %v13976_v29 = vor.u32 %v15155_v36, %v13975_v9  ;;  %v14685_v33 = vld [vmem:[#allocation13 + $0x144] sm:$0xf]  ;;  %v5106_v8 = vpop.f32.mrf.mxu0  ;;  %v5051_v36 = vadd.f32 %v15949_v45, %v4371_v32  ;;  %v15111_v45 = vld [vmem:[#allocation13 + $0xe8c] sm:$0xf0]  ;;  %v13927_v32 = vld [vmem:[#allocation13 + $0xf80] sm:$0xf] }
 0x34d   :  { %8598 = vmatmul.bf16.vlgmr.msrb.gmra.mxu1 %v15953_v46  ;;  %v12108_v35 = vor.u32 %v14685_v33, %v12105_v30  ;;  %v14649_v9 = vld [vmem:[#allocation13 + $0x24] sm:$0xf]  ;;  %v13783_v30 = vld [vmem:[#allocation13 + $0xe60] sm:$0xf] }
 0x34e   :  { %8553 = vmatpush.bf16.msra.mxu2 %v13304_v14  ;;  %8566 = vmatpush.bf16.msra.mxu3 %v13432_v22  ;;  %v13239_v14 = vld [vmem:[#allocation13 + $0xa20] sm:$0xf]  ;;  %v15961_v22 = vpop.f32.mrf.mxu1 }
 0x34f   :  { %8630 = vmatpush.bf16.msra.mxu0 %v12044_v52  ;;  %v13240_v25 = vor.u32 %v14971_v39, %v13239_v14  ;;  %v13352_v52 = vor.u32 %v14999_v13, %v13351_v0  ;;  %v12124_v14 = vor.u32 %v14689_v50, %v12121_v24  ;;  %v14653_v39 = vld [vmem:[#allocation13 + $0x44] sm:$0xf]  ;;  %v15147_v13 = vld [vmem:[#allocation13 + $0xfac] sm:$0xf0]  ;;  %v13799_v24 = vld [vmem:[#allocation13 + $0xe80] sm:$0xf] }
 0x350   :  { %8643 = vmatpush.bf16.msra.mxu1 %v12172_v18  ;;  %v15967_v2 = vpop.f32.mrf.mxu2  ;;  %v15969_v10 = vpop.f32.mrf.mxu3 }
 0x352   :  { %8554 = vmatpush.bf16.msra.mxu2 %v13288_v31  ;;  %8567 = vmatpush.bf16.msra.mxu3 %v13416_v54  ;;  %v13368_v31 = vor.u32 %v15003_v47, %v13367_v37  ;;  %v14967_v54 = vld [vmem:[#allocation13 + $0xa0c] sm:$0xf0]  ;;  %v5063_v37 = vadd.f32 %v15947_v44, %v5049_v27  ;;  %v15977_v47 = vpack.c.b16 %v5823_v40, %v5823_v40 }
 0x353   :  { %8631 = vmatpush.bf16.msra.mxu0 %v12028_v48  ;;  %v13224_v34 = vor.u32 %v14967_v54, %v13223_v56  ;;  %v15115_v54 = vld [vmem:[#allocation13 + $0xeac] sm:$0xf0]  ;;  %v5107_v27 = vadd.f32 %v5106_v8, %v4372_v28 }
 0x354   :  { %8644 = vmatpush.bf16.msra.mxu1 %v12156_v63  ;;  %v11977_v63 = vld [vmem:[#allocation13 + $0x50] sm:$0xf0]  ;;  %v5077_v15 = vadd.f32 %v15957_v23, %v5063_v37 }
 0x355   :  { %v11980_v43 = vor.u32 %v14653_v39, %v11977_v63  ;;  %v12697_v39 = vld [vmem:[#allocation13 + $0x5f0] sm:$0xf0]  ;;  %v13800_v63 = vor.u32 %v15111_v45, %v13799_v24  ;;  %v14793_v45 = vld [vmem:[#allocation13 + $0x4a4] sm:$0xf] }
 0x356   :  { %8555 = vmatpush.bf16.msra.mxu2 %v13272_v7  ;;  %8568 = vmatpush.bf16.msra.mxu3 %v13400_v57  ;;  %v5824_v7 = vunpack.c.h.b16 %v5280_v4  ;;  %v11993_v57 = vld [vmem:[#allocation13 + $0x70] sm:$0xf0]  ;;  %v5118_v18 = vpop.f32.mrf.mxu1  ;;  %v13943_v4 = vld [vmem:[#allocation13 + $0xfa0] sm:$0xf] }
 0x357   :  { %8632 = vmatpush.bf16.msra.mxu0 %v12012_v11  ;;  %v11996_v49 = vor.u32 %v14657_v59, %v11993_v57  ;;  %v5119_v56 = vadd.f32 %v5118_v18, %v5105_v3  ;;  %v11961_v11 = vld [vmem:[#allocation13 + $0x30] sm:$0xf0]  ;;  %v13944_v50 = vor.u32 %v15147_v13, %v13943_v4  ;;  %v15143_v3 = vld [vmem:[#allocation13 + $0xf8c] sm:$0xf0]  ;;  %v14645_v18 = vld [vmem:[#allocation13 + $0x4] sm:$0xf] }
 0x358   :  { %8645 = vmatpush.bf16.msra.mxu1 %v12140_v12  ;;  %v15979_v48 = vpack.c.b16 %v5824_v7, %v5824_v7  ;;  %v5132_v44 = vpop.f32.mrf.mxu2  ;;  %v5146_v0 = vpop.f32.mrf.mxu3  ;;  %v14681_v12 = vld [vmem:[#allocation13 + $0x124] sm:$0xf]  ;;  %v12089_v59 = vld [vmem:[#allocation13 + $0x130] sm:$0xf0]  ;;  %v5091_v7 = vadd.f32 %v15959_v42, %v5077_v15  ;;  %v13928_v33 = vor.u32 %v15143_v3, %v13927_v32  ;;  %v15139_v15 = vld [vmem:[#allocation13 + $0xf6c] sm:$0xf0] }
 0x359   :  { %v5133_v23 = vadd.f32 %v5132_v44, %v5119_v56  ;;  %v14677_v42 = vld [vmem:[#allocation13 + $0x104] sm:$0xf]  ;;  %v15107_v56 = vld [vmem:[#allocation13 + $0xe6c] sm:$0xf0]  ;;  %v12553_v13 = vld [vmem:[#allocation13 + $0x4d0] sm:$0xf0] }
 0x35a   :  { %8556 = vmatpush.bf16.msra.mxu2 %v13256_v19  ;;  %8569 = vmatpush.bf16.msra.mxu3 %v13384_v61  ;;  %v13959_v19 = vld [vmem:[#allocation13 + $0xfc0] sm:$0xf]  ;;  %v15151_v61 = vld [vmem:[#allocation13 + $0xfcc] sm:$0xf0]  ;;  %v12537_v32 = vld [vmem:[#allocation13 + $0x4b0] sm:$0xf0] }
 0x35b   :  { %8633 = vmatpush.bf16.msra.mxu0 %v11996_v49  ;;  %v5147_v57 = vadd.f32 %v5146_v0, %v5133_v23  ;;  %v12569_v49 = vld [vmem:[#allocation13 + $0x4f0] sm:$0xf0]  ;;  %v14797_v0 = vld [vmem:[#allocation13 + $0x4c4] sm:$0xf] }
 0x35c   :  { %8646 = vmatpush.bf16.msra.mxu1 %v12124_v14  ;;  %v14833_v14 = vld [vmem:[#allocation13 + $0x5e4] sm:$0xf]  ;;  %v12665_v3 = vld [vmem:[#allocation13 + $0x5b0] sm:$0xf0] }
 0x35d   :  { %v5263_v21 = vpack.c.bf16 %v5147_v57, %v5091_v7  ;;  %v12700_v44 = vor.u32 %v14833_v14, %v12697_v39  ;;  %v12649_v14 = vld [vmem:[#allocation13 + $0x590] sm:$0xf0] }
 0x35e   :  { %8557 = vmatpush.bf16.msra.mxu2 %v13240_v25  ;;  %8570 = vmatpush.bf16.msra.mxu3 %v13368_v31  ;;  %v13960_v25 = vor.u32 %v15151_v61, %v13959_v19  ;;  %v13815_v31 = vld [vmem:[#allocation13 + $0xea0] sm:$0xf]  ;;  %v5120_v28 = vpop.f32.mrf.mxu1  ;;  %v12073_v19 = vld [vmem:[#allocation13 + $0x110] sm:$0xf0] }
 0x35f   :  { %v13816_v40 = vor.u32 %v15115_v54, %v13815_v31  ;;  %8634 = vmatpush.bf16.msra.mxu0 %v11980_v43  ;;  %v5121_v61 = vadd.f32 %v5120_v28, %v5107_v27  ;;  %5267 = vst [vmem:[#allocation17] sm:$0xff] %v5263_v21  ;;  %v12572_v54 = vor.u32 %v14801_v16, %v12569_v49  ;;  %v14829_v43 = vld [vmem:[#allocation13 + $0x5c4] sm:$0xf]  ;;  %v13895_v27 = vld [vmem:[#allocation13 + $0xf40] sm:$0xf] }
 0x360   :  { %8647 = vmatpush.bf16.msra.mxu1 %v12108_v35  ;;  %v5134_v8 = vpop.f32.mrf.mxu2  ;;  %v5148_v4 = vpop.f32.mrf.mxu3  ;;  %v12681_v35 = vld [vmem:[#allocation13 + $0x5d0] sm:$0xf0]  ;;  %v15131_v28 = vld [vmem:[#allocation13 + $0xf2c] sm:$0xf0]  ;;  %v12540_v21 = vor.u32 %v14793_v45, %v12537_v32  ;;  %v14821_v49 = vld [vmem:[#allocation13 + $0x584] sm:$0xf] }
 0x361   :  { %v5135_v31 = vadd.f32 %v5134_v8, %v5121_v61  ;;  %v12684_v24 = vor.u32 %v14829_v43, %v12681_v35  ;;  %v12521_v61 = vld [vmem:[#allocation13 + $0x490] sm:$0xf0]  ;;  %v14737_v8 = vld [vmem:[#allocation13 + $0x2e4] sm:$0xf] }
 0x362   :  { %8558 = vmatpush.bf16.msra.mxu2 %v13224_v34  ;;  %8571 = vmatpush.bf16.msra.mxu3 %v13352_v52  ;;  %v11964_v34 = vor.u32 %v14649_v9, %v11961_v11  ;;  %v12092_v52 = vor.u32 %v14681_v12, %v12089_v59  ;;  %v15992_v9 = vpop.f32.mrf.mxu0  ;;  %v13767_v12 = vld [vmem:[#allocation13 + $0xe40] sm:$0xf]  ;;  %v15103_v59 = vld [vmem:[#allocation13 + $0xe4c] sm:$0xf0]  ;;  %v12633_v43 = vld [vmem:[#allocation13 + $0x570] sm:$0xf0] }
 0x363   :  { %v5149_v23 = vadd.f32 %v5148_v4, %v5135_v31  ;;  %v14781_v45 = vld [vmem:[#allocation13 + $0x444] sm:$0xf] }
 0x364   :  { %8635 = vmatpush.bf16.msra.mxu0 %v11964_v34  ;;  %8648 = vmatpush.bf16.msra.mxu1 %v12092_v52  ;;  %v13768_v34 = vor.u32 %v15103_v59, %v13767_v12  ;;  %v14733_v59 = vld [vmem:[#allocation13 + $0x2c4] sm:$0xf] }
 0x365   :  { %8559 = vmatmul.bf16.vlgmr.msra.gmra.mxu2 %v15977_v47  ;;  %8572 = vmatmul.bf16.vlgmr.msra.gmra.mxu3 %v15979_v48 }
 0x366   :  { %8603 = vmatpush.bf16.msrb.mxu2 %v13848_v5  ;;  %8616 = vmatpush.bf16.msrb.mxu3 %v13976_v29  ;;  %v11945_v5 = vld [vmem:[#allocation13 + $0x10] sm:$0xf0]  ;;  %v5065_v29 = vadd.f32 %v15961_v22, %v5051_v36  ;;  %v13911_v22 = vld [vmem:[#allocation13 + $0xf60] sm:$0xf]  ;;  %v15995_v7 = vpop.f32.mrf.mxu1 }
 0x367   :  { %v13912_v11 = vor.u32 %v15139_v15, %v13911_v22  ;;  %v12313_v22 = vld [vmem:[#allocation13 + $0x2f0] sm:$0xf0] }
 0x368   :  { %v5079_v37 = vadd.f32 %v15967_v2, %v5065_v29  ;;  %v13784_v2 = vor.u32 %v15107_v56, %v13783_v30  ;;  %v13879_v29 = vld [vmem:[#allocation13 + $0xf20] sm:$0xf]  ;;  %v5282_v30 = vld [vmem:[#allocation11 + $0x38] sm:$0xff]  ;;  %v15127_v56 = vld [vmem:[#allocation13 + $0xf0c] sm:$0xf0] }
 0x369   :  { %v5828_v4 = vunpack.c.h.b16 %v5282_v30 }
 0x36a   :  { %8604 = vmatpush.bf16.msrb.mxu2 %v13832_v41  ;;  %8617 = vmatpush.bf16.msrb.mxu3 %v13960_v25  ;;  %v11948_v41 = vor.u32 %v14645_v18, %v11945_v5  ;;  %v12076_v25 = vor.u32 %v14677_v42, %v12073_v19  ;;  %v5093_v36 = vadd.f32 %v15969_v10, %v5079_v37  ;;  %v14825_v10 = vld [vmem:[#allocation13 + $0x5a4] sm:$0xf]  ;;  %v13751_v18 = vld [vmem:[#allocation13 + $0xe20] sm:$0xf]  ;;  %v15099_v5 = vld [vmem:[#allocation13 + $0xe2c] sm:$0xf0]  ;;  %v15999_v15 = vpop.f32.mrf.mxu0 }
 0x36b   :  { %v12668_v16 = vor.u32 %v14825_v10, %v12665_v3  ;;  %v14789_v42 = vld [vmem:[#allocation13 + $0x484] sm:$0xf]  ;;  %v13735_v19 = vld [vmem:[#allocation13 + $0xe00] sm:$0xf]  ;;  %v13752_v39 = vor.u32 %v15099_v5, %v13751_v18  ;;  %v13880_v37 = vor.u32 %v15131_v28, %v13879_v29  ;;  %v16005_v10 = vpack.c.b16 %v5828_v4, %v5828_v4  ;;  %v12489_v3 = vld [vmem:[#allocation13 + $0x450] sm:$0xf0]  ;;  %v16007_v18 = vpop.f32.mrf.mxu2  ;;  %v16009_v5 = vpop.f32.mrf.mxu3 }
 0x36c   :  { %8636 = vmatpush.bf16.msra.mxu0 %v11948_v41  ;;  %8649 = vmatpush.bf16.msra.mxu1 %v12076_v25  ;;  %v5265_v57 = vpack.c.bf16 %v5149_v23, %v5093_v36  ;;  %v14769_v41 = vld [vmem:[#allocation13 + $0x3e4] sm:$0xf]  ;;  %v12441_v25 = vld [vmem:[#allocation13 + $0x3f0] sm:$0xf0]  ;;  %v12524_v31 = vor.u32 %v14789_v42, %v12521_v61 }
 0x36d   :  { %v12444_v12 = vor.u32 %v14769_v41, %v12441_v25  ;;  %v12409_v61 = vld [vmem:[#allocation13 + $0x3b0] sm:$0xf0]  ;;  %v14725_v41 = vld [vmem:[#allocation13 + $0x284] sm:$0xf] }
 0x36e   :  { %8605 = vmatpush.bf16.msrb.mxu2 %v13816_v40  ;;  %8618 = vmatpush.bf16.msrb.mxu3 %v13944_v50  ;;  %v15135_v40 = vld [vmem:[#allocation13 + $0xf4c] sm:$0xf0]  ;;  %v12556_v50 = vor.u32 %v14797_v0, %v12553_v13  ;;  %5269 = vst [vmem:[#allocation17 + $0x10] sm:$0xff] %v5265_v57  ;;  %v5827_v0 = vunpack.c.l.b16 %v5282_v30  ;;  %v14817_v13 = vld [vmem:[#allocation13 + $0x564] sm:$0xf]  ;;  %v16001_v35 = vpop.f32.mrf.mxu1  ;;  %v4373_v30 = vperm.slane %v15955_v51, 2 }
 0x36f   :  { %v13896_v52 = vor.u32 %v15135_v40, %v13895_v27  ;;  %8637 = vmatmul.bf16.vlgmr.msra.gmra.mxu0 %v15915_v58  ;;  %8650 = vmatmul.bf16.vlgmr.msra.gmra.mxu1 %v15917_v62  ;;  %v12297_v27 = vld [vmem:[#allocation13 + $0x2d0] sm:$0xf0]  ;;  %v14765_v40 = vld [vmem:[#allocation13 + $0x3c4] sm:$0xf] }
 0x370   :  { %8681 = vmatpush.bf16.msrb.mxu0 %v12572_v54  ;;  %8694 = vmatpush.bf16.msrb.mxu1 %v12700_v44  ;;  %v12652_v54 = vor.u32 %v14821_v49, %v12649_v14  ;;  %v14785_v44 = vld [vmem:[#allocation13 + $0x464] sm:$0xf]  ;;  %v12425_v57 = vld [vmem:[#allocation13 + $0x3d0] sm:$0xf0]  ;;  %v16003_v32 = vpack.c.b16 %v5827_v0, %v5827_v0  ;;  %v12300_v29 = vor.u32 %v14733_v59, %v12297_v27  ;;  %v4374_v59 = vperm.slane %v15955_v51, 3 }
 0x371   :  { %v12428_v28 = vor.u32 %v14765_v40, %v12425_v57  ;;  %v12492_v49 = vor.u32 %v14781_v45, %v12489_v3  ;;  %v12265_v25 = vld [vmem:[#allocation13 + $0x290] sm:$0xf0]  ;;  %v14773_v4 = vld [vmem:[#allocation13 + $0x404] sm:$0xf] }
 0x372   :  { %8606 = vmatpush.bf16.msrb.mxu2 %v13800_v63  ;;  %8619 = vmatpush.bf16.msrb.mxu3 %v13928_v33  ;;  %v15095_v63 = vld [vmem:[#allocation13 + $0xe0c] sm:$0xf0]  ;;  %v13863_v33 = vld [vmem:[#allocation13 + $0xf00] sm:$0xf]  ;;  %v5216_v42 = vpop.f32.mrf.mxu0  ;;  %v12268_v27 = vor.u32 %v14725_v41, %v12265_v25  ;;  %v14721_v57 = vld [vmem:[#allocation13 + $0x264] sm:$0xf] }
 0x373   :  { %v13736_v36 = vor.u32 %v15095_v63, %v13735_v19  ;;  %v13864_v23 = vor.u32 %v15127_v56, %v13863_v33  ;;  %v14761_v19 = vld [vmem:[#allocation13 + $0x3a4] sm:$0xf]  ;;  %v12601_v33 = vld [vmem:[#allocation13 + $0x530] sm:$0xf0]  ;;  %v16022_v45 = vpop.f32.mrf.mxu3 }
 0x374   :  { %8682 = vmatpush.bf16.msrb.mxu0 %v12556_v50  ;;  %8695 = vmatpush.bf16.msrb.mxu1 %v12684_v24  ;;  %v12636_v24 = vor.u32 %v14817_v13, %v12633_v43  ;;  %v14809_v63 = vld [vmem:[#allocation13 + $0x524] sm:$0xf]  ;;  %v12249_v3 = vld [vmem:[#allocation13 + $0x270] sm:$0xf0] }
 0x375   :  { %v12604_v0 = vor.u32 %v14809_v63, %v12601_v33  ;;  %v14929_v13 = vld [vmem:[#allocation13 + $0x8e4] sm:$0xf]  ;;  %v12233_v41 = vld [vmem:[#allocation13 + $0x250] sm:$0xf0] }
 0x376   :  { %8607 = vmatpush.bf16.msrb.mxu2 %v13784_v2  ;;  %8620 = vmatpush.bf16.msrb.mxu3 %v13912_v11  ;;  %v12505_v2 = vld [vmem:[#allocation13 + $0x470] sm:$0xf0]  ;;  %v12316_v11 = vor.u32 %v14737_v8, %v12313_v22  ;;  %v16014_v56 = vpop.f32.mrf.mxu1  ;;  %v12412_v22 = vor.u32 %v14761_v19, %v12409_v61  ;;  %v14805_v43 = vld [vmem:[#allocation13 + $0x504] sm:$0xf] }
 0x377   :  { %v12508_v50 = vor.u32 %v14785_v44, %v12505_v2  ;;  %v12457_v2 = vld [vmem:[#allocation13 + $0x410] sm:$0xf0]  ;;  %v14925_v19 = vld [vmem:[#allocation13 + $0x8c4] sm:$0xf] }
 0x378   :  { %8683 = vmatpush.bf16.msrb.mxu0 %v12540_v21  ;;  %8696 = vmatpush.bf16.msrb.mxu1 %v12668_v16  ;;  %v14729_v21 = vld [vmem:[#allocation13 + $0x2a4] sm:$0xf]  ;;  %v12281_v16 = vld [vmem:[#allocation13 + $0x2b0] sm:$0xf0] }
 0x379   :  { %v12284_v8 = vor.u32 %v14729_v21, %v12281_v16  ;;  %v14717_v33 = vld [vmem:[#allocation13 + $0x244] sm:$0xf]  ;;  %v12825_v51 = vld [vmem:[#allocation13 + $0x6f0] sm:$0xf0] }
 0x37a   :  { %8608 = vmatpush.bf16.msrb.mxu2 %v13768_v34  ;;  %8621 = vmatpush.bf16.msrb.mxu3 %v13896_v52  ;;  %v14813_v34 = vld [vmem:[#allocation13 + $0x544] sm:$0xf]  ;;  %v12617_v52 = vld [vmem:[#allocation13 + $0x550] sm:$0xf0]  ;;  %v5218_v61 = vpop.f32.mrf.mxu0 }
 0x37b   :  { %v12620_v14 = vor.u32 %v14813_v34, %v12617_v52  ;;  %v14753_v34 = vld [vmem:[#allocation13 + $0x364] sm:$0xf]  ;;  %v12377_v52 = vld [vmem:[#allocation13 + $0x370] sm:$0xf0] }
 0x37c   :  { %8684 = vmatpush.bf16.msrb.mxu0 %v12524_v31  ;;  %8697 = vmatpush.bf16.msrb.mxu1 %v12652_v54  ;;  %v14757_v31 = vld [vmem:[#allocation13 + $0x384] sm:$0xf]  ;;  %v12393_v54 = vld [vmem:[#allocation13 + $0x390] sm:$0xf0]  ;;  %v12380_v63 = vor.u32 %v14753_v34, %v12377_v52 }
 0x37d   :  { %v12396_v40 = vor.u32 %v14757_v31, %v12393_v54  ;;  %v14749_v25 = vld [vmem:[#allocation13 + $0x344] sm:$0xf]  ;;  %v12361_v31 = vld [vmem:[#allocation13 + $0x350] sm:$0xf0] }
 0x37e   :  { %8609 = vmatpush.bf16.msrb.mxu2 %v13752_v39  ;;  %8622 = vmatpush.bf16.msrb.mxu3 %v13880_v37  ;;  %v14777_v39 = vld [vmem:[#allocation13 + $0x424] sm:$0xf]  ;;  %v12473_v37 = vld [vmem:[#allocation13 + $0x430] sm:$0xf0] }
 0x37f   :  { %v12476_v44 = vor.u32 %v14777_v39, %v12473_v37  ;;  %v13193_v39 = vld [vmem:[#allocation13 + $0x9d0] sm:$0xf0]  ;;  %v12252_v37 = vor.u32 %v14721_v57, %v12249_v3  ;;  %v14745_v57 = vld [vmem:[#allocation13 + $0x324] sm:$0xf] }
 0x380   :  { %8685 = vmatpush.bf16.msrb.mxu0 %v12508_v50  ;;  %8698 = vmatpush.bf16.msrb.mxu1 %v12636_v24  ;;  %v5161_v50 = vadd.f32 %v15992_v9, %v4373_v30  ;;  %v16020_v24 = vpop.f32.mrf.mxu2  ;;  %v5217_v9 = vadd.f32 %v5216_v42, %v4374_v59  ;;  %v14917_v52 = vld [vmem:[#allocation13 + $0x884] sm:$0xf] }
 0x382   :  { %8610 = vmatpush.bf16.msrb.mxu2 %v13736_v36  ;;  %8623 = vmatpush.bf16.msrb.mxu3 %v13864_v23  ;;  %v12585_v36 = vld [vmem:[#allocation13 + $0x510] sm:$0xf0] }
 0x383   :  { %v13081_v23 = vld [vmem:[#allocation13 + $0x8f0] sm:$0xf0] }
 0x384   :  { %8686 = vmatpush.bf16.msrb.mxu0 %v12492_v49  ;;  %8699 = vmatpush.bf16.msrb.mxu1 %v12620_v14  ;;  %v13084_v21 = vor.u32 %v14929_v13, %v13081_v23  ;;  %v13065_v49 = vld [vmem:[#allocation13 + $0x8d0] sm:$0xf0]  ;;  %v14957_v14 = vld [vmem:[#allocation13 + $0x9c4] sm:$0xf] }
 0x385   :  { %8611 = vmatmul.bf16.vlgmr.msrb.gmra.mxu2 %v16003_v32  ;;  %8624 = vmatmul.bf16.vlgmr.msrb.gmra.mxu3 %v16005_v10  ;;  %v13068_v54 = vor.u32 %v14925_v19, %v13065_v49  ;;  %v13177_v13 = vld [vmem:[#allocation13 + $0x9b0] sm:$0xf0]  ;;  %v14713_v23 = vld [vmem:[#allocation13 + $0x224] sm:$0xf] }
 0x386   :  { %8655 = vmatpush.bf16.msra.mxu2 %v12316_v11  ;;  %8668 = vmatpush.bf16.msra.mxu3 %v12444_v12  ;;  %v14961_v11 = vld [vmem:[#allocation13 + $0x9e4] sm:$0xf]  ;;  %v13209_v12 = vld [vmem:[#allocation13 + $0x9f0] sm:$0xf0] }
 0x387   :  { %v13212_v16 = vor.u32 %v14961_v11, %v13209_v12  ;;  %v12217_v11 = vld [vmem:[#allocation13 + $0x230] sm:$0xf0]  ;;  %v5163_v12 = vadd.f32 %v15999_v15, %v4373_v30  ;;  %v5219_v15 = vadd.f32 %v5218_v61, %v4374_v59  ;;  %v14949_v19 = vld [vmem:[#allocation13 + $0x984] sm:$0xf] }
 0x388   :  { %8687 = vmatpush.bf16.msrb.mxu0 %v12476_v44  ;;  %8700 = vmatpush.bf16.msrb.mxu1 %v12604_v0  ;;  %v13196_v44 = vor.u32 %v14957_v14, %v13193_v39  ;;  %v14921_v0 = vld [vmem:[#allocation13 + $0x8a4] sm:$0xf]  ;;  %v13161_v49 = vld [vmem:[#allocation13 + $0x990] sm:$0xf0] }
 0x38a   :  { %8656 = vmatpush.bf16.msra.mxu2 %v12300_v29  ;;  %8669 = vmatpush.bf16.msra.mxu3 %v12428_v28  ;;  %v12460_v29 = vor.u32 %v14773_v4, %v12457_v2  ;;  %v12588_v28 = vor.u32 %v14805_v43, %v12585_v36  ;;  %v13049_v4 = vld [vmem:[#allocation13 + $0x8b0] sm:$0xf0]  ;;  %v14953_v2 = vld [vmem:[#allocation13 + $0x9a4] sm:$0xf]  ;;  %v5231_v43 = vadd.f32 %v16014_v56, %v5217_v9 }
 0x38b   :  { %v12364_v36 = vor.u32 %v14749_v25, %v12361_v31  ;;  %v13052_v3 = vor.u32 %v14921_v0, %v13049_v4  ;;  %v13180_v34 = vor.u32 %v14953_v2, %v13177_v13  ;;  %v14709_v9 = vld [vmem:[#allocation13 + $0x204] sm:$0xf]  ;;  %v13017_v2 = vld [vmem:[#allocation13 + $0x870] sm:$0xf0] }
 0x38c   :  { %8688 = vmatpush.bf16.msrb.mxu0 %v12460_v29  ;;  %8701 = vmatpush.bf16.msrb.mxu1 %v12588_v28  ;;  %v13033_v29 = vld [vmem:[#allocation13 + $0x890] sm:$0xf0]  ;;  %v14865_v25 = vld [vmem:[#allocation13 + $0x6e4] sm:$0xf] }
 0x38d   :  { %v13036_v59 = vor.u32 %v14917_v52, %v13033_v29  ;;  %v14897_v31 = vld [vmem:[#allocation13 + $0x7e4] sm:$0xf] }
 0x38e   :  { %8657 = vmatpush.bf16.msra.mxu2 %v12284_v8  ;;  %8670 = vmatpush.bf16.msra.mxu3 %v12412_v22  ;;  %v5175_v8 = vadd.f32 %v15995_v7, %v5161_v50  ;;  %v16027_v22 = vpop.f32.mrf.mxu1  ;;  %v12236_v7 = vor.u32 %v14717_v33, %v12233_v41  ;;  %v12345_v50 = vld [vmem:[#allocation13 + $0x330] sm:$0xf0]  ;;  %v14945_v13 = vld [vmem:[#allocation13 + $0x964] sm:$0xf] }
 0x38f   :  { %8689 = vmatmul.bf16.vlgmr.msrb.gmra.mxu0 %v15925_v6  ;;  %8702 = vmatmul.bf16.vlgmr.msrb.gmra.mxu1 %v15927_v53  ;;  %v12348_v39 = vor.u32 %v14745_v57, %v12345_v50  ;;  %v12329_v41 = vld [vmem:[#allocation13 + $0x310] sm:$0xf0]  ;;  %v5233_v4 = vadd.f32 %v16027_v22, %v5219_v15  ;;  %v14893_v50 = vld [vmem:[#allocation13 + $0x7c4] sm:$0xf] }
 0x390   :  { %8733 = vmatpush.bf16.msra.mxu0 %v13084_v21  ;;  %8746 = vmatpush.bf16.msra.mxu1 %v13212_v16  ;;  %v5189_v42 = vadd.f32 %v16007_v18, %v5175_v8  ;;  %v5795_v18 = vld [vmem:[#allocation14] sm:$0xf]  ;;  %v12220_v21 = vor.u32 %v14713_v23, %v12217_v11  ;;  %v8430_v16 = vpop.f32.mrf.mxu0  ;;  %v5177_v8 = vadd.f32 %v16001_v35, %v5163_v12  ;;  %v14941_v29 = vld [vmem:[#allocation13 + $0x944] sm:$0xf] }
 0x391   :  { %v5797_v28 = vperm.slane %v5795_v18, 0  ;;  %v12828_v11 = vor.u32 %v14865_v25, %v12825_v51  ;;  %v12937_v18 = vld [vmem:[#allocation13 + $0x7d0] sm:$0xf0] }
 0x392   :  { %8658 = vmatpush.bf16.msra.mxu2 %v12268_v27  ;;  %8671 = vmatpush.bf16.msra.mxu3 %v12396_v40  ;;  %v5244_v27 = vpop.f32.mrf.mxu2  ;;  %v5258_v40 = vpop.f32.mrf.mxu3  ;;  %v5203_v30 = vadd.f32 %v16009_v5, %v5189_v42  ;;  %v14913_v42 = vld [vmem:[#allocation13 + $0x864] sm:$0xf]  ;;  %v5191_v35 = vadd.f32 %v16020_v24, %v5177_v8  ;;  %v13001_v24 = vld [vmem:[#allocation13 + $0x850] sm:$0xf0] }
 0x393   :  { %v5245_v56 = vadd.f32 %v5244_v27, %v5231_v43  ;;  %v8431_v33 = vadd.f32 %v8430_v16, %v5797_v28  ;;  %v13145_v43 = vld [vmem:[#allocation13 + $0x970] sm:$0xf0]  ;;  %v14861_v27 = vld [vmem:[#allocation13 + $0x6c4] sm:$0xf]  ;;  %v13020_v22 = vor.u32 %v14913_v42, %v13017_v2  ;;  %v12940_v16 = vor.u32 %v14893_v50, %v12937_v18 }
 0x394   :  { %8734 = vmatpush.bf16.msra.mxu0 %v13068_v54  ;;  %8747 = vmatpush.bf16.msra.mxu1 %v13196_v44  ;;  %v12953_v54 = vld [vmem:[#allocation13 + $0x7f0] sm:$0xf0]  ;;  %v13164_v44 = vor.u32 %v14949_v19, %v13161_v49  ;;  %v5205_v15 = vadd.f32 %v16022_v45, %v5191_v35  ;;  %v14857_v19 = vld [vmem:[#allocation13 + $0x6a4] sm:$0xf] }
 0x395   :  { %v5259_v14 = vadd.f32 %v5258_v40, %v5245_v56  ;;  %v12956_v12 = vor.u32 %v14897_v31, %v12953_v54  ;;  %v12809_v40 = vld [vmem:[#allocation13 + $0x6d0] sm:$0xf0]  ;;  %v13148_v56 = vor.u32 %v14945_v13, %v13145_v43  ;;  %v14905_v8 = vld [vmem:[#allocation13 + $0x824] sm:$0xf] }
 0x396   :  { %8659 = vmatpush.bf16.msra.mxu2 %v12252_v37  ;;  %8672 = vmatpush.bf16.msra.mxu3 %v12380_v63  ;;  %v12201_v37 = vld [vmem:[#allocation13 + $0x210] sm:$0xf0]  ;;  %v14741_v63 = vld [vmem:[#allocation13 + $0x304] sm:$0xf]  ;;  %v8443_v61 = vpop.f32.mrf.mxu1 }
 0x397   :  { %v5264_v5 = vpack.c.bf16 %v5259_v14, %v5203_v30  ;;  %v16040_v0 = vadd.f32 %v8443_v61, %v8431_v33  ;;  %v13129_v28 = vld [vmem:[#allocation13 + $0x950] sm:$0xf0]  ;;  %v14853_v61 = vld [vmem:[#allocation13 + $0x684] sm:$0xf] }
 0x398   :  { %8735 = vmatpush.bf16.msra.mxu0 %v13052_v3  ;;  %8748 = vmatpush.bf16.msra.mxu1 %v13180_v34  ;;  %v14909_v3 = vld [vmem:[#allocation13 + $0x844] sm:$0xf]  ;;  %v8432_v52 = vpop.f32.mrf.mxu0  ;;  %v12793_v49 = vld [vmem:[#allocation13 + $0x6b0] sm:$0xf0]  ;;  %v13132_v33 = vor.u32 %v14941_v29, %v13129_v28 }
 0x399   :  { %5268 = vst [vmem:[#allocation17 + $0x8] sm:$0xff] %v5264_v5  ;;  %v12985_v45 = vld [vmem:[#allocation13 + $0x830] sm:$0xf0]  ;;  %v12796_v51 = vor.u32 %v14857_v19, %v12793_v49  ;;  %v14885_v31 = vld [vmem:[#allocation13 + $0x784] sm:$0xf] }
 0x39a   :  { %8660 = vmatpush.bf16.msra.mxu2 %v12236_v7  ;;  %8673 = vmatpush.bf16.msra.mxu3 %v12364_v36  ;;  %v12204_v7 = vor.u32 %v14709_v9, %v12201_v37  ;;  %v12332_v36 = vor.u32 %v14741_v63, %v12329_v41  ;;  %v5246_v23 = vpop.f32.mrf.mxu2  ;;  %v5260_v34 = vpop.f32.mrf.mxu3  ;;  %v14889_v9 = vld [vmem:[#allocation13 + $0x7a4] sm:$0xf]  ;;  %v12921_v37 = vld [vmem:[#allocation13 + $0x7b0] sm:$0xf0]  ;;  %v13004_v63 = vor.u32 %v14909_v3, %v13001_v24 }
 0x39b   :  { %v5247_v57 = vadd.f32 %v5246_v23, %v5233_v4  ;;  %v14937_v41 = vld [vmem:[#allocation13 + $0x924] sm:$0xf]  ;;  %v13113_v25 = vld [vmem:[#allocation13 + $0x930] sm:$0xf0] }
 0x39c   :  { %8736 = vmatpush.bf16.msra.mxu0 %v13036_v59  ;;  %8749 = vmatpush.bf16.msra.mxu1 %v13164_v44  ;;  %v12924_v59 = vor.u32 %v14889_v9, %v12921_v37  ;;  %v12777_v5 = vld [vmem:[#allocation13 + $0x690] sm:$0xf0]  ;;  %v12988_v44 = vor.u32 %v14905_v8, %v12985_v45  ;;  %v13116_v42 = vor.u32 %v14937_v41, %v13113_v25  ;;  %v14901_v4 = vld [vmem:[#allocation13 + $0x804] sm:$0xf] }
 0x39d   :  { %v5261_v30 = vadd.f32 %v5260_v34, %v5247_v57  ;;  %v12905_v54 = vld [vmem:[#allocation13 + $0x790] sm:$0xf0]  ;;  %v15057_v13 = vld [vmem:[#allocation13 + $0xce4] sm:$0xf] }
 0x39e   :  { %8661 = vmatpush.bf16.msra.mxu2 %v12220_v21  ;;  %8674 = vmatpush.bf16.msra.mxu3 %v12348_v39  ;;  %v12812_v21 = vor.u32 %v14861_v27, %v12809_v40  ;;  %v8445_v14 = vpop.f32.mrf.mxu1  ;;  %v12969_v2 = vld [vmem:[#allocation13 + $0x810] sm:$0xf0]  ;;  %v14933_v43 = vld [vmem:[#allocation13 + $0x904] sm:$0xf] }
 0x39f   :  { %v5266_v39 = vpack.c.bf16 %v5261_v30, %v5205_v15  ;;  %v13097_v35 = vld [vmem:[#allocation13 + $0x910] sm:$0xf0]  ;;  %v14849_v27 = vld [vmem:[#allocation13 + $0x664] sm:$0xf]  ;;  %v12972_v18 = vor.u32 %v14901_v4, %v12969_v2 }
 0x3a0   :  { %8737 = vmatpush.bf16.msra.mxu0 %v13020_v22  ;;  %8750 = vmatpush.bf16.msra.mxu1 %v13148_v56  ;;  %v13721_v23 = vld [vmem:[#allocation13 + $0xdf0] sm:$0xf0]  ;;  %v14881_v57 = vld [vmem:[#allocation13 + $0x764] sm:$0xf]  ;;  %v13100_v22 = vor.u32 %v14933_v43, %v13097_v35  ;;  %v8482_v3 = vpop.f32.mrf.mxu0 }
 0x3a1   :  { %5270 = vst [vmem:[#allocation17 + $0x18] sm:$0xff] %v5266_v39  ;;  %v12761_v40 = vld [vmem:[#allocation13 + $0x670] sm:$0xf0]  ;;  %v15053_v52 = vld [vmem:[#allocation13 + $0xcc4] sm:$0xf] }
 0x3a2   :  { %8662 = vmatpush.bf16.msra.mxu2 %v12204_v7  ;;  %8675 = vmatpush.bf16.msra.mxu3 %v12332_v36  ;;  %v13593_v7 = vld [vmem:[#allocation13 + $0xcf0] sm:$0xf0]  ;;  %v15089_v36 = vld [vmem:[#allocation13 + $0xde4] sm:$0xf]  ;;  %v12764_v30 = vor.u32 %v14849_v27, %v12761_v40  ;;  %9286 = dma.vmem_to_hbm [thread:$0]  %s9279_s7, 512, %s9281_s13, [#allocation18], %s15455_s21, %s15455_s21, %s15456_s22  }
 0x3a3   :  { %v12889_v50 = vld [vmem:[#allocation13 + $0x770] sm:$0xf0]  ;;  %v13596_v56 = vor.u32 %v15057_v13, %v13593_v7  ;;  %v13724_v34 = vor.u32 %v15089_v36, %v13721_v23  ;;  %v15085_v28 = vld [vmem:[#allocation13 + $0xdc4] sm:$0xf] }
 0x3a4   :  { %8738 = vmatpush.bf16.msra.mxu0 %v13004_v63  ;;  %8751 = vmatpush.bf16.msra.mxu1 %v13132_v33  ;;  %v13577_v29 = vld [vmem:[#allocation13 + $0xcd0] sm:$0xf0]  ;;  %v14877_v49 = vld [vmem:[#allocation13 + $0x744] sm:$0xf] }
 0x3a5   :  { %8663 = vmatmul.bf16.vlgmr.msra.gmra.mxu2 %v15921_v60  ;;  %8676 = vmatmul.bf16.vlgmr.msra.gmra.mxu3 %v15923_v26  ;;  %v13705_v15 = vld [vmem:[#allocation13 + $0xdd0] sm:$0xf0]  ;;  %v13580_v39 = vor.u32 %v15053_v52, %v13577_v29  ;;  %v15049_v37 = vld [vmem:[#allocation13 + $0xca4] sm:$0xf] }
 0x3a6   :  { %8707 = vmatpush.bf16.msrb.mxu2 %v12828_v11  ;;  %8720 = vmatpush.bf16.msrb.mxu3 %v12956_v12  ;;  %v12780_v11 = vor.u32 %v14853_v61, %v12777_v5  ;;  %v12908_v12 = vor.u32 %v14885_v31, %v12905_v54  ;;  %v16047_v24 = vpop.f32.mrf.mxu1  ;;  %v12745_v19 = vld [vmem:[#allocation13 + $0x650] sm:$0xf0]  ;;  %v13708_v9 = vor.u32 %v15085_v28, %v13705_v15  ;;  %v15081_v33 = vld [vmem:[#allocation13 + $0xda4] sm:$0xf] }
 0x3a7   :  { %v12873_v14 = vld [vmem:[#allocation13 + $0x750] sm:$0xf0]  ;;  %v14841_v25 = vld [vmem:[#allocation13 + $0x624] sm:$0xf] }
 0x3a8   :  { %8739 = vmatpush.bf16.msra.mxu0 %v12988_v44  ;;  %8752 = vmatpush.bf16.msra.mxu1 %v13116_v42  ;;  %v13561_v63 = vld [vmem:[#allocation13 + $0xcb0] sm:$0xf0]  ;;  %v12876_v41 = vor.u32 %v14877_v49, %v12873_v14  ;;  %v8456_v5 = vpop.f32.mrf.mxu2  ;;  %v8469_v31 = vpop.f32.mrf.mxu3  ;;  %v15045_v13 = vld [vmem:[#allocation13 + $0xc84] sm:$0xf] }
 0x3a9   :  { %v13689_v8 = vld [vmem:[#allocation13 + $0xdb0] sm:$0xf0]  ;;  %v8457_v54 = vadd.f32 %v8456_v5, %v16040_v0  ;;  %v13564_v44 = vor.u32 %v15049_v37, %v13561_v63  ;;  %v8484_v42 = vpop.f32.mrf.mxu0  ;;  %v15077_v35 = vld [vmem:[#allocation13 + $0xd84] sm:$0xf] }
 0x3aa   :  { %8708 = vmatpush.bf16.msrb.mxu2 %v12812_v21  ;;  %8721 = vmatpush.bf16.msrb.mxu3 %v12940_v16  ;;  %v12892_v21 = vor.u32 %v14881_v57, %v12889_v50  ;;  %v14845_v16 = vld [vmem:[#allocation13 + $0x644] sm:$0xf]  ;;  %v12857_v61 = vld [vmem:[#allocation13 + $0x730] sm:$0xf0]  ;;  %v13692_v4 = vor.u32 %v15081_v33, %v13689_v8 }
 0x3ab   :  { %v12748_v45 = vor.u32 %v14845_v16, %v12745_v19  ;;  %v13545_v43 = vld [vmem:[#allocation13 + $0xc90] sm:$0xf0]  ;;  %v14869_v27 = vld [vmem:[#allocation13 + $0x704] sm:$0xf]  ;;  %v8470_v40 = vadd.f32 %v8469_v31, %v8457_v54 }
 0x3ac   :  { %8740 = vmatpush.bf16.msra.mxu0 %v12972_v18  ;;  %8753 = vmatpush.bf16.msra.mxu1 %v13100_v22  ;;  %v13673_v7 = vld [vmem:[#allocation13 + $0xd90] sm:$0xf0]  ;;  %v14993_v0 = vld [vmem:[#allocation13 + $0xae4] sm:$0xf] }
 0x3ad   :  { %v12841_v57 = vld [vmem:[#allocation13 + $0x710] sm:$0xf0]  ;;  %v15025_v18 = vld [vmem:[#allocation13 + $0xbe4] sm:$0xf]  ;;  %v13676_v52 = vor.u32 %v15077_v35, %v13673_v7 }
 0x3ae   :  { %8709 = vmatpush.bf16.msrb.mxu2 %v12796_v51  ;;  %8722 = vmatpush.bf16.msrb.mxu3 %v12924_v59  ;;  %v12729_v51 = vld [vmem:[#allocation13 + $0x630] sm:$0xf0]  ;;  %v14873_v59 = vld [vmem:[#allocation13 + $0x724] sm:$0xf]  ;;  %v8497_v2 = vpop.f32.mrf.mxu1  ;;  %v12844_v16 = vor.u32 %v14869_v27, %v12841_v57 }
 0x3af   :  { %8741 = vmatmul.bf16.vlgmr.msra.gmra.mxu0 %v15933_v20  ;;  %8754 = vmatmul.bf16.vlgmr.msra.gmra.mxu1 %v15935_v55  ;;  %v12732_v36 = vor.u32 %v14841_v25, %v12729_v51  ;;  %v12860_v23 = vor.u32 %v14873_v59, %v12857_v61  ;;  %v13337_v50 = vld [vmem:[#allocation13 + $0xaf0] sm:$0xf0]  ;;  %v15041_v29 = vld [vmem:[#allocation13 + $0xc64] sm:$0xf] }
 0x3b0   :  { %8785 = vmatpush.bf16.msrb.mxu0 %v13596_v56  ;;  %8798 = vmatpush.bf16.msrb.mxu1 %v13724_v34  ;;  %v13465_v22 = vld [vmem:[#allocation13 + $0xbf0] sm:$0xf0]  ;;  %v8483_v56 = vadd.f32 %v8482_v3, %v8470_v40  ;;  %v13548_v34 = vor.u32 %v15045_v13, %v13545_v43  ;;  %v15073_v15 = vld [vmem:[#allocation13 + $0xd64] sm:$0xf]  ;;  %v13340_v49 = vor.u32 %v14993_v0, %v13337_v50  ;;  %v8458_v3 = vpop.f32.mrf.mxu2  ;;  %v8471_v37 = vpop.f32.mrf.mxu3 }
 0x3b1   :  { %v13529_v28 = vld [vmem:[#allocation13 + $0xc70] sm:$0xf0]  ;;  %v13468_v14 = vor.u32 %v15025_v18, %v13465_v22  ;;  %v15021_v63 = vld [vmem:[#allocation13 + $0xbc4] sm:$0xf]  ;;  %v16055_v25 = vpop.f32.mrf.mxu0 }
 0x3b2   :  { %8710 = vmatpush.bf16.msrb.mxu2 %v12780_v11  ;;  %8723 = vmatpush.bf16.msrb.mxu3 %v12908_v12  ;;  %v14837_v11 = vld [vmem:[#allocation13 + $0x604] sm:$0xf]  ;;  %v12713_v12 = vld [vmem:[#allocation13 + $0x610] sm:$0xf0]  ;;  %v16053_v19 = vadd.f32 %v16047_v24, %v8483_v56  ;;  %v13532_v8 = vor.u32 %v15041_v29, %v13529_v28  ;;  %v12063_v56 = vld [vmem:[#allocation13 + $0xe8] sm:$0xf] }
 0x3b3   :  { %v13449_v33 = vld [vmem:[#allocation13 + $0xbd0] sm:$0xf0]  ;;  %v15069_v24 = vld [vmem:[#allocation13 + $0xd44] sm:$0xf] }
 0x3b4   :  { %8786 = vmatpush.bf16.msrb.mxu0 %v13580_v39  ;;  %8799 = vmatpush.bf16.msrb.mxu1 %v13708_v9  ;;  %v14989_v39 = vld [vmem:[#allocation13 + $0xac4] sm:$0xf]  ;;  %v13321_v9 = vld [vmem:[#allocation13 + $0xad0] sm:$0xf0]  ;;  %v13452_v31 = vor.u32 %v15021_v63, %v13449_v33 }
 0x3b5   :  { %v13513_v59 = vld [vmem:[#allocation13 + $0xc50] sm:$0xf0]  ;;  %v13324_v5 = vor.u32 %v14989_v39, %v13321_v9  ;;  %v14985_v54 = vld [vmem:[#allocation13 + $0xaa4] sm:$0xf] }
 0x3b6   :  { %8711 = vmatpush.bf16.msrb.mxu2 %v12764_v30  ;;  %8724 = vmatpush.bf16.msrb.mxu3 %v12892_v21  ;;  %v13657_v30 = vld [vmem:[#allocation13 + $0xd70] sm:$0xf0]  ;;  %v12716_v21 = vor.u32 %v14837_v11, %v12713_v12  ;;  %v16057_v51 = vpop.f32.mrf.mxu1  ;;  %v15017_v42 = vld [vmem:[#allocation13 + $0xba4] sm:$0xf] }
 0x3b7   :  { %v13641_v61 = vld [vmem:[#allocation13 + $0xd50] sm:$0xf0]  ;;  %v15033_v43 = vld [vmem:[#allocation13 + $0xc24] sm:$0xf] }
 0x3b8   :  { %8787 = vmatpush.bf16.msrb.mxu0 %v13564_v44  ;;  %8800 = vmatpush.bf16.msrb.mxu1 %v13692_v4  ;;  %v13305_v44 = vld [vmem:[#allocation13 + $0xab0] sm:$0xf0]  ;;  %v13644_v13 = vor.u32 %v15069_v24, %v13641_v61  ;;  %v15065_v7 = vld [vmem:[#allocation13 + $0xd24] sm:$0xf]  ;;  %v14704_v24 = vld [vmem:[#allocation13 + $0x1d4] sm:$0xf0] }
 0x3b9   :  { %v13433_v4 = vld [vmem:[#allocation13 + $0xbb0] sm:$0xf0]  ;;  %v14981_v12 = vld [vmem:[#allocation13 + $0xa84] sm:$0xf]  ;;  %v8536_v29 = vpop.f32.mrf.mxu0 }
 0x3ba   :  { %8712 = vmatpush.bf16.msrb.mxu2 %v12748_v45  ;;  %8725 = vmatpush.bf16.msrb.mxu3 %v12876_v41  ;;  %v13660_v45 = vor.u32 %v15073_v15, %v13657_v30  ;;  %v15037_v41 = vld [vmem:[#allocation13 + $0xc44] sm:$0xf]  ;;  %v13497_v35 = vld [vmem:[#allocation13 + $0xc30] sm:$0xf0]  ;;  %v13436_v11 = vor.u32 %v15017_v42, %v13433_v4  ;;  %v14676_v15 = vld [vmem:[#allocation13 + $0xf4] sm:$0xf0] }
 0x3bb   :  { %v13516_v2 = vor.u32 %v15037_v41, %v13513_v59  ;;  %v13289_v27 = vld [vmem:[#allocation13 + $0xa90] sm:$0xf0]  ;;  %v15013_v40 = vld [vmem:[#allocation13 + $0xb84] sm:$0xf]  ;;  %v13500_v0 = vor.u32 %v15033_v43, %v13497_v35  ;;  %v12191_v30 = vld [vmem:[#allocation13 + $0x1e8] sm:$0xf]  ;;  %v12064_v33 = vor.u32 %v14676_v15, %v12063_v56 }
 0x3bc   :  { %8788 = vmatpush.bf16.msrb.mxu0 %v13548_v34  ;;  %8801 = vmatpush.bf16.msrb.mxu1 %v13676_v52  ;;  %v13417_v57 = vld [vmem:[#allocation13 + $0xb90] sm:$0xf0]  ;;  %v15029_v18 = vld [vmem:[#allocation13 + $0xc04] sm:$0xf]  ;;  %v14672_v41 = vld [vmem:[#allocation13 + $0xd4] sm:$0xf0] }
 0x3bd   :  { %v13481_v22 = vld [vmem:[#allocation13 + $0xc10] sm:$0xf0]  ;;  %v15061_v34 = vld [vmem:[#allocation13 + $0xd04] sm:$0xf]  ;;  %v12175_v59 = vld [vmem:[#allocation13 + $0x1c8] sm:$0xf] }
 0x3be   :  { %8713 = vmatpush.bf16.msrb.mxu2 %v12732_v36  ;;  %8726 = vmatpush.bf16.msrb.mxu3 %v12860_v23  ;;  %v13625_v36 = vld [vmem:[#allocation13 + $0xd30] sm:$0xf0]  ;;  %v13308_v23 = vor.u32 %v14985_v54, %v13305_v44  ;;  %v8549_v28 = vpop.f32.mrf.mxu1  ;;  %v15009_v9 = vld [vmem:[#allocation13 + $0xb64] sm:$0xf]  ;;  %v13484_v37 = vor.u32 %v15029_v18, %v13481_v22  ;;  %v14668_v43 = vld [vmem:[#allocation13 + $0xb4] sm:$0xf0] }
 0x3bf   :  { %v13628_v50 = vor.u32 %v15065_v7, %v13625_v36  ;;  %v13609_v52 = vld [vmem:[#allocation13 + $0xd10] sm:$0xf0]  ;;  %v15005_v44 = vld [vmem:[#allocation13 + $0xb44] sm:$0xf]  ;;  %v12159_v35 = vld [vmem:[#allocation13 + $0x1a8] sm:$0xf] }
 0x3c0   :  { %8789 = vmatpush.bf16.msrb.mxu0 %v13532_v8  ;;  %8802 = vmatpush.bf16.msrb.mxu1 %v13660_v45  ;;  %v13273_v39 = vld [vmem:[#allocation13 + $0xa70] sm:$0xf0]  ;;  %v13612_v63 = vor.u32 %v15061_v34, %v13609_v52  ;;  %v12047_v45 = vld [vmem:[#allocation13 + $0xc8] sm:$0xf]  ;;  %v14700_v7 = vld [vmem:[#allocation13 + $0x1b4] sm:$0xf0] }
 0x3c1   :  { %v13401_v3 = vld [vmem:[#allocation13 + $0xb70] sm:$0xf0]  ;;  %v12048_v4 = vor.u32 %v14672_v41, %v12047_v45  ;;  %v12160_v22 = vor.u32 %v14700_v7, %v12159_v35  ;;  %v12015_v56 = vld [vmem:[#allocation13 + $0x88] sm:$0xf]  ;;  %v14664_v34 = vld [vmem:[#allocation13 + $0x94] sm:$0xf0] }
 0x3c2   :  { %8714 = vmatpush.bf16.msrb.mxu2 %v12716_v21  ;;  %8727 = vmatpush.bf16.msrb.mxu3 %v12844_v16  ;;  %v14708_v21 = vld [vmem:[#allocation13 + $0x1f4] sm:$0xf0]  ;;  %v13292_v16 = vor.u32 %v14981_v12, %v13289_v27  ;;  %v13257_v54 = vld [vmem:[#allocation13 + $0xa50] sm:$0xf0]  ;;  %v12143_v52 = vld [vmem:[#allocation13 + $0x188] sm:$0xf] }
 0x3c3   :  { %v12192_v8 = vor.u32 %v14708_v21, %v12191_v30  ;;  %v13385_v42 = vld [vmem:[#allocation13 + $0xb50] sm:$0xf0]  ;;  %v14696_v29 = vld [vmem:[#allocation13 + $0x194] sm:$0xf0]  ;;  %v14965_v21 = vld [vmem:[#allocation13 + $0xa04] sm:$0xf] }
 0x3c4   :  { %8790 = vmatpush.bf16.msrb.mxu0 %v13516_v2  ;;  %8803 = vmatpush.bf16.msrb.mxu1 %v13644_v13  ;;  %v12176_v2 = vor.u32 %v14704_v24, %v12175_v59  ;;  %v12031_v13 = vld [vmem:[#allocation13 + $0xa8] sm:$0xf]  ;;  %v13241_v27 = vld [vmem:[#allocation13 + $0xa30] sm:$0xf0]  ;;  %v14660_v45 = vld [vmem:[#allocation13 + $0x74] sm:$0xf0] }
 0x3c5   :  { %8715 = vmatmul.bf16.vlgmr.msrb.gmra.mxu2 %v15939_v38  ;;  %8728 = vmatmul.bf16.vlgmr.msrb.gmra.mxu3 %v15941_v1  ;;  %v12032_v18 = vor.u32 %v14668_v43, %v12031_v13  ;;  %v12127_v41 = vld [vmem:[#allocation13 + $0x168] sm:$0xf]  ;;  %v14692_v59 = vld [vmem:[#allocation13 + $0x174] sm:$0xf0]  ;;  %v13961_v13 = vld [vmem:[#allocation13 + $0xfd0] sm:$0xf0] }
 0x3c6   :  { %8759 = vmatpush.bf16.msra.mxu2 %v13340_v49  ;;  %8772 = vmatpush.bf16.msra.mxu3 %v13468_v14  ;;  %v13420_v49 = vor.u32 %v15013_v40, %v13417_v57  ;;  %v14977_v14 = vld [vmem:[#allocation13 + $0xa64] sm:$0xf]  ;;  %v13369_v57 = vld [vmem:[#allocation13 + $0xb30] sm:$0xf0] }
 0x3c7   :  { %v13276_v61 = vor.u32 %v14977_v14, %v13273_v39  ;;  %v15001_v40 = vld [vmem:[#allocation13 + $0xb24] sm:$0xf]  ;;  %v13353_v14 = vld [vmem:[#allocation13 + $0xb10] sm:$0xf0] }
 0x3c8   :  { %8791 = vmatpush.bf16.msrb.mxu0 %v13500_v0  ;;  %8804 = vmatpush.bf16.msrb.mxu1 %v13628_v50  ;;  %v8508_v12 = vpop.f32.mrf.mxu2  ;;  %v8521_v0 = vpop.f32.mrf.mxu3  ;;  %v13372_v15 = vor.u32 %v15001_v40, %v13369_v57  ;;  %v15121_v39 = vld [vmem:[#allocation13 + $0xee4] sm:$0xf] }
 0x3c9   :  { %v8509_v50 = vadd.f32 %v8508_v12, %v16053_v19  ;;  %v16068_v43 = vpop.f32.mrf.mxu0  ;;  %v14688_v12 = vld [vmem:[#allocation13 + $0x154] sm:$0xf0]  ;;  %v15113_v57 = vld [vmem:[#allocation13 + $0xea4] sm:$0xf] }
 0x3ca   :  { %8760 = vmatpush.bf16.msra.mxu2 %v13324_v5  ;;  %8773 = vmatpush.bf16.msra.mxu3 %v13452_v31  ;;  %v13404_v5 = vor.u32 %v15009_v9, %v13401_v3  ;;  %v14973_v31 = vld [vmem:[#allocation13 + $0xa44] sm:$0xf]  ;;  %v13849_v9 = vld [vmem:[#allocation13 + $0xef0] sm:$0xf0]  ;;  %v16070_v35 = vpop.f32.mrf.mxu1 }
 0x3cb   :  { %v13260_v36 = vor.u32 %v14973_v31, %v13257_v54  ;;  %v8522_v30 = vadd.f32 %v8521_v0, %v8509_v50  ;;  %v15153_v3 = vld [vmem:[#allocation13 + $0xfe4] sm:$0xf]  ;;  %v13852_v31 = vor.u32 %v15121_v39, %v13849_v9  ;;  %v13817_v0 = vld [vmem:[#allocation13 + $0xeb0] sm:$0xf0] }
 0x3cc   :  { %8792 = vmatpush.bf16.msrb.mxu0 %v13484_v37  ;;  %8805 = vmatpush.bf16.msrb.mxu1 %v13612_v63  ;;  %v13977_v37 = vld [vmem:[#allocation13 + $0xff0] sm:$0xf0]  ;;  %v12016_v63 = vor.u32 %v14664_v34, %v12015_v56  ;;  %v15145_v50 = vld [vmem:[#allocation13 + $0xfa4] sm:$0xf]  ;;  %v11967_v34 = vld [vmem:[#allocation13 + $0x28] sm:$0xf] }
 0x3cd   :  { %v8535_v19 = vadd.f32 %v16055_v25, %v8522_v30  ;;  %v13980_v54 = vor.u32 %v15153_v3, %v13977_v37  ;;  %v15117_v25 = vld [vmem:[#allocation13 + $0xec4] sm:$0xf]  ;;  %v14648_v3 = vld [vmem:[#allocation13 + $0x14] sm:$0xf0] }
 0x3ce   :  { %8761 = vmatpush.bf16.msra.mxu2 %v13308_v23  ;;  %8774 = vmatpush.bf16.msra.mxu3 %v13436_v11  ;;  %v13388_v23 = vor.u32 %v15005_v44, %v13385_v42  ;;  %v14969_v11 = vld [vmem:[#allocation13 + $0xa24] sm:$0xf]  ;;  %v13833_v44 = vld [vmem:[#allocation13 + $0xed0] sm:$0xf0] }
 0x3cf   :  { %8793 = vmatmul.bf16.vlgmr.msrb.gmra.mxu0 %v15951_v17  ;;  %8806 = vmatmul.bf16.vlgmr.msrb.gmra.mxu1 %v15953_v46  ;;  %v13244_v28 = vor.u32 %v14969_v11, %v13241_v27  ;;  %v14656_v11 = vld [vmem:[#allocation13 + $0x54] sm:$0xf0]  ;;  %v13836_v27 = vor.u32 %v15117_v25, %v13833_v44  ;;  %v13785_v25 = vld [vmem:[#allocation13 + $0xe70] sm:$0xf0]  ;;  %v15137_v44 = vld [vmem:[#allocation13 + $0xf64] sm:$0xf] }
 0x3d0   :  { %8837 = vmatpush.bf16.msra.mxu0 %v12064_v33  ;;  %8850 = vmatpush.bf16.msra.mxu1 %v12192_v8  ;;  %v12144_v33 = vor.u32 %v14696_v29, %v12143_v52  ;;  %v11999_v8 = vld [vmem:[#allocation13 + $0x68] sm:$0xf]  ;;  %v8510_v42 = vpop.f32.mrf.mxu2  ;;  %v14652_v52 = vld [vmem:[#allocation13 + $0x34] sm:$0xf0] }
 0x3d1   :  { %v12000_v7 = vor.u32 %v14660_v45, %v11999_v8  ;;  %v12095_v29 = vld [vmem:[#allocation13 + $0x128] sm:$0xf]  ;;  %v11968_v39 = vor.u32 %v14652_v52, %v11967_v34  ;;  %v8588_v37 = vpop.f32.mrf.mxu0  ;;  %v14680_v45 = vld [vmem:[#allocation13 + $0x114] sm:$0xf0]  ;;  %v13913_v42 = vld [vmem:[#allocation13 + $0xf70] sm:$0xf0] }
 0x3d2   :  { %8762 = vmatpush.bf16.msra.mxu2 %v13292_v16  ;;  %8775 = vmatpush.bf16.msra.mxu3 %v13420_v49  ;;  %v13225_v16 = vld [vmem:[#allocation13 + $0xa10] sm:$0xf0]  ;;  %v14997_v49 = vld [vmem:[#allocation13 + $0xb04] sm:$0xf]  ;;  %v12079_v8 = vld [vmem:[#allocation13 + $0x108] sm:$0xf] }
 0x3d3   :  { %v13228_v24 = vor.u32 %v14965_v21, %v13225_v16  ;;  %v15109_v21 = vld [vmem:[#allocation13 + $0xe84] sm:$0xf]  ;;  %v13801_v16 = vld [vmem:[#allocation13 + $0xe90] sm:$0xf0]  ;;  %v14796_v34 = vld [vmem:[#allocation13 + $0x4b4] sm:$0xf0] }
 0x3d4   :  { %8838 = vmatpush.bf16.msra.mxu0 %v12048_v4  ;;  %8851 = vmatpush.bf16.msra.mxu1 %v12176_v2  ;;  %v8523_v4 = vpop.f32.mrf.mxu3  ;;  %v15149_v2 = vld [vmem:[#allocation13 + $0xfc4] sm:$0xf]  ;;  %v12671_v52 = vld [vmem:[#allocation13 + $0x5a8] sm:$0xf] }
 0x3d5   :  { %v13964_v40 = vor.u32 %v15149_v2, %v13961_v13  ;;  %v12080_v2 = vor.u32 %v14680_v45, %v12079_v8  ;;  %v12527_v37 = vld [vmem:[#allocation13 + $0x488] sm:$0xf]  ;;  %v14824_v8 = vld [vmem:[#allocation13 + $0x594] sm:$0xf0] }
 0x3d6   :  { %8763 = vmatpush.bf16.msra.mxu2 %v13276_v61  ;;  %8776 = vmatpush.bf16.msra.mxu3 %v13404_v5  ;;  %v13356_v61 = vor.u32 %v14997_v49, %v13353_v14  ;;  %v16066_v5 = vadd.f32 %v16057_v51, %v8535_v19  ;;  %v12111_v51 = vld [vmem:[#allocation13 + $0x148] sm:$0xf]  ;;  %v15141_v49 = vld [vmem:[#allocation13 + $0xf84] sm:$0xf]  ;;  %v13929_v14 = vld [vmem:[#allocation13 + $0xf90] sm:$0xf0] }
 0x3d7   :  { %v12112_v56 = vor.u32 %v14688_v12, %v12111_v51  ;;  %v11951_v19 = vld [vmem:[#allocation13 + $0x8] sm:$0xf]  ;;  %v14832_v51 = vld [vmem:[#allocation13 + $0x5d4] sm:$0xf0] }
 0x3d8   :  { %8839 = vmatpush.bf16.msra.mxu0 %v12032_v18  ;;  %8852 = vmatpush.bf16.msra.mxu1 %v12160_v22  ;;  %v13945_v18 = vld [vmem:[#allocation13 + $0xfb0] sm:$0xf0]  ;;  %v11952_v4 = vor.u32 %v14648_v3, %v11951_v19 }
 0x3d9   :  { %v13948_v30 = vor.u32 %v15145_v50, %v13945_v18  ;;  %v13897_v50 = vld [vmem:[#allocation13 + $0xf50] sm:$0xf0] }
 0x3da   :  { %8764 = vmatpush.bf16.msra.mxu2 %v13260_v36  ;;  %8777 = vmatpush.bf16.msra.mxu3 %v13388_v23  ;;  %v12128_v36 = vor.u32 %v14692_v59, %v12127_v41  ;;  %v11983_v23 = vld [vmem:[#allocation13 + $0x48] sm:$0xf]  ;;  %v14804_v41 = vld [vmem:[#allocation13 + $0x4f4] sm:$0xf0] }
 0x3db   :  { %v11984_v22 = vor.u32 %v14656_v11, %v11983_v23  ;;  %v12703_v59 = vld [vmem:[#allocation13 + $0x5e8] sm:$0xf]  ;;  %v14800_v23 = vld [vmem:[#allocation13 + $0x4d4] sm:$0xf0] }
 0x3dc   :  { %8840 = vmatpush.bf16.msra.mxu0 %v12016_v63  ;;  %8853 = vmatpush.bf16.msra.mxu1 %v12144_v33  ;;  %v8601_v63 = vpop.f32.mrf.mxu1  ;;  %v12575_v33 = vld [vmem:[#allocation13 + $0x4e8] sm:$0xf] }
 0x3dd   :  { %v12576_v13 = vor.u32 %v14804_v41, %v12575_v33  ;;  %v12687_v11 = vld [vmem:[#allocation13 + $0x5c8] sm:$0xf]  ;;  %v14792_v63 = vld [vmem:[#allocation13 + $0x494] sm:$0xf0] }
 0x3de   :  { %8765 = vmatpush.bf16.msra.mxu2 %v13244_v28  ;;  %8778 = vmatpush.bf16.msra.mxu3 %v13372_v15  ;;  %v14684_v28 = vld [vmem:[#allocation13 + $0x134] sm:$0xf0]  ;;  %v13820_v15 = vor.u32 %v15113_v57, %v13817_v0  ;;  %v13769_v57 = vld [vmem:[#allocation13 + $0xe50] sm:$0xf0]  ;;  %v15133_v0 = vld [vmem:[#allocation13 + $0xf44] sm:$0xf] }
 0x3df   :  { %v12096_v9 = vor.u32 %v14684_v28, %v12095_v29  ;;  %v14828_v29 = vld [vmem:[#allocation13 + $0x5b4] sm:$0xf0]  ;;  %v12655_v33 = vld [vmem:[#allocation13 + $0x588] sm:$0xf] }
 0x3e0   :  { %8841 = vmatpush.bf16.msra.mxu0 %v12000_v7  ;;  %8854 = vmatpush.bf16.msra.mxu1 %v12128_v36  ;;  %v12559_v36 = vld [vmem:[#allocation13 + $0x4c8] sm:$0xf]  ;;  %v12672_v3 = vor.u32 %v14828_v29, %v12671_v52 }
 0x3e1   :  { %v12560_v18 = vor.u32 %v14800_v23, %v12559_v36  ;;  %v14788_v36 = vld [vmem:[#allocation13 + $0x474] sm:$0xf0]  ;;  %v12639_v23 = vld [vmem:[#allocation13 + $0x568] sm:$0xf] }
 0x3e2   :  { %8766 = vmatpush.bf16.msra.mxu2 %v13228_v24  ;;  %8779 = vmatpush.bf16.msra.mxu3 %v13356_v61  ;;  %v14836_v24 = vld [vmem:[#allocation13 + $0x5f4] sm:$0xf0]  ;;  %v13804_v61 = vor.u32 %v15109_v21, %v13801_v16  ;;  %v12495_v29 = vld [vmem:[#allocation13 + $0x448] sm:$0xf] }
 0x3e3   :  { %v12704_v7 = vor.u32 %v14836_v24, %v12703_v59  ;;  %v15093_v24 = vld [vmem:[#allocation13 + $0xe04] sm:$0xf] }
 0x3e4   :  { %8842 = vmatpush.bf16.msra.mxu0 %v11984_v22  ;;  %8855 = vmatpush.bf16.msra.mxu1 %v12112_v56  ;;  %v12688_v22 = vor.u32 %v14832_v51, %v12687_v11  ;;  %v12543_v56 = vld [vmem:[#allocation13 + $0x4a8] sm:$0xf]  ;;  %v14820_v11 = vld [vmem:[#allocation13 + $0x574] sm:$0xf0] }
 0x3e5   :  { %8767 = vmatmul.bf16.vlgmr.msra.gmra.mxu2 %v15977_v47  ;;  %8780 = vmatmul.bf16.vlgmr.msra.gmra.mxu3 %v15979_v48  ;;  %v12544_v19 = vor.u32 %v14796_v34, %v12543_v56  ;;  %v14768_v56 = vld [vmem:[#allocation13 + $0x3d4] sm:$0xf0]  ;;  %v12640_v52 = vor.u32 %v14820_v11, %v12639_v23  ;;  %v12255_v11 = vld [vmem:[#allocation13 + $0x268] sm:$0xf] }
 0x3e6   :  { %8811 = vmatpush.bf16.msrb.mxu2 %v13852_v31  ;;  %8824 = vmatpush.bf16.msrb.mxu3 %v13980_v54  ;;  %v13932_v31 = vor.u32 %v15141_v49, %v13929_v14  ;;  %v15105_v54 = vld [vmem:[#allocation13 + $0xe64] sm:$0xf]  ;;  %v13753_v49 = vld [vmem:[#allocation13 + $0xe30] sm:$0xf0] }
 0x3e7   :  { %v13788_v12 = vor.u32 %v15105_v54, %v13785_v25  ;;  %v15129_v14 = vld [vmem:[#allocation13 + $0xf24] sm:$0xf]  ;;  %v13865_v54 = vld [vmem:[#allocation13 + $0xf10] sm:$0xf0]  ;;  %v12319_v25 = vld [vmem:[#allocation13 + $0x2e8] sm:$0xf] }
 0x3e8   :  { %8843 = vmatpush.bf16.msra.mxu0 %v11968_v39  ;;  %8856 = vmatpush.bf16.msra.mxu1 %v12096_v9  ;;  %v8560_v21 = vpop.f32.mrf.mxu2  ;;  %v8573_v16 = vpop.f32.mrf.mxu3  ;;  %v13881_v39 = vld [vmem:[#allocation13 + $0xf30] sm:$0xf0] }
 0x3e9   :  { %v8561_v9 = vadd.f32 %v8560_v21, %v16066_v5  ;;  %v13884_v59 = vor.u32 %v15129_v14, %v13881_v39  ;;  %v12415_v14 = vld [vmem:[#allocation13 + $0x3a8] sm:$0xf]  ;;  %v14764_v39 = vld [vmem:[#allocation13 + $0x3b4] sm:$0xf0] }
 0x3ea   :  { %8812 = vmatpush.bf16.msrb.mxu2 %v13836_v27  ;;  %8825 = vmatpush.bf16.msrb.mxu3 %v13964_v40  ;;  %v13916_v27 = vor.u32 %v15137_v44, %v13913_v42  ;;  %v15101_v40 = vld [vmem:[#allocation13 + $0xe44] sm:$0xf]  ;;  %v14740_v44 = vld [vmem:[#allocation13 + $0x2f4] sm:$0xf0]  ;;  %v12447_v42 = vld [vmem:[#allocation13 + $0x3e8] sm:$0xf] }
 0x3eb   :  { %v13772_v28 = vor.u32 %v15101_v40, %v13769_v57  ;;  %v8574_v45 = vadd.f32 %v8573_v16, %v8561_v9  ;;  %v12320_v40 = vor.u32 %v14740_v44, %v12319_v25  ;;  %v12287_v16 = vld [vmem:[#allocation13 + $0x2a8] sm:$0xf]  ;;  %v14776_v44 = vld [vmem:[#allocation13 + $0x414] sm:$0xf0] }
 0x3ec   :  { %8844 = vmatpush.bf16.msra.mxu0 %v11952_v4  ;;  %8857 = vmatpush.bf16.msra.mxu1 %v12080_v2  ;;  %v14772_v4 = vld [vmem:[#allocation13 + $0x3f4] sm:$0xf0]  ;;  %v12528_v2 = vor.u32 %v14792_v63, %v12527_v37  ;;  %v12607_v63 = vld [vmem:[#allocation13 + $0x528] sm:$0xf] }
 0x3ed   :  { %v8587_v5 = vadd.f32 %v16068_v43, %v8574_v45  ;;  %v12448_v57 = vor.u32 %v14772_v4, %v12447_v42  ;;  %v12303_v43 = vld [vmem:[#allocation13 + $0x2c8] sm:$0xf]  ;;  %v14780_v37 = vld [vmem:[#allocation13 + $0x434] sm:$0xf0]  ;;  %v12416_v45 = vor.u32 %v14764_v39, %v12415_v14 }
 0x3ee   :  { %8813 = vmatpush.bf16.msrb.mxu2 %v13820_v15  ;;  %8826 = vmatpush.bf16.msrb.mxu3 %v13948_v30  ;;  %v13900_v15 = vor.u32 %v15133_v0, %v13897_v50  ;;  %v15097_v30 = vld [vmem:[#allocation13 + $0xe24] sm:$0xf]  ;;  %v14736_v0 = vld [vmem:[#allocation13 + $0x2d4] sm:$0xf0]  ;;  %v12463_v25 = vld [vmem:[#allocation13 + $0x408] sm:$0xf] }
 0x3ef   :  { %8845 = vmatmul.bf16.vlgmr.msra.gmra.mxu0 %v15915_v58  ;;  %8858 = vmatmul.bf16.vlgmr.msra.gmra.mxu1 %v15917_v62  ;;  %v13756_v41 = vor.u32 %v15097_v30, %v13753_v49  ;;  %v16079_v51 = vadd.f32 %v16070_v35, %v8587_v5  ;;  %v12623_v35 = vld [vmem:[#allocation13 + $0x548] sm:$0xf]  ;;  %v12304_v30 = vor.u32 %v14736_v0, %v12303_v43  ;;  %v14732_v49 = vld [vmem:[#allocation13 + $0x2b4] sm:$0xf0] }
 0x3f0   :  { %8889 = vmatpush.bf16.msrb.mxu0 %v12576_v13  ;;  %8902 = vmatpush.bf16.msrb.mxu1 %v12704_v7  ;;  %v12656_v13 = vor.u32 %v14824_v8, %v12655_v33  ;;  %v12511_v7 = vld [vmem:[#allocation13 + $0x468] sm:$0xf]  ;;  %v8562_v50 = vpop.f32.mrf.mxu2  ;;  %v14812_v33 = vld [vmem:[#allocation13 + $0x534] sm:$0xf0]  ;;  %v12288_v8 = vor.u32 %v14732_v49, %v12287_v16 }
 0x3f1   :  { %v12512_v34 = vor.u32 %v14788_v36, %v12511_v7  ;;  %v13087_v5 = vld [vmem:[#allocation13 + $0x8e8] sm:$0xf]  ;;  %v14808_v4 = vld [vmem:[#allocation13 + $0x514] sm:$0xf0] }
 0x3f2   :  { %8814 = vmatpush.bf16.msrb.mxu2 %v13804_v61  ;;  %8827 = vmatpush.bf16.msrb.mxu3 %v13932_v31  ;;  %v13737_v61 = vld [vmem:[#allocation13 + $0xe10] sm:$0xf0]  ;;  %v15125_v31 = vld [vmem:[#allocation13 + $0xf04] sm:$0xf]  ;;  %v12591_v42 = vld [vmem:[#allocation13 + $0x508] sm:$0xf] }
 0x3f3   :  { %v14964_v7 = vld [vmem:[#allocation13 + $0x9f4] sm:$0xf0]  ;;  %v12592_v43 = vor.u32 %v14808_v4, %v12591_v42  ;;  %v13055_v49 = vld [vmem:[#allocation13 + $0x8a8] sm:$0xf] }
 0x3f4   :  { %8890 = vmatpush.bf16.msrb.mxu0 %v12560_v18  ;;  %8903 = vmatpush.bf16.msrb.mxu1 %v12688_v22  ;;  %v8575_v18 = vpop.f32.mrf.mxu3  ;;  %v12431_v22 = vld [vmem:[#allocation13 + $0x3c8] sm:$0xf]  ;;  %v14924_v14 = vld [vmem:[#allocation13 + $0x8b4] sm:$0xf0] }
 0x3f5   :  { %v12432_v21 = vor.u32 %v14768_v56, %v12431_v22  ;;  %v13071_v18 = vld [vmem:[#allocation13 + $0x8c8] sm:$0xf]  ;;  %v14928_v22 = vld [vmem:[#allocation13 + $0x8d4] sm:$0xf0] }
 0x3f6   :  { %8815 = vmatpush.bf16.msrb.mxu2 %v13788_v12  ;;  %8828 = vmatpush.bf16.msrb.mxu3 %v13916_v27  ;;  %v13740_v12 = vor.u32 %v15093_v24, %v13737_v61  ;;  %v13868_v27 = vor.u32 %v15125_v31, %v13865_v54  ;;  %v12399_v24 = vld [vmem:[#allocation13 + $0x388] sm:$0xf]  ;;  %v14760_v61 = vld [vmem:[#allocation13 + $0x394] sm:$0xf0]  ;;  %v12608_v54 = vor.u32 %v14812_v33, %v12607_v63 }
 0x3f7   :  { %v12400_v23 = vor.u32 %v14760_v61, %v12399_v24  ;;  %v13199_v56 = vld [vmem:[#allocation13 + $0x9c8] sm:$0xf]  ;;  %v14716_v63 = vld [vmem:[#allocation13 + $0x234] sm:$0xf0] }
 0x3f8   :  { %8891 = vmatpush.bf16.msrb.mxu0 %v12544_v19  ;;  %8904 = vmatpush.bf16.msrb.mxu1 %v12672_v3  ;;  %v12479_v3 = vld [vmem:[#allocation13 + $0x428] sm:$0xf] }
 0x3f9   :  { %v12480_v31 = vor.u32 %v14780_v37, %v12479_v3  ;;  %v13183_v39 = vld [vmem:[#allocation13 + $0x9a8] sm:$0xf] }
 0x3fa   :  { %8816 = vmatpush.bf16.msrb.mxu2 %v13772_v28  ;;  %8829 = vmatpush.bf16.msrb.mxu3 %v13900_v15  ;;  %v14784_v28 = vld [vmem:[#allocation13 + $0x454] sm:$0xf0]  ;;  %v12223_v37 = vld [vmem:[#allocation13 + $0x228] sm:$0xf] }
 0x3fb   :  { %v14816_v15 = vld [vmem:[#allocation13 + $0x554] sm:$0xf0]  ;;  %v12496_v9 = vor.u32 %v14784_v28, %v12495_v29  ;;  %v12239_v28 = vld [vmem:[#allocation13 + $0x248] sm:$0xf] }
 0x3fc   :  { %8892 = vmatpush.bf16.msrb.mxu0 %v12528_v2  ;;  %8905 = vmatpush.bf16.msrb.mxu1 %v12656_v13  ;;  %v12624_v19 = vor.u32 %v14816_v15, %v12623_v35  ;;  %v14932_v2 = vld [vmem:[#allocation13 + $0x8f4] sm:$0xf0]  ;;  %v13215_v13 = vld [vmem:[#allocation13 + $0x9e8] sm:$0xf] }
 0x3fd   :  { %v13088_v0 = vor.u32 %v14932_v2, %v13087_v5  ;;  %v13216_v50 = vor.u32 %v14964_v7, %v13215_v13  ;;  %v14720_v35 = vld [vmem:[#allocation13 + $0x254] sm:$0xf0]  ;;  %v12367_v15 = vld [vmem:[#allocation13 + $0x348] sm:$0xf]  ;;  %v12224_v7 = vor.u32 %v14716_v63, %v12223_v37 }
 0x3fe   :  { %8817 = vmatpush.bf16.msrb.mxu2 %v13756_v41  ;;  %8830 = vmatpush.bf16.msrb.mxu3 %v13884_v59  ;;  %v12271_v41 = vld [vmem:[#allocation13 + $0x288] sm:$0xf]  ;;  %v14728_v59 = vld [vmem:[#allocation13 + $0x294] sm:$0xf0] }
 0x3ff   :  { %v12272_v36 = vor.u32 %v14728_v59, %v12271_v41  ;;  %v14748_v41 = vld [vmem:[#allocation13 + $0x334] sm:$0xf0]  ;;  %v15174_v59 = vld [vmem:[#allocation14] sm:$0xf]  ;;  %v13167_v4 = vld [vmem:[#allocation13 + $0x988] sm:$0xf] }
 0x400   :  { %8893 = vmatpush.bf16.msrb.mxu0 %v12512_v34  ;;  %8906 = vmatpush.bf16.msrb.mxu1 %v12640_v52  ;;  %v14960_v34 = vld [vmem:[#allocation13 + $0x9d4] sm:$0xf0]  ;;  %v5798_v24 = vperm.slane %v15174_v59, 1  ;;  %v13007_v37 = vld [vmem:[#allocation13 + $0x848] sm:$0xf] }
 0x401   :  { %v13200_v16 = vor.u32 %v14960_v34, %v13199_v56  ;;  %v14920_v5 = vld [vmem:[#allocation13 + $0x894] sm:$0xf0]  ;;  %v13023_v56 = vld [vmem:[#allocation13 + $0x868] sm:$0xf] }
 0x402   :  { %8818 = vmatpush.bf16.msrb.mxu2 %v13740_v12  ;;  %8831 = vmatpush.bf16.msrb.mxu3 %v13868_v27  ;;  %v14724_v12 = vld [vmem:[#allocation13 + $0x274] sm:$0xf0]  ;;  %v12383_v27 = vld [vmem:[#allocation13 + $0x368] sm:$0xf] }
 0x403   :  { %v12256_v52 = vor.u32 %v14724_v12, %v12255_v11  ;;  %v14952_v2 = vld [vmem:[#allocation13 + $0x994] sm:$0xf0]  ;;  %v12335_v12 = vld [vmem:[#allocation13 + $0x308] sm:$0xf] }
 0x404   :  { %8894 = vmatpush.bf16.msrb.mxu0 %v12496_v9  ;;  %8907 = vmatpush.bf16.msrb.mxu1 %v12624_v19  ;;  %v14956_v9 = vld [vmem:[#allocation13 + $0x9b4] sm:$0xf0]  ;;  %v12240_v19 = vor.u32 %v14720_v35, %v12239_v28 }
 0x405   :  { %8819 = vmatmul.bf16.vlgmr.msrb.gmra.mxu2 %v16003_v32  ;;  %8832 = vmatmul.bf16.vlgmr.msrb.gmra.mxu3 %v16005_v10  ;;  %v14712_v11 = vld [vmem:[#allocation13 + $0x214] sm:$0xf0] }
 0x406   :  { %8863 = vmatpush.bf16.msra.mxu2 %v12320_v40  ;;  %8876 = vmatpush.bf16.msra.mxu3 %v12448_v57  ;;  %v14756_v40 = vld [vmem:[#allocation13 + $0x374] sm:$0xf0]  ;;  %v12464_v57 = vor.u32 %v14776_v44, %v12463_v25  ;;  %v13039_v25 = vld [vmem:[#allocation13 + $0x888] sm:$0xf]  ;;  %v8638_v44 = vpop.f32.mrf.mxu0 }
 0x407   :  { %v12384_v29 = vor.u32 %v14756_v40, %v12383_v27  ;;  %v8639_v42 = vadd.f32 %v8638_v44, %v5798_v24  ;;  %v12831_v27 = vld [vmem:[#allocation13 + $0x6e8] sm:$0xf]  ;;  %v14868_v40 = vld [vmem:[#allocation13 + $0x6f4] sm:$0xf0] }
 0x408   :  { %8895 = vmatpush.bf16.msrb.mxu0 %v12480_v31  ;;  %8908 = vmatpush.bf16.msrb.mxu1 %v12608_v54  ;;  %v8612_v33 = vpop.f32.mrf.mxu2  ;;  %v13056_v31 = vor.u32 %v14924_v14, %v13055_v49  ;;  %v13184_v54 = vor.u32 %v14956_v9, %v13183_v39  ;;  %v14916_v34 = vld [vmem:[#allocation13 + $0x874] sm:$0xf0]  ;;  %v12943_v39 = vld [vmem:[#allocation13 + $0x7c8] sm:$0xf] }
 0x409   :  { %v8613_v61 = vadd.f32 %v8612_v33, %v16079_v51  ;;  %v14744_v51 = vld [vmem:[#allocation13 + $0x314] sm:$0xf0]  ;;  %v12799_v24 = vld [vmem:[#allocation13 + $0x6a8] sm:$0xf] }
 0x40a   :  { %8864 = vmatpush.bf16.msra.mxu2 %v12304_v30  ;;  %8877 = vmatpush.bf16.msra.mxu3 %v12432_v21  ;;  %v14752_v30 = vld [vmem:[#allocation13 + $0x354] sm:$0xf0]  ;;  %v13072_v21 = vor.u32 %v14928_v22, %v13071_v18  ;;  %v13168_v18 = vor.u32 %v14952_v2, %v13167_v4  ;;  %v12336_v35 = vor.u32 %v14744_v51, %v12335_v12  ;;  %v13119_v2 = vld [vmem:[#allocation13 + $0x928] sm:$0xf] }
 0x40b   :  { %v12368_v3 = vor.u32 %v14752_v30, %v12367_v15  ;;  %v12832_v15 = vor.u32 %v14868_v40, %v12831_v27  ;;  %v14896_v9 = vld [vmem:[#allocation13 + $0x7d4] sm:$0xf0]  ;;  %v12911_v51 = vld [vmem:[#allocation13 + $0x788] sm:$0xf] }
 0x40c   :  { %8896 = vmatpush.bf16.msrb.mxu0 %v12464_v57  ;;  %8909 = vmatpush.bf16.msrb.mxu1 %v12592_v43  ;;  %v8651_v57 = vpop.f32.mrf.mxu1  ;;  %v12959_v43 = vld [vmem:[#allocation13 + $0x7e8] sm:$0xf]  ;;  %v14912_v33 = vld [vmem:[#allocation13 + $0x854] sm:$0xf0]  ;;  %v12944_v59 = vor.u32 %v14896_v9, %v12943_v39 }
 0x40d   :  { %v16088_v22 = vadd.f32 %v8651_v57, %v8639_v42  ;;  %v13008_v44 = vor.u32 %v14912_v33, %v13007_v37  ;;  %v12991_v42 = vld [vmem:[#allocation13 + $0x828] sm:$0xf]  ;;  %v14908_v4 = vld [vmem:[#allocation13 + $0x834] sm:$0xf0] }
 0x40e   :  { %8865 = vmatpush.bf16.msra.mxu2 %v12288_v8  ;;  %8878 = vmatpush.bf16.msra.mxu3 %v12416_v45  ;;  %v8625_v8 = vpop.f32.mrf.mxu3  ;;  %v12351_v45 = vld [vmem:[#allocation13 + $0x328] sm:$0xf]  ;;  %v8640_v63 = vpop.f32.mrf.mxu0  ;;  %v14856_v12 = vld [vmem:[#allocation13 + $0x694] sm:$0xf0]  ;;  %v12992_v40 = vor.u32 %v14908_v4, %v12991_v42 }
 0x40f   :  { %8897 = vmatmul.bf16.vlgmr.msrb.gmra.mxu0 %v15925_v6  ;;  %8910 = vmatmul.bf16.vlgmr.msrb.gmra.mxu1 %v15927_v53  ;;  %v16086_v13 = vadd.f32 %v8625_v8, %v8613_v61  ;;  %v13135_v8 = vld [vmem:[#allocation13 + $0x948] sm:$0xf]  ;;  %v14860_v61 = vld [vmem:[#allocation13 + $0x6b4] sm:$0xf0] }
 0x410   :  { %8941 = vmatpush.bf16.msra.mxu0 %v13088_v0  ;;  %8954 = vmatpush.bf16.msra.mxu1 %v13216_v50  ;;  %v14900_v0 = vld [vmem:[#allocation13 + $0x7f4] sm:$0xf0]  ;;  %v13040_v50 = vor.u32 %v14920_v5, %v13039_v25  ;;  %v8614_v49 = vpop.f32.mrf.mxu2  ;;  %v13583_v37 = vld [vmem:[#allocation13 + $0xcc8] sm:$0xf] }
 0x411   :  { %v12960_v30 = vor.u32 %v14900_v0, %v12959_v43  ;;  %v14892_v25 = vld [vmem:[#allocation13 + $0x7b4] sm:$0xf0]  ;;  %v12975_v43 = vld [vmem:[#allocation13 + $0x808] sm:$0xf] }
 0x412   :  { %8866 = vmatpush.bf16.msra.mxu2 %v12272_v36  ;;  %8879 = vmatpush.bf16.msra.mxu3 %v12400_v23  ;;  %v12352_v36 = vor.u32 %v14748_v41, %v12351_v45  ;;  %v12207_v23 = vld [vmem:[#allocation13 + $0x208] sm:$0xf]  ;;  %v14944_v45 = vld [vmem:[#allocation13 + $0x954] sm:$0xf0] }
 0x413   :  { %v12208_v28 = vor.u32 %v14712_v11, %v12207_v23  ;;  %v13136_v5 = vor.u32 %v14944_v45, %v13135_v8  ;;  %v12783_v11 = vld [vmem:[#allocation13 + $0x688] sm:$0xf]  ;;  %v14888_v27 = vld [vmem:[#allocation13 + $0x794] sm:$0xf0] }
 0x414   :  { %8942 = vmatpush.bf16.msra.mxu0 %v13072_v21  ;;  %8955 = vmatpush.bf16.msra.mxu1 %v13200_v16  ;;  %v12815_v21 = vld [vmem:[#allocation13 + $0x6c8] sm:$0xf]  ;;  %v14864_v16 = vld [vmem:[#allocation13 + $0x6d4] sm:$0xf0] }
 0x415   :  { %v12816_v41 = vor.u32 %v14864_v16, %v12815_v21  ;;  %v14904_v0 = vld [vmem:[#allocation13 + $0x814] sm:$0xf0]  ;;  %v12895_v16 = vld [vmem:[#allocation13 + $0x768] sm:$0xf] }
 0x416   :  { %8867 = vmatpush.bf16.msra.mxu2 %v12256_v52  ;;  %8880 = vmatpush.bf16.msra.mxu3 %v12384_v29  ;;  %v13151_v52 = vld [vmem:[#allocation13 + $0x968] sm:$0xf]  ;;  %v14948_v29 = vld [vmem:[#allocation13 + $0x974] sm:$0xf0]  ;;  %v8627_v14 = vpop.f32.mrf.mxu3 }
 0x417   :  { %v14852_v21 = vld [vmem:[#allocation13 + $0x674] sm:$0xf0]  ;;  %v12976_v14 = vor.u32 %v14904_v0, %v12975_v43  ;;  %v13711_v33 = vld [vmem:[#allocation13 + $0xdc8] sm:$0xf] }
 0x418   :  { %8943 = vmatpush.bf16.msra.mxu0 %v13056_v31  ;;  %8956 = vmatpush.bf16.msra.mxu1 %v13184_v54  ;;  %v8653_v31 = vpop.f32.mrf.mxu1  ;;  %v12927_v54 = vld [vmem:[#allocation13 + $0x7a8] sm:$0xf]  ;;  %v14884_v49 = vld [vmem:[#allocation13 + $0x774] sm:$0xf0] }
 0x419   :  { %v12928_v23 = vor.u32 %v14892_v25, %v12927_v54  ;;  %v15056_v63 = vld [vmem:[#allocation13 + $0xcd4] sm:$0xf0]  ;;  %v13695_v4 = vld [vmem:[#allocation13 + $0xda8] sm:$0xf] }
 0x41a   :  { %8868 = vmatpush.bf16.msra.mxu2 %v12240_v19  ;;  %8881 = vmatpush.bf16.msra.mxu3 %v12368_v3  ;;  %v13024_v19 = vor.u32 %v14916_v34, %v13023_v56  ;;  %v13152_v3 = vor.u32 %v14948_v29, %v13151_v52  ;;  %v13103_v56 = vld [vmem:[#allocation13 + $0x908] sm:$0xf]  ;;  %v14936_v34 = vld [vmem:[#allocation13 + $0x914] sm:$0xf0]  ;;  %v13584_v25 = vor.u32 %v15056_v63, %v13583_v37 }
 0x41b   :  { %v15060_v52 = vld [vmem:[#allocation13 + $0xcf4] sm:$0xf0]  ;;  %v13727_v29 = vld [vmem:[#allocation13 + $0xde8] sm:$0xf]  ;;  %v13104_v39 = vor.u32 %v14936_v34, %v13103_v56 }
 0x41c   :  { %8944 = vmatpush.bf16.msra.mxu0 %v13040_v50  ;;  %8957 = vmatpush.bf16.msra.mxu1 %v13168_v18  ;;  %v16092_v50 = vpop.f32.mrf.mxu0  ;;  %v13599_v18 = vld [vmem:[#allocation13 + $0xce8] sm:$0xf]  ;;  %v15088_v8 = vld [vmem:[#allocation13 + $0xdd4] sm:$0xf0] }
 0x41d   :  { %v14880_v31 = vld [vmem:[#allocation13 + $0x754] sm:$0xf0]  ;;  %v13551_v56 = vld [vmem:[#allocation13 + $0xc88] sm:$0xf] }
 0x41e   :  { %8869 = vmatpush.bf16.msra.mxu2 %v12224_v7  ;;  %8882 = vmatpush.bf16.msra.mxu3 %v12352_v36  ;;  %v14940_v7 = vld [vmem:[#allocation13 + $0x934] sm:$0xf0]  ;;  %v12800_v36 = vor.u32 %v14860_v61, %v12799_v24  ;;  %v12879_v61 = vld [vmem:[#allocation13 + $0x748] sm:$0xf] }
 0x41f   :  { %v13120_v57 = vor.u32 %v14940_v7, %v13119_v2  ;;  %v14848_v24 = vld [vmem:[#allocation13 + $0x654] sm:$0xf0] }
 0x420   :  { %8945 = vmatpush.bf16.msra.mxu0 %v13024_v19  ;;  %8958 = vmatpush.bf16.msra.mxu1 %v13152_v3  ;;  %v16094_v9 = vpop.f32.mrf.mxu1  ;;  %v13600_v19 = vor.u32 %v15060_v52, %v13599_v18  ;;  %v15052_v42 = vld [vmem:[#allocation13 + $0xcb4] sm:$0xf0]  ;;  %v13679_v52 = vld [vmem:[#allocation13 + $0xd88] sm:$0xf] }
 0x421   :  { %v15084_v2 = vld [vmem:[#allocation13 + $0xdb4] sm:$0xf0] }
 0x422   :  { %8870 = vmatpush.bf16.msra.mxu2 %v12208_v28  ;;  %8883 = vmatpush.bf16.msra.mxu3 %v12336_v35  ;;  %v15092_v28 = vld [vmem:[#allocation13 + $0xdf4] sm:$0xf0]  ;;  %v12784_v35 = vor.u32 %v14856_v12, %v12783_v11  ;;  %v12863_v12 = vld [vmem:[#allocation13 + $0x728] sm:$0xf]  ;;  %v13696_v0 = vor.u32 %v15084_v2, %v13695_v4 }
 0x423   :  { %v13728_v3 = vor.u32 %v15092_v28, %v13727_v29  ;;  %v14844_v11 = vld [vmem:[#allocation13 + $0x634] sm:$0xf0] }
 0x424   :  { %8946 = vmatpush.bf16.msra.mxu0 %v13008_v44  ;;  %8959 = vmatpush.bf16.msra.mxu1 %v13136_v5  ;;  %v8692_v54 = vpop.f32.mrf.mxu0  ;;  %v13712_v44 = vor.u32 %v15088_v8, %v13711_v33  ;;  %v13567_v5 = vld [vmem:[#allocation13 + $0xca8] sm:$0xf]  ;;  %v15048_v34 = vld [vmem:[#allocation13 + $0xc94] sm:$0xf0] }
 0x425   :  { %8871 = vmatmul.bf16.vlgmr.msra.gmra.mxu2 %v15921_v60  ;;  %8884 = vmatmul.bf16.vlgmr.msra.gmra.mxu3 %v15923_v26  ;;  %v13568_v43 = vor.u32 %v15052_v42, %v13567_v5  ;;  %v15080_v29 = vld [vmem:[#allocation13 + $0xd94] sm:$0xf0]  ;;  %v13552_v37 = vor.u32 %v15048_v34, %v13551_v56  ;;  %v13535_v33 = vld [vmem:[#allocation13 + $0xc68] sm:$0xf] }
 0x426   :  { %8915 = vmatpush.bf16.msrb.mxu2 %v12832_v15  ;;  %8928 = vmatpush.bf16.msrb.mxu3 %v12960_v30  ;;  %v12912_v15 = vor.u32 %v14888_v27, %v12911_v51  ;;  %v12767_v30 = vld [vmem:[#allocation13 + $0x668] sm:$0xf]  ;;  %v14876_v51 = vld [vmem:[#allocation13 + $0x734] sm:$0xf0]  ;;  %v13680_v63 = vor.u32 %v15080_v29, %v13679_v52 }
 0x427   :  { %v12768_v45 = vor.u32 %v14852_v21, %v12767_v30  ;;  %v14840_v30 = vld [vmem:[#allocation13 + $0x614] sm:$0xf0]  ;;  %v12847_v21 = vld [vmem:[#allocation13 + $0x708] sm:$0xf] }
 0x428   :  { %8947 = vmatpush.bf16.msra.mxu0 %v12992_v40  ;;  %8960 = vmatpush.bf16.msra.mxu1 %v13120_v57  ;;  %v8664_v27 = vpop.f32.mrf.mxu2  ;;  %v8677_v40 = vpop.f32.mrf.mxu3  ;;  %v15044_v8 = vld [vmem:[#allocation13 + $0xc74] sm:$0xf0]  ;;  %v13455_v42 = vld [vmem:[#allocation13 + $0xbc8] sm:$0xf] }
 0x429   :  { %v8665_v57 = vadd.f32 %v8664_v27, %v16088_v22  ;;  %v8705_v18 = vpop.f32.mrf.mxu1  ;;  %v14996_v22 = vld [vmem:[#allocation13 + $0xaf4] sm:$0xf0]  ;;  %v13536_v2 = vor.u32 %v15044_v8, %v13535_v33  ;;  %v13503_v52 = vld [vmem:[#allocation13 + $0xc28] sm:$0xf]  ;;  %v14674_v33 = vld [vmem:[#allocation13 + $0xec] sm:$0xf] }
 0x42a   :  { %8916 = vmatpush.bf16.msrb.mxu2 %v12816_v41  ;;  %8929 = vmatpush.bf16.msrb.mxu3 %v12944_v59  ;;  %v12896_v41 = vor.u32 %v14884_v49, %v12895_v16  ;;  %v12751_v59 = vld [vmem:[#allocation13 + $0x648] sm:$0xf]  ;;  %v14872_v49 = vld [vmem:[#allocation13 + $0x714] sm:$0xf0] }
 0x42b   :  { %v12752_v7 = vor.u32 %v14848_v24, %v12751_v59  ;;  %v8678_v16 = vadd.f32 %v8677_v40, %v8665_v57  ;;  %v12848_v24 = vor.u32 %v14872_v49, %v12847_v21  ;;  %v15024_v4 = vld [vmem:[#allocation13 + $0xbd4] sm:$0xf0]  ;;  %v13311_v57 = vld [vmem:[#allocation13 + $0xaa8] sm:$0xf] }
 0x42c   :  { %8948 = vmatpush.bf16.msra.mxu0 %v12976_v14  ;;  %8961 = vmatpush.bf16.msra.mxu1 %v13104_v39  ;;  %v13343_v14 = vld [vmem:[#allocation13 + $0xae8] sm:$0xf]  ;;  %v13456_v40 = vor.u32 %v15024_v4, %v13455_v42  ;;  %v15020_v18 = vld [vmem:[#allocation13 + $0xbb4] sm:$0xf0] }
 0x42d   :  { %v13471_v39 = vld [vmem:[#allocation13 + $0xbe8] sm:$0xf]  ;;  %v15036_v29 = vld [vmem:[#allocation13 + $0xc34] sm:$0xf0] }
 0x42e   :  { %8917 = vmatpush.bf16.msrb.mxu2 %v12800_v36  ;;  %8930 = vmatpush.bf16.msrb.mxu3 %v12928_v23  ;;  %v12880_v36 = vor.u32 %v14880_v31, %v12879_v61  ;;  %v12735_v23 = vld [vmem:[#allocation13 + $0x628] sm:$0xf]  ;;  %v13344_v31 = vor.u32 %v14996_v22, %v13343_v14  ;;  %v15016_v14 = vld [vmem:[#allocation13 + $0xb94] sm:$0xf0]  ;;  %v13504_v22 = vor.u32 %v15036_v29, %v13503_v52  ;;  %v14666_v52 = vld [vmem:[#allocation13 + $0xac] sm:$0xf] }
 0x42f   :  { %8949 = vmatmul.bf16.vlgmr.msra.gmra.mxu0 %v15933_v20  ;;  %8962 = vmatmul.bf16.vlgmr.msra.gmra.mxu1 %v15935_v55  ;;  %v12736_v28 = vor.u32 %v14844_v11, %v12735_v23  ;;  %v13519_v11 = vld [vmem:[#allocation13 + $0xc48] sm:$0xf]  ;;  %v12033_v29 = vld [vmem:[#allocation13 + $0xb8] sm:$0xf0] }
 0x430   :  { %8993 = vmatpush.bf16.msrb.mxu0 %v13600_v19  ;;  %9006 = vmatpush.bf16.msrb.mxu1 %v13728_v3  ;;  %v15028_v19 = vld [vmem:[#allocation13 + $0xbf4] sm:$0xf0]  ;;  %v8691_v3 = vadd.f32 %v16092_v50, %v8678_v16  ;;  %v8666_v50 = vpop.f32.mrf.mxu2  ;;  %v8679_v5 = vpop.f32.mrf.mxu3  ;;  %v13295_v21 = vld [vmem:[#allocation13 + $0xa88] sm:$0xf] }
 0x431   :  { %v13472_v54 = vor.u32 %v15028_v19, %v13471_v39  ;;  %v16105_v23 = vpop.f32.mrf.mxu1  ;;  %v14984_v16 = vld [vmem:[#allocation13 + $0xa94] sm:$0xf0]  ;;  %v13423_v49 = vld [vmem:[#allocation13 + $0xb88] sm:$0xf] }
 0x432   :  { %8918 = vmatpush.bf16.msrb.mxu2 %v12784_v35  ;;  %8931 = vmatpush.bf16.msrb.mxu3 %v12912_v15  ;;  %v12864_v35 = vor.u32 %v14876_v51, %v12863_v12  ;;  %v12719_v15 = vld [vmem:[#allocation13 + $0x608] sm:$0xf]  ;;  %v16101_v61 = vadd.f32 %v16094_v9, %v8691_v3  ;;  %v15040_v12 = vld [vmem:[#allocation13 + $0xc54] sm:$0xf0] }
 0x433   :  { %v12720_v59 = vor.u32 %v14840_v30, %v12719_v15  ;;  %v13647_v9 = vld [vmem:[#allocation13 + $0xd48] sm:$0xf]  ;;  %v15072_v51 = vld [vmem:[#allocation13 + $0xd54] sm:$0xf0]  ;;  %v13520_v56 = vor.u32 %v15040_v12, %v13519_v11  ;;  %v14670_v11 = vld [vmem:[#allocation13 + $0xcc] sm:$0xf] }
 0x434   :  { %8994 = vmatpush.bf16.msrb.mxu0 %v13584_v25  ;;  %9007 = vmatpush.bf16.msrb.mxu1 %v13712_v44  ;;  %v13327_v25 = vld [vmem:[#allocation13 + $0xac8] sm:$0xf]  ;;  %v14992_v44 = vld [vmem:[#allocation13 + $0xad4] sm:$0xf0]  ;;  %v13648_v34 = vor.u32 %v15072_v51, %v13647_v9  ;;  %v12049_v12 = vld [vmem:[#allocation13 + $0xd8] sm:$0xf0] }
 0x435   :  { %v13328_v27 = vor.u32 %v14992_v44, %v13327_v25  ;;  %v13487_v19 = vld [vmem:[#allocation13 + $0xc08] sm:$0xf]  ;;  %v15032_v3 = vld [vmem:[#allocation13 + $0xc14] sm:$0xf0]  ;;  %v14702_v9 = vld [vmem:[#allocation13 + $0x1cc] sm:$0xf] }
 0x436   :  { %8919 = vmatpush.bf16.msrb.mxu2 %v12768_v45  ;;  %8932 = vmatpush.bf16.msrb.mxu3 %v12896_v41  ;;  %v13663_v45 = vld [vmem:[#allocation13 + $0xd68] sm:$0xf]  ;;  %v15076_v41 = vld [vmem:[#allocation13 + $0xd74] sm:$0xf0]  ;;  %v13488_v42 = vor.u32 %v15032_v3, %v13487_v19  ;;  %v12177_v51 = vld [vmem:[#allocation13 + $0x1d8] sm:$0xf0]  ;;  %v12036_v3 = vor.u32 %v14666_v52, %v12033_v29 }
 0x437   :  { %v13615_v8 = vld [vmem:[#allocation13 + $0xd08] sm:$0xf]  ;;  %v14980_v44 = vld [vmem:[#allocation13 + $0xa74] sm:$0xf0] }
 0x438   :  { %8995 = vmatpush.bf16.msrb.mxu0 %v13568_v43  ;;  %9008 = vmatpush.bf16.msrb.mxu1 %v13696_v0  ;;  %v14988_v43 = vld [vmem:[#allocation13 + $0xab4] sm:$0xf0]  ;;  %v13439_v0 = vld [vmem:[#allocation13 + $0xba8] sm:$0xf] }
 0x439   :  { %v13312_v15 = vor.u32 %v14988_v43, %v13311_v57  ;;  %v13440_v30 = vor.u32 %v15020_v18, %v13439_v0  ;;  %v13279_v25 = vld [vmem:[#allocation13 + $0xa68] sm:$0xf]  ;;  %v15012_v5 = vld [vmem:[#allocation13 + $0xb74] sm:$0xf0] }
 0x43a   :  { %8920 = vmatpush.bf16.msrb.mxu2 %v12752_v7  ;;  %8933 = vmatpush.bf16.msrb.mxu3 %v12880_v36  ;;  %v16103_v7 = vpop.f32.mrf.mxu0  ;;  %v13664_v36 = vor.u32 %v15076_v41, %v13663_v45  ;;  %v15064_v45 = vld [vmem:[#allocation13 + $0xd14] sm:$0xf0]  ;;  %v12065_v41 = vld [vmem:[#allocation13 + $0xf8] sm:$0xf0]  ;;  %v13407_v50 = vld [vmem:[#allocation13 + $0xb68] sm:$0xf] }
 0x43b   :  { %v13616_v4 = vor.u32 %v15064_v45, %v13615_v8  ;;  %v13263_v57 = vld [vmem:[#allocation13 + $0xa48] sm:$0xf]  ;;  %v14976_v43 = vld [vmem:[#allocation13 + $0xa54] sm:$0xf0]  ;;  %v14694_v8 = vld [vmem:[#allocation13 + $0x18c] sm:$0xf] }
 0x43c   :  { %8996 = vmatpush.bf16.msrb.mxu0 %v13552_v37  ;;  %9009 = vmatpush.bf16.msrb.mxu1 %v13680_v63  ;;  %v8757_v63 = vpop.f32.mrf.mxu1  ;;  %v13391_v0 = vld [vmem:[#allocation13 + $0xb48] sm:$0xf]  ;;  %v15008_v18 = vld [vmem:[#allocation13 + $0xb54] sm:$0xf0]  ;;  %v12145_v45 = vld [vmem:[#allocation13 + $0x198] sm:$0xf0] }
 0x43d   :  { %v14662_v63 = vld [vmem:[#allocation13 + $0x8c] sm:$0xf]  ;;  %v13967_v52 = vld [vmem:[#allocation13 + $0xfc8] sm:$0xf]  ;;  %v15152_v29 = vld [vmem:[#allocation13 + $0xfd4] sm:$0xf0] }
 0x43e   :  { %8921 = vmatpush.bf16.msrb.mxu2 %v12736_v28  ;;  %8934 = vmatpush.bf16.msrb.mxu3 %v12864_v35  ;;  %v13631_v28 = vld [vmem:[#allocation13 + $0xd28] sm:$0xf]  ;;  %v15068_v35 = vld [vmem:[#allocation13 + $0xd34] sm:$0xf0] }
 0x43f   :  { %v13632_v39 = vor.u32 %v15068_v35, %v13631_v28  ;;  %v14698_v28 = vld [vmem:[#allocation13 + $0x1ac] sm:$0xf]  ;;  %v12161_v35 = vld [vmem:[#allocation13 + $0x1b8] sm:$0xf0] }
 0x440   :  { %8997 = vmatpush.bf16.msrb.mxu0 %v13536_v2  ;;  %9010 = vmatpush.bf16.msrb.mxu1 %v13664_v36  ;;  %v12068_v2 = vor.u32 %v14674_v33, %v12065_v41  ;;  %v12017_v33 = vld [vmem:[#allocation13 + $0x98] sm:$0xf0] }
 0x442   :  { %8922 = vmatpush.bf16.msrb.mxu2 %v12720_v59  ;;  %8935 = vmatpush.bf16.msrb.mxu3 %v12848_v24  ;;  %v8744_v37 = vpop.f32.mrf.mxu0  ;;  %v14706_v59 = vld [vmem:[#allocation13 + $0x1ec] sm:$0xf]  ;;  %v12193_v24 = vld [vmem:[#allocation13 + $0x1f8] sm:$0xf0] }
 0x443   :  { %v12196_v36 = vor.u32 %v14706_v59, %v12193_v24  ;;  %v12164_v37 = vor.u32 %v14698_v28, %v12161_v35 }
 0x444   :  { %8998 = vmatpush.bf16.msrb.mxu0 %v13520_v56  ;;  %9011 = vmatpush.bf16.msrb.mxu1 %v13648_v34  ;;  %v12052_v56 = vor.u32 %v14670_v11, %v12049_v12  ;;  %v12180_v34 = vor.u32 %v14702_v9, %v12177_v51  ;;  %v14658_v11 = vld [vmem:[#allocation13 + $0x6c] sm:$0xf]  ;;  %v12001_v12 = vld [vmem:[#allocation13 + $0x78] sm:$0xf0] }
 0x445   :  { %8923 = vmatmul.bf16.vlgmr.msrb.gmra.mxu2 %v15939_v38  ;;  %8936 = vmatmul.bf16.vlgmr.msrb.gmra.mxu3 %v15941_v1  ;;  %v14690_v9 = vld [vmem:[#allocation13 + $0x16c] sm:$0xf]  ;;  %v12129_v51 = vld [vmem:[#allocation13 + $0x178] sm:$0xf0] }
 0x446   :  { %8967 = vmatpush.bf16.msra.mxu2 %v13344_v31  ;;  %8980 = vmatpush.bf16.msra.mxu3 %v13472_v54  ;;  %v13296_v31 = vor.u32 %v14984_v16, %v13295_v21  ;;  %v13424_v54 = vor.u32 %v15016_v14, %v13423_v49  ;;  %v13247_v21 = vld [vmem:[#allocation13 + $0xa28] sm:$0xf]  ;;  %v14972_v49 = vld [vmem:[#allocation13 + $0xa34] sm:$0xf0] }
 0x447   :  { %v13375_v14 = vld [vmem:[#allocation13 + $0xb28] sm:$0xf]  ;;  %v13248_v41 = vor.u32 %v14972_v49, %v13247_v21  ;;  %v14654_v21 = vld [vmem:[#allocation13 + $0x4c] sm:$0xf]  ;;  %v12113_v49 = vld [vmem:[#allocation13 + $0x158] sm:$0xf0] }
 0x448   :  { %8999 = vmatpush.bf16.msrb.mxu0 %v13504_v22  ;;  %9012 = vmatpush.bf16.msrb.mxu1 %v13632_v39  ;;  %v8716_v16 = vpop.f32.mrf.mxu2  ;;  %v15004_v22 = vld [vmem:[#allocation13 + $0xb34] sm:$0xf0]  ;;  %v8729_v39 = vpop.f32.mrf.mxu3 }
 0x449   :  { %v8717_v19 = vadd.f32 %v8716_v16, %v16101_v61  ;;  %v13376_v59 = vor.u32 %v15004_v22, %v13375_v14  ;;  %v11985_v16 = vld [vmem:[#allocation13 + $0x58] sm:$0xf0]  ;;  %v13968_v22 = vor.u32 %v15152_v29, %v13967_v52 }
 0x44a   :  { %8968 = vmatpush.bf16.msra.mxu2 %v13328_v27  ;;  %8981 = vmatpush.bf16.msra.mxu3 %v13456_v40  ;;  %v13280_v27 = vor.u32 %v14980_v44, %v13279_v25  ;;  %v13408_v40 = vor.u32 %v15012_v5, %v13407_v50  ;;  %v13359_v25 = vld [vmem:[#allocation13 + $0xb08] sm:$0xf]  ;;  %v15000_v44 = vld [vmem:[#allocation13 + $0xb14] sm:$0xf0] }
 0x44b   :  { %v8730_v24 = vadd.f32 %v8729_v39, %v8717_v19  ;;  %v13855_v50 = vld [vmem:[#allocation13 + $0xee8] sm:$0xf]  ;;  %v15124_v5 = vld [vmem:[#allocation13 + $0xef4] sm:$0xf0] }
 0x44c   :  { %9000 = vmatpush.bf16.msrb.mxu0 %v13488_v42  ;;  %9013 = vmatpush.bf16.msrb.mxu1 %v13616_v4  ;;  %v13983_v42 = vld [vmem:[#allocation13 + $0xfe8] sm:$0xf]  ;;  %v15156_v4 = vld [vmem:[#allocation13 + $0xff4] sm:$0xf0]  ;;  %v16116_v28 = vpop.f32.mrf.mxu0  ;;  %v16118_v35 = vpop.f32.mrf.mxu1 }
 0x44d   :  { %v8743_v61 = vadd.f32 %v16103_v7, %v8730_v24  ;;  %v13839_v7 = vld [vmem:[#allocation13 + $0xec8] sm:$0xf]  ;;  %v15116_v19 = vld [vmem:[#allocation13 + $0xeb4] sm:$0xf0] }
 0x44e   :  { %8969 = vmatpush.bf16.msra.mxu2 %v13312_v15  ;;  %8982 = vmatpush.bf16.msra.mxu3 %v13440_v30  ;;  %v13264_v15 = vor.u32 %v14976_v43, %v13263_v57  ;;  %v13392_v30 = vor.u32 %v15008_v18, %v13391_v0  ;;  %v13856_v43 = vor.u32 %v15124_v5, %v13855_v50  ;;  %v15120_v18 = vld [vmem:[#allocation13 + $0xed4] sm:$0xf0]  ;;  %v13823_v39 = vld [vmem:[#allocation13 + $0xea8] sm:$0xf] }
 0x44f   :  { %9001 = vmatmul.bf16.vlgmr.msrb.gmra.mxu0 %v15951_v17  ;;  %9014 = vmatmul.bf16.vlgmr.msrb.gmra.mxu1 %v15953_v46  ;;  %v16114_v57 = vadd.f32 %v16105_v23, %v8743_v61  ;;  %v13984_v0 = vor.u32 %v15156_v4, %v13983_v42  ;;  %v14686_v23 = vld [vmem:[#allocation13 + $0x14c] sm:$0xf]  ;;  %v13840_v14 = vor.u32 %v15120_v18, %v13839_v7  ;;  %v15144_v50 = vld [vmem:[#allocation13 + $0xf94] sm:$0xf0]  ;;  %v11953_v4 = vld [vmem:[#allocation13 + $0x18] sm:$0xf0] }
 0x450   :  { %9045 = vmatpush.bf16.msra.mxu0 %v12068_v2  ;;  %9058 = vmatpush.bf16.msra.mxu1 %v12196_v36  ;;  %v12020_v2 = vor.u32 %v14662_v63, %v12017_v33  ;;  %v12148_v36 = vor.u32 %v14694_v8, %v12145_v45  ;;  %v11988_v63 = vor.u32 %v14654_v21, %v11985_v16  ;;  %v14650_v8 = vld [vmem:[#allocation13 + $0x2c] sm:$0xf]  ;;  %v11969_v45 = vld [vmem:[#allocation13 + $0x38] sm:$0xf0]  ;;  %v13791_v7 = vld [vmem:[#allocation13 + $0xe68] sm:$0xf] }
 0x451   :  { %v12116_v33 = vor.u32 %v14686_v23, %v12113_v49  ;;  %v13824_v24 = vor.u32 %v15116_v19, %v13823_v39  ;;  %v11972_v5 = vor.u32 %v14650_v8, %v11969_v45  ;;  %v14646_v42 = vld [vmem:[#allocation13 + $0xc] sm:$0xf]  ;;  %v15108_v18 = vld [vmem:[#allocation13 + $0xe74] sm:$0xf0]  ;;  %v12561_v16 = vld [vmem:[#allocation13 + $0x4d8] sm:$0xf0] }
 0x452   :  { %8970 = vmatpush.bf16.msra.mxu2 %v13296_v31  ;;  %8983 = vmatpush.bf16.msra.mxu3 %v13424_v54  ;;  %v13231_v31 = vld [vmem:[#allocation13 + $0xa08] sm:$0xf]  ;;  %v14968_v54 = vld [vmem:[#allocation13 + $0xa14] sm:$0xf0]  ;;  %v11956_v52 = vor.u32 %v14646_v42, %v11953_v4  ;;  %v14798_v21 = vld [vmem:[#allocation13 + $0x4cc] sm:$0xf] }
 0x453   :  { %v14830_v23 = vld [vmem:[#allocation13 + $0x5cc] sm:$0xf]  ;;  %v12689_v49 = vld [vmem:[#allocation13 + $0x5d8] sm:$0xf0]  ;;  %v13775_v39 = vld [vmem:[#allocation13 + $0xe48] sm:$0xf] }
 0x454   :  { %9046 = vmatpush.bf16.msra.mxu0 %v12052_v56  ;;  %9059 = vmatpush.bf16.msra.mxu1 %v12180_v34  ;;  %v8718_v56 = vpop.f32.mrf.mxu2  ;;  %v8731_v34 = vpop.f32.mrf.mxu3  ;;  %v15104_v19 = vld [vmem:[#allocation13 + $0xe54] sm:$0xf0]  ;;  %v14794_v8 = vld [vmem:[#allocation13 + $0x4ac] sm:$0xf]  ;;  %v12545_v45 = vld [vmem:[#allocation13 + $0x4b8] sm:$0xf0] }
 0x455   :  { %v13919_v56 = vld [vmem:[#allocation13 + $0xf68] sm:$0xf]  ;;  %v15140_v34 = vld [vmem:[#allocation13 + $0xf74] sm:$0xf0]  ;;  %v12548_v42 = vor.u32 %v14794_v8, %v12545_v45  ;;  %v14782_v8 = vld [vmem:[#allocation13 + $0x44c] sm:$0xf] }
 0x456   :  { %8971 = vmatpush.bf16.msra.mxu2 %v13280_v27  ;;  %8984 = vmatpush.bf16.msra.mxu3 %v13408_v40  ;;  %v13232_v27 = vor.u32 %v14968_v54, %v13231_v31  ;;  %v13360_v40 = vor.u32 %v15000_v44, %v13359_v25  ;;  %v13807_v54 = vld [vmem:[#allocation13 + $0xe88] sm:$0xf]  ;;  %v15112_v25 = vld [vmem:[#allocation13 + $0xe94] sm:$0xf0]  ;;  %v12497_v45 = vld [vmem:[#allocation13 + $0x458] sm:$0xf0] }
 0x457   :  { %v13935_v44 = vld [vmem:[#allocation13 + $0xf88] sm:$0xf] }
 0x458   :  { %9047 = vmatpush.bf16.msra.mxu0 %v12036_v3  ;;  %9060 = vmatpush.bf16.msra.mxu1 %v12164_v37  ;;  %v13951_v3 = vld [vmem:[#allocation13 + $0xfa8] sm:$0xf]  ;;  %v15148_v37 = vld [vmem:[#allocation13 + $0xfb4] sm:$0xf0] }
 0x459   :  { %v13952_v31 = vor.u32 %v15148_v37, %v13951_v3  ;;  %v13903_v3 = vld [vmem:[#allocation13 + $0xf48] sm:$0xf]  ;;  %v15136_v37 = vld [vmem:[#allocation13 + $0xf54] sm:$0xf0] }
 0x45a   :  { %8972 = vmatpush.bf16.msra.mxu2 %v13264_v15  ;;  %8985 = vmatpush.bf16.msra.mxu3 %v13392_v30  ;;  %v12004_v15 = vor.u32 %v14658_v11, %v12001_v12  ;;  %v12132_v30 = vor.u32 %v14690_v9, %v12129_v51  ;;  %v14802_v11 = vld [vmem:[#allocation13 + $0x4ec] sm:$0xf]  ;;  %v12081_v9 = vld [vmem:[#allocation13 + $0x118] sm:$0xf0] }
 0x45b   :  { %v14678_v12 = vld [vmem:[#allocation13 + $0x10c] sm:$0xf]  ;;  %v12577_v51 = vld [vmem:[#allocation13 + $0x4f8] sm:$0xf0] }
 0x45c   :  { %9048 = vmatpush.bf16.msra.mxu0 %v12020_v2  ;;  %9061 = vmatpush.bf16.msra.mxu1 %v12148_v36  ;;  %v8796_v2 = vpop.f32.mrf.mxu0  ;;  %v8809_v36 = vpop.f32.mrf.mxu1  ;;  %v12084_v29 = vor.u32 %v14678_v12, %v12081_v9  ;;  %v12657_v12 = vld [vmem:[#allocation13 + $0x598] sm:$0xf0] }
 0x45d   :  { %v14790_v2 = vld [vmem:[#allocation13 + $0x48c] sm:$0xf]  ;;  %v12529_v36 = vld [vmem:[#allocation13 + $0x498] sm:$0xf0] }
 0x45e   :  { %8973 = vmatpush.bf16.msra.mxu2 %v13248_v41  ;;  %8986 = vmatpush.bf16.msra.mxu3 %v13376_v59  ;;  %v14682_v41 = vld [vmem:[#allocation13 + $0x12c] sm:$0xf]  ;;  %v12097_v59 = vld [vmem:[#allocation13 + $0x138] sm:$0xf0] }
 0x45f   :  { %v12100_v61 = vor.u32 %v14682_v41, %v12097_v59  ;;  %v14826_v41 = vld [vmem:[#allocation13 + $0x5ac] sm:$0xf]  ;;  %v12673_v59 = vld [vmem:[#allocation13 + $0x5b8] sm:$0xf0] }
 0x460   :  { %9049 = vmatpush.bf16.msra.mxu0 %v12004_v15  ;;  %9062 = vmatpush.bf16.msra.mxu1 %v12132_v30  ;;  %v12580_v15 = vor.u32 %v14802_v11, %v12577_v51  ;;  %v12676_v4 = vor.u32 %v14826_v41, %v12673_v59  ;;  %v14822_v11 = vld [vmem:[#allocation13 + $0x58c] sm:$0xf]  ;;  %v12625_v59 = vld [vmem:[#allocation13 + $0x558] sm:$0xf0] }
 0x461   :  { %v14814_v41 = vld [vmem:[#allocation13 + $0x54c] sm:$0xf] }
 0x462   :  { %8974 = vmatpush.bf16.msra.mxu2 %v13232_v27  ;;  %8987 = vmatpush.bf16.msra.mxu3 %v13360_v40  ;;  %v14834_v27 = vld [vmem:[#allocation13 + $0x5ec] sm:$0xf]  ;;  %v12705_v40 = vld [vmem:[#allocation13 + $0x5f8] sm:$0xf0] }
 0x463   :  { %v12708_v30 = vor.u32 %v14834_v27, %v12705_v40  ;;  %v13743_v27 = vld [vmem:[#allocation13 + $0xe08] sm:$0xf]  ;;  %v15096_v40 = vld [vmem:[#allocation13 + $0xe14] sm:$0xf0] }
 0x464   :  { %9050 = vmatpush.bf16.msra.mxu0 %v11988_v63  ;;  %9063 = vmatpush.bf16.msra.mxu1 %v12116_v33  ;;  %v12564_v63 = vor.u32 %v14798_v21, %v12561_v16  ;;  %v12692_v33 = vor.u32 %v14830_v23, %v12689_v49  ;;  %v13744_v21 = vor.u32 %v15096_v40, %v13743_v27  ;;  %v14726_v40 = vld [vmem:[#allocation13 + $0x28c] sm:$0xf] }
 0x465   :  { %8975 = vmatmul.bf16.vlgmr.msra.gmra.mxu2 %v15977_v47  ;;  %8988 = vmatmul.bf16.vlgmr.msra.gmra.mxu3 %v15979_v48 }
 0x466   :  { %9019 = vmatpush.bf16.msrb.mxu2 %v13856_v43  ;;  %9032 = vmatpush.bf16.msrb.mxu3 %v13984_v0  ;;  %v13808_v43 = vor.u32 %v15112_v25, %v13807_v54  ;;  %v13936_v0 = vor.u32 %v15144_v50, %v13935_v44  ;;  %v13759_v54 = vld [vmem:[#allocation13 + $0xe28] sm:$0xf]  ;;  %v15100_v50 = vld [vmem:[#allocation13 + $0xe34] sm:$0xf0] }
 0x467   :  { %v13760_v9 = vor.u32 %v15100_v50, %v13759_v54  ;;  %v14730_v54 = vld [vmem:[#allocation13 + $0x2ac] sm:$0xf]  ;;  %v12289_v50 = vld [vmem:[#allocation13 + $0x2b8] sm:$0xf0] }
 0x468   :  { %9051 = vmatpush.bf16.msra.mxu0 %v11972_v5  ;;  %9064 = vmatpush.bf16.msra.mxu1 %v12100_v61  ;;  %v16122_v25 = vpop.f32.mrf.mxu2  ;;  %v16124_v44 = vpop.f32.mrf.mxu3  ;;  %v13887_v5 = vld [vmem:[#allocation13 + $0xf28] sm:$0xf]  ;;  %v15132_v61 = vld [vmem:[#allocation13 + $0xf34] sm:$0xf0] }
 0x469   :  { %v13888_v51 = vor.u32 %v15132_v61, %v13887_v5  ;;  %v14762_v5 = vld [vmem:[#allocation13 + $0x3ac] sm:$0xf]  ;;  %v12417_v61 = vld [vmem:[#allocation13 + $0x3b8] sm:$0xf0] }
 0x46a   :  { %9020 = vmatpush.bf16.msrb.mxu2 %v13840_v14  ;;  %9033 = vmatpush.bf16.msrb.mxu3 %v13968_v22  ;;  %v13792_v14 = vor.u32 %v15108_v18, %v13791_v7  ;;  %v13920_v22 = vor.u32 %v15140_v34, %v13919_v56  ;;  %v14738_v7 = vld [vmem:[#allocation13 + $0x2ec] sm:$0xf]  ;;  %v12532_v56 = vor.u32 %v14790_v2, %v12529_v36  ;;  %v12481_v36 = vld [vmem:[#allocation13 + $0x438] sm:$0xf0] }
 0x46b   :  { %v14770_v18 = vld [vmem:[#allocation13 + $0x3ec] sm:$0xf]  ;;  %v12660_v34 = vor.u32 %v14822_v11, %v12657_v12  ;;  %v12609_v12 = vld [vmem:[#allocation13 + $0x538] sm:$0xf0]  ;;  %v12420_v27 = vor.u32 %v14762_v5, %v12417_v61 }
 0x46c   :  { %9052 = vmatpush.bf16.msra.mxu0 %v11956_v52  ;;  %9065 = vmatpush.bf16.msra.mxu1 %v12084_v29  ;;  %v14786_v52 = vld [vmem:[#allocation13 + $0x46c] sm:$0xf]  ;;  %v12513_v29 = vld [vmem:[#allocation13 + $0x478] sm:$0xf0] }
 0x46d   :  { %v14778_v2 = vld [vmem:[#allocation13 + $0x42c] sm:$0xf] }
 0x46e   :  { %9021 = vmatpush.bf16.msrb.mxu2 %v13824_v24  ;;  %9034 = vmatpush.bf16.msrb.mxu3 %v13952_v31  ;;  %v13776_v24 = vor.u32 %v15104_v19, %v13775_v39  ;;  %v13904_v31 = vor.u32 %v15136_v37, %v13903_v3  ;;  %v14766_v3 = vld [vmem:[#allocation13 + $0x3cc] sm:$0xf]  ;;  %v12433_v37 = vld [vmem:[#allocation13 + $0x3d8] sm:$0xf0] }
 0x46f   :  { %9053 = vmatmul.bf16.vlgmr.msra.gmra.mxu0 %v15915_v58  ;;  %9066 = vmatmul.bf16.vlgmr.msra.gmra.mxu1 %v15917_v62  ;;  %v12321_v58 = vld [vmem:[#allocation13 + $0x2f8] sm:$0xf0]  ;;  %v14810_v11 = vld [vmem:[#allocation13 + $0x52c] sm:$0xf] }
 0x470   :  { %9097 = vmatpush.bf16.msrb.mxu0 %v12580_v15  ;;  %9110 = vmatpush.bf16.msrb.mxu1 %v12708_v30  ;;  %v12449_v62 = vld [vmem:[#allocation13 + $0x3f8] sm:$0xf0]  ;;  %v14818_v15 = vld [vmem:[#allocation13 + $0x56c] sm:$0xf]  ;;  %v12324_v23 = vor.u32 %v14738_v7, %v12321_v58  ;;  %v8770_v39 = vpop.f32.mrf.mxu2  ;;  %v8783_v19 = vpop.f32.mrf.mxu3  ;;  %v12484_v58 = vor.u32 %v14778_v2, %v12481_v36 }
 0x471   :  { %v12641_v30 = vld [vmem:[#allocation13 + $0x578] sm:$0xf0]  ;;  %v12452_v49 = vor.u32 %v14770_v18, %v12449_v62  ;;  %v12612_v18 = vor.u32 %v14810_v11, %v12609_v12  ;;  %v14774_v62 = vld [vmem:[#allocation13 + $0x40c] sm:$0xf] }
 0x472   :  { %9022 = vmatpush.bf16.msrb.mxu2 %v13808_v43  ;;  %9035 = vmatpush.bf16.msrb.mxu3 %v13936_v0  ;;  %v13871_v43 = vld [vmem:[#allocation13 + $0xf08] sm:$0xf]  ;;  %v15128_v0 = vld [vmem:[#allocation13 + $0xf14] sm:$0xf0]  ;;  %v12401_v7 = vld [vmem:[#allocation13 + $0x398] sm:$0xf0] }
 0x473   :  { %v13872_v16 = vor.u32 %v15128_v0, %v13871_v43  ;;  %v12273_v43 = vld [vmem:[#allocation13 + $0x298] sm:$0xf0]  ;;  %v14758_v0 = vld [vmem:[#allocation13 + $0x38c] sm:$0xf] }
 0x474   :  { %9098 = vmatpush.bf16.msrb.mxu0 %v12564_v63  ;;  %9111 = vmatpush.bf16.msrb.mxu1 %v12692_v33  ;;  %v12516_v63 = vor.u32 %v14786_v52, %v12513_v29  ;;  %v12644_v33 = vor.u32 %v14818_v15, %v12641_v30  ;;  %v14806_v52 = vld [vmem:[#allocation13 + $0x50c] sm:$0xf]  ;;  %v12593_v29 = vld [vmem:[#allocation13 + $0x518] sm:$0xf0] }
 0x475   :  { %v13089_v15 = vld [vmem:[#allocation13 + $0x8f8] sm:$0xf0]  ;;  %v14962_v30 = vld [vmem:[#allocation13 + $0x9ec] sm:$0xf]  ;;  %v12596_v19 = vor.u32 %v14806_v52, %v12593_v29  ;;  %v8846_v52 = vpop.f32.mrf.mxu0 }
 0x476   :  { %9023 = vmatpush.bf16.msrb.mxu2 %v13792_v14  ;;  %9036 = vmatpush.bf16.msrb.mxu3 %v13920_v22  ;;  %v14734_v14 = vld [vmem:[#allocation13 + $0x2cc] sm:$0xf]  ;;  %v12305_v22 = vld [vmem:[#allocation13 + $0x2d8] sm:$0xf0] }
 0x477   :  { %v14954_v2 = vld [vmem:[#allocation13 + $0x9ac] sm:$0xf]  ;;  %v13185_v36 = vld [vmem:[#allocation13 + $0x9b8] sm:$0xf0] }
 0x478   :  { %9099 = vmatpush.bf16.msrb.mxu0 %v12548_v42  ;;  %9112 = vmatpush.bf16.msrb.mxu1 %v12676_v4  ;;  %v12500_v42 = vor.u32 %v14782_v8, %v12497_v45  ;;  %v12628_v4 = vor.u32 %v14814_v41, %v12625_v59  ;;  %v14958_v8 = vld [vmem:[#allocation13 + $0x9cc] sm:$0xf]  ;;  %v13201_v45 = vld [vmem:[#allocation13 + $0x9d8] sm:$0xf0] }
 0x479   :  { %v13204_v61 = vor.u32 %v14958_v8, %v13201_v45  ;;  %v14710_v29 = vld [vmem:[#allocation13 + $0x20c] sm:$0xf]  ;;  %v13025_v45 = vld [vmem:[#allocation13 + $0x878] sm:$0xf0] }
 0x47a   :  { %9024 = vmatpush.bf16.msrb.mxu2 %v13776_v24  ;;  %9037 = vmatpush.bf16.msrb.mxu3 %v13904_v31  ;;  %v12308_v24 = vor.u32 %v14734_v14, %v12305_v22  ;;  %v12436_v31 = vor.u32 %v14766_v3, %v12433_v37  ;;  %v14754_v14 = vld [vmem:[#allocation13 + $0x36c] sm:$0xf]  ;;  %v12385_v22 = vld [vmem:[#allocation13 + $0x378] sm:$0xf0] }
 0x47b   :  { %v12388_v59 = vor.u32 %v14754_v14, %v12385_v22  ;;  %v12833_v14 = vld [vmem:[#allocation13 + $0x6f8] sm:$0xf0]  ;;  %v14898_v22 = vld [vmem:[#allocation13 + $0x7ec] sm:$0xf] }
 0x47c   :  { %9100 = vmatpush.bf16.msrb.mxu0 %v12532_v56  ;;  %9113 = vmatpush.bf16.msrb.mxu1 %v12660_v34  ;;  %v12465_v56 = vld [vmem:[#allocation13 + $0x418] sm:$0xf0]  ;;  %v14930_v34 = vld [vmem:[#allocation13 + $0x8ec] sm:$0xf] }
 0x47d   :  { %v12468_v39 = vor.u32 %v14774_v62, %v12465_v56  ;;  %v13092_v3 = vor.u32 %v14930_v34, %v13089_v15  ;;  %v13188_v56 = vor.u32 %v14954_v2, %v13185_v36  ;;  %v14918_v34 = vld [vmem:[#allocation13 + $0x88c] sm:$0xf]  ;;  %v13041_v15 = vld [vmem:[#allocation13 + $0x898] sm:$0xf0] }
 0x47e   :  { %9025 = vmatpush.bf16.msrb.mxu2 %v13760_v9  ;;  %9038 = vmatpush.bf16.msrb.mxu3 %v13888_v51  ;;  %v8769_v9 = vadd.f32 %v16122_v25, %v16114_v57  ;;  %v12292_v51 = vor.u32 %v14730_v54, %v12289_v50  ;;  %v13217_v57 = vld [vmem:[#allocation13 + $0x9f8] sm:$0xf0]  ;;  %v14750_v54 = vld [vmem:[#allocation13 + $0x34c] sm:$0xf] }
 0x47f   :  { %v13220_v37 = vor.u32 %v14962_v30, %v13217_v57  ;;  %v12369_v50 = vld [vmem:[#allocation13 + $0x358] sm:$0xf0]  ;;  %v14950_v57 = vld [vmem:[#allocation13 + $0x98c] sm:$0xf] }
 0x480   :  { %9101 = vmatpush.bf16.msrb.mxu0 %v12516_v63  ;;  %9114 = vmatpush.bf16.msrb.mxu1 %v12644_v33  ;;  %v8782_v25 = vadd.f32 %v16124_v44, %v8769_v9  ;;  %v14926_v63 = vld [vmem:[#allocation13 + $0x8cc] sm:$0xf]  ;;  %v13073_v33 = vld [vmem:[#allocation13 + $0x8d8] sm:$0xf0]  ;;  %v12372_v12 = vor.u32 %v14750_v54, %v12369_v50 }
 0x481   :  { %v13076_v5 = vor.u32 %v14926_v63, %v13073_v33  ;;  %v14714_v9 = vld [vmem:[#allocation13 + $0x22c] sm:$0xf]  ;;  %v12945_v36 = vld [vmem:[#allocation13 + $0x7d8] sm:$0xf0] }
 0x482   :  { %9026 = vmatpush.bf16.msrb.mxu2 %v13744_v21  ;;  %9039 = vmatpush.bf16.msrb.mxu3 %v13872_v16  ;;  %v12276_v21 = vor.u32 %v14726_v40, %v12273_v43  ;;  %v12404_v16 = vor.u32 %v14758_v0, %v12401_v7  ;;  %v8795_v44 = vadd.f32 %v16116_v28, %v8782_v25  ;;  %v14746_v43 = vld [vmem:[#allocation13 + $0x32c] sm:$0xf]  ;;  %v12353_v0 = vld [vmem:[#allocation13 + $0x338] sm:$0xf0]  ;;  %v16135_v7 = vld [vmem:[#allocation14] sm:$0xf] }
 0x483   :  { %v13169_v25 = vld [vmem:[#allocation13 + $0x998] sm:$0xf0]  ;;  %v14914_v8 = vld [vmem:[#allocation13 + $0x86c] sm:$0xf] }
 0x484   :  { %9102 = vmatpush.bf16.msrb.mxu0 %v12500_v42  ;;  %9115 = vmatpush.bf16.msrb.mxu1 %v12628_v4  ;;  %v14922_v42 = vld [vmem:[#allocation13 + $0x8ac] sm:$0xf]  ;;  %v13057_v4 = vld [vmem:[#allocation13 + $0x8b8] sm:$0xf0]  ;;  %v8808_v28 = vadd.f32 %v16118_v35, %v8795_v44  ;;  %v9253_v35 = vmax.f32 %v16086_v13, 0.0  ;;  %v13172_v63 = vor.u32 %v14950_v57, %v13169_v25 }
 0x485   :  { %9027 = vmatmul.bf16.vlgmr.msrb.gmra.mxu2 %v16003_v32  ;;  %9040 = vmatmul.bf16.vlgmr.msrb.gmra.mxu3 %v16005_v10  ;;  %v13060_v62 = vor.u32 %v14922_v42, %v13057_v4  ;;  %v12337_v13 = vld [vmem:[#allocation13 + $0x318] sm:$0xf0]  ;;  %v14946_v44 = vld [vmem:[#allocation13 + $0x96c] sm:$0xf] }
 0x486   :  { %9071 = vmatpush.bf16.msra.mxu2 %v12324_v23  ;;  %9084 = vmatpush.bf16.msra.mxu3 %v12452_v49  ;;  %v14722_v23 = vld [vmem:[#allocation13 + $0x26c] sm:$0xf]  ;;  %v12257_v49 = vld [vmem:[#allocation13 + $0x278] sm:$0xf0] }
 0x487   :  { %v12260_v41 = vor.u32 %v14722_v23, %v12257_v49  ;;  %v14742_v23 = vld [vmem:[#allocation13 + $0x30c] sm:$0xf]  ;;  %v13121_v57 = vld [vmem:[#allocation13 + $0x938] sm:$0xf0] }
 0x488   :  { %9103 = vmatpush.bf16.msrb.mxu0 %v12484_v58  ;;  %9116 = vmatpush.bf16.msrb.mxu1 %v12612_v18  ;;  %v8833_v40 = vpop.f32.mrf.mxu3  ;;  %v5799_v58 = vperm.slane %v16135_v7, 2  ;;  %v14866_v49 = vld [vmem:[#allocation13 + $0x6ec] sm:$0xf] }
 0x489   :  { %v12836_v54 = vor.u32 %v14866_v49, %v12833_v14  ;;  %v14894_v42 = vld [vmem:[#allocation13 + $0x7cc] sm:$0xf] }
 0x48a   :  { %9072 = vmatpush.bf16.msra.mxu2 %v12308_v24  ;;  %9085 = vmatpush.bf16.msra.mxu3 %v12436_v31  ;;  %v14718_v24 = vld [vmem:[#allocation13 + $0x24c] sm:$0xf]  ;;  %v12241_v31 = vld [vmem:[#allocation13 + $0x258] sm:$0xf0]  ;;  %v8847_v30 = vadd.f32 %v8846_v52, %v5799_v58 }
 0x48b   :  { %v12244_v11 = vor.u32 %v14718_v24, %v12241_v31  ;;  %v12340_v31 = vor.u32 %v14742_v23, %v12337_v13  ;;  %v14858_v58 = vld [vmem:[#allocation13 + $0x6ac] sm:$0xf]  ;;  %v12913_v23 = vld [vmem:[#allocation13 + $0x798] sm:$0xf0] }
 0x48c   :  { %9104 = vmatpush.bf16.msrb.mxu0 %v12468_v39  ;;  %9117 = vmatpush.bf16.msrb.mxu1 %v12596_v19  ;;  %v8859_v39 = vpop.f32.mrf.mxu1  ;;  %v14902_v14 = vld [vmem:[#allocation13 + $0x80c] sm:$0xf] }
 0x48d   :  { %v16141_v33 = vadd.f32 %v8859_v39, %v8847_v30  ;;  %v14938_v30 = vld [vmem:[#allocation13 + $0x92c] sm:$0xf] }
 0x48e   :  { %9073 = vmatpush.bf16.msra.mxu2 %v12292_v51  ;;  %9086 = vmatpush.bf16.msra.mxu3 %v12420_v27  ;;  %v12225_v51 = vld [vmem:[#allocation13 + $0x238] sm:$0xf0]  ;;  %v8820_v27 = vpop.f32.mrf.mxu2  ;;  %v13124_v49 = vor.u32 %v14938_v30, %v13121_v57  ;;  %v14934_v39 = vld [vmem:[#allocation13 + $0x90c] sm:$0xf] }
 0x48f   :  { %9105 = vmatmul.bf16.vlgmr.msrb.gmra.mxu0 %v15925_v6  ;;  %9118 = vmatmul.bf16.vlgmr.msrb.gmra.mxu1 %v15927_v53  ;;  %v8821_v18 = vadd.f32 %v8820_v27, %v8808_v28  ;;  %v12228_v6 = vor.u32 %v14714_v9, %v12225_v51  ;;  %v12209_v53 = vld [vmem:[#allocation13 + $0x218] sm:$0xf0]  ;;  %v13028_v28 = vor.u32 %v14914_v8, %v13025_v45  ;;  %v8848_v9 = vpop.f32.mrf.mxu0  ;;  %v14942_v27 = vld [vmem:[#allocation13 + $0x94c] sm:$0xf] }
 0x490   :  { %9149 = vmatpush.bf16.msra.mxu0 %v13092_v3  ;;  %9162 = vmatpush.bf16.msra.mxu1 %v13220_v37  ;;  %v12961_v3 = vld [vmem:[#allocation13 + $0x7f8] sm:$0xf0]  ;;  %v13044_v37 = vor.u32 %v14918_v34, %v13041_v15  ;;  %v12212_v24 = vor.u32 %v14710_v29, %v12209_v53  ;;  %v8835_v2 = vpop.f32.mrf.mxu3  ;;  %v14906_v29 = vld [vmem:[#allocation13 + $0x82c] sm:$0xf] }
 0x491   :  { %v12964_v50 = vor.u32 %v14898_v22, %v12961_v3  ;;  %v13009_v51 = vld [vmem:[#allocation13 + $0x858] sm:$0xf0]  ;;  %v14886_v53 = vld [vmem:[#allocation13 + $0x78c] sm:$0xf] }
 0x492   :  { %9074 = vmatpush.bf16.msra.mxu2 %v12276_v21  ;;  %9087 = vmatpush.bf16.msra.mxu3 %v12404_v16  ;;  %v8834_v21 = vadd.f32 %v8833_v40, %v8821_v18  ;;  %v12356_v16 = vor.u32 %v14746_v43, %v12353_v0  ;;  %v13137_v40 = vld [vmem:[#allocation13 + $0x958] sm:$0xf0]  ;;  %v12948_v0 = vor.u32 %v14894_v42, %v12945_v36  ;;  %v15054_v42 = vld [vmem:[#allocation13 + $0xccc] sm:$0xf] }
 0x493   :  { %v13140_v52 = vor.u32 %v14942_v27, %v13137_v40  ;;  %v12993_v15 = vld [vmem:[#allocation13 + $0x838] sm:$0xf0]  ;;  %v12916_v45 = vor.u32 %v14886_v53, %v12913_v23  ;;  %v15086_v2 = vld [vmem:[#allocation13 + $0xdcc] sm:$0xf] }
 0x494   :  { %9150 = vmatpush.bf16.msra.mxu0 %v13076_v5  ;;  %9163 = vmatpush.bf16.msra.mxu1 %v13204_v61  ;;  %v9254_v19 = vmax.f32 %v8834_v21, 0.0  ;;  %v14862_v5 = vld [vmem:[#allocation13 + $0x6cc] sm:$0xf]  ;;  %v12817_v61 = vld [vmem:[#allocation13 + $0x6d8] sm:$0xf0]  ;;  %v8861_v18 = vpop.f32.mrf.mxu1  ;;  %v12996_v13 = vor.u32 %v14906_v29, %v12993_v15 }
 0x495   :  { %v12820_v43 = vor.u32 %v14862_v5, %v12817_v61  ;;  %v12977_v22 = vld [vmem:[#allocation13 + $0x818] sm:$0xf0]  ;;  %v15082_v18 = vld [vmem:[#allocation13 + $0xdac] sm:$0xf] }
 0x496   :  { %9075 = vmatpush.bf16.msra.mxu2 %v12260_v41  ;;  %9088 = vmatpush.bf16.msra.mxu3 %v12388_v59  ;;  %v13153_v41 = vld [vmem:[#allocation13 + $0x978] sm:$0xf0]  ;;  %v9257_v59 = vpack.c.bf16 %v9254_v19, %v9253_v35  ;;  %v8822_v4 = vpop.f32.mrf.mxu2  ;;  %v14874_v15 = vld [vmem:[#allocation13 + $0x72c] sm:$0xf] }
 0x497   :  { %v12801_v35 = vld [vmem:[#allocation13 + $0x6b8] sm:$0xf0]  ;;  %v15046_v23 = vld [vmem:[#allocation13 + $0xc8c] sm:$0xf] }
 0x498   :  { %9151 = vmatpush.bf16.msra.mxu0 %v13060_v62  ;;  %9164 = vmatpush.bf16.msra.mxu1 %v13188_v56  ;;  %9259 = vst [vmem:[#allocation19] sm:$0xff] %v9257_v59  ;;  %v14890_v62 = vld [vmem:[#allocation13 + $0x7ac] sm:$0xf]  ;;  %v12929_v56 = vld [vmem:[#allocation13 + $0x7b8] sm:$0xf0]  ;;  %v12804_v25 = vor.u32 %v14858_v58, %v12801_v35 }
 0x499   :  { %v12932_v21 = vor.u32 %v14890_v62, %v12929_v56  ;;  %v13105_v19 = vld [vmem:[#allocation13 + $0x918] sm:$0xf0]  ;;  %v14882_v59 = vld [vmem:[#allocation13 + $0x76c] sm:$0xf] }
 0x49a   :  { %9076 = vmatpush.bf16.msra.mxu2 %v12244_v11  ;;  %9089 = vmatpush.bf16.msra.mxu3 %v12372_v12  ;;  %v13156_v11 = vor.u32 %v14946_v44, %v13153_v41  ;;  %v14910_v12 = vld [vmem:[#allocation13 + $0x84c] sm:$0xf]  ;;  %v13601_v3 = vld [vmem:[#allocation13 + $0xcf8] sm:$0xf0] }
 0x49b   :  { %v13012_v34 = vor.u32 %v14910_v12, %v13009_v51  ;;  %v14850_v44 = vld [vmem:[#allocation13 + $0x66c] sm:$0xf]  ;;  %v12769_v41 = vld [vmem:[#allocation13 + $0x678] sm:$0xf0] }
 0x49c   :  { %9152 = vmatpush.bf16.msra.mxu0 %v13044_v37  ;;  %9165 = vmatpush.bf16.msra.mxu1 %v13172_v63  ;;  %v15090_v37 = vld [vmem:[#allocation13 + $0xdec] sm:$0xf]  ;;  %v13729_v63 = vld [vmem:[#allocation13 + $0xdf8] sm:$0xf0] }
 0x49d   :  { %v13732_v61 = vor.u32 %v15090_v37, %v13729_v63  ;;  %v13585_v4 = vld [vmem:[#allocation13 + $0xcd8] sm:$0xf0]  ;;  %v14846_v12 = vld [vmem:[#allocation13 + $0x64c] sm:$0xf] }
 0x49e   :  { %9077 = vmatpush.bf16.msra.mxu2 %v12228_v6  ;;  %9090 = vmatpush.bf16.msra.mxu3 %v12356_v16  ;;  %v14854_v6 = vld [vmem:[#allocation13 + $0x68c] sm:$0xf]  ;;  %v12785_v16 = vld [vmem:[#allocation13 + $0x698] sm:$0xf0] }
 0x49f   :  { %v12788_v8 = vor.u32 %v14854_v6, %v12785_v16  ;;  %v13713_v36 = vld [vmem:[#allocation13 + $0xdd8] sm:$0xf0]  ;;  %v14878_v51 = vld [vmem:[#allocation13 + $0x74c] sm:$0xf] }
 0x4a0   :  { %9153 = vmatpush.bf16.msra.mxu0 %v13028_v28  ;;  %9166 = vmatpush.bf16.msra.mxu1 %v13156_v11  ;;  %v12772_v28 = vor.u32 %v14850_v44, %v12769_v41  ;;  %v12753_v9 = vld [vmem:[#allocation13 + $0x658] sm:$0xf0]  ;;  %v15050_v58 = vld [vmem:[#allocation13 + $0xcac] sm:$0xf] }
 0x4a1   :  { %v12881_v27 = vld [vmem:[#allocation13 + $0x758] sm:$0xf0]  ;;  %v12756_v56 = vor.u32 %v14846_v12, %v12753_v9  ;;  %v14994_v37 = vld [vmem:[#allocation13 + $0xaec] sm:$0xf] }
 0x4a2   :  { %9078 = vmatpush.bf16.msra.mxu2 %v12212_v24  ;;  %9091 = vmatpush.bf16.msra.mxu3 %v12340_v31  ;;  %v12897_v24 = vld [vmem:[#allocation13 + $0x778] sm:$0xf0]  ;;  %v12980_v31 = vor.u32 %v14902_v14, %v12977_v22  ;;  %v15026_v63 = vld [vmem:[#allocation13 + $0xbec] sm:$0xf] }
 0x4a3   :  { %v12900_v11 = vor.u32 %v14882_v59, %v12897_v24  ;;  %v13569_v35 = vld [vmem:[#allocation13 + $0xcb8] sm:$0xf0]  ;;  %v15042_v59 = vld [vmem:[#allocation13 + $0xc6c] sm:$0xf] }
 0x4a4   :  { %9154 = vmatpush.bf16.msra.mxu0 %v13012_v34  ;;  %9167 = vmatpush.bf16.msra.mxu1 %v13140_v52  ;;  %v13697_v62 = vld [vmem:[#allocation13 + $0xdb8] sm:$0xf0]  ;;  %v12884_v34 = vor.u32 %v14878_v51, %v12881_v27  ;;  %v14842_v52 = vld [vmem:[#allocation13 + $0x62c] sm:$0xf]  ;;  %v13572_v6 = vor.u32 %v15050_v58, %v13569_v35 }
 0x4a5   :  { %9079 = vmatmul.bf16.vlgmr.msra.gmra.mxu2 %v15921_v60  ;;  %9092 = vmatmul.bf16.vlgmr.msra.gmra.mxu3 %v15923_v26  ;;  %v16145_v60 = vpop.f32.mrf.mxu0  ;;  %v15058_v26 = vld [vmem:[#allocation13 + $0xcec] sm:$0xf]  ;;  %v12737_v29 = vld [vmem:[#allocation13 + $0x638] sm:$0xf0]  ;;  %v13700_v16 = vor.u32 %v15082_v18, %v13697_v62 }
 0x4a6   :  { %9123 = vmatpush.bf16.msrb.mxu2 %v12836_v54  ;;  %9136 = vmatpush.bf16.msrb.mxu3 %v12964_v50  ;;  %v13108_v54 = vor.u32 %v14934_v39, %v13105_v19  ;;  %v16147_v50 = vpop.f32.mrf.mxu1  ;;  %v13604_v5 = vor.u32 %v15058_v26, %v13601_v3  ;;  %v12865_v30 = vld [vmem:[#allocation13 + $0x738] sm:$0xf0]  ;;  %v12740_v22 = vor.u32 %v14842_v52, %v12737_v29  ;;  %v14838_v39 = vld [vmem:[#allocation13 + $0x60c] sm:$0xf] }
 0x4a7   :  { %v13681_v14 = vld [vmem:[#allocation13 + $0xd98] sm:$0xf0]  ;;  %v12868_v26 = vor.u32 %v14874_v15, %v12865_v30  ;;  %v15022_v12 = vld [vmem:[#allocation13 + $0xbcc] sm:$0xf] }
 0x4a8   :  { %9155 = vmatpush.bf16.msra.mxu0 %v12996_v13  ;;  %9168 = vmatpush.bf16.msra.mxu1 %v13124_v49  ;;  %v8872_v57 = vpop.f32.mrf.mxu2  ;;  %v13553_v13 = vld [vmem:[#allocation13 + $0xc98] sm:$0xf0]  ;;  %v15078_v49 = vld [vmem:[#allocation13 + $0xd8c] sm:$0xf] }
 0x4a9   :  { %v12721_v19 = vld [vmem:[#allocation13 + $0x618] sm:$0xf0]  ;;  %v13556_v44 = vor.u32 %v15046_v23, %v13553_v13  ;;  %v13684_v41 = vor.u32 %v15078_v49, %v13681_v14  ;;  %v15018_v52 = vld [vmem:[#allocation13 + $0xbac] sm:$0xf] }
 0x4aa   :  { %9124 = vmatpush.bf16.msrb.mxu2 %v12820_v43  ;;  %9137 = vmatpush.bf16.msrb.mxu3 %v12948_v0  ;;  %v13588_v43 = vor.u32 %v15054_v42, %v13585_v4  ;;  %v13716_v0 = vor.u32 %v15086_v2, %v13713_v36  ;;  %v13537_v24 = vld [vmem:[#allocation13 + $0xc78] sm:$0xf0]  ;;  %v14990_v36 = vld [vmem:[#allocation13 + $0xacc] sm:$0xf] }
 0x4ab   :  { %v13457_v9 = vld [vmem:[#allocation13 + $0xbd8] sm:$0xf0]  ;;  %v13540_v51 = vor.u32 %v15042_v59, %v13537_v24  ;;  %v14982_v23 = vld [vmem:[#allocation13 + $0xa8c] sm:$0xf] }
 0x4ac   :  { %9156 = vmatpush.bf16.msra.mxu0 %v12980_v31  ;;  %9169 = vmatpush.bf16.msra.mxu1 %v13108_v54  ;;  %v15074_v31 = vld [vmem:[#allocation13 + $0xd6c] sm:$0xf]  ;;  %v13665_v54 = vld [vmem:[#allocation13 + $0xd78] sm:$0xf0]  ;;  %v13460_v62 = vor.u32 %v15022_v12, %v13457_v9 }
 0x4ad   :  { %v8900_v40 = vpop.f32.mrf.mxu0  ;;  %v13521_v58 = vld [vmem:[#allocation13 + $0xc58] sm:$0xf0]  ;;  %v15014_v49 = vld [vmem:[#allocation13 + $0xb8c] sm:$0xf] }
 0x4ae   :  { %9125 = vmatpush.bf16.msrb.mxu2 %v12804_v25  ;;  %9138 = vmatpush.bf16.msrb.mxu3 %v12932_v21  ;;  %v8885_v25 = vpop.f32.mrf.mxu3  ;;  %v8873_v21 = vadd.f32 %v8872_v57, %v16141_v33  ;;  %v8913_v53 = vpop.f32.mrf.mxu1  ;;  %v13345_v33 = vld [vmem:[#allocation13 + $0xaf8] sm:$0xf0]  ;;  %v13668_v40 = vor.u32 %v15074_v31, %v13665_v54  ;;  %v15034_v57 = vld [vmem:[#allocation13 + $0xc2c] sm:$0xf] }
 0x4af   :  { %9157 = vmatmul.bf16.vlgmr.msra.gmra.mxu0 %v15933_v20  ;;  %9170 = vmatmul.bf16.vlgmr.msra.gmra.mxu1 %v15935_v55  ;;  %v14870_v20 = vld [vmem:[#allocation13 + $0x70c] sm:$0xf]  ;;  %v12849_v55 = vld [vmem:[#allocation13 + $0x718] sm:$0xf0]  ;;  %v13348_v4 = vor.u32 %v14994_v37, %v13345_v33 }
 0x4b0   :  { %9201 = vmatpush.bf16.msrb.mxu0 %v13604_v5  ;;  %9214 = vmatpush.bf16.msrb.mxu1 %v13732_v61  ;;  %v8886_v3 = vadd.f32 %v8885_v25, %v8873_v21  ;;  %v12724_v5 = vor.u32 %v14838_v39, %v12721_v19  ;;  %v12852_v61 = vor.u32 %v14870_v20, %v12849_v55  ;;  %v13649_v35 = vld [vmem:[#allocation13 + $0xd58] sm:$0xf0]  ;;  %v15066_v21 = vld [vmem:[#allocation13 + $0xd2c] sm:$0xf] }
 0x4b1   :  { %v13441_v29 = vld [vmem:[#allocation13 + $0xbb8] sm:$0xf0]  ;;  %v15030_v39 = vld [vmem:[#allocation13 + $0xc0c] sm:$0xf] }
 0x4b2   :  { %9126 = vmatpush.bf16.msrb.mxu2 %v12788_v8  ;;  %9139 = vmatpush.bf16.msrb.mxu3 %v12916_v45  ;;  %v13473_v8 = vld [vmem:[#allocation13 + $0xbf8] sm:$0xf0]  ;;  %v8899_v45 = vadd.f32 %v16145_v60, %v8886_v3  ;;  %v8874_v60 = vpop.f32.mrf.mxu2  ;;  %v13444_v53 = vor.u32 %v15018_v52, %v13441_v29  ;;  %v14978_v33 = vld [vmem:[#allocation13 + $0xa6c] sm:$0xf] }
 0x4b3   :  { %v13476_v2 = vor.u32 %v15026_v63, %v13473_v8  ;;  %v13505_v25 = vld [vmem:[#allocation13 + $0xc38] sm:$0xf0]  ;;  %v15010_v8 = vld [vmem:[#allocation13 + $0xb6c] sm:$0xf] }
 0x4b4   :  { %9202 = vmatpush.bf16.msrb.mxu0 %v13588_v43  ;;  %9215 = vmatpush.bf16.msrb.mxu1 %v13716_v0  ;;  %v16154_v42 = vadd.f32 %v16147_v50, %v8899_v45  ;;  %v15038_v0 = vld [vmem:[#allocation13 + $0xc4c] sm:$0xf]  ;;  %v13297_v13 = vld [vmem:[#allocation13 + $0xa98] sm:$0xf0] }
 0x4b5   :  { %v16156_v27 = vpop.f32.mrf.mxu0  ;;  %v15070_v50 = vld [vmem:[#allocation13 + $0xd4c] sm:$0xf]  ;;  %v13524_v15 = vor.u32 %v15038_v0, %v13521_v58  ;;  %v13425_v14 = vld [vmem:[#allocation13 + $0xb98] sm:$0xf0]  ;;  %v13300_v55 = vor.u32 %v14982_v23, %v13297_v13 }
 0x4b6   :  { %9127 = vmatpush.bf16.msrb.mxu2 %v12772_v28  ;;  %9140 = vmatpush.bf16.msrb.mxu3 %v12900_v11  ;;  %v13329_v28 = vld [vmem:[#allocation13 + $0xad8] sm:$0xf0]  ;;  %v8887_v11 = vpop.f32.mrf.mxu3  ;;  %v16158_v43 = vpop.f32.mrf.mxu1  ;;  %v13652_v30 = vor.u32 %v15070_v50, %v13649_v35  ;;  %v13428_v37 = vor.u32 %v15014_v49, %v13425_v14  ;;  %v14974_v31 = vld [vmem:[#allocation13 + $0xa4c] sm:$0xf] }
 0x4b7   :  { %v13332_v18 = vor.u32 %v14990_v36, %v13329_v28  ;;  %v13489_v20 = vld [vmem:[#allocation13 + $0xc18] sm:$0xf0]  ;;  %v14970_v36 = vld [vmem:[#allocation13 + $0xa2c] sm:$0xf] }
 0x4b8   :  { %9203 = vmatpush.bf16.msrb.mxu0 %v13572_v6  ;;  %9216 = vmatpush.bf16.msrb.mxu1 %v13700_v16  ;;  %v13633_v6 = vld [vmem:[#allocation13 + $0xd38] sm:$0xf0]  ;;  %v15002_v11 = vld [vmem:[#allocation13 + $0xb2c] sm:$0xf] }
 0x4b9   :  { %v13617_v3 = vld [vmem:[#allocation13 + $0xd18] sm:$0xf0]  ;;  %v14966_v50 = vld [vmem:[#allocation13 + $0xa0c] sm:$0xf] }
 0x4ba   :  { %9128 = vmatpush.bf16.msrb.mxu2 %v12756_v56  ;;  %9141 = vmatpush.bf16.msrb.mxu3 %v12884_v34  ;;  %v14986_v56 = vld [vmem:[#allocation13 + $0xaac] sm:$0xf]  ;;  %v13313_v34 = vld [vmem:[#allocation13 + $0xab8] sm:$0xf0] }
 0x4bb   :  { %v13316_v16 = vor.u32 %v14986_v56, %v13313_v34  ;;  %v13281_v63 = vld [vmem:[#allocation13 + $0xa78] sm:$0xf0]  ;;  %v15122_v56 = vld [vmem:[#allocation13 + $0xeec] sm:$0xf] }
 0x4bc   :  { %9204 = vmatpush.bf16.msrb.mxu0 %v13556_v44  ;;  %9217 = vmatpush.bf16.msrb.mxu1 %v13684_v41  ;;  %v13409_v45 = vld [vmem:[#allocation13 + $0xb78] sm:$0xf0]  ;;  %v13492_v44 = vor.u32 %v15030_v39, %v13489_v20  ;;  %v13284_v59 = vor.u32 %v14978_v33, %v13281_v63  ;;  %v15154_v29 = vld [vmem:[#allocation13 + $0xfec] sm:$0xf] }
 0x4bd   :  { %v8952_v19 = vpop.f32.mrf.mxu0  ;;  %v13412_v24 = vor.u32 %v15010_v8, %v13409_v45  ;;  %v13265_v54 = vld [vmem:[#allocation13 + $0xa58] sm:$0xf0]  ;;  %v15146_v39 = vld [vmem:[#allocation13 + $0xfac] sm:$0xf] }
 0x4be   :  { %9129 = vmatpush.bf16.msrb.mxu2 %v12740_v22  ;;  %9142 = vmatpush.bf16.msrb.mxu3 %v12868_v26  ;;  %v13508_v22 = vor.u32 %v15034_v57, %v13505_v25  ;;  %v13636_v26 = vor.u32 %v15066_v21, %v13633_v6  ;;  %v13249_v60 = vld [vmem:[#allocation13 + $0xa38] sm:$0xf0]  ;;  %v15118_v25 = vld [vmem:[#allocation13 + $0xecc] sm:$0xf] }
 0x4bf   :  { %v13377_v12 = vld [vmem:[#allocation13 + $0xb38] sm:$0xf0]  ;;  %v15110_v20 = vld [vmem:[#allocation13 + $0xe8c] sm:$0xf] }
 0x4c0   :  { %9205 = vmatpush.bf16.msrb.mxu0 %v13540_v51  ;;  %9218 = vmatpush.bf16.msrb.mxu1 %v13668_v40  ;;  %v13252_v40 = vor.u32 %v14970_v36, %v13249_v60  ;;  %v13380_v0 = vor.u32 %v15002_v11, %v13377_v12  ;;  %v13233_v35 = vld [vmem:[#allocation13 + $0xa18] sm:$0xf0]  ;;  %v15106_v45 = vld [vmem:[#allocation13 + $0xe6c] sm:$0xf] }
 0x4c1   :  { %v13857_v52 = vld [vmem:[#allocation13 + $0xef8] sm:$0xf0]  ;;  %v15130_v11 = vld [vmem:[#allocation13 + $0xf2c] sm:$0xf] }
 0x4c2   :  { %9130 = vmatpush.bf16.msrb.mxu2 %v12724_v5  ;;  %9143 = vmatpush.bf16.msrb.mxu3 %v12852_v61  ;;  %v15006_v5 = vld [vmem:[#allocation13 + $0xb4c] sm:$0xf]  ;;  %v13393_v61 = vld [vmem:[#allocation13 + $0xb58] sm:$0xf0] }
 0x4c3   :  { %v13969_v23 = vld [vmem:[#allocation13 + $0xfd8] sm:$0xf0] }
 0x4c4   :  { %9206 = vmatpush.bf16.msrb.mxu0 %v13524_v15  ;;  %9219 = vmatpush.bf16.msrb.mxu1 %v13652_v30  ;;  %v13985_v15 = vld [vmem:[#allocation13 + $0xff8] sm:$0xf0]  ;;  %v13860_v30 = vor.u32 %v15122_v56, %v13857_v52  ;;  %v5800_v56 = vperm.slane %v16135_v7, 3 }
 0x4c5   :  { %9131 = vmatmul.bf16.vlgmr.msrb.gmra.mxu2 %v15939_v38  ;;  %9144 = vmatmul.bf16.vlgmr.msrb.gmra.mxu3 %v15941_v1  ;;  %v8965_v38 = vpop.f32.mrf.mxu1  ;;  %v15062_v1 = vld [vmem:[#allocation13 + $0xd0c] sm:$0xf]  ;;  %v13988_v57 = vor.u32 %v15154_v29, %v13985_v15  ;;  %v13761_v60 = vld [vmem:[#allocation13 + $0xe38] sm:$0xf0] }
 0x4c6   :  { %9175 = vmatpush.bf16.msra.mxu2 %v13348_v4  ;;  %9188 = vmatpush.bf16.msra.mxu3 %v13476_v2  ;;  %v13620_v41 = vor.u32 %v15062_v1, %v13617_v3  ;;  %v13268_v4 = vor.u32 %v14974_v31, %v13265_v54  ;;  %v13396_v2 = vor.u32 %v15006_v5, %v13393_v61  ;;  %v13809_v1 = vld [vmem:[#allocation13 + $0xe98] sm:$0xf0]  ;;  %v15142_v3 = vld [vmem:[#allocation13 + $0xf8c] sm:$0xf] }
 0x4c7   :  { %v13812_v63 = vor.u32 %v15110_v20, %v13809_v1  ;;  %v13777_v31 = vld [vmem:[#allocation13 + $0xe58] sm:$0xf0]  ;;  %v15134_v54 = vld [vmem:[#allocation13 + $0xf4c] sm:$0xf] }
 0x4c8   :  { %9207 = vmatpush.bf16.msrb.mxu0 %v13508_v22  ;;  %9220 = vmatpush.bf16.msrb.mxu1 %v13636_v26  ;;  %v8924_v28 = vpop.f32.mrf.mxu2  ;;  %v8937_v9 = vpop.f32.mrf.mxu3  ;;  %v15114_v22 = vld [vmem:[#allocation13 + $0xeac] sm:$0xf]  ;;  %v13825_v26 = vld [vmem:[#allocation13 + $0xeb8] sm:$0xf0] }
 0x4c9   :  { %v8925_v51 = vadd.f32 %v8924_v28, %v16154_v42  ;;  %v13828_v19 = vor.u32 %v15114_v22, %v13825_v26  ;;  %v13905_v5 = vld [vmem:[#allocation13 + $0xf58] sm:$0xf0] }
 0x4ca   :  { %9176 = vmatpush.bf16.msra.mxu2 %v13332_v18  ;;  %9189 = vmatpush.bf16.msra.mxu3 %v13460_v62  ;;  %v14998_v18 = vld [vmem:[#allocation13 + $0xb0c] sm:$0xf]  ;;  %v13361_v62 = vld [vmem:[#allocation13 + $0xb18] sm:$0xf0] }
 0x4cb   :  { %v8938_v58 = vadd.f32 %v8937_v9, %v8925_v51  ;;  %v13889_v12 = vld [vmem:[#allocation13 + $0xf38] sm:$0xf0] }
 0x4cc   :  { %9208 = vmatpush.bf16.msrb.mxu0 %v13492_v44  ;;  %9221 = vmatpush.bf16.msrb.mxu1 %v13620_v41  ;;  %v9002_v13 = vpop.f32.mrf.mxu0  ;;  %v13793_v44 = vld [vmem:[#allocation13 + $0xe78] sm:$0xf0]  ;;  %v15138_v41 = vld [vmem:[#allocation13 + $0xf6c] sm:$0xf] }
 0x4cd   :  { %v8951_v34 = vadd.f32 %v16156_v27, %v8938_v58  ;;  %v9015_v49 = vpop.f32.mrf.mxu1  ;;  %v15094_v58 = vld [vmem:[#allocation13 + $0xe0c] sm:$0xf] }
 0x4ce   :  { %9177 = vmatpush.bf16.msra.mxu2 %v13316_v16  ;;  %9190 = vmatpush.bf16.msra.mxu3 %v13444_v53  ;;  %v13841_v16 = vld [vmem:[#allocation13 + $0xed8] sm:$0xf0]  ;;  %v15150_v53 = vld [vmem:[#allocation13 + $0xfcc] sm:$0xf] }
 0x4cf   :  { %9209 = vmatmul.bf16.vlgmr.msrb.gmra.mxu0 %v15951_v17  ;;  %9222 = vmatmul.bf16.vlgmr.msrb.gmra.mxu1 %v15953_v46  ;;  %v13236_v17 = vor.u32 %v14966_v50, %v13233_v35  ;;  %v13364_v46 = vor.u32 %v14998_v18, %v13361_v62  ;;  %v8964_v42 = vadd.f32 %v16158_v43, %v8951_v34  ;;  %v13953_v43 = vld [vmem:[#allocation13 + $0xfb8] sm:$0xf0]  ;;  %v15126_v35 = vld [vmem:[#allocation13 + $0xf0c] sm:$0xf] }
 0x4d0   :  { %v8926_v21 = vpop.f32.mrf.mxu2  ;;  %v8939_v6 = vpop.f32.mrf.mxu3  ;;  %v13844_v27 = vor.u32 %v15118_v25, %v13841_v16  ;;  %v13972_v14 = vor.u32 %v15150_v53, %v13969_v23  ;;  %v13956_v38 = vor.u32 %v15146_v39, %v13953_v43  ;;  %v13745_v50 = vld [vmem:[#allocation13 + $0xe18] sm:$0xf0] }
 0x4d1   :  { %v13873_v18 = vld [vmem:[#allocation13 + $0xf18] sm:$0xf0]  ;;  %v13748_v52 = vor.u32 %v15094_v58, %v13745_v50 }
 0x4d2   :  { %9178 = vmatpush.bf16.msra.mxu2 %v13300_v55  ;;  %9191 = vmatpush.bf16.msra.mxu3 %v13428_v37  ;;  %v13937_v55 = vld [vmem:[#allocation13 + $0xf98] sm:$0xf0]  ;;  %v13876_v29 = vor.u32 %v15126_v35, %v13873_v18 }
 0x4d3   :  { %v13940_v8 = vor.u32 %v15142_v3, %v13937_v55 }
 0x4d4   :  { %v9004_v37 = vpop.f32.mrf.mxu0 }
 0x4d5   :  { %v9017_v33 = vpop.f32.mrf.mxu1 }
 0x4d6   :  { %9179 = vmatpush.bf16.msra.mxu2 %v13284_v59  ;;  %9192 = vmatpush.bf16.msra.mxu3 %v13412_v24  ;;  %v15102_v24 = vld [vmem:[#allocation13 + $0xe4c] sm:$0xf] }
 0x4d7   :  { %v13780_v61 = vor.u32 %v15102_v24, %v13777_v31 }
 0x4da   :  { %9180 = vmatpush.bf16.msra.mxu2 %v13268_v4  ;;  %9193 = vmatpush.bf16.msra.mxu3 %v13396_v2  ;;  %v13908_v4 = vor.u32 %v15134_v54, %v13905_v5  ;;  %v15098_v2 = vld [vmem:[#allocation13 + $0xe2c] sm:$0xf] }
 0x4de   :  { %9181 = vmatpush.bf16.msra.mxu2 %v13252_v40  ;;  %9194 = vmatpush.bf16.msra.mxu3 %v13380_v0  ;;  %v13764_v40 = vor.u32 %v15098_v2, %v13761_v60  ;;  %v13892_v0 = vor.u32 %v15130_v11, %v13889_v12 }
 0x4e2   :  { %9182 = vmatpush.bf16.msra.mxu2 %v13236_v17  ;;  %9195 = vmatpush.bf16.msra.mxu3 %v13364_v46 }
 0x4e5   :  { %9183 = vmatmul.bf16.vlgmr.msra.gmra.mxu2 %v15977_v47  ;;  %9196 = vmatmul.bf16.vlgmr.msra.gmra.mxu3 %v15979_v48  ;;  %v13921_v47 = vld [vmem:[#allocation13 + $0xf78] sm:$0xf0]  ;;  %v13796_v48 = vor.u32 %v15106_v45, %v13793_v44 }
 0x4e6   :  { %9227 = vmatpush.bf16.msrb.mxu2 %v13860_v30  ;;  %9240 = vmatpush.bf16.msrb.mxu3 %v13988_v57  ;;  %v13924_v59 = vor.u32 %v15138_v41, %v13921_v47 }
 0x4e8   :  { %v8976_v36 = vpop.f32.mrf.mxu2  ;;  %v8989_v28 = vpop.f32.mrf.mxu3 }
 0x4e9   :  { %v8977_v9 = vadd.f32 %v8976_v36, %v8964_v42 }
 0x4ea   :  { %9228 = vmatpush.bf16.msrb.mxu2 %v13844_v27  ;;  %9241 = vmatpush.bf16.msrb.mxu3 %v13972_v14 }
 0x4eb   :  { %v8990_v51 = vadd.f32 %v8989_v28, %v8977_v9 }
 0x4ec   :  { %v9054_v46 = vpop.f32.mrf.mxu0  ;;  %v9067_v42 = vpop.f32.mrf.mxu1 }
 0x4ed   :  { %v9003_v62 = vadd.f32 %v9002_v13, %v8990_v51  ;;  %v9055_v30 = vadd.f32 %v9054_v46, %v5800_v56 }
 0x4ee   :  { %9229 = vmatpush.bf16.msrb.mxu2 %v13828_v19  ;;  %9242 = vmatpush.bf16.msrb.mxu3 %v13956_v38 }
 0x4ef   :  { %v9016_v34 = vadd.f32 %v9015_v49, %v9003_v62  ;;  %v9068_v57 = vadd.f32 %v9067_v42, %v9055_v30 }
 0x4f0   :  { %v8978_v15 = vpop.f32.mrf.mxu2  ;;  %v8991_v17 = vpop.f32.mrf.mxu3 }
 0x4f2   :  { %9230 = vmatpush.bf16.msrb.mxu2 %v13812_v63  ;;  %9243 = vmatpush.bf16.msrb.mxu3 %v13940_v8 }
 0x4f4   :  { %v9056_v25 = vpop.f32.mrf.mxu0  ;;  %v9069_v21 = vpop.f32.mrf.mxu1 }
 0x4f6   :  { %9231 = vmatpush.bf16.msrb.mxu2 %v13796_v48  ;;  %9244 = vmatpush.bf16.msrb.mxu3 %v13924_v59 }
 0x4fa   :  { %9232 = vmatpush.bf16.msrb.mxu2 %v13780_v61  ;;  %9245 = vmatpush.bf16.msrb.mxu3 %v13908_v4 }
 0x4fe   :  { %9233 = vmatpush.bf16.msrb.mxu2 %v13764_v40  ;;  %9246 = vmatpush.bf16.msrb.mxu3 %v13892_v0 }
 0x502   :  { %9234 = vmatpush.bf16.msrb.mxu2 %v13748_v52  ;;  %9247 = vmatpush.bf16.msrb.mxu3 %v13876_v29 }
 0x505   :  { %9235 = vmatmul.bf16.vlgmr.msrb.gmra.mxu2 %v16003_v32  ;;  %9248 = vmatmul.bf16.vlgmr.msrb.gmra.mxu3 %v16005_v10 }
 0x508   :  { %v9028_v32 = vpop.f32.mrf.mxu2  ;;  %v9041_v10 = vpop.f32.mrf.mxu3 }
 0x509   :  { %v9029_v7 = vadd.f32 %v9028_v32, %v9016_v34 }
 0x50b   :  { %v9042_v6 = vadd.f32 %v9041_v10, %v9029_v7 }
 0x50c   :  { %v9106_v23 = vpop.f32.mrf.mxu0  ;;  %v9119_v13 = vpop.f32.mrf.mxu1 }
 0x50d   :  { %v9255_v0 = vmax.f32 %v9042_v6, 0.0 }
 0x510   :  { %v9030_v16 = vpop.f32.mrf.mxu2  ;;  %v9043_v53 = vpop.f32.mrf.mxu3 }
 0x514   :  { %v9108_v49 = vpop.f32.mrf.mxu0  ;;  %v9121_v27 = vpop.f32.mrf.mxu1 }
 0x528   :  { %v9080_v14 = vpop.f32.mrf.mxu2  ;;  %v9093_v22 = vpop.f32.mrf.mxu3 }
 0x529   :  { %v9081_v26 = vadd.f32 %v9080_v14, %v9068_v57 }
 0x52b   :  { %v9094_v39 = vadd.f32 %v9093_v22, %v9081_v26 }
 0x52c   :  { %v9158_v1 = vpop.f32.mrf.mxu0  ;;  %v9171_v3 = vpop.f32.mrf.mxu1 }
 0x52d   :  { %v9107_v43 = vadd.f32 %v9106_v23, %v9094_v39 }
 0x52f   :  { %v9120_v19 = vadd.f32 %v9119_v13, %v9107_v43 }
 0x530   :  { %v9082_v38 = vpop.f32.mrf.mxu2  ;;  %v9095_v20 = vpop.f32.mrf.mxu3 }
 0x534   :  { %v9160_v55 = vpop.f32.mrf.mxu0  ;;  %v9173_v37 = vpop.f32.mrf.mxu1 }
 0x548   :  { %v9132_v33 = vpop.f32.mrf.mxu2  ;;  %v9145_v63 = vpop.f32.mrf.mxu3 }
 0x549   :  { %v9133_v8 = vadd.f32 %v9132_v33, %v9120_v19 }
 0x54b   :  { %v9146_v45 = vadd.f32 %v9145_v63, %v9133_v8 }
 0x54c   :  { %v9210_v59 = vpop.f32.mrf.mxu0  ;;  %v9223_v24 = vpop.f32.mrf.mxu1 }
 0x54d   :  { %v9159_v44 = vadd.f32 %v9158_v1, %v9146_v45 }
 0x54f   :  { %v9172_v41 = vadd.f32 %v9171_v3, %v9159_v44 }
 0x550   :  { %v9134_v47 = vpop.f32.mrf.mxu2  ;;  %v9147_v48 = vpop.f32.mrf.mxu3 }
 0x554   :  { %v9212_v31 = vpop.f32.mrf.mxu0  ;;  %v9225_v54 = vpop.f32.mrf.mxu1 }
 0x568   :  { %v9184_v5 = vpop.f32.mrf.mxu2  ;;  %v9197_v61 = vpop.f32.mrf.mxu3 }
 0x569   :  { %v9185_v36 = vadd.f32 %v9184_v5, %v9172_v41 }
 0x56b   :  { %v9198_v28 = vadd.f32 %v9197_v61, %v9185_v36 }
 0x56d   :  { %v9211_v60 = vadd.f32 %v9210_v59, %v9198_v28 }
 0x56f   :  { %v9224_v11 = vadd.f32 %v9223_v24, %v9211_v60 }
 0x570   :  { %v9186_v4 = vpop.f32.mrf.mxu2  ;;  %v9199_v2 = vpop.f32.mrf.mxu3 }
 0x588   :  { %v9236_v12 = vpop.f32.mrf.mxu2  ;;  %v9249_v9 = vpop.f32.mrf.mxu3 }
 0x589   :  { %v9237_v51 = vadd.f32 %v9236_v12, %v9224_v11 }
 0x58b   :  { %v9250_v40 = vadd.f32 %v9249_v9, %v9237_v51 }
 0x58d   :  { %v9256_v58 = vmax.f32 %v9250_v40, 0.0 }
 0x58f   :  { %v9258_v50 = vpack.c.bf16 %v9256_v58, %v9255_v0 }
 0x590   :  { %v9238_v35 = vpop.f32.mrf.mxu2  ;;  %v9251_v18 = vpop.f32.mrf.mxu3 }
 0x591   :  { %9260 = vst [vmem:[#allocation19 + $0x8] sm:$0xff] %v9258_v50 }
 0x592   :  { %9297 = dma.vmem_to_hbm [thread:$0]  %s9293_s9, 256, %s9295_s18, [#allocation18]  }
 0x593   :  { %15450 = dma.done.wait [#allocation4], 512  }
 0x594   :  { %15451 = vsyncadd [#allocation4], 4294966784 }
 0x595   :  { %15452 = dma.done.wait [#allocation18], 768  }
 0x596   :  { %15453 = vsyncadd [#allocation18], 4294966528 }
 0x597   :  { %9310 = vsyncpa [#allocation3], 1 }
 0x598   :  { %9311 = vsyncpa [#allocation6], 1 }
 0x599   :  { %9312 = vsyncpa [#allocation9], 1 }
 0x59a   :  { %9313 = vsyncpa [#allocation12], 1 }
 0x59b   :  { %9314 = vsyncpa [#allocation15], 1 }
 0x59c   :  { %9315 = vsyncpa [#allocation4], 1 }
 0x59d   :  { %9316 = vsyncpa [#allocation18], 1 }

</bundles_post_ra>
